<compile_context>
chip_gen: v5e
topology: v5e:2x2
jax: 0.10.0
libtpu: 0.0.40
codegen_flags: <defaults>
</compile_context>

<pallas_src>
import numpy as np
import jax
import jax.numpy as jnp
from jax import lax
from jax.experimental import pallas as pl
from jax.experimental.pallas import tpu as pltpu

N_BATCH = 2                       # layout constants specialized to batch = 2
PLANE_ROWS = N_BATCH * 8 * 8      # 128 rows per parity plane (n, oh//2, ow//2)
Y1_ROWS = 4 * PLANE_ROWS          # 512
Y1_ROWS_PADDED = 544              # >= 512 + max conv2 shift (18), multiple of 16


# ---------------------------------------------------------------------------
# Constant layout helpers (plain numpy, built once at import time)
# ---------------------------------------------------------------------------
def _conv1_gather_index():
    # cols1 row order: (a=oh%2, b=ow%2, n, rh=oh//2, rw=ow//2)
    #   global row = (a*2+b)*128 + n*64 + rh*8 + rw
    # cols1 col order: (ki, kj, c) -> matches w1m row order (ki*8+kj)*3 + c.
    # Source pixel (already padded by 3): row 2*oh + ki, col 2*ow + kj.
    a = np.arange(2); b = np.arange(2); n = np.arange(N_BATCH)
    rh = np.arange(8); rw = np.arange(8); ki = np.arange(8); kj = np.arange(8)
    A, B, NN, RH, RW, KI, KJ = np.meshgrid(a, b, n, rh, rw, ki, kj, indexing="ij")
    oh = 2 * RH + A
    ow = 2 * RW + B
    src = NN * (38 * 38) + (2 * oh + KI) * 38 + (2 * ow + KJ)
    return src.reshape(-1).astype(np.int32)        # (512 * 64,)


def _conv3_select():
    # Gathers conv3 patches out of the padded conv2 output (128 rows, layout
    # m = n*64 + y*8 + x with only y,x < 6 valid -> invalid rows never hit).
    # Row order (k, s, n) so the fc epilogue can take 2-row slices per spatial
    # position:  S3[(i*5+j)*8 + (h*2+w)*2 + n, n*64 + (h+i)*8 + (w+j)] = 1
    i = np.arange(5)[:, None, None, None, None]
    j = np.arange(5)[None, :, None, None, None]
    h = np.arange(2)[None, None, :, None, None]
    w = np.arange(2)[None, None, None, :, None]
    n = np.arange(N_BATCH)[None, None, None, None, :]
    rows = (i * 5 + j) * 8 + (h * 2 + w) * 2 + n
    cols = n * 64 + (h + i) * 8 + (w + j)
    rows, cols = np.broadcast_arrays(rows, cols)
    s3 = np.zeros((25 * 8, PLANE_ROWS), np.float32)
    s3[rows.reshape(-1), cols.reshape(-1)] = 1.0
    return s3


_CONV1_SRC = _conv1_gather_index()


# ---------------------------------------------------------------------------
# The single fused kernel: conv1 -> conv2 -> conv3 -> fc1, all in VMEM
# ---------------------------------------------------------------------------
def _fused_net_kernel(cols1_ref, w1_ref, b1_ref, w2_hbm_ref, b2_ref,
                      s3_ref, w3_hbm_ref, b3_ref, wfc_ref, bfc_ref,
                      out_ref, w2_vmem, w3_vmem, y1_vmem, sem):
    f32, bf16 = jnp.float32, jnp.bfloat16

    # Kick off the big weight DMAs immediately so they overlap with conv1/conv2.
    w2_copy = pltpu.make_async_copy(w2_hbm_ref, w2_vmem, sem.at[0])
    w3_copy = pltpu.make_async_copy(w3_hbm_ref, w3_vmem, sem.at[1])
    w2_copy.start()
    w3_copy.start()

    # ---- conv1: (544,192) @ (192,64), bias + ReLU in f32, stash bf16 copy ----
    y1 = jnp.dot(cols1_ref[...], w1_ref[...], preferred_element_type=f32)
    y1_vmem[...] = jnp.maximum(y1 + b1_ref[...], 0.0).astype(bf16)     # (544, 64)

    # ---- conv2: each kernel offset (i, j) is a contiguous 128-row slice of
    #      the parity plane (i%2, j%2), matmul'd against its weight block.
    #      Output rows m = n*64 + y*8 + x (only y,x < 6 are valid; the rest is
    #      finite garbage that conv3's selection matrix never reads). ----
    w2_copy.wait()
    acc2 = jnp.zeros((PLANE_ROWS, 128), f32)
    for i in range(6):
        for j in range(6):
            pa, di = i % 2, i // 2
            pb, dj = j % 2, j // 2
            start = (pa * 2 + pb) * PLANE_ROWS + di * 8 + dj
            lhs = y1_vmem[pl.ds(start, PLANE_ROWS), :]                 # (128, 64) bf16
            rhs = w2_vmem[pl.ds((i * 6 + j) * 64, 64), :]              # (64, 128) bf16
            acc2 = acc2 + jnp.dot(lhs, rhs, preferred_element_type=f32)
    y2 = jnp.maximum(acc2 + b2_ref[...], 0.0).astype(bf16)             # (128, 128)

    # ---- conv3: tiny 0/1 selection matmul gathers the 25*8 patch rows (and
    #      drops the invalid padded positions), then one matmul per offset ----
    p3 = jnp.dot(s3_ref[...], y2, preferred_element_type=f32)          # (200, 128) f32

    w3_copy.wait()
    acc3 = jnp.zeros((8, 128), f32)
    for k in range(25):
        lhs = p3[k * 8:(k + 1) * 8, :].astype(bf16)                    # (8, 128)
        rhs = w3_vmem[pl.ds(k * 128, 128), :]                          # (128, 128)
        acc3 = acc3 + jnp.dot(lhs, rhs, preferred_element_type=f32)
    y3 = jnp.maximum(acc3 + b3_ref[...], 0.0)                          # (8,128) f32, rows (s, n)

    # ---- fc1 epilogue: PyTorch (C,H,W) flatten folded into wfc's row order ----
    acc = jnp.zeros((N_BATCH, 16), f32)
    for s in range(4):
        lhs = y3[s * N_BATCH:(s + 1) * N_BATCH, :].astype(bf16)        # (2, 128)
        rhs = wfc_ref[pl.ds(s * 128, 128), :]                          # (128, 16)
        acc = acc + jnp.dot(lhs, rhs, preferred_element_type=f32)
    out_ref[...] = acc + bfc_ref[...]


def _fused_forward(cols1, prep):
    args = (cols1, prep["w1m"], prep["b1"], prep["w2m"], prep["b2"],
            prep["s3"], prep["w3m"], prep["b3"], prep["wfcm"], prep["bfc"])

    def vmem_spec(shape):
        return pl.BlockSpec(shape, lambda i: (0,) * len(shape))

    hbm_spec = pl.BlockSpec(memory_space=pl.ANY)   # manual, overlapped DMA
    in_specs = [
        vmem_spec(cols1.shape),                    # cols1
        vmem_spec(prep["w1m"].shape),              # w1m
        vmem_spec(prep["b1"].shape),               # b1
        hbm_spec,                                  # w2m  (async copy in kernel)
        vmem_spec(prep["b2"].shape),               # b2
        vmem_spec(prep["s3"].shape),               # s3
        hbm_spec,                                  # w3m  (async copy in kernel)
        vmem_spec(prep["b3"].shape),               # b3
        vmem_spec(prep["wfcm"].shape),             # wfcm
        vmem_spec(prep["bfc"].shape),              # bfc
    ]
    return pl.pallas_call(
        _fused_net_kernel,
        out_shape=jax.ShapeDtypeStruct((N_BATCH, 16), jnp.float32),
        grid=(1,),
        in_specs=in_specs,
        out_specs=pl.BlockSpec((N_BATCH, 16), lambda i: (0, 0)),
        scratch_shapes=[
            pltpu.VMEM((6 * 6 * 64, 128), jnp.bfloat16),     # w2 staging
            pltpu.VMEM((5 * 5 * 128, 128), jnp.bfloat16),    # w3 staging
            pltpu.VMEM((Y1_ROWS_PADDED, 64), jnp.bfloat16),  # y1 (parity-plane layout)
            pltpu.SemaphoreType.DMA((2,)),
        ],
        compiler_params=pltpu.CompilerParams(
            dimension_semantics=("arbitrary",),
            vmem_limit_bytes=32 * 1024 * 1024,
        ),
        cost_estimate=pl.CostEstimate(flops=102_000_000, transcendentals=0,
                                      bytes_accessed=1_720_000),
    )(*args)


# ---------------------------------------------------------------------------
# One-time parameter repack (weights in MXU matmul form, bf16; biases f32)
# ---------------------------------------------------------------------------
def prepare_params(params):
    bf16 = jnp.bfloat16
    w1m = jnp.transpose(params["w1"], (2, 3, 1, 0)).reshape(8 * 8 * 3, 64).astype(bf16)
    w2m = jnp.transpose(params["w2"], (2, 3, 1, 0)).reshape(6 * 6 * 64, 128).astype(bf16)
    w3m = jnp.transpose(params["w3"], (2, 3, 1, 0)).reshape(5 * 5 * 128, 128).astype(bf16)
    # Wfcm[s*128 + c, o] = w_fc[o, c*4 + s]  (folds the NCHW flatten order in)
    wfcm = jnp.transpose(params["w_fc"].reshape(16, 128, 4), (2, 1, 0)).reshape(512, 16).astype(bf16)
    return {
        "w1m": w1m, "b1": params["b1"].reshape(1, 64).astype(jnp.float32),
        "w2m": w2m, "b2": params["b2"].reshape(1, 128).astype(jnp.float32),
        "w3m": w3m, "b3": params["b3"].reshape(1, 128).astype(jnp.float32),
        "wfcm": wfcm, "bfc": params["b_fc"].reshape(1, 16).astype(jnp.float32),
        "s3": jnp.asarray(_conv3_select(), dtype=bf16),
    }


@jax.jit
def net_forward(x_nchw, prep):
    n = x_nchw.shape[0]
    assert n == N_BATCH, "layout constants are specialized to batch=2"
    # NCHW -> NHWC (bf16 before the gather to halve its traffic), pad=3, then a
    # SINGLE gather builds the conv1 im2col matrix in parity-plane row order.
    x = jnp.transpose(x_nchw, (0, 2, 3, 1)).astype(jnp.bfloat16)
    x = jnp.pad(x, ((0, 0), (3, 3), (3, 3), (0, 0)))                   # (2, 38, 38, 3)
    x_flat = x.reshape(n * 38 * 38, 3)
    cols1 = jnp.take(x_flat, jnp.asarray(_CONV1_SRC), axis=0)          # (32768, 3)
    cols1 = cols1.reshape(Y1_ROWS, 8 * 8 * 3)                          # (512, 192)
    # Zero rows past 512 so the conv2 shifted slices of plane 3 read finite data.
    cols1 = jnp.pad(cols1, ((0, Y1_ROWS_PADDED - Y1_ROWS), (0, 0)))    # (544, 192)
    return _fused_forward(cols1, prep)


# ---------------------------------------------------------------------------
# Reference (plain JAX/XLA) and parameter init
# ---------------------------------------------------------------------------
def net_forward_reference(x, params):
    dn = ("NCHW", "OIHW", "NCHW")
    y = lax.conv_general_dilated(x, params["w1"], (2, 2), ((3, 3), (3, 3)), dimension_numbers=dn)
    y = jax.nn.relu(y + params["b1"][None, :, None, None])
    y = lax.conv_general_dilated(y, params["w2"], (2, 2), ((0, 0), (0, 0)), dimension_numbers=dn)
    y = jax.nn.relu(y + params["b2"][None, :, None, None])
    y = lax.conv_general_dilated(y, params["w3"], (1, 1), ((0, 0), (0, 0)), dimension_numbers=dn)
    y = jax.nn.relu(y + params["b3"][None, :, None, None])
    y = y.reshape(y.shape[0], -1)
    return y @ params["w_fc"].T + params["b_fc"]


def init_params(key):
    ks = jax.random.split(key, 8)

    def u(k, shape, fan_in):
        bound = 1.0 / jnp.sqrt(float(fan_in))
        return jax.random.uniform(k, shape, jnp.float32, -bound, bound)

    return {
        "w1": u(ks[0], (64, 3, 8, 8), 3 * 8 * 8),
        "b1": u(ks[1], (64,), 3 * 8 * 8),
        "w2": u(ks[2], (128, 64, 6, 6), 64 * 6 * 6),
        "b2": u(ks[3], (128,), 64 * 6 * 6),
        "w3": u(ks[4], (128, 128, 5, 5), 128 * 5 * 5),
        "b3": u(ks[5], (128,), 128 * 5 * 5),
        "w_fc": u(ks[6], (16, 512), 512),
        "b_fc": u(ks[7], (16,), 512),
    }


if __name__ == "__main__":
    key = jax.random.PRNGKey(0)
    k_x, k_p = jax.random.split(key)
    # fc1(512, 16) forces 32x32x3 inputs; batch=2 (NCHW like PyTorch).
    x = jax.random.normal(k_x, (N_BATCH, 3, 32, 32), jnp.float32)
    params = init_params(k_p)
    prep = prepare_params(params)          # one-time weight/layout packing

    out = net_forward(x, prep)
    out = jax.block_until_ready(out)
    assert out.shape == (N_BATCH, 16), out.shape
    assert out.dtype == jnp.float32

    # Correctness check vs an XLA reference (bf16 MXU + f32 accumulation -> loose tol).
    ref = net_forward_reference(x, params)
    np.testing.assert_allclose(np.asarray(out, np.float32), np.asarray(ref, np.float32),
                               rtol=5e-2, atol=5e-2)
    print("KERNEL_OK")
</pallas_src>

<mosaic_0001>
module attributes {stable_mosaic.version = 11 : i64} {
  func.func @_fused_net_kernel(%arg0: i32, %arg1: memref<544x192xbf16, #tpu.memory_space<vmem>>, %arg2: memref<192x64xbf16, #tpu.memory_space<vmem>>, %arg3: memref<1x64xf32, #tpu.memory_space<vmem>>, %arg4: memref<2304x128xbf16, #tpu.memory_space<any>>, %arg5: memref<1x128xf32, #tpu.memory_space<vmem>>, %arg6: memref<200x128xbf16, #tpu.memory_space<vmem>>, %arg7: memref<3200x128xbf16, #tpu.memory_space<any>>, %arg8: memref<1x128xf32, #tpu.memory_space<vmem>>, %arg9: memref<512x16xbf16, #tpu.memory_space<vmem>>, %arg10: memref<1x16xf32, #tpu.memory_space<vmem>>, %arg11: memref<2x16xf32, #tpu.memory_space<vmem>>, %arg12: memref<2304x128xbf16, #tpu.memory_space<vmem>>, %arg13: memref<3200x128xbf16, #tpu.memory_space<vmem>>, %arg14: memref<544x64xbf16, #tpu.memory_space<vmem>>, %arg15: memref<2x!tpu.dma_semaphore, #tpu.memory_space<semaphore_mem>>) attributes {dimension_semantics = [#tpu.dimension_semantics<arbitrary>], iteration_bounds = array<i64: 1>, scalar_prefetch = 0 : i64, scratch_operands = 4 : i64, tpu.core_type = #tpu.core_type<tc>, window_params = [{pipeline_mode = #tpu.pipeline_mode<synchronous>, transform_indices = @transform_0, window_bounds = array<i64: 544, 192>}, {pipeline_mode = #tpu.pipeline_mode<synchronous>, transform_indices = @transform_1, window_bounds = array<i64: 192, 64>}, {pipeline_mode = #tpu.pipeline_mode<synchronous>, transform_indices = @transform_2, window_bounds = array<i64: 1, 64>}, {}, {pipeline_mode = #tpu.pipeline_mode<synchronous>, transform_indices = @transform_4, window_bounds = array<i64: 1, 128>}, {pipeline_mode = #tpu.pipeline_mode<synchronous>, transform_indices = @transform_5, window_bounds = array<i64: 200, 128>}, {}, {pipeline_mode = #tpu.pipeline_mode<synchronous>, transform_indices = @transform_7, window_bounds = array<i64: 1, 128>}, {pipeline_mode = #tpu.pipeline_mode<synchronous>, transform_indices = @transform_8, window_bounds = array<i64: 512, 16>}, {pipeline_mode = #tpu.pipeline_mode<synchronous>, transform_indices = @transform_9, window_bounds = array<i64: 1, 16>}, {pipeline_mode = #tpu.pipeline_mode<synchronous>, transform_indices = @transform_10, window_bounds = array<i64: 2, 16>}]} {
    %c0_i32 = arith.constant 0 : i32
    %0 = tpu.memref_slice %arg15[%c0_i32] : memref<2x!tpu.dma_semaphore, #tpu.memory_space<semaphore_mem>> -> memref<1x!tpu.dma_semaphore, #tpu.memory_space<semaphore_mem>>
    %1 = tpu.memref_squeeze %0 : memref<1x!tpu.dma_semaphore, #tpu.memory_space<semaphore_mem>> -> memref<!tpu.dma_semaphore, #tpu.memory_space<semaphore_mem>>
    tpu.enqueue_dma source(%arg4 : memref<2304x128xbf16, #tpu.memory_space<any>>) target(%arg12 : memref<2304x128xbf16, #tpu.memory_space<vmem>>) target_semaphore(%1 : memref<!tpu.dma_semaphore, #tpu.memory_space<semaphore_mem>>)
    %c1_i32 = arith.constant 1 : i32
    %2 = tpu.memref_slice %arg15[%c1_i32] : memref<2x!tpu.dma_semaphore, #tpu.memory_space<semaphore_mem>> -> memref<1x!tpu.dma_semaphore, #tpu.memory_space<semaphore_mem>>
    %3 = tpu.memref_squeeze %2 : memref<1x!tpu.dma_semaphore, #tpu.memory_space<semaphore_mem>> -> memref<!tpu.dma_semaphore, #tpu.memory_space<semaphore_mem>>
    tpu.enqueue_dma source(%arg7 : memref<3200x128xbf16, #tpu.memory_space<any>>) target(%arg13 : memref<3200x128xbf16, #tpu.memory_space<vmem>>) target_semaphore(%3 : memref<!tpu.dma_semaphore, #tpu.memory_space<semaphore_mem>>)
    %c0 = arith.constant 0 : index
    %c0_0 = arith.constant 0 : index
    %4 = vector.load %arg1[%c0, %c0_0] : memref<544x192xbf16, #tpu.memory_space<vmem>>, vector<544x192xbf16>
    %c0_1 = arith.constant 0 : index
    %c0_2 = arith.constant 0 : index
    %5 = vector.load %arg2[%c0_1, %c0_2] : memref<192x64xbf16, #tpu.memory_space<vmem>>, vector<192x64xbf16>
    %cst = arith.constant dense<0.000000e+00> : vector<544x64xf32>
    %6 = tpu.matmul %4, %5, %cst {dimension_numbers = #tpu.dot_dimension_numbers<[1], [0], [0], [1], [0, 0, 1, 1], [], []>} : vector<544x192xbf16>, vector<192x64xbf16>, vector<544x64xf32> -> vector<544x64xf32>
    %c0_3 = arith.constant 0 : index
    %c0_4 = arith.constant 0 : index
    %7 = vector.load %arg3[%c0_3, %c0_4] : memref<1x64xf32, #tpu.memory_space<vmem>>, vector<1x64xf32>
    %8 = vector.broadcast %7 : vector<1x64xf32> to vector<544x64xf32>
    %9 = arith.addf %6, %8 : vector<544x64xf32>
    %cst_5 = arith.constant 0.000000e+00 : f32
    %10 = vector.broadcast %cst_5 : f32 to vector<544x64xf32>
    %11 = arith.maximumf %9, %10 : vector<544x64xf32>
    %12 = arith.truncf %11 : vector<544x64xf32> to vector<544x64xbf16>
    %c0_6 = arith.constant 0 : index
    %c0_7 = arith.constant 0 : index
    %13 = vector.load %arg14[%c0_6, %c0_7] : memref<544x64xbf16, #tpu.memory_space<vmem>>, vector<544x64xbf16>
    tpu.vector_store %arg14[%c0_6, %c0_7], %12 {strides = array<i32>} : memref<544x64xbf16, #tpu.memory_space<vmem>>, vector<544x64xbf16>,
    %c0_i32_8 = arith.constant 0 : i32
    %14 = tpu.memref_slice %arg15[%c0_i32_8] : memref<2x!tpu.dma_semaphore, #tpu.memory_space<semaphore_mem>> -> memref<1x!tpu.dma_semaphore, #tpu.memory_space<semaphore_mem>>
    %15 = tpu.memref_squeeze %14 : memref<1x!tpu.dma_semaphore, #tpu.memory_space<semaphore_mem>> -> memref<!tpu.dma_semaphore, #tpu.memory_space<semaphore_mem>>
    tpu.wait_dma2 semaphore(%15 : memref<!tpu.dma_semaphore, #tpu.memory_space<semaphore_mem>>) src(%arg4 : memref<2304x128xbf16, #tpu.memory_space<any>>) dst(%arg12 : memref<2304x128xbf16, #tpu.memory_space<vmem>>)
    %cst_9 = arith.constant 0.000000e+00 : f32
    %16 = vector.broadcast %cst_9 : f32 to vector<128x128xf32>
    %c0_10 = arith.constant 0 : index
    %c0_11 = arith.constant 0 : index
    %17 = vector.load %arg14[%c0_10, %c0_11] : memref<544x64xbf16, #tpu.memory_space<vmem>>, vector<128x64xbf16>
    %c0_12 = arith.constant 0 : index
    %c0_13 = arith.constant 0 : index
    %18 = vector.load %arg12[%c0_12, %c0_13] : memref<2304x128xbf16, #tpu.memory_space<vmem>>, vector<64x128xbf16>
    %cst_14 = arith.constant dense<0.000000e+00> : vector<128x128xf32>
    %19 = tpu.matmul %17, %18, %cst_14 {dimension_numbers = #tpu.dot_dimension_numbers<[1], [0], [0], [1], [0, 0, 1, 1], [], []>} : vector<128x64xbf16>, vector<64x128xbf16>, vector<128x128xf32> -> vector<128x128xf32>
    %20 = arith.addf %16, %19 : vector<128x128xf32>
    %c128 = arith.constant 128 : index
    %c0_15 = arith.constant 0 : index
    %21 = vector.load %arg14[%c128, %c0_15] : memref<544x64xbf16, #tpu.memory_space<vmem>>, vector<128x64xbf16>
    %c64 = arith.constant 64 : index
    %c0_16 = arith.constant 0 : index
    %22 = vector.load %arg12[%c64, %c0_16] : memref<2304x128xbf16, #tpu.memory_space<vmem>>, vector<64x128xbf16>
    %cst_17 = arith.constant dense<0.000000e+00> : vector<128x128xf32>
    %23 = tpu.matmul %21, %22, %cst_17 {dimension_numbers = #tpu.dot_dimension_numbers<[1], [0], [0], [1], [0, 0, 1, 1], [], []>} : vector<128x64xbf16>, vector<64x128xbf16>, vector<128x128xf32> -> vector<128x128xf32>
    %24 = arith.addf %20, %23 : vector<128x128xf32>
    %c1 = arith.constant 1 : index
    %c0_18 = arith.constant 0 : index
    %25 = vector.load %arg14[%c1, %c0_18] : memref<544x64xbf16, #tpu.memory_space<vmem>>, vector<128x64xbf16>
    %c128_19 = arith.constant 128 : index
    %c0_20 = arith.constant 0 : index
    %26 = vector.load %arg12[%c128_19, %c0_20] : memref<2304x128xbf16, #tpu.memory_space<vmem>>, vector<64x128xbf16>
    %cst_21 = arith.constant dense<0.000000e+00> : vector<128x128xf32>
    %27 = tpu.matmul %25, %26, %cst_21 {dimension_numbers = #tpu.dot_dimension_numbers<[1], [0], [0], [1], [0, 0, 1, 1], [], []>} : vector<128x64xbf16>, vector<64x128xbf16>, vector<128x128xf32> -> vector<128x128xf32>
    %28 = arith.addf %24, %27 : vector<128x128xf32>
    %c129 = arith.constant 129 : index
    %c0_22 = arith.constant 0 : index
    %29 = vector.load %arg14[%c129, %c0_22] : memref<544x64xbf16, #tpu.memory_space<vmem>>, vector<128x64xbf16>
    %c192 = arith.constant 192 : index
    %c0_23 = arith.constant 0 : index
    %30 = vector.load %arg12[%c192, %c0_23] : memref<2304x128xbf16, #tpu.memory_space<vmem>>, vector<64x128xbf16>
    %cst_24 = arith.constant dense<0.000000e+00> : vector<128x128xf32>
    %31 = tpu.matmul %29, %30, %cst_24 {dimension_numbers = #tpu.dot_dimension_numbers<[1], [0], [0], [1], [0, 0, 1, 1], [], []>} : vector<128x64xbf16>, vector<64x128xbf16>, vector<128x128xf32> -> vector<128x128xf32>
    %32 = arith.addf %28, %31 : vector<128x128xf32>
    %c2 = arith.constant 2 : index
    %c0_25 = arith.constant 0 : index
    %33 = vector.load %arg14[%c2, %c0_25] : memref<544x64xbf16, #tpu.memory_space<vmem>>, vector<128x64xbf16>
    %c256 = arith.constant 256 : index
    %c0_26 = arith.constant 0 : index
    %34 = vector.load %arg12[%c256, %c0_26] : memref<2304x128xbf16, #tpu.memory_space<vmem>>, vector<64x128xbf16>
    %cst_27 = arith.constant dense<0.000000e+00> : vector<128x128xf32>
    %35 = tpu.matmul %33, %34, %cst_27 {dimension_numbers = #tpu.dot_dimension_numbers<[1], [0], [0], [1], [0, 0, 1, 1], [], []>} : vector<128x64xbf16>, vector<64x128xbf16>, vector<128x128xf32> -> vector<128x128xf32>
    %36 = arith.addf %32, %35 : vector<128x128xf32>
    %c130 = arith.constant 130 : index
    %c0_28 = arith.constant 0 : index
    %37 = vector.load %arg14[%c130, %c0_28] : memref<544x64xbf16, #tpu.memory_space<vmem>>, vector<128x64xbf16>
    %c320 = arith.constant 320 : index
    %c0_29 = arith.constant 0 : index
    %38 = vector.load %arg12[%c320, %c0_29] : memref<2304x128xbf16, #tpu.memory_space<vmem>>, vector<64x128xbf16>
    %cst_30 = arith.constant dense<0.000000e+00> : vector<128x128xf32>
    %39 = tpu.matmul %37, %38, %cst_30 {dimension_numbers = #tpu.dot_dimension_numbers<[1], [0], [0], [1], [0, 0, 1, 1], [], []>} : vector<128x64xbf16>, vector<64x128xbf16>, vector<128x128xf32> -> vector<128x128xf32>
    %40 = arith.addf %36, %39 : vector<128x128xf32>
    %c256_31 = arith.constant 256 : index
    %c0_32 = arith.constant 0 : index
    %41 = vector.load %arg14[%c256_31, %c0_32] : memref<544x64xbf16, #tpu.memory_space<vmem>>, vector<128x64xbf16>
    %c384 = arith.constant 384 : index
    %c0_33 = arith.constant 0 : index
    %42 = vector.load %arg12[%c384, %c0_33] : memref<2304x128xbf16, #tpu.memory_space<vmem>>, vector<64x128xbf16>
    %cst_34 = arith.constant dense<0.000000e+00> : vector<128x128xf32>
    %43 = tpu.matmul %41, %42, %cst_34 {dimension_numbers = #tpu.dot_dimension_numbers<[1], [0], [0], [1], [0, 0, 1, 1], [], []>} : vector<128x64xbf16>, vector<64x128xbf16>, vector<128x128xf32> -> vector<128x128xf32>
    %44 = arith.addf %40, %43 : vector<128x128xf32>
    %c384_35 = arith.constant 384 : index
    %c0_36 = arith.constant 0 : index
    %45 = vector.load %arg14[%c384_35, %c0_36] : memref<544x64xbf16, #tpu.memory_space<vmem>>, vector<128x64xbf16>
    %c448 = arith.constant 448 : index
    %c0_37 = arith.constant 0 : index
    %46 = vector.load %arg12[%c448, %c0_37] : memref<2304x128xbf16, #tpu.memory_space<vmem>>, vector<64x128xbf16>
    %cst_38 = arith.constant dense<0.000000e+00> : vector<128x128xf32>
    %47 = tpu.matmul %45, %46, %cst_38 {dimension_numbers = #tpu.dot_dimension_numbers<[1], [0], [0], [1], [0, 0, 1, 1], [], []>} : vector<128x64xbf16>, vector<64x128xbf16>, vector<128x128xf32> -> vector<128x128xf32>
    %48 = arith.addf %44, %47 : vector<128x128xf32>
    %c257 = arith.constant 257 : index
    %c0_39 = arith.constant 0 : index
    %49 = vector.load %arg14[%c257, %c0_39] : memref<544x64xbf16, #tpu.memory_space<vmem>>, vector<128x64xbf16>
    %c512 = arith.constant 512 : index
    %c0_40 = arith.constant 0 : index
    %50 = vector.load %arg12[%c512, %c0_40] : memref<2304x128xbf16, #tpu.memory_space<vmem>>, vector<64x128xbf16>
    %cst_41 = arith.constant dense<0.000000e+00> : vector<128x128xf32>
    %51 = tpu.matmul %49, %50, %cst_41 {dimension_numbers = #tpu.dot_dimension_numbers<[1], [0], [0], [1], [0, 0, 1, 1], [], []>} : vector<128x64xbf16>, vector<64x128xbf16>, vector<128x128xf32> -> vector<128x128xf32>
    %52 = arith.addf %48, %51 : vector<128x128xf32>
    %c385 = arith.constant 385 : index
    %c0_42 = arith.constant 0 : index
    %53 = vector.load %arg14[%c385, %c0_42] : memref<544x64xbf16, #tpu.memory_space<vmem>>, vector<128x64xbf16>
    %c576 = arith.constant 576 : index
    %c0_43 = arith.constant 0 : index
    %54 = vector.load %arg12[%c576, %c0_43] : memref<2304x128xbf16, #tpu.memory_space<vmem>>, vector<64x128xbf16>
    %cst_44 = arith.constant dense<0.000000e+00> : vector<128x128xf32>
    %55 = tpu.matmul %53, %54, %cst_44 {dimension_numbers = #tpu.dot_dimension_numbers<[1], [0], [0], [1], [0, 0, 1, 1], [], []>} : vector<128x64xbf16>, vector<64x128xbf16>, vector<128x128xf32> -> vector<128x128xf32>
    %56 = arith.addf %52, %55 : vector<128x128xf32>
    %c258 = arith.constant 258 : index
    %c0_45 = arith.constant 0 : index
    %57 = vector.load %arg14[%c258, %c0_45] : memref<544x64xbf16, #tpu.memory_space<vmem>>, vector<128x64xbf16>
    %c640 = arith.constant 640 : index
    %c0_46 = arith.constant 0 : index
    %58 = vector.load %arg12[%c640, %c0_46] : memref<2304x128xbf16, #tpu.memory_space<vmem>>, vector<64x128xbf16>
    %cst_47 = arith.constant dense<0.000000e+00> : vector<128x128xf32>
    %59 = tpu.matmul %57, %58, %cst_47 {dimension_numbers = #tpu.dot_dimension_numbers<[1], [0], [0], [1], [0, 0, 1, 1], [], []>} : vector<128x64xbf16>, vector<64x128xbf16>, vector<128x128xf32> -> vector<128x128xf32>
    %60 = arith.addf %56, %59 : vector<128x128xf32>
    %c386 = arith.constant 386 : index
    %c0_48 = arith.constant 0 : index
    %61 = vector.load %arg14[%c386, %c0_48] : memref<544x64xbf16, #tpu.memory_space<vmem>>, vector<128x64xbf16>
    %c704 = arith.constant 704 : index
    %c0_49 = arith.constant 0 : index
    %62 = vector.load %arg12[%c704, %c0_49] : memref<2304x128xbf16, #tpu.memory_space<vmem>>, vector<64x128xbf16>
    %cst_50 = arith.constant dense<0.000000e+00> : vector<128x128xf32>
    %63 = tpu.matmul %61, %62, %cst_50 {dimension_numbers = #tpu.dot_dimension_numbers<[1], [0], [0], [1], [0, 0, 1, 1], [], []>} : vector<128x64xbf16>, vector<64x128xbf16>, vector<128x128xf32> -> vector<128x128xf32>
    %64 = arith.addf %60, %63 : vector<128x128xf32>
    %c8 = arith.constant 8 : index
    %c0_51 = arith.constant 0 : index
    %65 = vector.load %arg14[%c8, %c0_51] : memref<544x64xbf16, #tpu.memory_space<vmem>>, vector<128x64xbf16>
    %c768 = arith.constant 768 : index
    %c0_52 = arith.constant 0 : index
    %66 = vector.load %arg12[%c768, %c0_52] : memref<2304x128xbf16, #tpu.memory_space<vmem>>, vector<64x128xbf16>
    %cst_53 = arith.constant dense<0.000000e+00> : vector<128x128xf32>
    %67 = tpu.matmul %65, %66, %cst_53 {dimension_numbers = #tpu.dot_dimension_numbers<[1], [0], [0], [1], [0, 0, 1, 1], [], []>} : vector<128x64xbf16>, vector<64x128xbf16>, vector<128x128xf32> -> vector<128x128xf32>
    %68 = arith.addf %64, %67 : vector<128x128xf32>
    %c136 = arith.constant 136 : index
    %c0_54 = arith.constant 0 : index
    %69 = vector.load %arg14[%c136, %c0_54] : memref<544x64xbf16, #tpu.memory_space<vmem>>, vector<128x64xbf16>
    %c832 = arith.constant 832 : index
    %c0_55 = arith.constant 0 : index
    %70 = vector.load %arg12[%c832, %c0_55] : memref<2304x128xbf16, #tpu.memory_space<vmem>>, vector<64x128xbf16>
    %cst_56 = arith.constant dense<0.000000e+00> : vector<128x128xf32>
    %71 = tpu.matmul %69, %70, %cst_56 {dimension_numbers = #tpu.dot_dimension_numbers<[1], [0], [0], [1], [0, 0, 1, 1], [], []>} : vector<128x64xbf16>, vector<64x128xbf16>, vector<128x128xf32> -> vector<128x128xf32>
    %72 = arith.addf %68, %71 : vector<128x128xf32>
    %c9 = arith.constant 9 : index
    %c0_57 = arith.constant 0 : index
    %73 = vector.load %arg14[%c9, %c0_57] : memref<544x64xbf16, #tpu.memory_space<vmem>>, vector<128x64xbf16>
    %c896 = arith.constant 896 : index
    %c0_58 = arith.constant 0 : index
    %74 = vector.load %arg12[%c896, %c0_58] : memref<2304x128xbf16, #tpu.memory_space<vmem>>, vector<64x128xbf16>
    %cst_59 = arith.constant dense<0.000000e+00> : vector<128x128xf32>
    %75 = tpu.matmul %73, %74, %cst_59 {dimension_numbers = #tpu.dot_dimension_numbers<[1], [0], [0], [1], [0, 0, 1, 1], [], []>} : vector<128x64xbf16>, vector<64x128xbf16>, vector<128x128xf32> -> vector<128x128xf32>
    %76 = arith.addf %72, %75 : vector<128x128xf32>
    %c137 = arith.constant 137 : index
    %c0_60 = arith.constant 0 : index
    %77 = vector.load %arg14[%c137, %c0_60] : memref<544x64xbf16, #tpu.memory_space<vmem>>, vector<128x64xbf16>
    %c960 = arith.constant 960 : index
    %c0_61 = arith.constant 0 : index
    %78 = vector.load %arg12[%c960, %c0_61] : memref<2304x128xbf16, #tpu.memory_space<vmem>>, vector<64x128xbf16>
    %cst_62 = arith.constant dense<0.000000e+00> : vector<128x128xf32>
    %79 = tpu.matmul %77, %78, %cst_62 {dimension_numbers = #tpu.dot_dimension_numbers<[1], [0], [0], [1], [0, 0, 1, 1], [], []>} : vector<128x64xbf16>, vector<64x128xbf16>, vector<128x128xf32> -> vector<128x128xf32>
    %80 = arith.addf %76, %79 : vector<128x128xf32>
    %c10 = arith.constant 10 : index
    %c0_63 = arith.constant 0 : index
    %81 = vector.load %arg14[%c10, %c0_63] : memref<544x64xbf16, #tpu.memory_space<vmem>>, vector<128x64xbf16>
    %c1024 = arith.constant 1024 : index
    %c0_64 = arith.constant 0 : index
    %82 = vector.load %arg12[%c1024, %c0_64] : memref<2304x128xbf16, #tpu.memory_space<vmem>>, vector<64x128xbf16>
    %cst_65 = arith.constant dense<0.000000e+00> : vector<128x128xf32>
    %83 = tpu.matmul %81, %82, %cst_65 {dimension_numbers = #tpu.dot_dimension_numbers<[1], [0], [0], [1], [0, 0, 1, 1], [], []>} : vector<128x64xbf16>, vector<64x128xbf16>, vector<128x128xf32> -> vector<128x128xf32>
    %84 = arith.addf %80, %83 : vector<128x128xf32>
    %c138 = arith.constant 138 : index
    %c0_66 = arith.constant 0 : index
    %85 = vector.load %arg14[%c138, %c0_66] : memref<544x64xbf16, #tpu.memory_space<vmem>>, vector<128x64xbf16>
    %c1088 = arith.constant 1088 : index
    %c0_67 = arith.constant 0 : index
    %86 = vector.load %arg12[%c1088, %c0_67] : memref<2304x128xbf16, #tpu.memory_space<vmem>>, vector<64x128xbf16>
    %cst_68 = arith.constant dense<0.000000e+00> : vector<128x128xf32>
    %87 = tpu.matmul %85, %86, %cst_68 {dimension_numbers = #tpu.dot_dimension_numbers<[1], [0], [0], [1], [0, 0, 1, 1], [], []>} : vector<128x64xbf16>, vector<64x128xbf16>, vector<128x128xf32> -> vector<128x128xf32>
    %88 = arith.addf %84, %87 : vector<128x128xf32>
    %c264 = arith.constant 264 : index
    %c0_69 = arith.constant 0 : index
    %89 = vector.load %arg14[%c264, %c0_69] : memref<544x64xbf16, #tpu.memory_space<vmem>>, vector<128x64xbf16>
    %c1152 = arith.constant 1152 : index
    %c0_70 = arith.constant 0 : index
    %90 = vector.load %arg12[%c1152, %c0_70] : memref<2304x128xbf16, #tpu.memory_space<vmem>>, vector<64x128xbf16>
    %cst_71 = arith.constant dense<0.000000e+00> : vector<128x128xf32>
    %91 = tpu.matmul %89, %90, %cst_71 {dimension_numbers = #tpu.dot_dimension_numbers<[1], [0], [0], [1], [0, 0, 1, 1], [], []>} : vector<128x64xbf16>, vector<64x128xbf16>, vector<128x128xf32> -> vector<128x128xf32>
    %92 = arith.addf %88, %91 : vector<128x128xf32>
    %c392 = arith.constant 392 : index
    %c0_72 = arith.constant 0 : index
    %93 = vector.load %arg14[%c392, %c0_72] : memref<544x64xbf16, #tpu.memory_space<vmem>>, vector<128x64xbf16>
    %c1216 = arith.constant 1216 : index
    %c0_73 = arith.constant 0 : index
    %94 = vector.load %arg12[%c1216, %c0_73] : memref<2304x128xbf16, #tpu.memory_space<vmem>>, vector<64x128xbf16>
    %cst_74 = arith.constant dense<0.000000e+00> : vector<128x128xf32>
    %95 = tpu.matmul %93, %94, %cst_74 {dimension_numbers = #tpu.dot_dimension_numbers<[1], [0], [0], [1], [0, 0, 1, 1], [], []>} : vector<128x64xbf16>, vector<64x128xbf16>, vector<128x128xf32> -> vector<128x128xf32>
    %96 = arith.addf %92, %95 : vector<128x128xf32>
    %c265 = arith.constant 265 : index
    %c0_75 = arith.constant 0 : index
    %97 = vector.load %arg14[%c265, %c0_75] : memref<544x64xbf16, #tpu.memory_space<vmem>>, vector<128x64xbf16>
    %c1280 = arith.constant 1280 : index
    %c0_76 = arith.constant 0 : index
    %98 = vector.load %arg12[%c1280, %c0_76] : memref<2304x128xbf16, #tpu.memory_space<vmem>>, vector<64x128xbf16>
    %cst_77 = arith.constant dense<0.000000e+00> : vector<128x128xf32>
    %99 = tpu.matmul %97, %98, %cst_77 {dimension_numbers = #tpu.dot_dimension_numbers<[1], [0], [0], [1], [0, 0, 1, 1], [], []>} : vector<128x64xbf16>, vector<64x128xbf16>, vector<128x128xf32> -> vector<128x128xf32>
    %100 = arith.addf %96, %99 : vector<128x128xf32>
    %c393 = arith.constant 393 : index
    %c0_78 = arith.constant 0 : index
    %101 = vector.load %arg14[%c393, %c0_78] : memref<544x64xbf16, #tpu.memory_space<vmem>>, vector<128x64xbf16>
    %c1344 = arith.constant 1344 : index
    %c0_79 = arith.constant 0 : index
    %102 = vector.load %arg12[%c1344, %c0_79] : memref<2304x128xbf16, #tpu.memory_space<vmem>>, vector<64x128xbf16>
    %cst_80 = arith.constant dense<0.000000e+00> : vector<128x128xf32>
    %103 = tpu.matmul %101, %102, %cst_80 {dimension_numbers = #tpu.dot_dimension_numbers<[1], [0], [0], [1], [0, 0, 1, 1], [], []>} : vector<128x64xbf16>, vector<64x128xbf16>, vector<128x128xf32> -> vector<128x128xf32>
    %104 = arith.addf %100, %103 : vector<128x128xf32>
    %c266 = arith.constant 266 : index
    %c0_81 = arith.constant 0 : index
    %105 = vector.load %arg14[%c266, %c0_81] : memref<544x64xbf16, #tpu.memory_space<vmem>>, vector<128x64xbf16>
    %c1408 = arith.constant 1408 : index
    %c0_82 = arith.constant 0 : index
    %106 = vector.load %arg12[%c1408, %c0_82] : memref<2304x128xbf16, #tpu.memory_space<vmem>>, vector<64x128xbf16>
    %cst_83 = arith.constant dense<0.000000e+00> : vector<128x128xf32>
    %107 = tpu.matmul %105, %106, %cst_83 {dimension_numbers = #tpu.dot_dimension_numbers<[1], [0], [0], [1], [0, 0, 1, 1], [], []>} : vector<128x64xbf16>, vector<64x128xbf16>, vector<128x128xf32> -> vector<128x128xf32>
    %108 = arith.addf %104, %107 : vector<128x128xf32>
    %c394 = arith.constant 394 : index
    %c0_84 = arith.constant 0 : index
    %109 = vector.load %arg14[%c394, %c0_84] : memref<544x64xbf16, #tpu.memory_space<vmem>>, vector<128x64xbf16>
    %c1472 = arith.constant 1472 : index
    %c0_85 = arith.constant 0 : index
    %110 = vector.load %arg12[%c1472, %c0_85] : memref<2304x128xbf16, #tpu.memory_space<vmem>>, vector<64x128xbf16>
    %cst_86 = arith.constant dense<0.000000e+00> : vector<128x128xf32>
    %111 = tpu.matmul %109, %110, %cst_86 {dimension_numbers = #tpu.dot_dimension_numbers<[1], [0], [0], [1], [0, 0, 1, 1], [], []>} : vector<128x64xbf16>, vector<64x128xbf16>, vector<128x128xf32> -> vector<128x128xf32>
    %112 = arith.addf %108, %111 : vector<128x128xf32>
    %c16 = arith.constant 16 : index
    %c0_87 = arith.constant 0 : index
    %113 = vector.load %arg14[%c16, %c0_87] : memref<544x64xbf16, #tpu.memory_space<vmem>>, vector<128x64xbf16>
    %c1536 = arith.constant 1536 : index
    %c0_88 = arith.constant 0 : index
    %114 = vector.load %arg12[%c1536, %c0_88] : memref<2304x128xbf16, #tpu.memory_space<vmem>>, vector<64x128xbf16>
    %cst_89 = arith.constant dense<0.000000e+00> : vector<128x128xf32>
    %115 = tpu.matmul %113, %114, %cst_89 {dimension_numbers = #tpu.dot_dimension_numbers<[1], [0], [0], [1], [0, 0, 1, 1], [], []>} : vector<128x64xbf16>, vector<64x128xbf16>, vector<128x128xf32> -> vector<128x128xf32>
    %116 = arith.addf %112, %115 : vector<128x128xf32>
    %c144 = arith.constant 144 : index
    %c0_90 = arith.constant 0 : index
    %117 = vector.load %arg14[%c144, %c0_90] : memref<544x64xbf16, #tpu.memory_space<vmem>>, vector<128x64xbf16>
    %c1600 = arith.constant 1600 : index
    %c0_91 = arith.constant 0 : index
    %118 = vector.load %arg12[%c1600, %c0_91] : memref<2304x128xbf16, #tpu.memory_space<vmem>>, vector<64x128xbf16>
    %cst_92 = arith.constant dense<0.000000e+00> : vector<128x128xf32>
    %119 = tpu.matmul %117, %118, %cst_92 {dimension_numbers = #tpu.dot_dimension_numbers<[1], [0], [0], [1], [0, 0, 1, 1], [], []>} : vector<128x64xbf16>, vector<64x128xbf16>, vector<128x128xf32> -> vector<128x128xf32>
    %120 = arith.addf %116, %119 : vector<128x128xf32>
    %c17 = arith.constant 17 : index
    %c0_93 = arith.constant 0 : index
    %121 = vector.load %arg14[%c17, %c0_93] : memref<544x64xbf16, #tpu.memory_space<vmem>>, vector<128x64xbf16>
    %c1664 = arith.constant 1664 : index
    %c0_94 = arith.constant 0 : index
    %122 = vector.load %arg12[%c1664, %c0_94] : memref<2304x128xbf16, #tpu.memory_space<vmem>>, vector<64x128xbf16>
    %cst_95 = arith.constant dense<0.000000e+00> : vector<128x128xf32>
    %123 = tpu.matmul %121, %122, %cst_95 {dimension_numbers = #tpu.dot_dimension_numbers<[1], [0], [0], [1], [0, 0, 1, 1], [], []>} : vector<128x64xbf16>, vector<64x128xbf16>, vector<128x128xf32> -> vector<128x128xf32>
    %124 = arith.addf %120, %123 : vector<128x128xf32>
    %c145 = arith.constant 145 : index
    %c0_96 = arith.constant 0 : index
    %125 = vector.load %arg14[%c145, %c0_96] : memref<544x64xbf16, #tpu.memory_space<vmem>>, vector<128x64xbf16>
    %c1728 = arith.constant 1728 : index
    %c0_97 = arith.constant 0 : index
    %126 = vector.load %arg12[%c1728, %c0_97] : memref<2304x128xbf16, #tpu.memory_space<vmem>>, vector<64x128xbf16>
    %cst_98 = arith.constant dense<0.000000e+00> : vector<128x128xf32>
    %127 = tpu.matmul %125, %126, %cst_98 {dimension_numbers = #tpu.dot_dimension_numbers<[1], [0], [0], [1], [0, 0, 1, 1], [], []>} : vector<128x64xbf16>, vector<64x128xbf16>, vector<128x128xf32> -> vector<128x128xf32>
    %128 = arith.addf %124, %127 : vector<128x128xf32>
    %c18 = arith.constant 18 : index
    %c0_99 = arith.constant 0 : index
    %129 = vector.load %arg14[%c18, %c0_99] : memref<544x64xbf16, #tpu.memory_space<vmem>>, vector<128x64xbf16>
    %c1792 = arith.constant 1792 : index
    %c0_100 = arith.constant 0 : index
    %130 = vector.load %arg12[%c1792, %c0_100] : memref<2304x128xbf16, #tpu.memory_space<vmem>>, vector<64x128xbf16>
    %cst_101 = arith.constant dense<0.000000e+00> : vector<128x128xf32>
    %131 = tpu.matmul %129, %130, %cst_101 {dimension_numbers = #tpu.dot_dimension_numbers<[1], [0], [0], [1], [0, 0, 1, 1], [], []>} : vector<128x64xbf16>, vector<64x128xbf16>, vector<128x128xf32> -> vector<128x128xf32>
    %132 = arith.addf %128, %131 : vector<128x128xf32>
    %c146 = arith.constant 146 : index
    %c0_102 = arith.constant 0 : index
    %133 = vector.load %arg14[%c146, %c0_102] : memref<544x64xbf16, #tpu.memory_space<vmem>>, vector<128x64xbf16>
    %c1856 = arith.constant 1856 : index
    %c0_103 = arith.constant 0 : index
    %134 = vector.load %arg12[%c1856, %c0_103] : memref<2304x128xbf16, #tpu.memory_space<vmem>>, vector<64x128xbf16>
    %cst_104 = arith.constant dense<0.000000e+00> : vector<128x128xf32>
    %135 = tpu.matmul %133, %134, %cst_104 {dimension_numbers = #tpu.dot_dimension_numbers<[1], [0], [0], [1], [0, 0, 1, 1], [], []>} : vector<128x64xbf16>, vector<64x128xbf16>, vector<128x128xf32> -> vector<128x128xf32>
    %136 = arith.addf %132, %135 : vector<128x128xf32>
    %c272 = arith.constant 272 : index
    %c0_105 = arith.constant 0 : index
    %137 = vector.load %arg14[%c272, %c0_105] : memref<544x64xbf16, #tpu.memory_space<vmem>>, vector<128x64xbf16>
    %c1920 = arith.constant 1920 : index
    %c0_106 = arith.constant 0 : index
    %138 = vector.load %arg12[%c1920, %c0_106] : memref<2304x128xbf16, #tpu.memory_space<vmem>>, vector<64x128xbf16>
    %cst_107 = arith.constant dense<0.000000e+00> : vector<128x128xf32>
    %139 = tpu.matmul %137, %138, %cst_107 {dimension_numbers = #tpu.dot_dimension_numbers<[1], [0], [0], [1], [0, 0, 1, 1], [], []>} : vector<128x64xbf16>, vector<64x128xbf16>, vector<128x128xf32> -> vector<128x128xf32>
    %140 = arith.addf %136, %139 : vector<128x128xf32>
    %c400 = arith.constant 400 : index
    %c0_108 = arith.constant 0 : index
    %141 = vector.load %arg14[%c400, %c0_108] : memref<544x64xbf16, #tpu.memory_space<vmem>>, vector<128x64xbf16>
    %c1984 = arith.constant 1984 : index
    %c0_109 = arith.constant 0 : index
    %142 = vector.load %arg12[%c1984, %c0_109] : memref<2304x128xbf16, #tpu.memory_space<vmem>>, vector<64x128xbf16>
    %cst_110 = arith.constant dense<0.000000e+00> : vector<128x128xf32>
    %143 = tpu.matmul %141, %142, %cst_110 {dimension_numbers = #tpu.dot_dimension_numbers<[1], [0], [0], [1], [0, 0, 1, 1], [], []>} : vector<128x64xbf16>, vector<64x128xbf16>, vector<128x128xf32> -> vector<128x128xf32>
    %144 = arith.addf %140, %143 : vector<128x128xf32>
    %c273 = arith.constant 273 : index
    %c0_111 = arith.constant 0 : index
    %145 = vector.load %arg14[%c273, %c0_111] : memref<544x64xbf16, #tpu.memory_space<vmem>>, vector<128x64xbf16>
    %c2048 = arith.constant 2048 : index
    %c0_112 = arith.constant 0 : index
    %146 = vector.load %arg12[%c2048, %c0_112] : memref<2304x128xbf16, #tpu.memory_space<vmem>>, vector<64x128xbf16>
    %cst_113 = arith.constant dense<0.000000e+00> : vector<128x128xf32>
    %147 = tpu.matmul %145, %146, %cst_113 {dimension_numbers = #tpu.dot_dimension_numbers<[1], [0], [0], [1], [0, 0, 1, 1], [], []>} : vector<128x64xbf16>, vector<64x128xbf16>, vector<128x128xf32> -> vector<128x128xf32>
    %148 = arith.addf %144, %147 : vector<128x128xf32>
    %c401 = arith.constant 401 : index
    %c0_114 = arith.constant 0 : index
    %149 = vector.load %arg14[%c401, %c0_114] : memref<544x64xbf16, #tpu.memory_space<vmem>>, vector<128x64xbf16>
    %c2112 = arith.constant 2112 : index
    %c0_115 = arith.constant 0 : index
    %150 = vector.load %arg12[%c2112, %c0_115] : memref<2304x128xbf16, #tpu.memory_space<vmem>>, vector<64x128xbf16>
    %cst_116 = arith.constant dense<0.000000e+00> : vector<128x128xf32>
    %151 = tpu.matmul %149, %150, %cst_116 {dimension_numbers = #tpu.dot_dimension_numbers<[1], [0], [0], [1], [0, 0, 1, 1], [], []>} : vector<128x64xbf16>, vector<64x128xbf16>, vector<128x128xf32> -> vector<128x128xf32>
    %152 = arith.addf %148, %151 : vector<128x128xf32>
    %c274 = arith.constant 274 : index
    %c0_117 = arith.constant 0 : index
    %153 = vector.load %arg14[%c274, %c0_117] : memref<544x64xbf16, #tpu.memory_space<vmem>>, vector<128x64xbf16>
    %c2176 = arith.constant 2176 : index
    %c0_118 = arith.constant 0 : index
    %154 = vector.load %arg12[%c2176, %c0_118] : memref<2304x128xbf16, #tpu.memory_space<vmem>>, vector<64x128xbf16>
    %cst_119 = arith.constant dense<0.000000e+00> : vector<128x128xf32>
    %155 = tpu.matmul %153, %154, %cst_119 {dimension_numbers = #tpu.dot_dimension_numbers<[1], [0], [0], [1], [0, 0, 1, 1], [], []>} : vector<128x64xbf16>, vector<64x128xbf16>, vector<128x128xf32> -> vector<128x128xf32>
    %156 = arith.addf %152, %155 : vector<128x128xf32>
    %c402 = arith.constant 402 : index
    %c0_120 = arith.constant 0 : index
    %157 = vector.load %arg14[%c402, %c0_120] : memref<544x64xbf16, #tpu.memory_space<vmem>>, vector<128x64xbf16>
    %c2240 = arith.constant 2240 : index
    %c0_121 = arith.constant 0 : index
    %158 = vector.load %arg12[%c2240, %c0_121] : memref<2304x128xbf16, #tpu.memory_space<vmem>>, vector<64x128xbf16>
    %cst_122 = arith.constant dense<0.000000e+00> : vector<128x128xf32>
    %159 = tpu.matmul %157, %158, %cst_122 {dimension_numbers = #tpu.dot_dimension_numbers<[1], [0], [0], [1], [0, 0, 1, 1], [], []>} : vector<128x64xbf16>, vector<64x128xbf16>, vector<128x128xf32> -> vector<128x128xf32>
    %160 = arith.addf %156, %159 : vector<128x128xf32>
    %c0_123 = arith.constant 0 : index
    %c0_124 = arith.constant 0 : index
    %161 = vector.load %arg5[%c0_123, %c0_124] : memref<1x128xf32, #tpu.memory_space<vmem>>, vector<1x128xf32>
    %162 = vector.broadcast %161 : vector<1x128xf32> to vector<128x128xf32>
    %163 = arith.addf %160, %162 : vector<128x128xf32>
    %cst_125 = arith.constant 0.000000e+00 : f32
    %164 = vector.broadcast %cst_125 : f32 to vector<128x128xf32>
    %165 = arith.maximumf %163, %164 : vector<128x128xf32>
    %166 = arith.truncf %165 : vector<128x128xf32> to vector<128x128xbf16>
    %c0_126 = arith.constant 0 : index
    %c0_127 = arith.constant 0 : index
    %167 = vector.load %arg6[%c0_126, %c0_127] : memref<200x128xbf16, #tpu.memory_space<vmem>>, vector<200x128xbf16>
    %cst_128 = arith.constant dense<0.000000e+00> : vector<200x128xf32>
    %168 = tpu.matmul %167, %166, %cst_128 {dimension_numbers = #tpu.dot_dimension_numbers<[1], [0], [0], [1], [0, 0, 1, 1], [], []>} : vector<200x128xbf16>, vector<128x128xbf16>, vector<200x128xf32> -> vector<200x128xf32>
    %c1_i32_129 = arith.constant 1 : i32
    %169 = tpu.memref_slice %arg15[%c1_i32_129] : memref<2x!tpu.dma_semaphore, #tpu.memory_space<semaphore_mem>> -> memref<1x!tpu.dma_semaphore, #tpu.memory_space<semaphore_mem>>
    %170 = tpu.memref_squeeze %169 : memref<1x!tpu.dma_semaphore, #tpu.memory_space<semaphore_mem>> -> memref<!tpu.dma_semaphore, #tpu.memory_space<semaphore_mem>>
    tpu.wait_dma2 semaphore(%170 : memref<!tpu.dma_semaphore, #tpu.memory_space<semaphore_mem>>) src(%arg7 : memref<3200x128xbf16, #tpu.memory_space<any>>) dst(%arg13 : memref<3200x128xbf16, #tpu.memory_space<vmem>>)
    %cst_130 = arith.constant 0.000000e+00 : f32
    %171 = vector.broadcast %cst_130 : f32 to vector<8x128xf32>
    %172 = vector.extract_strided_slice %168 {offsets = [0, 0], sizes = [8, 128], strides = [1, 1]} : vector<200x128xf32> to vector<8x128xf32>
    %173 = arith.truncf %172 : vector<8x128xf32> to vector<8x128xbf16>
    %c0_131 = arith.constant 0 : index
    %c0_132 = arith.constant 0 : index
    %174 = vector.load %arg13[%c0_131, %c0_132] : memref<3200x128xbf16, #tpu.memory_space<vmem>>, vector<128x128xbf16>
    %cst_133 = arith.constant dense<0.000000e+00> : vector<8x128xf32>
    %175 = tpu.matmul %173, %174, %cst_133 {dimension_numbers = #tpu.dot_dimension_numbers<[1], [0], [0], [1], [0, 0, 1, 1], [], []>} : vector<8x128xbf16>, vector<128x128xbf16>, vector<8x128xf32> -> vector<8x128xf32>
    %176 = arith.addf %171, %175 : vector<8x128xf32>
    %177 = vector.extract_strided_slice %168 {offsets = [8, 0], sizes = [8, 128], strides = [1, 1]} : vector<200x128xf32> to vector<8x128xf32>
    %178 = arith.truncf %177 : vector<8x128xf32> to vector<8x128xbf16>
    %c128_134 = arith.constant 128 : index
    %c0_135 = arith.constant 0 : index
    %179 = vector.load %arg13[%c128_134, %c0_135] : memref<3200x128xbf16, #tpu.memory_space<vmem>>, vector<128x128xbf16>
    %cst_136 = arith.constant dense<0.000000e+00> : vector<8x128xf32>
    %180 = tpu.matmul %178, %179, %cst_136 {dimension_numbers = #tpu.dot_dimension_numbers<[1], [0], [0], [1], [0, 0, 1, 1], [], []>} : vector<8x128xbf16>, vector<128x128xbf16>, vector<8x128xf32> -> vector<8x128xf32>
    %181 = arith.addf %176, %180 : vector<8x128xf32>
    %182 = vector.extract_strided_slice %168 {offsets = [16, 0], sizes = [8, 128], strides = [1, 1]} : vector<200x128xf32> to vector<8x128xf32>
    %183 = arith.truncf %182 : vector<8x128xf32> to vector<8x128xbf16>
    %c256_137 = arith.constant 256 : index
    %c0_138 = arith.constant 0 : index
    %184 = vector.load %arg13[%c256_137, %c0_138] : memref<3200x128xbf16, #tpu.memory_space<vmem>>, vector<128x128xbf16>
    %cst_139 = arith.constant dense<0.000000e+00> : vector<8x128xf32>
    %185 = tpu.matmul %183, %184, %cst_139 {dimension_numbers = #tpu.dot_dimension_numbers<[1], [0], [0], [1], [0, 0, 1, 1], [], []>} : vector<8x128xbf16>, vector<128x128xbf16>, vector<8x128xf32> -> vector<8x128xf32>
    %186 = arith.addf %181, %185 : vector<8x128xf32>
    %187 = vector.extract_strided_slice %168 {offsets = [24, 0], sizes = [8, 128], strides = [1, 1]} : vector<200x128xf32> to vector<8x128xf32>
    %188 = arith.truncf %187 : vector<8x128xf32> to vector<8x128xbf16>
    %c384_140 = arith.constant 384 : index
    %c0_141 = arith.constant 0 : index
    %189 = vector.load %arg13[%c384_140, %c0_141] : memref<3200x128xbf16, #tpu.memory_space<vmem>>, vector<128x128xbf16>
    %cst_142 = arith.constant dense<0.000000e+00> : vector<8x128xf32>
    %190 = tpu.matmul %188, %189, %cst_142 {dimension_numbers = #tpu.dot_dimension_numbers<[1], [0], [0], [1], [0, 0, 1, 1], [], []>} : vector<8x128xbf16>, vector<128x128xbf16>, vector<8x128xf32> -> vector<8x128xf32>
    %191 = arith.addf %186, %190 : vector<8x128xf32>
    %192 = vector.extract_strided_slice %168 {offsets = [32, 0], sizes = [8, 128], strides = [1, 1]} : vector<200x128xf32> to vector<8x128xf32>
    %193 = arith.truncf %192 : vector<8x128xf32> to vector<8x128xbf16>
    %c512_143 = arith.constant 512 : index
    %c0_144 = arith.constant 0 : index
    %194 = vector.load %arg13[%c512_143, %c0_144] : memref<3200x128xbf16, #tpu.memory_space<vmem>>, vector<128x128xbf16>
    %cst_145 = arith.constant dense<0.000000e+00> : vector<8x128xf32>
    %195 = tpu.matmul %193, %194, %cst_145 {dimension_numbers = #tpu.dot_dimension_numbers<[1], [0], [0], [1], [0, 0, 1, 1], [], []>} : vector<8x128xbf16>, vector<128x128xbf16>, vector<8x128xf32> -> vector<8x128xf32>
    %196 = arith.addf %191, %195 : vector<8x128xf32>
    %197 = vector.extract_strided_slice %168 {offsets = [40, 0], sizes = [8, 128], strides = [1, 1]} : vector<200x128xf32> to vector<8x128xf32>
    %198 = arith.truncf %197 : vector<8x128xf32> to vector<8x128xbf16>
    %c640_146 = arith.constant 640 : index
    %c0_147 = arith.constant 0 : index
    %199 = vector.load %arg13[%c640_146, %c0_147] : memref<3200x128xbf16, #tpu.memory_space<vmem>>, vector<128x128xbf16>
    %cst_148 = arith.constant dense<0.000000e+00> : vector<8x128xf32>
    %200 = tpu.matmul %198, %199, %cst_148 {dimension_numbers = #tpu.dot_dimension_numbers<[1], [0], [0], [1], [0, 0, 1, 1], [], []>} : vector<8x128xbf16>, vector<128x128xbf16>, vector<8x128xf32> -> vector<8x128xf32>
    %201 = arith.addf %196, %200 : vector<8x128xf32>
    %202 = vector.extract_strided_slice %168 {offsets = [48, 0], sizes = [8, 128], strides = [1, 1]} : vector<200x128xf32> to vector<8x128xf32>
    %203 = arith.truncf %202 : vector<8x128xf32> to vector<8x128xbf16>
    %c768_149 = arith.constant 768 : index
    %c0_150 = arith.constant 0 : index
    %204 = vector.load %arg13[%c768_149, %c0_150] : memref<3200x128xbf16, #tpu.memory_space<vmem>>, vector<128x128xbf16>
    %cst_151 = arith.constant dense<0.000000e+00> : vector<8x128xf32>
    %205 = tpu.matmul %203, %204, %cst_151 {dimension_numbers = #tpu.dot_dimension_numbers<[1], [0], [0], [1], [0, 0, 1, 1], [], []>} : vector<8x128xbf16>, vector<128x128xbf16>, vector<8x128xf32> -> vector<8x128xf32>
    %206 = arith.addf %201, %205 : vector<8x128xf32>
    %207 = vector.extract_strided_slice %168 {offsets = [56, 0], sizes = [8, 128], strides = [1, 1]} : vector<200x128xf32> to vector<8x128xf32>
    %208 = arith.truncf %207 : vector<8x128xf32> to vector<8x128xbf16>
    %c896_152 = arith.constant 896 : index
    %c0_153 = arith.constant 0 : index
    %209 = vector.load %arg13[%c896_152, %c0_153] : memref<3200x128xbf16, #tpu.memory_space<vmem>>, vector<128x128xbf16>
    %cst_154 = arith.constant dense<0.000000e+00> : vector<8x128xf32>
    %210 = tpu.matmul %208, %209, %cst_154 {dimension_numbers = #tpu.dot_dimension_numbers<[1], [0], [0], [1], [0, 0, 1, 1], [], []>} : vector<8x128xbf16>, vector<128x128xbf16>, vector<8x128xf32> -> vector<8x128xf32>
    %211 = arith.addf %206, %210 : vector<8x128xf32>
    %212 = vector.extract_strided_slice %168 {offsets = [64, 0], sizes = [8, 128], strides = [1, 1]} : vector<200x128xf32> to vector<8x128xf32>
    %213 = arith.truncf %212 : vector<8x128xf32> to vector<8x128xbf16>
    %c1024_155 = arith.constant 1024 : index
    %c0_156 = arith.constant 0 : index
    %214 = vector.load %arg13[%c1024_155, %c0_156] : memref<3200x128xbf16, #tpu.memory_space<vmem>>, vector<128x128xbf16>
    %cst_157 = arith.constant dense<0.000000e+00> : vector<8x128xf32>
    %215 = tpu.matmul %213, %214, %cst_157 {dimension_numbers = #tpu.dot_dimension_numbers<[1], [0], [0], [1], [0, 0, 1, 1], [], []>} : vector<8x128xbf16>, vector<128x128xbf16>, vector<8x128xf32> -> vector<8x128xf32>
    %216 = arith.addf %211, %215 : vector<8x128xf32>
    %217 = vector.extract_strided_slice %168 {offsets = [72, 0], sizes = [8, 128], strides = [1, 1]} : vector<200x128xf32> to vector<8x128xf32>
    %218 = arith.truncf %217 : vector<8x128xf32> to vector<8x128xbf16>
    %c1152_158 = arith.constant 1152 : index
    %c0_159 = arith.constant 0 : index
    %219 = vector.load %arg13[%c1152_158, %c0_159] : memref<3200x128xbf16, #tpu.memory_space<vmem>>, vector<128x128xbf16>
    %cst_160 = arith.constant dense<0.000000e+00> : vector<8x128xf32>
    %220 = tpu.matmul %218, %219, %cst_160 {dimension_numbers = #tpu.dot_dimension_numbers<[1], [0], [0], [1], [0, 0, 1, 1], [], []>} : vector<8x128xbf16>, vector<128x128xbf16>, vector<8x128xf32> -> vector<8x128xf32>
    %221 = arith.addf %216, %220 : vector<8x128xf32>
    %222 = vector.extract_strided_slice %168 {offsets = [80, 0], sizes = [8, 128], strides = [1, 1]} : vector<200x128xf32> to vector<8x128xf32>
    %223 = arith.truncf %222 : vector<8x128xf32> to vector<8x128xbf16>
    %c1280_161 = arith.constant 1280 : index
    %c0_162 = arith.constant 0 : index
    %224 = vector.load %arg13[%c1280_161, %c0_162] : memref<3200x128xbf16, #tpu.memory_space<vmem>>, vector<128x128xbf16>
    %cst_163 = arith.constant dense<0.000000e+00> : vector<8x128xf32>
    %225 = tpu.matmul %223, %224, %cst_163 {dimension_numbers = #tpu.dot_dimension_numbers<[1], [0], [0], [1], [0, 0, 1, 1], [], []>} : vector<8x128xbf16>, vector<128x128xbf16>, vector<8x128xf32> -> vector<8x128xf32>
    %226 = arith.addf %221, %225 : vector<8x128xf32>
    %227 = vector.extract_strided_slice %168 {offsets = [88, 0], sizes = [8, 128], strides = [1, 1]} : vector<200x128xf32> to vector<8x128xf32>
    %228 = arith.truncf %227 : vector<8x128xf32> to vector<8x128xbf16>
    %c1408_164 = arith.constant 1408 : index
    %c0_165 = arith.constant 0 : index
    %229 = vector.load %arg13[%c1408_164, %c0_165] : memref<3200x128xbf16, #tpu.memory_space<vmem>>, vector<128x128xbf16>
    %cst_166 = arith.constant dense<0.000000e+00> : vector<8x128xf32>
    %230 = tpu.matmul %228, %229, %cst_166 {dimension_numbers = #tpu.dot_dimension_numbers<[1], [0], [0], [1], [0, 0, 1, 1], [], []>} : vector<8x128xbf16>, vector<128x128xbf16>, vector<8x128xf32> -> vector<8x128xf32>
    %231 = arith.addf %226, %230 : vector<8x128xf32>
    %232 = vector.extract_strided_slice %168 {offsets = [96, 0], sizes = [8, 128], strides = [1, 1]} : vector<200x128xf32> to vector<8x128xf32>
    %233 = arith.truncf %232 : vector<8x128xf32> to vector<8x128xbf16>
    %c1536_167 = arith.constant 1536 : index
    %c0_168 = arith.constant 0 : index
    %234 = vector.load %arg13[%c1536_167, %c0_168] : memref<3200x128xbf16, #tpu.memory_space<vmem>>, vector<128x128xbf16>
    %cst_169 = arith.constant dense<0.000000e+00> : vector<8x128xf32>
    %235 = tpu.matmul %233, %234, %cst_169 {dimension_numbers = #tpu.dot_dimension_numbers<[1], [0], [0], [1], [0, 0, 1, 1], [], []>} : vector<8x128xbf16>, vector<128x128xbf16>, vector<8x128xf32> -> vector<8x128xf32>
    %236 = arith.addf %231, %235 : vector<8x128xf32>
    %237 = vector.extract_strided_slice %168 {offsets = [104, 0], sizes = [8, 128], strides = [1, 1]} : vector<200x128xf32> to vector<8x128xf32>
    %238 = arith.truncf %237 : vector<8x128xf32> to vector<8x128xbf16>
    %c1664_170 = arith.constant 1664 : index
    %c0_171 = arith.constant 0 : index
    %239 = vector.load %arg13[%c1664_170, %c0_171] : memref<3200x128xbf16, #tpu.memory_space<vmem>>, vector<128x128xbf16>
    %cst_172 = arith.constant dense<0.000000e+00> : vector<8x128xf32>
    %240 = tpu.matmul %238, %239, %cst_172 {dimension_numbers = #tpu.dot_dimension_numbers<[1], [0], [0], [1], [0, 0, 1, 1], [], []>} : vector<8x128xbf16>, vector<128x128xbf16>, vector<8x128xf32> -> vector<8x128xf32>
    %241 = arith.addf %236, %240 : vector<8x128xf32>
    %242 = vector.extract_strided_slice %168 {offsets = [112, 0], sizes = [8, 128], strides = [1, 1]} : vector<200x128xf32> to vector<8x128xf32>
    %243 = arith.truncf %242 : vector<8x128xf32> to vector<8x128xbf16>
    %c1792_173 = arith.constant 1792 : index
    %c0_174 = arith.constant 0 : index
    %244 = vector.load %arg13[%c1792_173, %c0_174] : memref<3200x128xbf16, #tpu.memory_space<vmem>>, vector<128x128xbf16>
    %cst_175 = arith.constant dense<0.000000e+00> : vector<8x128xf32>
    %245 = tpu.matmul %243, %244, %cst_175 {dimension_numbers = #tpu.dot_dimension_numbers<[1], [0], [0], [1], [0, 0, 1, 1], [], []>} : vector<8x128xbf16>, vector<128x128xbf16>, vector<8x128xf32> -> vector<8x128xf32>
    %246 = arith.addf %241, %245 : vector<8x128xf32>
    %247 = vector.extract_strided_slice %168 {offsets = [120, 0], sizes = [8, 128], strides = [1, 1]} : vector<200x128xf32> to vector<8x128xf32>
    %248 = arith.truncf %247 : vector<8x128xf32> to vector<8x128xbf16>
    %c1920_176 = arith.constant 1920 : index
    %c0_177 = arith.constant 0 : index
    %249 = vector.load %arg13[%c1920_176, %c0_177] : memref<3200x128xbf16, #tpu.memory_space<vmem>>, vector<128x128xbf16>
    %cst_178 = arith.constant dense<0.000000e+00> : vector<8x128xf32>
    %250 = tpu.matmul %248, %249, %cst_178 {dimension_numbers = #tpu.dot_dimension_numbers<[1], [0], [0], [1], [0, 0, 1, 1], [], []>} : vector<8x128xbf16>, vector<128x128xbf16>, vector<8x128xf32> -> vector<8x128xf32>
    %251 = arith.addf %246, %250 : vector<8x128xf32>
    %252 = vector.extract_strided_slice %168 {offsets = [128, 0], sizes = [8, 128], strides = [1, 1]} : vector<200x128xf32> to vector<8x128xf32>
    %253 = arith.truncf %252 : vector<8x128xf32> to vector<8x128xbf16>
    %c2048_179 = arith.constant 2048 : index
    %c0_180 = arith.constant 0 : index
    %254 = vector.load %arg13[%c2048_179, %c0_180] : memref<3200x128xbf16, #tpu.memory_space<vmem>>, vector<128x128xbf16>
    %cst_181 = arith.constant dense<0.000000e+00> : vector<8x128xf32>
    %255 = tpu.matmul %253, %254, %cst_181 {dimension_numbers = #tpu.dot_dimension_numbers<[1], [0], [0], [1], [0, 0, 1, 1], [], []>} : vector<8x128xbf16>, vector<128x128xbf16>, vector<8x128xf32> -> vector<8x128xf32>
    %256 = arith.addf %251, %255 : vector<8x128xf32>
    %257 = vector.extract_strided_slice %168 {offsets = [136, 0], sizes = [8, 128], strides = [1, 1]} : vector<200x128xf32> to vector<8x128xf32>
    %258 = arith.truncf %257 : vector<8x128xf32> to vector<8x128xbf16>
    %c2176_182 = arith.constant 2176 : index
    %c0_183 = arith.constant 0 : index
    %259 = vector.load %arg13[%c2176_182, %c0_183] : memref<3200x128xbf16, #tpu.memory_space<vmem>>, vector<128x128xbf16>
    %cst_184 = arith.constant dense<0.000000e+00> : vector<8x128xf32>
    %260 = tpu.matmul %258, %259, %cst_184 {dimension_numbers = #tpu.dot_dimension_numbers<[1], [0], [0], [1], [0, 0, 1, 1], [], []>} : vector<8x128xbf16>, vector<128x128xbf16>, vector<8x128xf32> -> vector<8x128xf32>
    %261 = arith.addf %256, %260 : vector<8x128xf32>
    %262 = vector.extract_strided_slice %168 {offsets = [144, 0], sizes = [8, 128], strides = [1, 1]} : vector<200x128xf32> to vector<8x128xf32>
    %263 = arith.truncf %262 : vector<8x128xf32> to vector<8x128xbf16>
    %c2304 = arith.constant 2304 : index
    %c0_185 = arith.constant 0 : index
    %264 = vector.load %arg13[%c2304, %c0_185] : memref<3200x128xbf16, #tpu.memory_space<vmem>>, vector<128x128xbf16>
    %cst_186 = arith.constant dense<0.000000e+00> : vector<8x128xf32>
    %265 = tpu.matmul %263, %264, %cst_186 {dimension_numbers = #tpu.dot_dimension_numbers<[1], [0], [0], [1], [0, 0, 1, 1], [], []>} : vector<8x128xbf16>, vector<128x128xbf16>, vector<8x128xf32> -> vector<8x128xf32>
    %266 = arith.addf %261, %265 : vector<8x128xf32>
    %267 = vector.extract_strided_slice %168 {offsets = [152, 0], sizes = [8, 128], strides = [1, 1]} : vector<200x128xf32> to vector<8x128xf32>
    %268 = arith.truncf %267 : vector<8x128xf32> to vector<8x128xbf16>
    %c2432 = arith.constant 2432 : index
    %c0_187 = arith.constant 0 : index
    %269 = vector.load %arg13[%c2432, %c0_187] : memref<3200x128xbf16, #tpu.memory_space<vmem>>, vector<128x128xbf16>
    %cst_188 = arith.constant dense<0.000000e+00> : vector<8x128xf32>
    %270 = tpu.matmul %268, %269, %cst_188 {dimension_numbers = #tpu.dot_dimension_numbers<[1], [0], [0], [1], [0, 0, 1, 1], [], []>} : vector<8x128xbf16>, vector<128x128xbf16>, vector<8x128xf32> -> vector<8x128xf32>
    %271 = arith.addf %266, %270 : vector<8x128xf32>
    %272 = vector.extract_strided_slice %168 {offsets = [160, 0], sizes = [8, 128], strides = [1, 1]} : vector<200x128xf32> to vector<8x128xf32>
    %273 = arith.truncf %272 : vector<8x128xf32> to vector<8x128xbf16>
    %c2560 = arith.constant 2560 : index
    %c0_189 = arith.constant 0 : index
    %274 = vector.load %arg13[%c2560, %c0_189] : memref<3200x128xbf16, #tpu.memory_space<vmem>>, vector<128x128xbf16>
    %cst_190 = arith.constant dense<0.000000e+00> : vector<8x128xf32>
    %275 = tpu.matmul %273, %274, %cst_190 {dimension_numbers = #tpu.dot_dimension_numbers<[1], [0], [0], [1], [0, 0, 1, 1], [], []>} : vector<8x128xbf16>, vector<128x128xbf16>, vector<8x128xf32> -> vector<8x128xf32>
    %276 = arith.addf %271, %275 : vector<8x128xf32>
    %277 = vector.extract_strided_slice %168 {offsets = [168, 0], sizes = [8, 128], strides = [1, 1]} : vector<200x128xf32> to vector<8x128xf32>
    %278 = arith.truncf %277 : vector<8x128xf32> to vector<8x128xbf16>
    %c2688 = arith.constant 2688 : index
    %c0_191 = arith.constant 0 : index
    %279 = vector.load %arg13[%c2688, %c0_191] : memref<3200x128xbf16, #tpu.memory_space<vmem>>, vector<128x128xbf16>
    %cst_192 = arith.constant dense<0.000000e+00> : vector<8x128xf32>
    %280 = tpu.matmul %278, %279, %cst_192 {dimension_numbers = #tpu.dot_dimension_numbers<[1], [0], [0], [1], [0, 0, 1, 1], [], []>} : vector<8x128xbf16>, vector<128x128xbf16>, vector<8x128xf32> -> vector<8x128xf32>
    %281 = arith.addf %276, %280 : vector<8x128xf32>
    %282 = vector.extract_strided_slice %168 {offsets = [176, 0], sizes = [8, 128], strides = [1, 1]} : vector<200x128xf32> to vector<8x128xf32>
    %283 = arith.truncf %282 : vector<8x128xf32> to vector<8x128xbf16>
    %c2816 = arith.constant 2816 : index
    %c0_193 = arith.constant 0 : index
    %284 = vector.load %arg13[%c2816, %c0_193] : memref<3200x128xbf16, #tpu.memory_space<vmem>>, vector<128x128xbf16>
    %cst_194 = arith.constant dense<0.000000e+00> : vector<8x128xf32>
    %285 = tpu.matmul %283, %284, %cst_194 {dimension_numbers = #tpu.dot_dimension_numbers<[1], [0], [0], [1], [0, 0, 1, 1], [], []>} : vector<8x128xbf16>, vector<128x128xbf16>, vector<8x128xf32> -> vector<8x128xf32>
    %286 = arith.addf %281, %285 : vector<8x128xf32>
    %287 = vector.extract_strided_slice %168 {offsets = [184, 0], sizes = [8, 128], strides = [1, 1]} : vector<200x128xf32> to vector<8x128xf32>
    %288 = arith.truncf %287 : vector<8x128xf32> to vector<8x128xbf16>
    %c2944 = arith.constant 2944 : index
    %c0_195 = arith.constant 0 : index
    %289 = vector.load %arg13[%c2944, %c0_195] : memref<3200x128xbf16, #tpu.memory_space<vmem>>, vector<128x128xbf16>
    %cst_196 = arith.constant dense<0.000000e+00> : vector<8x128xf32>
    %290 = tpu.matmul %288, %289, %cst_196 {dimension_numbers = #tpu.dot_dimension_numbers<[1], [0], [0], [1], [0, 0, 1, 1], [], []>} : vector<8x128xbf16>, vector<128x128xbf16>, vector<8x128xf32> -> vector<8x128xf32>
    %291 = arith.addf %286, %290 : vector<8x128xf32>
    %292 = vector.extract_strided_slice %168 {offsets = [192, 0], sizes = [8, 128], strides = [1, 1]} : vector<200x128xf32> to vector<8x128xf32>
    %293 = arith.truncf %292 : vector<8x128xf32> to vector<8x128xbf16>
    %c3072 = arith.constant 3072 : index
    %c0_197 = arith.constant 0 : index
    %294 = vector.load %arg13[%c3072, %c0_197] : memref<3200x128xbf16, #tpu.memory_space<vmem>>, vector<128x128xbf16>
    %cst_198 = arith.constant dense<0.000000e+00> : vector<8x128xf32>
    %295 = tpu.matmul %293, %294, %cst_198 {dimension_numbers = #tpu.dot_dimension_numbers<[1], [0], [0], [1], [0, 0, 1, 1], [], []>} : vector<8x128xbf16>, vector<128x128xbf16>, vector<8x128xf32> -> vector<8x128xf32>
    %296 = arith.addf %291, %295 : vector<8x128xf32>
    %c0_199 = arith.constant 0 : index
    %c0_200 = arith.constant 0 : index
    %297 = vector.load %arg8[%c0_199, %c0_200] : memref<1x128xf32, #tpu.memory_space<vmem>>, vector<1x128xf32>
    %298 = vector.broadcast %297 : vector<1x128xf32> to vector<8x128xf32>
    %299 = arith.addf %296, %298 : vector<8x128xf32>
    %cst_201 = arith.constant 0.000000e+00 : f32
    %300 = vector.broadcast %cst_201 : f32 to vector<8x128xf32>
    %301 = arith.maximumf %299, %300 : vector<8x128xf32>
    %cst_202 = arith.constant 0.000000e+00 : f32
    %302 = vector.broadcast %cst_202 : f32 to vector<2x16xf32>
    %303 = vector.extract_strided_slice %301 {offsets = [0, 0], sizes = [2, 128], strides = [1, 1]} : vector<8x128xf32> to vector<2x128xf32>
    %304 = arith.truncf %303 : vector<2x128xf32> to vector<2x128xbf16>
    %c0_203 = arith.constant 0 : index
    %c0_204 = arith.constant 0 : index
    %305 = vector.load %arg9[%c0_203, %c0_204] : memref<512x16xbf16, #tpu.memory_space<vmem>>, vector<128x16xbf16>
    %cst_205 = arith.constant dense<0.000000e+00> : vector<2x16xf32>
    %306 = tpu.matmul %304, %305, %cst_205 {dimension_numbers = #tpu.dot_dimension_numbers<[1], [0], [0], [1], [0, 0, 1, 1], [], []>} : vector<2x128xbf16>, vector<128x16xbf16>, vector<2x16xf32> -> vector<2x16xf32>
    %307 = arith.addf %302, %306 : vector<2x16xf32>
    %308 = vector.extract_strided_slice %301 {offsets = [2, 0], sizes = [2, 128], strides = [1, 1]} : vector<8x128xf32> to vector<2x128xf32>
    %309 = arith.truncf %308 : vector<2x128xf32> to vector<2x128xbf16>
    %c128_206 = arith.constant 128 : index
    %c0_207 = arith.constant 0 : index
    %310 = vector.load %arg9[%c128_206, %c0_207] : memref<512x16xbf16, #tpu.memory_space<vmem>>, vector<128x16xbf16>
    %cst_208 = arith.constant dense<0.000000e+00> : vector<2x16xf32>
    %311 = tpu.matmul %309, %310, %cst_208 {dimension_numbers = #tpu.dot_dimension_numbers<[1], [0], [0], [1], [0, 0, 1, 1], [], []>} : vector<2x128xbf16>, vector<128x16xbf16>, vector<2x16xf32> -> vector<2x16xf32>
    %312 = arith.addf %307, %311 : vector<2x16xf32>
    %313 = vector.extract_strided_slice %301 {offsets = [4, 0], sizes = [2, 128], strides = [1, 1]} : vector<8x128xf32> to vector<2x128xf32>
    %314 = arith.truncf %313 : vector<2x128xf32> to vector<2x128xbf16>
    %c256_209 = arith.constant 256 : index
    %c0_210 = arith.constant 0 : index
    %315 = vector.load %arg9[%c256_209, %c0_210] : memref<512x16xbf16, #tpu.memory_space<vmem>>, vector<128x16xbf16>
    %cst_211 = arith.constant dense<0.000000e+00> : vector<2x16xf32>
    %316 = tpu.matmul %314, %315, %cst_211 {dimension_numbers = #tpu.dot_dimension_numbers<[1], [0], [0], [1], [0, 0, 1, 1], [], []>} : vector<2x128xbf16>, vector<128x16xbf16>, vector<2x16xf32> -> vector<2x16xf32>
    %317 = arith.addf %312, %316 : vector<2x16xf32>
    %318 = vector.extract_strided_slice %301 {offsets = [6, 0], sizes = [2, 128], strides = [1, 1]} : vector<8x128xf32> to vector<2x128xf32>
    %319 = arith.truncf %318 : vector<2x128xf32> to vector<2x128xbf16>
    %c384_212 = arith.constant 384 : index
    %c0_213 = arith.constant 0 : index
    %320 = vector.load %arg9[%c384_212, %c0_213] : memref<512x16xbf16, #tpu.memory_space<vmem>>, vector<128x16xbf16>
    %cst_214 = arith.constant dense<0.000000e+00> : vector<2x16xf32>
    %321 = tpu.matmul %319, %320, %cst_214 {dimension_numbers = #tpu.dot_dimension_numbers<[1], [0], [0], [1], [0, 0, 1, 1], [], []>} : vector<2x128xbf16>, vector<128x16xbf16>, vector<2x16xf32> -> vector<2x16xf32>
    %322 = arith.addf %317, %321 : vector<2x16xf32>
    %c0_215 = arith.constant 0 : index
    %c0_216 = arith.constant 0 : index
    %323 = vector.load %arg10[%c0_215, %c0_216] : memref<1x16xf32, #tpu.memory_space<vmem>>, vector<1x16xf32>
    %324 = vector.broadcast %323 : vector<1x16xf32> to vector<2x16xf32>
    %325 = arith.addf %322, %324 : vector<2x16xf32>
    %c0_217 = arith.constant 0 : index
    %c0_218 = arith.constant 0 : index
    %326 = vector.load %arg11[%c0_217, %c0_218] : memref<2x16xf32, #tpu.memory_space<vmem>>, vector<2x16xf32>
    tpu.vector_store %arg11[%c0_217, %c0_218], %325 {strides = array<i32>} : memref<2x16xf32, #tpu.memory_space<vmem>>, vector<2x16xf32>,
    return
  }
  func.func @transform_0(%arg0: i32) -> (i32, i32) {
    %c0_i32 = arith.constant 0 : i32
    %c0_i32_0 = arith.constant 0 : i32
    %c0_i32_1 = arith.constant 0 : i32
    return %c0_i32, %c0_i32_0 : i32, i32
  }
  func.func @transform_1(%arg0: i32) -> (i32, i32) {
    %c0_i32 = arith.constant 0 : i32
    %c0_i32_0 = arith.constant 0 : i32
    %c0_i32_1 = arith.constant 0 : i32
    return %c0_i32, %c0_i32_0 : i32, i32
  }
  func.func @transform_2(%arg0: i32) -> (i32, i32) {
    %c0_i32 = arith.constant 0 : i32
    %c0_i32_0 = arith.constant 0 : i32
    %c0_i32_1 = arith.constant 0 : i32
    return %c0_i32, %c0_i32_0 : i32, i32
  }
  func.func @transform_4(%arg0: i32) -> (i32, i32) {
    %c0_i32 = arith.constant 0 : i32
    %c0_i32_0 = arith.constant 0 : i32
    %c0_i32_1 = arith.constant 0 : i32
    return %c0_i32, %c0_i32_0 : i32, i32
  }
  func.func @transform_5(%arg0: i32) -> (i32, i32) {
    %c0_i32 = arith.constant 0 : i32
    %c0_i32_0 = arith.constant 0 : i32
    %c0_i32_1 = arith.constant 0 : i32
    return %c0_i32, %c0_i32_0 : i32, i32
  }
  func.func @transform_7(%arg0: i32) -> (i32, i32) {
    %c0_i32 = arith.constant 0 : i32
    %c0_i32_0 = arith.constant 0 : i32
    %c0_i32_1 = arith.constant 0 : i32
    return %c0_i32, %c0_i32_0 : i32, i32
  }
  func.func @transform_8(%arg0: i32) -> (i32, i32) {
    %c0_i32 = arith.constant 0 : i32
    %c0_i32_0 = arith.constant 0 : i32
    %c0_i32_1 = arith.constant 0 : i32
    return %c0_i32, %c0_i32_0 : i32, i32
  }
  func.func @transform_9(%arg0: i32) -> (i32, i32) {
    %c0_i32 = arith.constant 0 : i32
    %c0_i32_0 = arith.constant 0 : i32
    %c0_i32_1 = arith.constant 0 : i32
    return %c0_i32, %c0_i32_0 : i32, i32
  }
  func.func @transform_10(%arg0: i32) -> (i32, i32) {
    %c0_i32 = arith.constant 0 : i32
    %c0_i32_0 = arith.constant 0 : i32
    %c0_i32_1 = arith.constant 0 : i32
    return %c0_i32, %c0_i32_0 : i32, i32
  }
}

</mosaic_0001>

<bundles_post_ra>
// kernel: net_forward.1
= control target key start
LH: loop header
LB: loop body
LE: loop exit
PB: predicated region body
PF: predicated region fallthrough
CT: control target
= control target key end

     0   :  { %15 = vsyncpa [#allocation7], 0  ;;  %s18659_s0 = inlined_call_operand.vmem [shape: bf16[544,192], index: 0, kind: input, shape index: {}]   ;;  %s18660_s1 = inlined_call_operand.vmem [shape: bf16[192,64], index: 1, kind: input, shape index: {}]   ;;  %s18661_s2 = inlined_call_operand.vmem [shape: f32[1,64], index: 2, kind: input, shape index: {}]   ;;  %s18662_s3 = inlined_call_operand.vmem [shape: bf16[2304,128], index: 3, kind: input, shape index: {}]   ;;  %s18663_s4 = inlined_call_operand.vmem [shape: f32[1,128], index: 4, kind: input, shape index: {}]   ;;  %s18664_s5 = inlined_call_operand.vmem [shape: bf16[200,128], index: 5, kind: input, shape index: {}]   ;;  %s18665_s6 = inlined_call_operand.vmem [shape: bf16[3200,128], index: 6, kind: input, shape index: {}]   ;;  %s18666_s7 = inlined_call_operand.vmem [shape: f32[1,128], index: 7, kind: input, shape index: {}]   ;;  %s18667_s8 = inlined_call_operand.vmem [shape: bf16[512,16], index: 8, kind: input, shape index: {}]   ;;  %s18668_s9 = inlined_call_operand.vmem [shape: f32[1,16], index: 9, kind: input, shape index: {}]   ;;  %s18669_s10 = inlined_call_operand.hbm [shape: f32[2,16], index: 10, kind: output, shape index: {}]  }
   0x1   :  { %v43_v0 = vld [vmem:[%s18662_s3] sm:$0xff]  ;;  %v45_v1 = vld [vmem:[%s18662_s3 + $0x8] sm:$0xff]  ;;  %v47_v2 = vld [vmem:[%s18662_s3 + $0x10] sm:$0xff] }
   0x2   :  { %44 = vst [vmem:[#allocation2 + $0x2b0] sm:$0xff] %v43_v0  ;;  %v49_v3 = vld [vmem:[%s18662_s3 + $0x18] sm:$0xff]  ;;  %v51_v4 = vld [vmem:[%s18662_s3 + $0x20] sm:$0xff]  ;;  %v53_v5 = vld [vmem:[%s18662_s3 + $0x28] sm:$0xff] }
   0x3   :  { %46 = vst [vmem:[#allocation2 + $0x3b0] sm:$0xff] %v45_v1  ;;  %v55_v6 = vld [vmem:[%s18662_s3 + $0x30] sm:$0xff]  ;;  %v57_v7 = vld [vmem:[%s18662_s3 + $0x38] sm:$0xff]  ;;  %v59_v8 = vld [vmem:[%s18662_s3 + $0x40] sm:$0xff] }
   0x4   :  { %48 = vst [vmem:[#allocation2 + $0x10] sm:$0xff] %v47_v2  ;;  %v61_v9 = vld [vmem:[%s18662_s3 + $0x48] sm:$0xff]  ;;  %v63_v10 = vld [vmem:[%s18662_s3 + $0x50] sm:$0xff]  ;;  %v65_v11 = vld [vmem:[%s18662_s3 + $0x58] sm:$0xff] }
   0x5   :  { %50 = vst [vmem:[#allocation2 + $0x448] sm:$0xff] %v49_v3  ;;  %v67_v12 = vld [vmem:[%s18662_s3 + $0x60] sm:$0xff]  ;;  %v69_v13 = vld [vmem:[%s18662_s3 + $0x68] sm:$0xff]  ;;  %v71_v14 = vld [vmem:[%s18662_s3 + $0x70] sm:$0xff] }
   0x6   :  { %52 = vst [vmem:[#allocation2 + $0x320] sm:$0xff] %v51_v4  ;;  %v73_v15 = vld [vmem:[%s18662_s3 + $0x78] sm:$0xff]  ;;  %v75_v16 = vld [vmem:[%s18662_s3 + $0x80] sm:$0xff]  ;;  %v77_v17 = vld [vmem:[%s18662_s3 + $0x88] sm:$0xff] }
   0x7   :  { %54 = vst [vmem:[#allocation2 + $0x438] sm:$0xff] %v53_v5  ;;  %v79_v18 = vld [vmem:[%s18662_s3 + $0x90] sm:$0xff]  ;;  %v81_v19 = vld [vmem:[%s18662_s3 + $0x98] sm:$0xff]  ;;  %v83_v20 = vld [vmem:[%s18662_s3 + $0xa0] sm:$0xff] }
   0x8   :  { %56 = vst [vmem:[#allocation2 + $0x370] sm:$0xff] %v55_v6  ;;  %v85_v21 = vld [vmem:[%s18662_s3 + $0xa8] sm:$0xff]  ;;  %v87_v22 = vld [vmem:[%s18662_s3 + $0xb0] sm:$0xff]  ;;  %v89_v23 = vld [vmem:[%s18662_s3 + $0xb8] sm:$0xff] }
   0x9   :  { %58 = vst [vmem:[#allocation2 + $0x100] sm:$0xff] %v57_v7  ;;  %v91_v24 = vld [vmem:[%s18662_s3 + $0xc0] sm:$0xff]  ;;  %v93_v25 = vld [vmem:[%s18662_s3 + $0xc8] sm:$0xff]  ;;  %v95_v26 = vld [vmem:[%s18662_s3 + $0xd0] sm:$0xff] }
   0xa   :  { %60 = vst [vmem:[#allocation2 + $0x300] sm:$0xff] %v59_v8  ;;  %v97_v27 = vld [vmem:[%s18662_s3 + $0xd8] sm:$0xff]  ;;  %v99_v28 = vld [vmem:[%s18662_s3 + $0xe0] sm:$0xff]  ;;  %v101_v29 = vld [vmem:[%s18662_s3 + $0xe8] sm:$0xff] }
   0xb   :  { %62 = vst [vmem:[#allocation2 + $0x2f0] sm:$0xff] %v61_v9  ;;  %v103_v30 = vld [vmem:[%s18662_s3 + $0xf0] sm:$0xff]  ;;  %v105_v31 = vld [vmem:[%s18662_s3 + $0xf8] sm:$0xff]  ;;  %v107_v32 = vld [vmem:[%s18662_s3 + $0x100] sm:$0xff] }
   0xc   :  { %64 = vst [vmem:[#allocation2 + $0x290] sm:$0xff] %v63_v10  ;;  %v109_v33 = vld [vmem:[%s18662_s3 + $0x108] sm:$0xff]  ;;  %v111_v34 = vld [vmem:[%s18662_s3 + $0x110] sm:$0xff]  ;;  %v113_v35 = vld [vmem:[%s18662_s3 + $0x118] sm:$0xff] }
   0xd   :  { %66 = vst [vmem:[#allocation2 + $0x380] sm:$0xff] %v65_v11  ;;  %v115_v36 = vld [vmem:[%s18662_s3 + $0x120] sm:$0xff]  ;;  %v117_v37 = vld [vmem:[%s18662_s3 + $0x128] sm:$0xff]  ;;  %v119_v38 = vld [vmem:[%s18662_s3 + $0x130] sm:$0xff] }
   0xe   :  { %68 = vst [vmem:[#allocation2 + $0x48] sm:$0xff] %v67_v12  ;;  %v121_v39 = vld [vmem:[%s18662_s3 + $0x138] sm:$0xff]  ;;  %v123_v40 = vld [vmem:[%s18662_s3 + $0x140] sm:$0xff]  ;;  %v125_v41 = vld [vmem:[%s18662_s3 + $0x148] sm:$0xff] }
   0xf   :  { %70 = vst [vmem:[#allocation2 + $0xc0] sm:$0xff] %v69_v13  ;;  %v127_v42 = vld [vmem:[%s18662_s3 + $0x150] sm:$0xff]  ;;  %v129_v43 = vld [vmem:[%s18662_s3 + $0x158] sm:$0xff]  ;;  %v131_v44 = vld [vmem:[%s18662_s3 + $0x160] sm:$0xff] }
  0x10   :  { %72 = vst [vmem:[#allocation2 + $0x30] sm:$0xff] %v71_v14  ;;  %v133_v45 = vld [vmem:[%s18662_s3 + $0x168] sm:$0xff]  ;;  %v135_v46 = vld [vmem:[%s18662_s3 + $0x170] sm:$0xff]  ;;  %v137_v47 = vld [vmem:[%s18662_s3 + $0x178] sm:$0xff] }
  0x11   :  { %74 = vst [vmem:[#allocation2 + $0x148] sm:$0xff] %v73_v15  ;;  %v139_v48 = vld [vmem:[%s18662_s3 + $0x180] sm:$0xff]  ;;  %v141_v49 = vld [vmem:[%s18662_s3 + $0x188] sm:$0xff]  ;;  %v143_v50 = vld [vmem:[%s18662_s3 + $0x190] sm:$0xff] }
  0x12   :  { %76 = vst [vmem:[#allocation2 + $0x208] sm:$0xff] %v75_v16  ;;  %v145_v51 = vld [vmem:[%s18662_s3 + $0x198] sm:$0xff]  ;;  %v147_v52 = vld [vmem:[%s18662_s3 + $0x1a0] sm:$0xff]  ;;  %v149_v53 = vld [vmem:[%s18662_s3 + $0x1a8] sm:$0xff] }
  0x13   :  { %78 = vst [vmem:[#allocation2 + $0x88] sm:$0xff] %v77_v17  ;;  %v151_v54 = vld [vmem:[%s18662_s3 + $0x1b0] sm:$0xff]  ;;  %v153_v55 = vld [vmem:[%s18662_s3 + $0x1b8] sm:$0xff]  ;;  %v155_v56 = vld [vmem:[%s18662_s3 + $0x1c0] sm:$0xff] }
  0x14   :  { %80 = vst [vmem:[#allocation2 + $0x348] sm:$0xff] %v79_v18  ;;  %v157_v57 = vld [vmem:[%s18662_s3 + $0x1c8] sm:$0xff]  ;;  %v159_v58 = vld [vmem:[%s18662_s3 + $0x1d0] sm:$0xff]  ;;  %v161_v59 = vld [vmem:[%s18662_s3 + $0x1d8] sm:$0xff] }
  0x15   :  { %82 = vst [vmem:[#allocation2 + $0xe0] sm:$0xff] %v81_v19  ;;  %v163_v60 = vld [vmem:[%s18662_s3 + $0x1e0] sm:$0xff]  ;;  %v165_v61 = vld [vmem:[%s18662_s3 + $0x1e8] sm:$0xff]  ;;  %v167_v62 = vld [vmem:[%s18662_s3 + $0x1f0] sm:$0xff] }
  0x16   :  { %84 = vst [vmem:[#allocation2 + $0x368] sm:$0xff] %v83_v20  ;;  %v169_v63 = vld [vmem:[%s18662_s3 + $0x1f8] sm:$0xff]  ;;  %v171_v0 = vld [vmem:[%s18662_s3 + $0x200] sm:$0xff]  ;;  %v173_v1 = vld [vmem:[%s18662_s3 + $0x208] sm:$0xff] }
  0x17   :  { %86 = vst [vmem:[#allocation2 + $0x3e0] sm:$0xff] %v85_v21  ;;  %v175_v2 = vld [vmem:[%s18662_s3 + $0x210] sm:$0xff]  ;;  %v177_v3 = vld [vmem:[%s18662_s3 + $0x218] sm:$0xff]  ;;  %v179_v4 = vld [vmem:[%s18662_s3 + $0x220] sm:$0xff] }
  0x18   :  { %88 = vst [vmem:[#allocation2 + $0x1a8] sm:$0xff] %v87_v22  ;;  %v181_v5 = vld [vmem:[%s18662_s3 + $0x228] sm:$0xff]  ;;  %v183_v6 = vld [vmem:[%s18662_s3 + $0x230] sm:$0xff]  ;;  %v185_v7 = vld [vmem:[%s18662_s3 + $0x238] sm:$0xff] }
  0x19   :  { %90 = vst [vmem:[#allocation2 + $0x450] sm:$0xff] %v89_v23  ;;  %v187_v8 = vld [vmem:[%s18662_s3 + $0x240] sm:$0xff]  ;;  %v189_v9 = vld [vmem:[%s18662_s3 + $0x248] sm:$0xff]  ;;  %v191_v10 = vld [vmem:[%s18662_s3 + $0x250] sm:$0xff] }
  0x1a   :  { %92 = vst [vmem:[#allocation2 + $0x420] sm:$0xff] %v91_v24  ;;  %v193_v11 = vld [vmem:[%s18662_s3 + $0x258] sm:$0xff]  ;;  %v195_v12 = vld [vmem:[%s18662_s3 + $0x260] sm:$0xff]  ;;  %v197_v13 = vld [vmem:[%s18662_s3 + $0x268] sm:$0xff] }
  0x1b   :  { %94 = vst [vmem:[#allocation2 + $0x398] sm:$0xff] %v93_v25  ;;  %v199_v14 = vld [vmem:[%s18662_s3 + $0x270] sm:$0xff]  ;;  %v201_v15 = vld [vmem:[%s18662_s3 + $0x278] sm:$0xff]  ;;  %v203_v16 = vld [vmem:[%s18662_s3 + $0x280] sm:$0xff] }
  0x1c   :  { %96 = vst [vmem:[#allocation2 + $0x350] sm:$0xff] %v95_v26  ;;  %v205_v17 = vld [vmem:[%s18662_s3 + $0x288] sm:$0xff]  ;;  %v207_v18 = vld [vmem:[%s18662_s3 + $0x290] sm:$0xff]  ;;  %v209_v19 = vld [vmem:[%s18662_s3 + $0x298] sm:$0xff] }
  0x1d   :  { %98 = vst [vmem:[#allocation2 + $0xc8] sm:$0xff] %v97_v27  ;;  %v211_v20 = vld [vmem:[%s18662_s3 + $0x2a0] sm:$0xff]  ;;  %v213_v21 = vld [vmem:[%s18662_s3 + $0x2a8] sm:$0xff]  ;;  %v215_v22 = vld [vmem:[%s18662_s3 + $0x2b0] sm:$0xff] }
  0x1e   :  { %100 = vst [vmem:[#allocation2 + $0x240] sm:$0xff] %v99_v28  ;;  %v217_v23 = vld [vmem:[%s18662_s3 + $0x2b8] sm:$0xff]  ;;  %v219_v24 = vld [vmem:[%s18662_s3 + $0x2c0] sm:$0xff]  ;;  %v221_v25 = vld [vmem:[%s18662_s3 + $0x2c8] sm:$0xff] }
  0x1f   :  { %102 = vst [vmem:[#allocation2 + $0x390] sm:$0xff] %v101_v29  ;;  %v223_v26 = vld [vmem:[%s18662_s3 + $0x2d0] sm:$0xff]  ;;  %v225_v27 = vld [vmem:[%s18662_s3 + $0x2d8] sm:$0xff]  ;;  %v227_v28 = vld [vmem:[%s18662_s3 + $0x2e0] sm:$0xff] }
  0x20   :  { %104 = vst [vmem:[#allocation2 + $0x458] sm:$0xff] %v103_v30  ;;  %v229_v29 = vld [vmem:[%s18662_s3 + $0x2e8] sm:$0xff]  ;;  %v231_v30 = vld [vmem:[%s18662_s3 + $0x2f0] sm:$0xff] }
  0x21   :  { %106 = vst [vmem:[#allocation2 + $0x68] sm:$0xff] %v105_v31  ;;  %v233_v31 = vld [vmem:[%s18662_s3 + $0x2f8] sm:$0xff] }
  0x22   :  { %108 = vst [vmem:[#allocation2 + $0x470] sm:$0xff] %v107_v32  ;;  %v235_v32 = vld [vmem:[%s18662_s3 + $0x300] sm:$0xff] }
  0x23   :  { %110 = vst [vmem:[#allocation2 + $0x298] sm:$0xff] %v109_v33  ;;  %v237_v33 = vld [vmem:[%s18662_s3 + $0x308] sm:$0xff] }
  0x24   :  { %112 = vst [vmem:[#allocation2 + $0x278] sm:$0xff] %v111_v34  ;;  %v239_v34 = vld [vmem:[%s18662_s3 + $0x310] sm:$0xff] }
  0x25   :  { %114 = vst [vmem:[#allocation2 + $0x170] sm:$0xff] %v113_v35  ;;  %v241_v35 = vld [vmem:[%s18662_s3 + $0x318] sm:$0xff] }
  0x26   :  { %116 = vst [vmem:[#allocation2 + $0x198] sm:$0xff] %v115_v36  ;;  %v243_v36 = vld [vmem:[%s18662_s3 + $0x320] sm:$0xff] }
  0x27   :  { %118 = vst [vmem:[#allocation2 + $0xb0] sm:$0xff] %v117_v37  ;;  %v245_v37 = vld [vmem:[%s18662_s3 + $0x328] sm:$0xff] }
  0x28   :  { %120 = vst [vmem:[#allocation2 + $0x20] sm:$0xff] %v119_v38  ;;  %v247_v38 = vld [vmem:[%s18662_s3 + $0x330] sm:$0xff] }
  0x29   :  { %122 = vst [vmem:[#allocation2 + $0x1e8] sm:$0xff] %v121_v39  ;;  %v249_v39 = vld [vmem:[%s18662_s3 + $0x338] sm:$0xff] }
  0x2a   :  { %124 = vst [vmem:[#allocation2 + $0x1f8] sm:$0xff] %v123_v40  ;;  %v251_v40 = vld [vmem:[%s18662_s3 + $0x340] sm:$0xff] }
  0x2b   :  { %126 = vst [vmem:[#allocation2 + $0x60] sm:$0xff] %v125_v41  ;;  %v253_v41 = vld [vmem:[%s18662_s3 + $0x348] sm:$0xff] }
  0x2c   :  { %128 = vst [vmem:[#allocation2 + $0x3c8] sm:$0xff] %v127_v42  ;;  %v255_v42 = vld [vmem:[%s18662_s3 + $0x350] sm:$0xff] }
  0x2d   :  { %130 = vst [vmem:[#allocation2 + $0x18] sm:$0xff] %v129_v43  ;;  %v257_v43 = vld [vmem:[%s18662_s3 + $0x358] sm:$0xff] }
  0x2e   :  { %132 = vst [vmem:[#allocation2 + $0xa0] sm:$0xff] %v131_v44  ;;  %v259_v44 = vld [vmem:[%s18662_s3 + $0x360] sm:$0xff] }
  0x2f   :  { %134 = vst [vmem:[#allocation2 + $0x1d0] sm:$0xff] %v133_v45  ;;  %v261_v45 = vld [vmem:[%s18662_s3 + $0x368] sm:$0xff] }
  0x30   :  { %136 = vst [vmem:[#allocation2 + $0x258] sm:$0xff] %v135_v46  ;;  %v263_v46 = vld [vmem:[%s18662_s3 + $0x370] sm:$0xff] }
  0x31   :  { %138 = vst [vmem:[#allocation2 + $0xd0] sm:$0xff] %v137_v47  ;;  %v265_v47 = vld [vmem:[%s18662_s3 + $0x378] sm:$0xff] }
  0x32   :  { %140 = vst [vmem:[#allocation2 + $0x408] sm:$0xff] %v139_v48  ;;  %v267_v48 = vld [vmem:[%s18662_s3 + $0x380] sm:$0xff] }
  0x33   :  { %142 = vst [vmem:[#allocation2 + $0x2c0] sm:$0xff] %v141_v49  ;;  %v269_v49 = vld [vmem:[%s18662_s3 + $0x388] sm:$0xff] }
  0x34   :  { %144 = vst [vmem:[#allocation2 + $0x3f8] sm:$0xff] %v143_v50  ;;  %v271_v50 = vld [vmem:[%s18662_s3 + $0x390] sm:$0xff] }
  0x35   :  { %146 = vst [vmem:[#allocation2 + $0x3f0] sm:$0xff] %v145_v51  ;;  %v273_v51 = vld [vmem:[%s18662_s3 + $0x398] sm:$0xff] }
  0x36   :  { %148 = vst [vmem:[#allocation2 + $0x338] sm:$0xff] %v147_v52  ;;  %v275_v52 = vld [vmem:[%s18662_s3 + $0x3a0] sm:$0xff] }
  0x37   :  { %150 = vst [vmem:[#allocation2 + $0x248] sm:$0xff] %v149_v53  ;;  %v277_v53 = vld [vmem:[%s18662_s3 + $0x3a8] sm:$0xff] }
  0x38   :  { %152 = vst [vmem:[#allocation2 + $0x330] sm:$0xff] %v151_v54  ;;  %v279_v54 = vld [vmem:[%s18662_s3 + $0x3b0] sm:$0xff] }
  0x39   :  { %154 = vst [vmem:[#allocation2 + $0x220] sm:$0xff] %v153_v55  ;;  %v281_v55 = vld [vmem:[%s18662_s3 + $0x3b8] sm:$0xff] }
  0x3a   :  { %156 = vst [vmem:[#allocation2 + $0x1b8] sm:$0xff] %v155_v56  ;;  %v283_v56 = vld [vmem:[%s18662_s3 + $0x3c0] sm:$0xff] }
  0x3b   :  { %158 = vst [vmem:[#allocation2 + $0x310] sm:$0xff] %v157_v57  ;;  %v285_v57 = vld [vmem:[%s18662_s3 + $0x3c8] sm:$0xff] }
  0x3c   :  { %160 = vst [vmem:[#allocation2 + $0x280] sm:$0xff] %v159_v58  ;;  %v287_v58 = vld [vmem:[%s18662_s3 + $0x3d0] sm:$0xff] }
  0x3d   :  { %162 = vst [vmem:[#allocation2 + $0x288] sm:$0xff] %v161_v59  ;;  %v289_v59 = vld [vmem:[%s18662_s3 + $0x3d8] sm:$0xff] }
  0x3e   :  { %164 = vst [vmem:[#allocation2 + $0x2e8] sm:$0xff] %v163_v60  ;;  %v291_v60 = vld [vmem:[%s18662_s3 + $0x3e0] sm:$0xff] }
  0x3f   :  { %166 = vst [vmem:[#allocation2 + $0x120] sm:$0xff] %v165_v61  ;;  %v293_v61 = vld [vmem:[%s18662_s3 + $0x3e8] sm:$0xff] }
  0x40   :  { %168 = vst [vmem:[#allocation2 + $0x2c8] sm:$0xff] %v167_v62  ;;  %v295_v62 = vld [vmem:[%s18662_s3 + $0x3f0] sm:$0xff] }
  0x41   :  { %170 = vst [vmem:[#allocation2 + $0x3c0] sm:$0xff] %v169_v63  ;;  %v297_v63 = vld [vmem:[%s18662_s3 + $0x3f8] sm:$0xff] }
  0x42   :  { %172 = vst [vmem:[#allocation2 + $0x418] sm:$0xff] %v171_v0  ;;  %v299_v0 = vld [vmem:[%s18662_s3 + $0x400] sm:$0xff] }
  0x43   :  { %174 = vst [vmem:[#allocation2 + $0x70] sm:$0xff] %v173_v1  ;;  %v301_v1 = vld [vmem:[%s18662_s3 + $0x408] sm:$0xff] }
  0x44   :  { %176 = vst [vmem:[#allocation2 + $0x270] sm:$0xff] %v175_v2  ;;  %v303_v2 = vld [vmem:[%s18662_s3 + $0x410] sm:$0xff] }
  0x45   :  { %178 = vst [vmem:[#allocation2 + $0x200] sm:$0xff] %v177_v3  ;;  %v305_v3 = vld [vmem:[%s18662_s3 + $0x418] sm:$0xff] }
  0x46   :  { %180 = vst [vmem:[#allocation2 + $0x1a0] sm:$0xff] %v179_v4  ;;  %v307_v4 = vld [vmem:[%s18662_s3 + $0x420] sm:$0xff] }
  0x47   :  { %182 = vst [vmem:[#allocation2 + $0x140] sm:$0xff] %v181_v5  ;;  %v309_v5 = vld [vmem:[%s18662_s3 + $0x428] sm:$0xff] }
  0x48   :  { %184 = vst [vmem:[#allocation2 + $0x3a0] sm:$0xff] %v183_v6  ;;  %v311_v6 = vld [vmem:[%s18662_s3 + $0x430] sm:$0xff] }
  0x49   :  { %186 = vst [vmem:[#allocation2 + $0xf8] sm:$0xff] %v185_v7  ;;  %v313_v7 = vld [vmem:[%s18662_s3 + $0x438] sm:$0xff] }
  0x4a   :  { %188 = vst [vmem:[#allocation2 + $0x128] sm:$0xff] %v187_v8  ;;  %v315_v8 = vld [vmem:[%s18662_s3 + $0x440] sm:$0xff] }
  0x4b   :  { %190 = vst [vmem:[#allocation2 + $0x160] sm:$0xff] %v189_v9  ;;  %v317_v9 = vld [vmem:[%s18662_s3 + $0x448] sm:$0xff] }
  0x4c   :  { %192 = vst [vmem:[#allocation2 + $0x2a8] sm:$0xff] %v191_v10  ;;  %v319_v10 = vld [vmem:[%s18662_s3 + $0x450] sm:$0xff] }
  0x4d   :  { %194 = vst [vmem:[#allocation2 + $0x130] sm:$0xff] %v193_v11  ;;  %v321_v11 = vld [vmem:[%s18662_s3 + $0x458] sm:$0xff] }
  0x4e   :  { %196 = vst [vmem:[#allocation2 + $0x318] sm:$0xff] %v195_v12  ;;  %v323_v12 = vld [vmem:[%s18662_s3 + $0x460] sm:$0xff] }
  0x4f   :  { %198 = vst [vmem:[#allocation2 + $0x268] sm:$0xff] %v197_v13  ;;  %v325_v13 = vld [vmem:[%s18662_s3 + $0x468] sm:$0xff] }
  0x50   :  { %200 = vst [vmem:[#allocation2 + $0x228] sm:$0xff] %v199_v14  ;;  %v327_v14 = vld [vmem:[%s18662_s3 + $0x470] sm:$0xff] }
  0x51   :  { %202 = vst [vmem:[#allocation2 + $0x410] sm:$0xff] %v201_v15  ;;  %v329_v15 = vld [vmem:[%s18662_s3 + $0x478] sm:$0xff] }
  0x52   :  { %204 = vst [vmem:[#allocation2 + $0x210] sm:$0xff] %v203_v16 }
  0x53   :  { %206 = vst [vmem:[#allocation2 + $0x1c0] sm:$0xff] %v205_v17 }
  0x54   :  { %208 = vst [vmem:[#allocation2 + $0x358] sm:$0xff] %v207_v18 }
  0x55   :  { %210 = vst [vmem:[#allocation2 + $0x8] sm:$0xff] %v209_v19 }
  0x56   :  { %212 = vst [vmem:[#allocation2 + $0x400] sm:$0xff] %v211_v20 }
  0x57   :  { %214 = vst [vmem:[#allocation2 + $0x1b0] sm:$0xff] %v213_v21 }
  0x58   :  { %216 = vst [vmem:[#allocation2 + $0x328] sm:$0xff] %v215_v22 }
  0x59   :  { %218 = vst [vmem:[#allocation2 + $0x230] sm:$0xff] %v217_v23 }
  0x5a   :  { %220 = vst [vmem:[#allocation2 + $0xb8] sm:$0xff] %v219_v24 }
  0x5b   :  { %222 = vst [vmem:[#allocation2 + $0x468] sm:$0xff] %v221_v25 }
  0x5c   :  { %224 = vst [vmem:[#allocation2 + $0x2d0] sm:$0xff] %v223_v26 }
  0x5d   :  { %226 = vst [vmem:[#allocation2 + $0x78] sm:$0xff] %v225_v27 }
  0x5e   :  { %228 = vst [vmem:[#allocation2 + $0x2f8] sm:$0xff] %v227_v28 }
  0x5f   :  { %230 = vst [vmem:[#allocation2 + $0x218] sm:$0xff] %v229_v29 }
  0x60   :  { %232 = vst [vmem:[#allocation2 + $0x1f0] sm:$0xff] %v231_v30 }
  0x61   :  { %234 = vst [vmem:[#allocation2 + $0x178] sm:$0xff] %v233_v31 }
  0x62   :  { %236 = vst [vmem:[#allocation2 + $0x110] sm:$0xff] %v235_v32 }
  0x63   :  { %238 = vst [vmem:[#allocation2 + $0x460] sm:$0xff] %v237_v33 }
  0x64   :  { %240 = vst [vmem:[#allocation2 + $0x2a0] sm:$0xff] %v239_v34 }
  0x65   :  { %242 = vst [vmem:[#allocation2 + $0x3d8] sm:$0xff] %v241_v35 }
  0x66   :  { %244 = vst [vmem:[#allocation2 + $0xa8] sm:$0xff] %v243_v36 }
  0x67   :  { %246 = vst [vmem:[#allocation2 + $0x1d8] sm:$0xff] %v245_v37 }
  0x68   :  { %248 = vst [vmem:[#allocation2 + $0x118] sm:$0xff] %v247_v38 }
  0x69   :  { %250 = vst [vmem:[#allocation2] sm:$0xff] %v249_v39 }
  0x6a   :  { %252 = vst [vmem:[#allocation2 + $0x478] sm:$0xff] %v251_v40 }
  0x6b   :  { %254 = vst [vmem:[#allocation2 + $0x138] sm:$0xff] %v253_v41 }
  0x6c   :  { %256 = vst [vmem:[#allocation2 + $0xd8] sm:$0xff] %v255_v42 }
  0x6d   :  { %258 = vst [vmem:[#allocation2 + $0x2d8] sm:$0xff] %v257_v43 }
  0x6e   :  { %260 = vst [vmem:[#allocation2 + $0x260] sm:$0xff] %v259_v44 }
  0x6f   :  { %262 = vst [vmem:[#allocation2 + $0x3b8] sm:$0xff] %v261_v45 }
  0x70   :  { %264 = vst [vmem:[#allocation2 + $0x180] sm:$0xff] %v263_v46 }
  0x71   :  { %266 = vst [vmem:[#allocation2 + $0x28] sm:$0xff] %v265_v47 }
  0x72   :  { %268 = vst [vmem:[#allocation2 + $0x108] sm:$0xff] %v267_v48 }
  0x73   :  { %270 = vst [vmem:[#allocation2 + $0x378] sm:$0xff] %v269_v49 }
  0x74   :  { %272 = vst [vmem:[#allocation2 + $0x440] sm:$0xff] %v271_v50 }
  0x75   :  { %274 = vst [vmem:[#allocation2 + $0x158] sm:$0xff] %v273_v51 }
  0x76   :  { %276 = vst [vmem:[#allocation2 + $0x360] sm:$0xff] %v275_v52 }
  0x77   :  { %278 = vst [vmem:[#allocation2 + $0x50] sm:$0xff] %v277_v53 }
  0x78   :  { %280 = vst [vmem:[#allocation2 + $0x308] sm:$0xff] %v279_v54 }
  0x79   :  { %282 = vst [vmem:[#allocation2 + $0x340] sm:$0xff] %v281_v55 }
  0x7a   :  { %284 = vst [vmem:[#allocation2 + $0x2e0] sm:$0xff] %v283_v56 }
  0x7b   :  { %286 = vst [vmem:[#allocation2 + $0x3e8] sm:$0xff] %v285_v57 }
  0x7c   :  { %288 = vst [vmem:[#allocation2 + $0x250] sm:$0xff] %v287_v58 }
  0x7d   :  { %290 = vst [vmem:[#allocation2 + $0x1c8] sm:$0xff] %v289_v59 }
  0x7e   :  { %292 = vst [vmem:[#allocation2 + $0x190] sm:$0xff] %v291_v60 }
  0x7f   :  { %294 = vst [vmem:[#allocation2 + $0x3d0] sm:$0xff] %v293_v61 }
  0x80   :  { %296 = vst [vmem:[#allocation2 + $0xe8] sm:$0xff] %v295_v62 }
  0x81   :  { %298 = vst [vmem:[#allocation2 + $0xf0] sm:$0xff] %v297_v63 }
  0x82   :  { %300 = vst [vmem:[#allocation2 + $0x168] sm:$0xff] %v299_v0 }
  0x83   :  { %302 = vst [vmem:[#allocation2 + $0x90] sm:$0xff] %v301_v1 }
  0x84   :  { %304 = vst [vmem:[#allocation2 + $0x1e0] sm:$0xff] %v303_v2 }
  0x85   :  { %306 = vst [vmem:[#allocation2 + $0x38] sm:$0xff] %v305_v3 }
  0x86   :  { %308 = vst [vmem:[#allocation2 + $0x388] sm:$0xff] %v307_v4 }
  0x87   :  { %310 = vst [vmem:[#allocation2 + $0x430] sm:$0xff] %v309_v5 }
  0x88   :  { %312 = vst [vmem:[#allocation2 + $0x80] sm:$0xff] %v311_v6 }
  0x89   :  { %314 = vst [vmem:[#allocation2 + $0x428] sm:$0xff] %v313_v7 }
  0x8a   :  { %316 = vst [vmem:[#allocation2 + $0x238] sm:$0xff] %v315_v8 }
  0x8b   :  { %318 = vst [vmem:[#allocation2 + $0x2b8] sm:$0xff] %v317_v9 }
  0x8c   :  { %320 = vst [vmem:[#allocation2 + $0x40] sm:$0xff] %v319_v10 }
  0x8d   :  { %322 = vst [vmem:[#allocation2 + $0x150] sm:$0xff] %v321_v11 }
  0x8e   :  { %324 = vst [vmem:[#allocation2 + $0x3a8] sm:$0xff] %v323_v12 }
  0x8f   :  { %326 = vst [vmem:[#allocation2 + $0x98] sm:$0xff] %v325_v13 }
  0x90   :  { %328 = vst [vmem:[#allocation2 + $0x58] sm:$0xff] %v327_v14 }
  0x91   :  { %330 = vst [vmem:[#allocation2 + $0x188] sm:$0xff] %v329_v15 }
  0x92   :  { %336 = vsyncadd [#allocation5], 18432  ;;  %v348_v16 = vld [vmem:[%s18665_s6] sm:$0xff]  ;;  %v350_v17 = vld [vmem:[%s18665_s6 + $0x8] sm:$0xff] }
  0x93   :  { %349 = vst [vmem:[#allocation3 + $0x58] sm:$0xff] %v348_v16  ;;  %v352_v18 = vld [vmem:[%s18665_s6 + $0x10] sm:$0xff]  ;;  %v354_v19 = vld [vmem:[%s18665_s6 + $0x18] sm:$0xff]  ;;  %v356_v20 = vld [vmem:[%s18665_s6 + $0x20] sm:$0xff] }
  0x94   :  { %351 = vst [vmem:[#allocation3 + $0x488] sm:$0xff] %v350_v17  ;;  %v358_v21 = vld [vmem:[%s18665_s6 + $0x28] sm:$0xff]  ;;  %v360_v22 = vld [vmem:[%s18665_s6 + $0x30] sm:$0xff]  ;;  %v362_v23 = vld [vmem:[%s18665_s6 + $0x38] sm:$0xff] }
  0x95   :  { %353 = vst [vmem:[#allocation3 + $0x88] sm:$0xff] %v352_v18  ;;  %v364_v24 = vld [vmem:[%s18665_s6 + $0x40] sm:$0xff]  ;;  %v366_v25 = vld [vmem:[%s18665_s6 + $0x48] sm:$0xff]  ;;  %v368_v26 = vld [vmem:[%s18665_s6 + $0x50] sm:$0xff] }
  0x96   :  { %355 = vst [vmem:[#allocation3 + $0x298] sm:$0xff] %v354_v19  ;;  %v370_v27 = vld [vmem:[%s18665_s6 + $0x58] sm:$0xff]  ;;  %v372_v28 = vld [vmem:[%s18665_s6 + $0x60] sm:$0xff]  ;;  %v374_v29 = vld [vmem:[%s18665_s6 + $0x68] sm:$0xff] }
  0x97   :  { %357 = vst [vmem:[#allocation3 + $0x2f0] sm:$0xff] %v356_v20  ;;  %v376_v30 = vld [vmem:[%s18665_s6 + $0x70] sm:$0xff]  ;;  %v378_v31 = vld [vmem:[%s18665_s6 + $0x78] sm:$0xff]  ;;  %v380_v32 = vld [vmem:[%s18665_s6 + $0x80] sm:$0xff] }
  0x98   :  { %359 = vst [vmem:[#allocation3 + $0x218] sm:$0xff] %v358_v21  ;;  %v382_v33 = vld [vmem:[%s18665_s6 + $0x88] sm:$0xff]  ;;  %v384_v34 = vld [vmem:[%s18665_s6 + $0x90] sm:$0xff]  ;;  %v386_v35 = vld [vmem:[%s18665_s6 + $0x98] sm:$0xff] }
  0x99   :  { %361 = vst [vmem:[#allocation3 + $0x5d8] sm:$0xff] %v360_v22  ;;  %v388_v36 = vld [vmem:[%s18665_s6 + $0xa0] sm:$0xff]  ;;  %v390_v37 = vld [vmem:[%s18665_s6 + $0xa8] sm:$0xff]  ;;  %v392_v38 = vld [vmem:[%s18665_s6 + $0xb0] sm:$0xff] }
  0x9a   :  { %363 = vst [vmem:[#allocation3 + $0x4a0] sm:$0xff] %v362_v23  ;;  %v394_v39 = vld [vmem:[%s18665_s6 + $0xb8] sm:$0xff]  ;;  %v396_v40 = vld [vmem:[%s18665_s6 + $0xc0] sm:$0xff]  ;;  %v398_v41 = vld [vmem:[%s18665_s6 + $0xc8] sm:$0xff] }
  0x9b   :  { %365 = vst [vmem:[#allocation3 + $0xd8] sm:$0xff] %v364_v24  ;;  %v400_v42 = vld [vmem:[%s18665_s6 + $0xd0] sm:$0xff]  ;;  %v402_v43 = vld [vmem:[%s18665_s6 + $0xd8] sm:$0xff]  ;;  %v404_v44 = vld [vmem:[%s18665_s6 + $0xe0] sm:$0xff] }
  0x9c   :  { %367 = vst [vmem:[#allocation3 + $0x1a8] sm:$0xff] %v366_v25  ;;  %v406_v45 = vld [vmem:[%s18665_s6 + $0xe8] sm:$0xff]  ;;  %v408_v46 = vld [vmem:[%s18665_s6 + $0xf0] sm:$0xff]  ;;  %v410_v47 = vld [vmem:[%s18665_s6 + $0xf8] sm:$0xff] }
  0x9d   :  { %369 = vst [vmem:[#allocation3 + $0x480] sm:$0xff] %v368_v26  ;;  %v412_v48 = vld [vmem:[%s18665_s6 + $0x100] sm:$0xff]  ;;  %v414_v49 = vld [vmem:[%s18665_s6 + $0x108] sm:$0xff]  ;;  %v416_v50 = vld [vmem:[%s18665_s6 + $0x110] sm:$0xff] }
  0x9e   :  { %371 = vst [vmem:[#allocation3 + $0xa8] sm:$0xff] %v370_v27  ;;  %v418_v51 = vld [vmem:[%s18665_s6 + $0x118] sm:$0xff]  ;;  %v420_v52 = vld [vmem:[%s18665_s6 + $0x120] sm:$0xff]  ;;  %v422_v53 = vld [vmem:[%s18665_s6 + $0x128] sm:$0xff] }
  0x9f   :  { %373 = vst [vmem:[#allocation3 + $0x180] sm:$0xff] %v372_v28  ;;  %v424_v54 = vld [vmem:[%s18665_s6 + $0x130] sm:$0xff]  ;;  %v426_v55 = vld [vmem:[%s18665_s6 + $0x138] sm:$0xff]  ;;  %v428_v56 = vld [vmem:[%s18665_s6 + $0x140] sm:$0xff] }
  0xa0   :  { %375 = vst [vmem:[#allocation3 + $0x50] sm:$0xff] %v374_v29  ;;  %v430_v57 = vld [vmem:[%s18665_s6 + $0x148] sm:$0xff]  ;;  %v432_v58 = vld [vmem:[%s18665_s6 + $0x150] sm:$0xff]  ;;  %v434_v59 = vld [vmem:[%s18665_s6 + $0x158] sm:$0xff] }
  0xa1   :  { %377 = vst [vmem:[#allocation3 + $0x348] sm:$0xff] %v376_v30  ;;  %v436_v60 = vld [vmem:[%s18665_s6 + $0x160] sm:$0xff]  ;;  %v438_v61 = vld [vmem:[%s18665_s6 + $0x168] sm:$0xff]  ;;  %v440_v62 = vld [vmem:[%s18665_s6 + $0x170] sm:$0xff] }
  0xa2   :  { %379 = vst [vmem:[#allocation3 + $0x420] sm:$0xff] %v378_v31  ;;  %v442_v63 = vld [vmem:[%s18665_s6 + $0x178] sm:$0xff]  ;;  %v444_v0 = vld [vmem:[%s18665_s6 + $0x180] sm:$0xff]  ;;  %v446_v1 = vld [vmem:[%s18665_s6 + $0x188] sm:$0xff] }
  0xa3   :  { %381 = vst [vmem:[#allocation3 + $0x40] sm:$0xff] %v380_v32  ;;  %v448_v2 = vld [vmem:[%s18665_s6 + $0x190] sm:$0xff]  ;;  %v450_v3 = vld [vmem:[%s18665_s6 + $0x198] sm:$0xff]  ;;  %v452_v4 = vld [vmem:[%s18665_s6 + $0x1a0] sm:$0xff] }
  0xa4   :  { %383 = vst [vmem:[#allocation3 + $0x538] sm:$0xff] %v382_v33  ;;  %v454_v5 = vld [vmem:[%s18665_s6 + $0x1a8] sm:$0xff]  ;;  %v456_v6 = vld [vmem:[%s18665_s6 + $0x1b0] sm:$0xff]  ;;  %v458_v7 = vld [vmem:[%s18665_s6 + $0x1b8] sm:$0xff] }
  0xa5   :  { %385 = vst [vmem:[#allocation3 + $0x608] sm:$0xff] %v384_v34  ;;  %v460_v8 = vld [vmem:[%s18665_s6 + $0x1c0] sm:$0xff]  ;;  %v462_v9 = vld [vmem:[%s18665_s6 + $0x1c8] sm:$0xff]  ;;  %v464_v10 = vld [vmem:[%s18665_s6 + $0x1d0] sm:$0xff] }
  0xa6   :  { %387 = vst [vmem:[#allocation3 + $0x3d8] sm:$0xff] %v386_v35  ;;  %v466_v11 = vld [vmem:[%s18665_s6 + $0x1d8] sm:$0xff]  ;;  %v468_v12 = vld [vmem:[%s18665_s6 + $0x1e0] sm:$0xff]  ;;  %v470_v13 = vld [vmem:[%s18665_s6 + $0x1e8] sm:$0xff] }
  0xa7   :  { %389 = vst [vmem:[#allocation3 + $0x1b0] sm:$0xff] %v388_v36  ;;  %v472_v14 = vld [vmem:[%s18665_s6 + $0x1f0] sm:$0xff]  ;;  %v474_v15 = vld [vmem:[%s18665_s6 + $0x1f8] sm:$0xff]  ;;  %v476_v16 = vld [vmem:[%s18665_s6 + $0x200] sm:$0xff] }
  0xa8   :  { %391 = vst [vmem:[#allocation3 + $0x8] sm:$0xff] %v390_v37  ;;  %v478_v17 = vld [vmem:[%s18665_s6 + $0x208] sm:$0xff]  ;;  %v480_v18 = vld [vmem:[%s18665_s6 + $0x210] sm:$0xff]  ;;  %v482_v19 = vld [vmem:[%s18665_s6 + $0x218] sm:$0xff] }
  0xa9   :  { %393 = vst [vmem:[#allocation3 + $0x5a8] sm:$0xff] %v392_v38  ;;  %v484_v20 = vld [vmem:[%s18665_s6 + $0x220] sm:$0xff]  ;;  %v486_v21 = vld [vmem:[%s18665_s6 + $0x228] sm:$0xff]  ;;  %v488_v22 = vld [vmem:[%s18665_s6 + $0x230] sm:$0xff] }
  0xaa   :  { %395 = vst [vmem:[#allocation3 + $0x150] sm:$0xff] %v394_v39  ;;  %v490_v23 = vld [vmem:[%s18665_s6 + $0x238] sm:$0xff]  ;;  %v492_v24 = vld [vmem:[%s18665_s6 + $0x240] sm:$0xff]  ;;  %v494_v25 = vld [vmem:[%s18665_s6 + $0x248] sm:$0xff] }
  0xab   :  { %397 = vst [vmem:[#allocation3 + $0x4b8] sm:$0xff] %v396_v40  ;;  %v496_v26 = vld [vmem:[%s18665_s6 + $0x250] sm:$0xff]  ;;  %v498_v27 = vld [vmem:[%s18665_s6 + $0x258] sm:$0xff]  ;;  %v500_v28 = vld [vmem:[%s18665_s6 + $0x260] sm:$0xff] }
  0xac   :  { %399 = vst [vmem:[#allocation3 + $0x240] sm:$0xff] %v398_v41  ;;  %v502_v29 = vld [vmem:[%s18665_s6 + $0x268] sm:$0xff]  ;;  %v504_v30 = vld [vmem:[%s18665_s6 + $0x270] sm:$0xff]  ;;  %v506_v31 = vld [vmem:[%s18665_s6 + $0x278] sm:$0xff] }
  0xad   :  { %401 = vst [vmem:[#allocation3 + $0x110] sm:$0xff] %v400_v42  ;;  %v508_v32 = vld [vmem:[%s18665_s6 + $0x280] sm:$0xff]  ;;  %v510_v33 = vld [vmem:[%s18665_s6 + $0x288] sm:$0xff]  ;;  %v512_v34 = vld [vmem:[%s18665_s6 + $0x290] sm:$0xff] }
  0xae   :  { %403 = vst [vmem:[#allocation3 + $0x3a8] sm:$0xff] %v402_v43  ;;  %v514_v35 = vld [vmem:[%s18665_s6 + $0x298] sm:$0xff]  ;;  %v516_v36 = vld [vmem:[%s18665_s6 + $0x2a0] sm:$0xff]  ;;  %v518_v37 = vld [vmem:[%s18665_s6 + $0x2a8] sm:$0xff] }
  0xaf   :  { %405 = vst [vmem:[#allocation3 + $0x540] sm:$0xff] %v404_v44  ;;  %v520_v38 = vld [vmem:[%s18665_s6 + $0x2b0] sm:$0xff]  ;;  %v522_v39 = vld [vmem:[%s18665_s6 + $0x2b8] sm:$0xff]  ;;  %v524_v40 = vld [vmem:[%s18665_s6 + $0x2c0] sm:$0xff] }
  0xb0   :  { %407 = vst [vmem:[#allocation3 + $0xe8] sm:$0xff] %v406_v45  ;;  %v526_v41 = vld [vmem:[%s18665_s6 + $0x2c8] sm:$0xff]  ;;  %v528_v42 = vld [vmem:[%s18665_s6 + $0x2d0] sm:$0xff]  ;;  %v530_v43 = vld [vmem:[%s18665_s6 + $0x2d8] sm:$0xff] }
  0xb1   :  { %409 = vst [vmem:[#allocation3 + $0x208] sm:$0xff] %v408_v46  ;;  %v532_v44 = vld [vmem:[%s18665_s6 + $0x2e0] sm:$0xff]  ;;  %v534_v45 = vld [vmem:[%s18665_s6 + $0x2e8] sm:$0xff]  ;;  %v536_v46 = vld [vmem:[%s18665_s6 + $0x2f0] sm:$0xff] }
  0xb2   :  { %411 = vst [vmem:[#allocation3 + $0x5c0] sm:$0xff] %v410_v47  ;;  %v538_v47 = vld [vmem:[%s18665_s6 + $0x2f8] sm:$0xff] }
  0xb3   :  { %413 = vst [vmem:[#allocation3 + $0x610] sm:$0xff] %v412_v48  ;;  %v540_v48 = vld [vmem:[%s18665_s6 + $0x300] sm:$0xff] }
  0xb4   :  { %415 = vst [vmem:[#allocation3 + $0x308] sm:$0xff] %v414_v49  ;;  %v542_v49 = vld [vmem:[%s18665_s6 + $0x308] sm:$0xff] }
  0xb5   :  { %417 = vst [vmem:[#allocation3 + $0x460] sm:$0xff] %v416_v50  ;;  %v544_v50 = vld [vmem:[%s18665_s6 + $0x310] sm:$0xff] }
  0xb6   :  { %419 = vst [vmem:[#allocation3 + $0x38] sm:$0xff] %v418_v51  ;;  %v546_v51 = vld [vmem:[%s18665_s6 + $0x318] sm:$0xff] }
  0xb7   :  { %421 = vst [vmem:[#allocation3 + $0x158] sm:$0xff] %v420_v52  ;;  %v548_v52 = vld [vmem:[%s18665_s6 + $0x320] sm:$0xff] }
  0xb8   :  { %423 = vst [vmem:[#allocation3 + $0x3c8] sm:$0xff] %v422_v53  ;;  %v550_v53 = vld [vmem:[%s18665_s6 + $0x328] sm:$0xff] }
  0xb9   :  { %425 = vst [vmem:[#allocation3 + $0x118] sm:$0xff] %v424_v54  ;;  %v552_v54 = vld [vmem:[%s18665_s6 + $0x330] sm:$0xff] }
  0xba   :  { %427 = vst [vmem:[#allocation3 + $0x188] sm:$0xff] %v426_v55  ;;  %v554_v55 = vld [vmem:[%s18665_s6 + $0x338] sm:$0xff] }
  0xbb   :  { %429 = vst [vmem:[#allocation3 + $0x518] sm:$0xff] %v428_v56  ;;  %v556_v56 = vld [vmem:[%s18665_s6 + $0x340] sm:$0xff] }
  0xbc   :  { %431 = vst [vmem:[#allocation3 + $0x1d8] sm:$0xff] %v430_v57  ;;  %v558_v57 = vld [vmem:[%s18665_s6 + $0x348] sm:$0xff] }
  0xbd   :  { %433 = vst [vmem:[#allocation3 + $0x410] sm:$0xff] %v432_v58  ;;  %v560_v58 = vld [vmem:[%s18665_s6 + $0x350] sm:$0xff] }
  0xbe   :  { %435 = vst [vmem:[#allocation3 + $0x3e8] sm:$0xff] %v434_v59  ;;  %v562_v59 = vld [vmem:[%s18665_s6 + $0x358] sm:$0xff] }
  0xbf   :  { %437 = vst [vmem:[#allocation3 + $0x4f0] sm:$0xff] %v436_v60  ;;  %v564_v60 = vld [vmem:[%s18665_s6 + $0x360] sm:$0xff] }
  0xc0   :  { %439 = vst [vmem:[#allocation3 + $0x368] sm:$0xff] %v438_v61  ;;  %v566_v61 = vld [vmem:[%s18665_s6 + $0x368] sm:$0xff] }
  0xc1   :  { %441 = vst [vmem:[#allocation3 + $0x418] sm:$0xff] %v440_v62  ;;  %v568_v62 = vld [vmem:[%s18665_s6 + $0x370] sm:$0xff] }
  0xc2   :  { %443 = vst [vmem:[#allocation3 + $0x428] sm:$0xff] %v442_v63  ;;  %v570_v63 = vld [vmem:[%s18665_s6 + $0x378] sm:$0xff] }
  0xc3   :  { %445 = vst [vmem:[#allocation3 + $0x638] sm:$0xff] %v444_v0  ;;  %v572_v0 = vld [vmem:[%s18665_s6 + $0x380] sm:$0xff] }
  0xc4   :  { %447 = vst [vmem:[#allocation3 + $0x360] sm:$0xff] %v446_v1  ;;  %v574_v1 = vld [vmem:[%s18665_s6 + $0x388] sm:$0xff] }
  0xc5   :  { %449 = vst [vmem:[#allocation3 + $0x5f0] sm:$0xff] %v448_v2  ;;  %v576_v2 = vld [vmem:[%s18665_s6 + $0x390] sm:$0xff] }
  0xc6   :  { %451 = vst [vmem:[#allocation3 + $0x290] sm:$0xff] %v450_v3  ;;  %v578_v3 = vld [vmem:[%s18665_s6 + $0x398] sm:$0xff] }
  0xc7   :  { %453 = vst [vmem:[#allocation3 + $0x168] sm:$0xff] %v452_v4  ;;  %v580_v4 = vld [vmem:[%s18665_s6 + $0x3a0] sm:$0xff] }
  0xc8   :  { %455 = vst [vmem:[#allocation3 + $0x30] sm:$0xff] %v454_v5  ;;  %v582_v5 = vld [vmem:[%s18665_s6 + $0x3a8] sm:$0xff] }
  0xc9   :  { %457 = vst [vmem:[#allocation3 + $0x228] sm:$0xff] %v456_v6  ;;  %v584_v6 = vld [vmem:[%s18665_s6 + $0x3b0] sm:$0xff] }
  0xca   :  { %459 = vst [vmem:[#allocation3 + $0x160] sm:$0xff] %v458_v7  ;;  %v586_v7 = vld [vmem:[%s18665_s6 + $0x3b8] sm:$0xff] }
  0xcb   :  { %461 = vst [vmem:[#allocation3 + $0x248] sm:$0xff] %v460_v8  ;;  %v588_v8 = vld [vmem:[%s18665_s6 + $0x3c0] sm:$0xff] }
  0xcc   :  { %463 = vst [vmem:[#allocation3 + $0x1a0] sm:$0xff] %v462_v9  ;;  %v590_v9 = vld [vmem:[%s18665_s6 + $0x3c8] sm:$0xff] }
  0xcd   :  { %465 = vst [vmem:[#allocation3 + $0x230] sm:$0xff] %v464_v10  ;;  %v592_v10 = vld [vmem:[%s18665_s6 + $0x3d0] sm:$0xff] }
  0xce   :  { %467 = vst [vmem:[#allocation3 + $0x490] sm:$0xff] %v466_v11  ;;  %v594_v11 = vld [vmem:[%s18665_s6 + $0x3d8] sm:$0xff] }
  0xcf   :  { %469 = vst [vmem:[#allocation3 + $0x450] sm:$0xff] %v468_v12  ;;  %v596_v12 = vld [vmem:[%s18665_s6 + $0x3e0] sm:$0xff] }
  0xd0   :  { %471 = vst [vmem:[#allocation3 + $0x568] sm:$0xff] %v470_v13  ;;  %v598_v13 = vld [vmem:[%s18665_s6 + $0x3e8] sm:$0xff] }
  0xd1   :  { %473 = vst [vmem:[#allocation3 + $0x370] sm:$0xff] %v472_v14  ;;  %v600_v14 = vld [vmem:[%s18665_s6 + $0x3f0] sm:$0xff] }
  0xd2   :  { %475 = vst [vmem:[#allocation3 + $0x80] sm:$0xff] %v474_v15  ;;  %v602_v15 = vld [vmem:[%s18665_s6 + $0x3f8] sm:$0xff] }
  0xd3   :  { %477 = vst [vmem:[#allocation3 + $0x5c8] sm:$0xff] %v476_v16  ;;  %v604_v16 = vld [vmem:[%s18665_s6 + $0x400] sm:$0xff] }
  0xd4   :  { %479 = vst [vmem:[#allocation3 + $0x430] sm:$0xff] %v478_v17  ;;  %v606_v17 = vld [vmem:[%s18665_s6 + $0x408] sm:$0xff] }
  0xd5   :  { %481 = vst [vmem:[#allocation3 + $0x138] sm:$0xff] %v480_v18  ;;  %v608_v18 = vld [vmem:[%s18665_s6 + $0x410] sm:$0xff] }
  0xd6   :  { %483 = vst [vmem:[#allocation3 + $0x220] sm:$0xff] %v482_v19  ;;  %v610_v19 = vld [vmem:[%s18665_s6 + $0x418] sm:$0xff] }
  0xd7   :  { %485 = vst [vmem:[#allocation3 + $0x5b0] sm:$0xff] %v484_v20  ;;  %v612_v20 = vld [vmem:[%s18665_s6 + $0x420] sm:$0xff] }
  0xd8   :  { %487 = vst [vmem:[#allocation3 + $0x2f8] sm:$0xff] %v486_v21  ;;  %v614_v21 = vld [vmem:[%s18665_s6 + $0x428] sm:$0xff] }
  0xd9   :  { %489 = vst [vmem:[#allocation3 + $0x5f8] sm:$0xff] %v488_v22  ;;  %v616_v22 = vld [vmem:[%s18665_s6 + $0x430] sm:$0xff] }
  0xda   :  { %491 = vst [vmem:[#allocation3 + $0x20] sm:$0xff] %v490_v23  ;;  %v618_v23 = vld [vmem:[%s18665_s6 + $0x438] sm:$0xff] }
  0xdb   :  { %493 = vst [vmem:[#allocation3 + $0x238] sm:$0xff] %v492_v24  ;;  %v620_v24 = vld [vmem:[%s18665_s6 + $0x440] sm:$0xff] }
  0xdc   :  { %495 = vst [vmem:[#allocation3 + $0x278] sm:$0xff] %v494_v25  ;;  %v622_v25 = vld [vmem:[%s18665_s6 + $0x448] sm:$0xff] }
  0xdd   :  { %497 = vst [vmem:[#allocation3 + $0x378] sm:$0xff] %v496_v26  ;;  %v624_v26 = vld [vmem:[%s18665_s6 + $0x450] sm:$0xff] }
  0xde   :  { %499 = vst [vmem:[#allocation3 + $0x570] sm:$0xff] %v498_v27  ;;  %v626_v27 = vld [vmem:[%s18665_s6 + $0x458] sm:$0xff] }
  0xdf   :  { %501 = vst [vmem:[#allocation3 + $0x1b8] sm:$0xff] %v500_v28  ;;  %v628_v28 = vld [vmem:[%s18665_s6 + $0x460] sm:$0xff] }
  0xe0   :  { %503 = vst [vmem:[#allocation3 + $0x288] sm:$0xff] %v502_v29  ;;  %v630_v29 = vld [vmem:[%s18665_s6 + $0x468] sm:$0xff] }
  0xe1   :  { %505 = vst [vmem:[#allocation3 + $0x318] sm:$0xff] %v504_v30  ;;  %v632_v30 = vld [vmem:[%s18665_s6 + $0x470] sm:$0xff] }
  0xe2   :  { %507 = vst [vmem:[#allocation3 + $0x530] sm:$0xff] %v506_v31  ;;  %v634_v31 = vld [vmem:[%s18665_s6 + $0x478] sm:$0xff] }
  0xe3   :  { %509 = vst [vmem:[#allocation3 + $0x448] sm:$0xff] %v508_v32  ;;  %v636_v32 = vld [vmem:[%s18665_s6 + $0x480] sm:$0xff] }
  0xe4   :  { %511 = vst [vmem:[#allocation3 + $0x398] sm:$0xff] %v510_v33  ;;  %v638_v33 = vld [vmem:[%s18665_s6 + $0x488] sm:$0xff] }
  0xe5   :  { %513 = vst [vmem:[#allocation3 + $0x630] sm:$0xff] %v512_v34  ;;  %v640_v34 = vld [vmem:[%s18665_s6 + $0x490] sm:$0xff] }
  0xe6   :  { %515 = vst [vmem:[#allocation3 + $0x4e8] sm:$0xff] %v514_v35  ;;  %v642_v35 = vld [vmem:[%s18665_s6 + $0x498] sm:$0xff] }
  0xe7   :  { %517 = vst [vmem:[#allocation3 + $0x60] sm:$0xff] %v516_v36  ;;  %v644_v36 = vld [vmem:[%s18665_s6 + $0x4a0] sm:$0xff] }
  0xe8   :  { %519 = vst [vmem:[#allocation3 + $0x268] sm:$0xff] %v518_v37  ;;  %v646_v37 = vld [vmem:[%s18665_s6 + $0x4a8] sm:$0xff] }
  0xe9   :  { %521 = vst [vmem:[#allocation3 + $0x500] sm:$0xff] %v520_v38  ;;  %v648_v38 = vld [vmem:[%s18665_s6 + $0x4b0] sm:$0xff] }
  0xea   :  { %523 = vst [vmem:[#allocation3 + $0x3e0] sm:$0xff] %v522_v39  ;;  %v650_v39 = vld [vmem:[%s18665_s6 + $0x4b8] sm:$0xff] }
  0xeb   :  { %525 = vst [vmem:[#allocation3 + $0x558] sm:$0xff] %v524_v40  ;;  %v652_v40 = vld [vmem:[%s18665_s6 + $0x4c0] sm:$0xff] }
  0xec   :  { %527 = vst [vmem:[#allocation3 + $0x260] sm:$0xff] %v526_v41  ;;  %v654_v41 = vld [vmem:[%s18665_s6 + $0x4c8] sm:$0xff] }
  0xed   :  { %529 = vst [vmem:[#allocation3 + $0x280] sm:$0xff] %v528_v42  ;;  %v656_v42 = vld [vmem:[%s18665_s6 + $0x4d0] sm:$0xff] }
  0xee   :  { %531 = vst [vmem:[#allocation3 + $0x3d0] sm:$0xff] %v530_v43  ;;  %v658_v43 = vld [vmem:[%s18665_s6 + $0x4d8] sm:$0xff] }
  0xef   :  { %533 = vst [vmem:[#allocation3 + $0x468] sm:$0xff] %v532_v44  ;;  %v660_v44 = vld [vmem:[%s18665_s6 + $0x4e0] sm:$0xff] }
  0xf0   :  { %535 = vst [vmem:[#allocation3 + $0x328] sm:$0xff] %v534_v45  ;;  %v662_v45 = vld [vmem:[%s18665_s6 + $0x4e8] sm:$0xff] }
  0xf1   :  { %537 = vst [vmem:[#allocation3 + $0x600] sm:$0xff] %v536_v46  ;;  %v664_v46 = vld [vmem:[%s18665_s6 + $0x4f0] sm:$0xff] }
  0xf2   :  { %539 = vst [vmem:[#allocation3 + $0x2e0] sm:$0xff] %v538_v47  ;;  %v666_v47 = vld [vmem:[%s18665_s6 + $0x4f8] sm:$0xff] }
  0xf3   :  { %541 = vst [vmem:[#allocation3 + $0x78] sm:$0xff] %v540_v48  ;;  %v668_v48 = vld [vmem:[%s18665_s6 + $0x500] sm:$0xff] }
  0xf4   :  { %543 = vst [vmem:[#allocation3 + $0x1d0] sm:$0xff] %v542_v49  ;;  %v670_v49 = vld [vmem:[%s18665_s6 + $0x508] sm:$0xff] }
  0xf5   :  { %545 = vst [vmem:[#allocation3 + $0x358] sm:$0xff] %v544_v50  ;;  %v672_v50 = vld [vmem:[%s18665_s6 + $0x510] sm:$0xff] }
  0xf6   :  { %547 = vst [vmem:[#allocation3 + $0x190] sm:$0xff] %v546_v51  ;;  %v674_v51 = vld [vmem:[%s18665_s6 + $0x518] sm:$0xff] }
  0xf7   :  { %549 = vst [vmem:[#allocation3 + $0x4d8] sm:$0xff] %v548_v52  ;;  %v676_v52 = vld [vmem:[%s18665_s6 + $0x520] sm:$0xff] }
  0xf8   :  { %551 = vst [vmem:[#allocation3 + $0x100] sm:$0xff] %v550_v53  ;;  %v678_v53 = vld [vmem:[%s18665_s6 + $0x528] sm:$0xff] }
  0xf9   :  { %553 = vst [vmem:[#allocation3 + $0x2a0] sm:$0xff] %v552_v54  ;;  %v680_v54 = vld [vmem:[%s18665_s6 + $0x530] sm:$0xff] }
  0xfa   :  { %555 = vst [vmem:[#allocation3 + $0x5a0] sm:$0xff] %v554_v55  ;;  %v682_v55 = vld [vmem:[%s18665_s6 + $0x538] sm:$0xff] }
  0xfb   :  { %557 = vst [vmem:[#allocation3 + $0x350] sm:$0xff] %v556_v56  ;;  %v684_v56 = vld [vmem:[%s18665_s6 + $0x540] sm:$0xff] }
  0xfc   :  { %559 = vst [vmem:[#allocation3 + $0x3b8] sm:$0xff] %v558_v57  ;;  %v686_v57 = vld [vmem:[%s18665_s6 + $0x548] sm:$0xff] }
  0xfd   :  { %561 = vst [vmem:[#allocation3 + $0xc8] sm:$0xff] %v560_v58  ;;  %v688_v58 = vld [vmem:[%s18665_s6 + $0x550] sm:$0xff] }
  0xfe   :  { %563 = vst [vmem:[#allocation3 + $0x4e0] sm:$0xff] %v562_v59  ;;  %v690_v59 = vld [vmem:[%s18665_s6 + $0x558] sm:$0xff] }
  0xff   :  { %565 = vst [vmem:[#allocation3 + $0x5e8] sm:$0xff] %v564_v60  ;;  %v692_v60 = vld [vmem:[%s18665_s6 + $0x560] sm:$0xff] }
 0x100   :  { %567 = vst [vmem:[#allocation3 + $0x200] sm:$0xff] %v566_v61  ;;  %v694_v61 = vld [vmem:[%s18665_s6 + $0x568] sm:$0xff] }
 0x101   :  { %569 = vst [vmem:[#allocation3 + $0x590] sm:$0xff] %v568_v62  ;;  %v696_v62 = vld [vmem:[%s18665_s6 + $0x570] sm:$0xff] }
 0x102   :  { %571 = vst [vmem:[#allocation3 + $0x2c0] sm:$0xff] %v570_v63  ;;  %v698_v63 = vld [vmem:[%s18665_s6 + $0x578] sm:$0xff] }
 0x103   :  { %573 = vst [vmem:[#allocation3 + $0x210] sm:$0xff] %v572_v0  ;;  %v700_v0 = vld [vmem:[%s18665_s6 + $0x580] sm:$0xff] }
 0x104   :  { %575 = vst [vmem:[#allocation3 + $0x5e0] sm:$0xff] %v574_v1  ;;  %v702_v1 = vld [vmem:[%s18665_s6 + $0x588] sm:$0xff] }
 0x105   :  { %577 = vst [vmem:[#allocation3 + $0xc0] sm:$0xff] %v576_v2  ;;  %v704_v2 = vld [vmem:[%s18665_s6 + $0x590] sm:$0xff] }
 0x106   :  { %579 = vst [vmem:[#allocation3 + $0x438] sm:$0xff] %v578_v3  ;;  %v706_v3 = vld [vmem:[%s18665_s6 + $0x598] sm:$0xff] }
 0x107   :  { %581 = vst [vmem:[#allocation3 + $0x528] sm:$0xff] %v580_v4  ;;  %v708_v4 = vld [vmem:[%s18665_s6 + $0x5a0] sm:$0xff] }
 0x108   :  { %583 = vst [vmem:[#allocation3 + $0xf0] sm:$0xff] %v582_v5  ;;  %v710_v5 = vld [vmem:[%s18665_s6 + $0x5a8] sm:$0xff] }
 0x109   :  { %585 = vst [vmem:[#allocation3 + $0x178] sm:$0xff] %v584_v6  ;;  %v712_v6 = vld [vmem:[%s18665_s6 + $0x5b0] sm:$0xff] }
 0x10a   :  { %587 = vst [vmem:[#allocation3 + $0x1e8] sm:$0xff] %v586_v7  ;;  %v714_v7 = vld [vmem:[%s18665_s6 + $0x5b8] sm:$0xff] }
 0x10b   :  { %589 = vst [vmem:[#allocation3 + $0x198] sm:$0xff] %v588_v8  ;;  %v716_v8 = vld [vmem:[%s18665_s6 + $0x5c0] sm:$0xff] }
 0x10c   :  { %591 = vst [vmem:[#allocation3 + $0x580] sm:$0xff] %v590_v9  ;;  %v718_v9 = vld [vmem:[%s18665_s6 + $0x5c8] sm:$0xff] }
 0x10d   :  { %593 = vst [vmem:[#allocation3 + $0xb0] sm:$0xff] %v592_v10  ;;  %v720_v10 = vld [vmem:[%s18665_s6 + $0x5d0] sm:$0xff] }
 0x10e   :  { %595 = vst [vmem:[#allocation3 + $0x440] sm:$0xff] %v594_v11  ;;  %v722_v11 = vld [vmem:[%s18665_s6 + $0x5d8] sm:$0xff] }
 0x10f   :  { %597 = vst [vmem:[#allocation3 + $0x1e0] sm:$0xff] %v596_v12  ;;  %v724_v12 = vld [vmem:[%s18665_s6 + $0x5e0] sm:$0xff] }
 0x110   :  { %599 = vst [vmem:[#allocation3 + $0x98] sm:$0xff] %v598_v13  ;;  %v726_v13 = vld [vmem:[%s18665_s6 + $0x5e8] sm:$0xff] }
 0x111   :  { %601 = vst [vmem:[#allocation3 + $0x3c0] sm:$0xff] %v600_v14  ;;  %v728_v14 = vld [vmem:[%s18665_s6 + $0x5f0] sm:$0xff] }
 0x112   :  { %603 = vst [vmem:[#allocation3 + $0x90] sm:$0xff] %v602_v15  ;;  %v730_v15 = vld [vmem:[%s18665_s6 + $0x5f8] sm:$0xff] }
 0x113   :  { %605 = vst [vmem:[#allocation3 + $0x550] sm:$0xff] %v604_v16  ;;  %v732_v16 = vld [vmem:[%s18665_s6 + $0x600] sm:$0xff] }
 0x114   :  { %607 = vst [vmem:[#allocation3 + $0x510] sm:$0xff] %v606_v17  ;;  %v734_v17 = vld [vmem:[%s18665_s6 + $0x608] sm:$0xff] }
 0x115   :  { %609 = vst [vmem:[#allocation3 + $0x258] sm:$0xff] %v608_v18  ;;  %v736_v18 = vld [vmem:[%s18665_s6 + $0x610] sm:$0xff] }
 0x116   :  { %611 = vst [vmem:[#allocation3 + $0x70] sm:$0xff] %v610_v19  ;;  %v738_v19 = vld [vmem:[%s18665_s6 + $0x618] sm:$0xff] }
 0x117   :  { %613 = vst [vmem:[#allocation3 + $0x390] sm:$0xff] %v612_v20  ;;  %v740_v20 = vld [vmem:[%s18665_s6 + $0x620] sm:$0xff] }
 0x118   :  { %615 = vst [vmem:[#allocation3 + $0x28] sm:$0xff] %v614_v21  ;;  %v742_v21 = vld [vmem:[%s18665_s6 + $0x628] sm:$0xff] }
 0x119   :  { %617 = vst [vmem:[#allocation3 + $0x340] sm:$0xff] %v616_v22  ;;  %v744_v22 = vld [vmem:[%s18665_s6 + $0x630] sm:$0xff] }
 0x11a   :  { %619 = vst [vmem:[#allocation3 + $0x620] sm:$0xff] %v618_v23  ;;  %v746_v23 = vld [vmem:[%s18665_s6 + $0x638] sm:$0xff] }
 0x11b   :  { %621 = vst [vmem:[#allocation3 + $0x338] sm:$0xff] %v620_v24 }
 0x11c   :  { %623 = vst [vmem:[#allocation3 + $0x330] sm:$0xff] %v622_v25 }
 0x11d   :  { %625 = vst [vmem:[#allocation3 + $0x498] sm:$0xff] %v624_v26 }
 0x11e   :  { %627 = vst [vmem:[#allocation3 + $0x320] sm:$0xff] %v626_v27 }
 0x11f   :  { %629 = vst [vmem:[#allocation3 + $0x4f8] sm:$0xff] %v628_v28 }
 0x120   :  { %631 = vst [vmem:[#allocation3 + $0xb8] sm:$0xff] %v630_v29 }
 0x121   :  { %633 = vst [vmem:[#allocation3 + $0x388] sm:$0xff] %v632_v30 }
 0x122   :  { %635 = vst [vmem:[#allocation3 + $0x3b0] sm:$0xff] %v634_v31 }
 0x123   :  { %637 = vst [vmem:[#allocation3 + $0x4c8] sm:$0xff] %v636_v32 }
 0x124   :  { %639 = vst [vmem:[#allocation3 + $0x128] sm:$0xff] %v638_v33 }
 0x125   :  { %641 = vst [vmem:[#allocation3 + $0x130] sm:$0xff] %v640_v34 }
 0x126   :  { %643 = vst [vmem:[#allocation3 + $0x3f0] sm:$0xff] %v642_v35 }
 0x127   :  { %645 = vst [vmem:[#allocation3 + $0x108] sm:$0xff] %v644_v36 }
 0x128   :  { %647 = vst [vmem:[#allocation3 + $0x628] sm:$0xff] %v646_v37 }
 0x129   :  { %649 = vst [vmem:[#allocation3 + $0x2b8] sm:$0xff] %v648_v38 }
 0x12a   :  { %651 = vst [vmem:[#allocation3 + $0x470] sm:$0xff] %v650_v39 }
 0x12b   :  { %653 = vst [vmem:[#allocation3 + $0xd0] sm:$0xff] %v652_v40 }
 0x12c   :  { %655 = vst [vmem:[#allocation3 + $0x2c8] sm:$0xff] %v654_v41 }
 0x12d   :  { %657 = vst [vmem:[#allocation3 + $0x10] sm:$0xff] %v656_v42 }
 0x12e   :  { %659 = vst [vmem:[#allocation3 + $0x5b8] sm:$0xff] %v658_v43 }
 0x12f   :  { %661 = vst [vmem:[#allocation3 + $0x270] sm:$0xff] %v660_v44 }
 0x130   :  { %663 = vst [vmem:[#allocation3 + $0x250] sm:$0xff] %v662_v45 }
 0x131   :  { %665 = vst [vmem:[#allocation3 + $0x4d0] sm:$0xff] %v664_v46 }
 0x132   :  { %667 = vst [vmem:[#allocation3 + $0x2e8] sm:$0xff] %v666_v47 }
 0x133   :  { %669 = vst [vmem:[#allocation3 + $0x520] sm:$0xff] %v668_v48 }
 0x134   :  { %671 = vst [vmem:[#allocation3 + $0x1f0] sm:$0xff] %v670_v49 }
 0x135   :  { %673 = vst [vmem:[#allocation3 + $0x310] sm:$0xff] %v672_v50 }
 0x136   :  { %675 = vst [vmem:[#allocation3 + $0xa0] sm:$0xff] %v674_v51 }
 0x137   :  { %677 = vst [vmem:[#allocation3 + $0x18] sm:$0xff] %v676_v52 }
 0x138   :  { %679 = vst [vmem:[#allocation3 + $0x400] sm:$0xff] %v678_v53 }
 0x139   :  { %681 = vst [vmem:[#allocation3 + $0x2b0] sm:$0xff] %v680_v54 }
 0x13a   :  { %683 = vst [vmem:[#allocation3 + $0x560] sm:$0xff] %v682_v55 }
 0x13b   :  { %685 = vst [vmem:[#allocation3 + $0xe0] sm:$0xff] %v684_v56 }
 0x13c   :  { %687 = vst [vmem:[#allocation3 + $0x2a8] sm:$0xff] %v686_v57 }
 0x13d   :  { %689 = vst [vmem:[#allocation3 + $0x2d8] sm:$0xff] %v688_v58 }
 0x13e   :  { %691 = vst [vmem:[#allocation3 + $0x48] sm:$0xff] %v690_v59 }
 0x13f   :  { %693 = vst [vmem:[#allocation3 + $0x1f8] sm:$0xff] %v692_v60 }
 0x140   :  { %695 = vst [vmem:[#allocation3 + $0x548] sm:$0xff] %v694_v61 }
 0x141   :  { %697 = vst [vmem:[#allocation3 + $0x598] sm:$0xff] %v696_v62 }
 0x142   :  { %699 = vst [vmem:[#allocation3 + $0x1c8] sm:$0xff] %v698_v63 }
 0x143   :  { %701 = vst [vmem:[#allocation3 + $0x588] sm:$0xff] %v700_v0 }
 0x144   :  { %703 = vst [vmem:[#allocation3 + $0x478] sm:$0xff] %v702_v1 }
 0x145   :  { %705 = vst [vmem:[#allocation3 + $0x3f8] sm:$0xff] %v704_v2 }
 0x146   :  { %707 = vst [vmem:[#allocation3 + $0xf8] sm:$0xff] %v706_v3 }
 0x147   :  { %709 = vst [vmem:[#allocation3 + $0x4b0] sm:$0xff] %v708_v4 }
 0x148   :  { %711 = vst [vmem:[#allocation3 + $0x140] sm:$0xff] %v710_v5 }
 0x149   :  { %713 = vst [vmem:[#allocation3 + $0x148] sm:$0xff] %v712_v6 }
 0x14a   :  { %715 = vst [vmem:[#allocation3 + $0x380] sm:$0xff] %v714_v7 }
 0x14b   :  { %717 = vst [vmem:[#allocation3 + $0x458] sm:$0xff] %v716_v8 }
 0x14c   :  { %719 = vst [vmem:[#allocation3 + $0x170] sm:$0xff] %v718_v9 }
 0x14d   :  { %721 = vst [vmem:[#allocation3 + $0x68] sm:$0xff] %v720_v10 }
 0x14e   :  { %723 = vst [vmem:[#allocation3 + $0x4c0] sm:$0xff] %v722_v11 }
 0x14f   :  { %725 = vst [vmem:[#allocation3 + $0x3a0] sm:$0xff] %v724_v12 }
 0x150   :  { %727 = vst [vmem:[#allocation3 + $0x300] sm:$0xff] %v726_v13 }
 0x151   :  { %729 = vst [vmem:[#allocation3 + $0x5d0] sm:$0xff] %v728_v14 }
 0x152   :  { %731 = vst [vmem:[#allocation3 + $0x1c0] sm:$0xff] %v730_v15 }
 0x153   :  { %733 = vst [vmem:[#allocation3 + $0x2d0] sm:$0xff] %v732_v16 }
 0x154   :  { %735 = vst [vmem:[#allocation3 + $0x408] sm:$0xff] %v734_v17 }
 0x155   :  { %737 = vst [vmem:[#allocation3] sm:$0xff] %v736_v18 }
 0x156   :  { %739 = vst [vmem:[#allocation3 + $0x4a8] sm:$0xff] %v738_v19 }
 0x157   :  { %741 = vst [vmem:[#allocation3 + $0x508] sm:$0xff] %v740_v20 }
 0x158   :  { %743 = vst [vmem:[#allocation3 + $0x120] sm:$0xff] %v742_v21 }
 0x159   :  { %745 = vst [vmem:[#allocation3 + $0x618] sm:$0xff] %v744_v22 }
 0x15a   :  { %747 = vst [vmem:[#allocation3 + $0x578] sm:$0xff] %v746_v23 }
 0x15b   :  { %753 = vsyncadd [#allocation5 + $0x1], 25600  ;;  %v13398_v24 = vld [vmem:[%s18660_s1 + $0x38] sm:$0xff]  ;;  %v13397_v25 = vld [vmem:[%s18660_s1 + $0x30] sm:$0xff]  ;;  %vm1228_vm0 = vcmask 523264   ;;  %vm1825_vm1 = vcmask 519168  }
 0x15c   :  { %1331 = vmatpush.bf16.msra.mxu0 %v13398_v24  ;;  %v13402_v26 = vld [vmem:[%s18660_s1 + $0x58] sm:$0xff]  ;;  %v13401_v27 = vld [vmem:[%s18660_s1 + $0x50] sm:$0xff]  ;;  %v13396_v28 = vld [vmem:[%s18660_s1 + $0x28] sm:$0xff] }
 0x15d   :  { %1514 = vmatpush.bf16.msra.mxu1 %v13402_v26  ;;  %14498 = vmatpush.bf16.msra.mxu3 %v13402_v26  ;;  %v13400_v29 = vld [vmem:[%s18660_s1 + $0x48] sm:$0xff]  ;;  %v13395_v30 = vld [vmem:[%s18660_s1 + $0x20] sm:$0xff]  ;;  %v13394_v34 = vld [vmem:[%s18660_s1 + $0x18] sm:$0xff] }
 0x15e   :  { %v13399_v31 = vld [vmem:[%s18660_s1 + $0x40] sm:$0xff]  ;;  %v10891_v33 = vld [vmem:[%s18659_s0 + $0x8] sm:$0xf0]  ;;  %v13393_v36 = vld [vmem:[%s18660_s1 + $0x10] sm:$0xff] }
 0x15f   :  { %v13323_v32 = vld [vmem:[%s18659_s0 + $0x4] sm:$0xf]  ;;  %v13392_v37 = vld [vmem:[%s18660_s1 + $0x8] sm:$0xff]  ;;  %v10889_v39 = vld [vmem:[%s18659_s0] sm:$0xf] }
 0x160   :  { %1332 = vmatpush.bf16.msra.mxu0 %v13397_v25  ;;  %v10894_v35 = vor.u32 %v13323_v32, %v10891_v33  ;;  %v13391_v38 = vld [vmem:[%s18660_s1] sm:$0xff]  ;;  %v13324_v40 = vld [vmem:[%s18659_s0 + $0x4] sm:$0xf0]  ;;  %v13325_v41 = vld [vmem:[%s18659_s0 + $0x14] sm:$0xf] }
 0x161   :  { %1515 = vmatpush.bf16.msra.mxu1 %v13401_v27  ;;  %14499 = vmatpush.bf16.msra.mxu3 %v13401_v27  ;;  %v10899_v42 = vld [vmem:[%s18659_s0 + $0x18] sm:$0xf0]  ;;  %v10890_v43 = vor.u32 %v13324_v40, %v10889_v39  ;;  %v10897_v45 = vld [vmem:[%s18659_s0 + $0x10] sm:$0xf]  ;;  %v13326_v46 = vld [vmem:[%s18659_s0 + $0x14] sm:$0xf0] }
 0x162   :  { %v10902_v44 = vor.u32 %v13325_v41, %v10899_v42  ;;  %v13327_v47 = vld [vmem:[%s18659_s0 + $0x24] sm:$0xf]  ;;  %v10907_v48 = vld [vmem:[%s18659_s0 + $0x28] sm:$0xf0]  ;;  %v10898_v49 = vor.u32 %v13326_v46, %v10897_v45  ;;  %v10905_v51 = vld [vmem:[%s18659_s0 + $0x20] sm:$0xf] }
 0x163   :  { %v10910_v50 = vor.u32 %v13327_v47, %v10907_v48  ;;  %v13328_v52 = vld [vmem:[%s18659_s0 + $0x24] sm:$0xf0]  ;;  %v13329_v53 = vld [vmem:[%s18659_s0 + $0x34] sm:$0xf]  ;;  %v10915_v54 = vld [vmem:[%s18659_s0 + $0x38] sm:$0xf0] }
 0x164   :  { %1333 = vmatpush.bf16.msra.mxu0 %v13396_v28  ;;  %v10906_v55 = vor.u32 %v13328_v52, %v10905_v51  ;;  %v10918_v56 = vor.u32 %v13329_v53, %v10915_v54  ;;  %v10913_v57 = vld [vmem:[%s18659_s0 + $0x30] sm:$0xf]  ;;  %v13330_v58 = vld [vmem:[%s18659_s0 + $0x34] sm:$0xf0]  ;;  %v13331_v59 = vld [vmem:[%s18659_s0 + $0x44] sm:$0xf] }
 0x165   :  { %1516 = vmatpush.bf16.msra.mxu1 %v13400_v29  ;;  %14500 = vmatpush.bf16.msra.mxu3 %v13400_v29  ;;  %v10923_v60 = vld [vmem:[%s18659_s0 + $0x48] sm:$0xf0]  ;;  %v10914_v61 = vor.u32 %v13330_v58, %v10913_v57  ;;  %v10921_v63 = vld [vmem:[%s18659_s0 + $0x40] sm:$0xf]  ;;  %v13332_v0 = vld [vmem:[%s18659_s0 + $0x44] sm:$0xf0] }
 0x166   :  { %v10926_v62 = vor.u32 %v13331_v59, %v10923_v60  ;;  %v13333_v1 = vld [vmem:[%s18659_s0 + $0x54] sm:$0xf]  ;;  %v10931_v2 = vld [vmem:[%s18659_s0 + $0x58] sm:$0xf0]  ;;  %v10922_v3 = vor.u32 %v13332_v0, %v10921_v63  ;;  %v10929_v5 = vld [vmem:[%s18659_s0 + $0x50] sm:$0xf] }
 0x167   :  { %v10934_v4 = vor.u32 %v13333_v1, %v10931_v2  ;;  %v13334_v6 = vld [vmem:[%s18659_s0 + $0x54] sm:$0xf0]  ;;  %v13335_v7 = vld [vmem:[%s18659_s0 + $0x64] sm:$0xf]  ;;  %v10939_v8 = vld [vmem:[%s18659_s0 + $0x68] sm:$0xf0] }
 0x168   :  { %1334 = vmatpush.bf16.msra.mxu0 %v13395_v30  ;;  %v10930_v9 = vor.u32 %v13334_v6, %v10929_v5  ;;  %v10942_v10 = vor.u32 %v13335_v7, %v10939_v8  ;;  %v10937_v11 = vld [vmem:[%s18659_s0 + $0x60] sm:$0xf]  ;;  %v13336_v12 = vld [vmem:[%s18659_s0 + $0x64] sm:$0xf0]  ;;  %v13337_v13 = vld [vmem:[%s18659_s0 + $0x74] sm:$0xf] }
 0x169   :  { %1517 = vmatpush.bf16.msra.mxu1 %v13399_v31  ;;  %14501 = vmatpush.bf16.msra.mxu3 %v13399_v31  ;;  %v10947_v14 = vld [vmem:[%s18659_s0 + $0x78] sm:$0xf0]  ;;  %v10938_v15 = vor.u32 %v13336_v12, %v10937_v11  ;;  %v10945_v17 = vld [vmem:[%s18659_s0 + $0x70] sm:$0xf]  ;;  %v13338_v18 = vld [vmem:[%s18659_s0 + $0x74] sm:$0xf0] }
 0x16a   :  { %v10950_v16 = vor.u32 %v13337_v13, %v10947_v14  ;;  %v13339_v19 = vld [vmem:[%s18659_s0 + $0x84] sm:$0xf]  ;;  %v10955_v20 = vld [vmem:[%s18659_s0 + $0x88] sm:$0xf0]  ;;  %v10946_v21 = vor.u32 %v13338_v18, %v10945_v17  ;;  %v10953_v25 = vld [vmem:[%s18659_s0 + $0x80] sm:$0xf] }
 0x16b   :  { %v10958_v22 = vor.u32 %v13339_v19, %v10955_v20  ;;  %v13340_v26 = vld [vmem:[%s18659_s0 + $0x84] sm:$0xf0]  ;;  %v15840_v27 = vld [vmem:[%s18661_s2] ss:$0 sm:$0xff]  ;;  %v13341_v28 = vld [vmem:[%s18659_s0 + $0x94] sm:$0xf] }
 0x16c   :  { %1335 = vmatpush.bf16.msra.mxu0 %v13394_v34  ;;  %11207 = vmatmul.msk.bf16.vlgmr.msra.gmra.mxu1 %vm1228_vm0, %v10894_v35  ;;  %v10963_v29 = vld [vmem:[%s18659_s0 + $0x98] sm:$0xf0]  ;;  %v10954_v30 = vor.u32 %v13340_v26, %v10953_v25  ;;  %v10961_v42 = vld [vmem:[%s18659_s0 + $0x90] sm:$0xf]  ;;  %v13343_v45 = vld [vmem:[%s18659_s0 + $0xa4] sm:$0xf] }
 0x16d   :  { %v10966_v33 = vor.u32 %v13341_v28, %v10963_v29  ;;  %v10971_v46 = vld [vmem:[%s18659_s0 + $0xa8] sm:$0xf0]  ;;  %v10969_v60 = vld [vmem:[%s18659_s0 + $0xa0] sm:$0xf]  ;;  %v13345_v63 = vld [vmem:[%s18659_s0 + $0xb4] sm:$0xf] }
 0x16e   :  { %v10974_v51 = vor.u32 %v13343_v45, %v10971_v46  ;;  %v10979_v0 = vld [vmem:[%s18659_s0 + $0xb8] sm:$0xf0]  ;;  %v10977_v14 = vld [vmem:[%s18659_s0 + $0xb0] sm:$0xf]  ;;  %v13347_v17 = vld [vmem:[%s18659_s0 + $0xc4] sm:$0xf] }
 0x16f   :  { %v10982_v5 = vor.u32 %v13345_v63, %v10979_v0  ;;  %v10987_v18 = vld [vmem:[%s18659_s0 + $0xc8] sm:$0xf0] }
 0x170   :  { %1336 = vmatpush.bf16.msra.mxu0 %v13393_v36 }
 0x174   :  { %1337 = vmatpush.bf16.msra.mxu0 %v13392_v37 }
 0x178   :  { %1338 = vmatpush.bf16.msra.mxu0 %v13391_v38 }
 0x17b   :  { %1339 = vmatmul.bf16.vlgmr.msra.gmra.mxu0 %v10890_v43  ;;  %v13342_v43 = vld [vmem:[%s18659_s0 + $0x94] sm:$0xf0] }
 0x17c   :  { %11208 = vmatmul.msk.bf16.gmra.mxu1 %vm1228_vm0, %v10902_v44  ;;  %v10962_v48 = vor.u32 %v13342_v43, %v10961_v42 }
 0x18b   :  { %1344 = vmatmul.bf16.gmra.mxu0 %v10898_v49 }
 0x18c   :  { %11209 = vmatmul.msk.bf16.gmra.mxu1 %vm1228_vm0, %v10910_v50 }
 0x19b   :  { %1349 = vmatmul.bf16.gmra.mxu0 %v10906_v55 }
 0x19c   :  { %11210 = vmatmul.msk.bf16.gmra.mxu1 %vm1228_vm0, %v10918_v56 }
 0x1ab   :  { %1354 = vmatmul.bf16.gmra.mxu0 %v10914_v61  ;;  %v13344_v61 = vld [vmem:[%s18659_s0 + $0xa4] sm:$0xf0] }
 0x1ac   :  { %11211 = vmatmul.msk.bf16.gmra.mxu1 %vm1228_vm0, %v10926_v62  ;;  %v10970_v2 = vor.u32 %v13344_v61, %v10969_v60 }
 0x1bb   :  { %1359 = vmatmul.bf16.gmra.mxu0 %v10922_v3 }
 0x1bc   :  { %11212 = vmatmul.msk.bf16.gmra.mxu1 %vm1228_vm0, %v10934_v4 }
 0x1cb   :  { %1364 = vmatmul.bf16.gmra.mxu0 %v10930_v9 }
 0x1cc   :  { %11213 = vmatmul.msk.bf16.gmra.mxu1 %vm1228_vm0, %v10942_v10 }
 0x1db   :  { %1369 = vmatmul.bf16.gmra.mxu0 %v10938_v15  ;;  %v13346_v15 = vld [vmem:[%s18659_s0 + $0xb4] sm:$0xf0] }
 0x1dc   :  { %11214 = vmatmul.msk.bf16.gmra.mxu1 %vm1228_vm0, %v10950_v16  ;;  %v10978_v20 = vor.u32 %v13346_v15, %v10977_v14 }
 0x1e9   :  { %v1519_v23 = vpop.f32.mrf.mxu1 }
 0x1eb   :  { %1374 = vmatmul.bf16.gmra.mxu0 %v10946_v21 }
 0x1ec   :  { %11215 = vmatmul.msk.bf16.gmra.mxu1 %vm1228_vm0, %v10958_v22 }
 0x1f1   :  { %v1521_v24 = vpop.f32.mrf.mxu1 }
 0x1f8   :  { %v1340_v31 = vpop.f32.mrf.mxu0 }
 0x1f9   :  { %v1341_v32 = vadd.f32 %v15840_v27, %v1340_v31  ;;  %v1524_v34 = vpop.f32.mrf.mxu1 }
 0x1fb   :  { %v1520_v35 = vadd.f32 %v1519_v23, %v1341_v32  ;;  %1379 = vmatmul.bf16.gmra.mxu0 %v10954_v30  ;;  %v10990_v23 = vor.u32 %v13347_v17, %v10987_v18 }
 0x1fc   :  { %11216 = vmatmul.msk.bf16.gmra.mxu1 %vm1228_vm0, %v10966_v33  ;;  %v10985_v33 = vld [vmem:[%s18659_s0 + $0xc0] sm:$0xf] }
 0x1fd   :  { %v1689_v36 = vmax.f32 %v1520_v35, 0.0 }
 0x1ff   :  { %v1757_v37 = vpack.c.bf16 %v1689_v36, %v1689_v36  ;;  %v13349_v36 = vld [vmem:[%s18659_s0 + $0xd4] sm:$0xf] }
 0x200   :  { %v1342_v38 = vpop.f32.mrf.mxu0 }
 0x201   :  { %1826 = vst.msk [vmem:[#allocation4] sm:$0xf] %vm1825_vm1, %v1757_v37  ;;  %v1343_v39 = vadd.f32 %v15840_v27, %v1342_v38  ;;  %v1526_v40 = vpop.f32.mrf.mxu1  ;;  %v10995_v37 = vld [vmem:[%s18659_s0 + $0xd8] sm:$0xf0] }
 0x202   :  { %v10998_v42 = vor.u32 %v13349_v36, %v10995_v37 }
 0x203   :  { %v1522_v41 = vadd.f32 %v1521_v24, %v1343_v39 }
 0x205   :  { %v1690_v44 = vmax.f32 %v1522_v41, 0.0 }
 0x207   :  { %v1758_v47 = vpack.c.bf16 %v1690_v44, %v1690_v44 }
 0x208   :  { %v1345_v49 = vpop.f32.mrf.mxu0 }
 0x209   :  { %1827 = vst.msk [vmem:[#allocation4 + $0x4] sm:$0xf] %vm1825_vm1, %v1758_v47  ;;  %v1346_v50 = vadd.f32 %v15840_v27, %v1345_v49  ;;  %v1529_v52 = vpop.f32.mrf.mxu1 }
 0x20b   :  { %v1525_v53 = vadd.f32 %v1524_v34, %v1346_v50  ;;  %1384 = vmatmul.bf16.gmra.mxu0 %v10962_v48  ;;  %v13348_v34 = vld [vmem:[%s18659_s0 + $0xc4] sm:$0xf0] }
 0x20c   :  { %11217 = vmatmul.msk.bf16.gmra.mxu1 %vm1228_vm0, %v10974_v51  ;;  %v10986_v39 = vor.u32 %v13348_v34, %v10985_v33  ;;  %v10993_v51 = vld [vmem:[%s18659_s0 + $0xd0] sm:$0xf] }
 0x20d   :  { %v1691_v54 = vmax.f32 %v1525_v53, 0.0 }
 0x20f   :  { %v1759_v55 = vpack.c.bf16 %v1691_v54, %v1691_v54  ;;  %v13351_v54 = vld [vmem:[%s18659_s0 + $0xe4] sm:$0xf] }
 0x210   :  { %v1347_v56 = vpop.f32.mrf.mxu0 }
 0x211   :  { %1828 = vst.msk [vmem:[#allocation4 + $0x8] sm:$0xf] %vm1825_vm1, %v1759_v55  ;;  %v1348_v57 = vadd.f32 %v15840_v27, %v1347_v56  ;;  %v1531_v58 = vpop.f32.mrf.mxu1  ;;  %v11003_v55 = vld [vmem:[%s18659_s0 + $0xe8] sm:$0xf0] }
 0x212   :  { %v11006_v60 = vor.u32 %v13351_v54, %v11003_v55 }
 0x213   :  { %v1527_v59 = vadd.f32 %v1526_v40, %v1348_v57 }
 0x215   :  { %v1692_v62 = vmax.f32 %v1527_v59, 0.0 }
 0x217   :  { %v1760_v1 = vpack.c.bf16 %v1692_v62, %v1692_v62 }
 0x218   :  { %v1350_v3 = vpop.f32.mrf.mxu0 }
 0x219   :  { %1829 = vst.msk [vmem:[#allocation4 + $0xc] sm:$0xf] %vm1825_vm1, %v1760_v1  ;;  %v1351_v4 = vadd.f32 %v15840_v27, %v1350_v3  ;;  %v1534_v6 = vpop.f32.mrf.mxu1 }
 0x21b   :  { %v1530_v7 = vadd.f32 %v1529_v52, %v1351_v4  ;;  %1389 = vmatmul.bf16.gmra.mxu0 %v10970_v2  ;;  %v13350_v52 = vld [vmem:[%s18659_s0 + $0xd4] sm:$0xf0] }
 0x21c   :  { %11218 = vmatmul.msk.bf16.gmra.mxu1 %vm1228_vm0, %v10982_v5  ;;  %v10994_v57 = vor.u32 %v13350_v52, %v10993_v51  ;;  %v11001_v5 = vld [vmem:[%s18659_s0 + $0xe0] sm:$0xf] }
 0x21d   :  { %v1693_v8 = vmax.f32 %v1530_v7, 0.0 }
 0x21f   :  { %v1761_v9 = vpack.c.bf16 %v1693_v8, %v1693_v8  ;;  %v13353_v8 = vld [vmem:[%s18659_s0 + $0xf4] sm:$0xf] }
 0x220   :  { %v1352_v10 = vpop.f32.mrf.mxu0 }
 0x221   :  { %1830 = vst.msk [vmem:[#allocation4 + $0x10] sm:$0xf] %vm1825_vm1, %v1761_v9  ;;  %v1353_v11 = vadd.f32 %v15840_v27, %v1352_v10  ;;  %v1536_v12 = vpop.f32.mrf.mxu1  ;;  %v11011_v9 = vld [vmem:[%s18659_s0 + $0xf8] sm:$0xf0] }
 0x222   :  { %v11014_v14 = vor.u32 %v13353_v8, %v11011_v9 }
 0x223   :  { %v1532_v13 = vadd.f32 %v1531_v58, %v1353_v11 }
 0x225   :  { %v1694_v16 = vmax.f32 %v1532_v13, 0.0 }
 0x227   :  { %v1762_v19 = vpack.c.bf16 %v1694_v16, %v1694_v16 }
 0x228   :  { %v1355_v21 = vpop.f32.mrf.mxu0 }
 0x229   :  { %1831 = vst.msk [vmem:[#allocation4 + $0x14] sm:$0xf] %vm1825_vm1, %v1762_v19  ;;  %v1356_v22 = vadd.f32 %v15840_v27, %v1355_v21  ;;  %v1539_v24 = vpop.f32.mrf.mxu1 }
 0x22b   :  { %v1535_v25 = vadd.f32 %v1534_v6, %v1356_v22  ;;  %1394 = vmatmul.bf16.gmra.mxu0 %v10978_v20  ;;  %v13352_v6 = vld [vmem:[%s18659_s0 + $0xe4] sm:$0xf0] }
 0x22c   :  { %11219 = vmatmul.msk.bf16.gmra.mxu1 %vm1228_vm0, %v10990_v23  ;;  %v11002_v11 = vor.u32 %v13352_v6, %v11001_v5  ;;  %v11009_v23 = vld [vmem:[%s18659_s0 + $0xf0] sm:$0xf] }
 0x22d   :  { %v1695_v26 = vmax.f32 %v1535_v25, 0.0 }
 0x22f   :  { %v1763_v28 = vpack.c.bf16 %v1695_v26, %v1695_v26  ;;  %v13355_v26 = vld [vmem:[%s18659_s0 + $0x104] sm:$0xf] }
 0x230   :  { %v1357_v29 = vpop.f32.mrf.mxu0 }
 0x231   :  { %1832 = vst.msk [vmem:[#allocation4 + $0x18] sm:$0xf] %vm1825_vm1, %v1763_v28  ;;  %v1358_v30 = vadd.f32 %v15840_v27, %v1357_v29  ;;  %v1541_v31 = vpop.f32.mrf.mxu1  ;;  %v11019_v28 = vld [vmem:[%s18659_s0 + $0x108] sm:$0xf0] }
 0x232   :  { %v11022_v33 = vor.u32 %v13355_v26, %v11019_v28 }
 0x233   :  { %v1537_v32 = vadd.f32 %v1536_v12, %v1358_v30 }
 0x235   :  { %v1696_v35 = vmax.f32 %v1537_v32, 0.0 }
 0x237   :  { %v1764_v38 = vpack.c.bf16 %v1696_v35, %v1696_v35 }
 0x238   :  { %v1360_v40 = vpop.f32.mrf.mxu0 }
 0x239   :  { %1833 = vst.msk [vmem:[#allocation4 + $0x1c] sm:$0xf] %vm1825_vm1, %v1764_v38  ;;  %v1361_v41 = vadd.f32 %v15840_v27, %v1360_v40  ;;  %v1544_v43 = vpop.f32.mrf.mxu1 }
 0x23b   :  { %v1540_v44 = vadd.f32 %v1539_v24, %v1361_v41  ;;  %1399 = vmatmul.bf16.gmra.mxu0 %v10986_v39  ;;  %v13354_v24 = vld [vmem:[%s18659_s0 + $0xf4] sm:$0xf0] }
 0x23c   :  { %11220 = vmatmul.msk.bf16.gmra.mxu1 %vm1228_vm0, %v10998_v42  ;;  %v11010_v30 = vor.u32 %v13354_v24, %v11009_v23  ;;  %v11017_v42 = vld [vmem:[%s18659_s0 + $0x100] sm:$0xf] }
 0x23d   :  { %v1697_v45 = vmax.f32 %v1540_v44, 0.0 }
 0x23f   :  { %v1765_v46 = vpack.c.bf16 %v1697_v45, %v1697_v45  ;;  %v13357_v45 = vld [vmem:[%s18659_s0 + $0x114] sm:$0xf] }
 0x240   :  { %v1362_v47 = vpop.f32.mrf.mxu0 }
 0x241   :  { %1834 = vst.msk [vmem:[#allocation4 + $0x20] sm:$0xf] %vm1825_vm1, %v1765_v46  ;;  %v1363_v48 = vadd.f32 %v15840_v27, %v1362_v47  ;;  %v1546_v49 = vpop.f32.mrf.mxu1  ;;  %v11027_v46 = vld [vmem:[%s18659_s0 + $0x118] sm:$0xf0] }
 0x242   :  { %v11030_v51 = vor.u32 %v13357_v45, %v11027_v46 }
 0x243   :  { %v1542_v50 = vadd.f32 %v1541_v31, %v1363_v48 }
 0x245   :  { %v1698_v53 = vmax.f32 %v1542_v50, 0.0 }
 0x247   :  { %v1766_v56 = vpack.c.bf16 %v1698_v53, %v1698_v53 }
 0x248   :  { %v1365_v58 = vpop.f32.mrf.mxu0 }
 0x249   :  { %1835 = vst.msk [vmem:[#allocation4 + $0x24] sm:$0xf] %vm1825_vm1, %v1766_v56  ;;  %v1366_v59 = vadd.f32 %v15840_v27, %v1365_v58  ;;  %v1549_v61 = vpop.f32.mrf.mxu1 }
 0x24b   :  { %v1545_v62 = vadd.f32 %v1544_v43, %v1366_v59  ;;  %1404 = vmatmul.bf16.gmra.mxu0 %v10994_v57  ;;  %v13356_v43 = vld [vmem:[%s18659_s0 + $0x104] sm:$0xf0] }
 0x24c   :  { %11221 = vmatmul.msk.bf16.gmra.mxu1 %vm1228_vm0, %v11006_v60  ;;  %v11018_v48 = vor.u32 %v13356_v43, %v11017_v42  ;;  %v11025_v60 = vld [vmem:[%s18659_s0 + $0x110] sm:$0xf] }
 0x24d   :  { %v1699_v63 = vmax.f32 %v1545_v62, 0.0 }
 0x24f   :  { %v1767_v0 = vpack.c.bf16 %v1699_v63, %v1699_v63  ;;  %v13359_v63 = vld [vmem:[%s18659_s0 + $0x124] sm:$0xf] }
 0x250   :  { %v1367_v1 = vpop.f32.mrf.mxu0 }
 0x251   :  { %1836 = vst.msk [vmem:[#allocation4 + $0x28] sm:$0xf] %vm1825_vm1, %v1767_v0  ;;  %v1368_v2 = vadd.f32 %v15840_v27, %v1367_v1  ;;  %v1551_v3 = vpop.f32.mrf.mxu1  ;;  %v11035_v0 = vld [vmem:[%s18659_s0 + $0x128] sm:$0xf0] }
 0x252   :  { %v11038_v5 = vor.u32 %v13359_v63, %v11035_v0 }
 0x253   :  { %v1547_v4 = vadd.f32 %v1546_v49, %v1368_v2 }
 0x255   :  { %v1700_v7 = vmax.f32 %v1547_v4, 0.0 }
 0x257   :  { %v1768_v10 = vpack.c.bf16 %v1700_v7, %v1700_v7 }
 0x258   :  { %v1370_v12 = vpop.f32.mrf.mxu0 }
 0x259   :  { %1837 = vst.msk [vmem:[#allocation4 + $0x2c] sm:$0xf] %vm1825_vm1, %v1768_v10  ;;  %v1371_v13 = vadd.f32 %v15840_v27, %v1370_v12  ;;  %v1554_v15 = vpop.f32.mrf.mxu1 }
 0x25b   :  { %v1550_v16 = vadd.f32 %v1549_v61, %v1371_v13  ;;  %1409 = vmatmul.bf16.gmra.mxu0 %v11002_v11  ;;  %v13358_v61 = vld [vmem:[%s18659_s0 + $0x114] sm:$0xf0] }
 0x25c   :  { %11222 = vmatmul.msk.bf16.gmra.mxu1 %vm1228_vm0, %v11014_v14  ;;  %v11026_v2 = vor.u32 %v13358_v61, %v11025_v60  ;;  %v11033_v14 = vld [vmem:[%s18659_s0 + $0x120] sm:$0xf] }
 0x25d   :  { %v1701_v17 = vmax.f32 %v1550_v16, 0.0 }
 0x25f   :  { %v1769_v18 = vpack.c.bf16 %v1701_v17, %v1701_v17  ;;  %v13361_v17 = vld [vmem:[%s18659_s0 + $0x134] sm:$0xf] }
 0x260   :  { %v1372_v19 = vpop.f32.mrf.mxu0 }
 0x261   :  { %1838 = vst.msk [vmem:[#allocation4 + $0x30] sm:$0xf] %vm1825_vm1, %v1769_v18  ;;  %v1373_v20 = vadd.f32 %v15840_v27, %v1372_v19  ;;  %v1556_v21 = vpop.f32.mrf.mxu1  ;;  %v11043_v18 = vld [vmem:[%s18659_s0 + $0x138] sm:$0xf0] }
 0x262   :  { %v11046_v23 = vor.u32 %v13361_v17, %v11043_v18 }
 0x263   :  { %v1552_v22 = vadd.f32 %v1551_v3, %v1373_v20 }
 0x265   :  { %v1702_v25 = vmax.f32 %v1552_v22, 0.0 }
 0x267   :  { %v1770_v29 = vpack.c.bf16 %v1702_v25, %v1702_v25 }
 0x268   :  { %v1375_v31 = vpop.f32.mrf.mxu0 }
 0x269   :  { %1839 = vst.msk [vmem:[#allocation4 + $0x34] sm:$0xf] %vm1825_vm1, %v1770_v29  ;;  %v1376_v32 = vadd.f32 %v15840_v27, %v1375_v31  ;;  %v1559_v34 = vpop.f32.mrf.mxu1 }
 0x26b   :  { %v1555_v35 = vadd.f32 %v1554_v15, %v1376_v32  ;;  %1414 = vmatmul.bf16.gmra.mxu0 %v11010_v30  ;;  %v13360_v15 = vld [vmem:[%s18659_s0 + $0x124] sm:$0xf0] }
 0x26c   :  { %11223 = vmatmul.msk.bf16.gmra.mxu1 %vm1228_vm0, %v11022_v33  ;;  %v11034_v20 = vor.u32 %v13360_v15, %v11033_v14  ;;  %v11041_v33 = vld [vmem:[%s18659_s0 + $0x130] sm:$0xf] }
 0x26d   :  { %v1703_v36 = vmax.f32 %v1555_v35, 0.0 }
 0x26f   :  { %v1771_v37 = vpack.c.bf16 %v1703_v36, %v1703_v36  ;;  %v13363_v36 = vld [vmem:[%s18659_s0 + $0x144] sm:$0xf] }
 0x270   :  { %v1377_v38 = vpop.f32.mrf.mxu0 }
 0x271   :  { %1840 = vst.msk [vmem:[#allocation4 + $0x38] sm:$0xf] %vm1825_vm1, %v1771_v37  ;;  %v1378_v39 = vadd.f32 %v15840_v27, %v1377_v38  ;;  %v1561_v40 = vpop.f32.mrf.mxu1  ;;  %v11051_v37 = vld [vmem:[%s18659_s0 + $0x148] sm:$0xf0] }
 0x272   :  { %v11054_v42 = vor.u32 %v13363_v36, %v11051_v37 }
 0x273   :  { %v1557_v41 = vadd.f32 %v1556_v21, %v1378_v39 }
 0x275   :  { %v1704_v44 = vmax.f32 %v1557_v41, 0.0 }
 0x277   :  { %v1772_v47 = vpack.c.bf16 %v1704_v44, %v1704_v44 }
 0x278   :  { %v1380_v49 = vpop.f32.mrf.mxu0 }
 0x279   :  { %1841 = vst.msk [vmem:[#allocation4 + $0x3c] sm:$0xf] %vm1825_vm1, %v1772_v47  ;;  %v1381_v50 = vadd.f32 %v15840_v27, %v1380_v49  ;;  %v1564_v52 = vpop.f32.mrf.mxu1 }
 0x27b   :  { %v1560_v53 = vadd.f32 %v1559_v34, %v1381_v50  ;;  %1419 = vmatmul.bf16.gmra.mxu0 %v11018_v48  ;;  %v13362_v34 = vld [vmem:[%s18659_s0 + $0x134] sm:$0xf0] }
 0x27c   :  { %11224 = vmatmul.msk.bf16.gmra.mxu1 %vm1228_vm0, %v11030_v51  ;;  %v11042_v39 = vor.u32 %v13362_v34, %v11041_v33  ;;  %v11049_v51 = vld [vmem:[%s18659_s0 + $0x140] sm:$0xf] }
 0x27d   :  { %v1705_v54 = vmax.f32 %v1560_v53, 0.0 }
 0x27f   :  { %v1773_v55 = vpack.c.bf16 %v1705_v54, %v1705_v54  ;;  %v13365_v54 = vld [vmem:[%s18659_s0 + $0x154] sm:$0xf] }
 0x280   :  { %v1382_v56 = vpop.f32.mrf.mxu0 }
 0x281   :  { %1842 = vst.msk [vmem:[#allocation4 + $0x40] sm:$0xf] %vm1825_vm1, %v1773_v55  ;;  %v1383_v57 = vadd.f32 %v15840_v27, %v1382_v56  ;;  %v1566_v58 = vpop.f32.mrf.mxu1  ;;  %v11059_v55 = vld [vmem:[%s18659_s0 + $0x158] sm:$0xf0] }
 0x282   :  { %v11062_v60 = vor.u32 %v13365_v54, %v11059_v55 }
 0x283   :  { %v1562_v59 = vadd.f32 %v1561_v40, %v1383_v57 }
 0x285   :  { %v1706_v62 = vmax.f32 %v1562_v59, 0.0 }
 0x287   :  { %v1774_v1 = vpack.c.bf16 %v1706_v62, %v1706_v62 }
 0x288   :  { %v1385_v3 = vpop.f32.mrf.mxu0 }
 0x289   :  { %1843 = vst.msk [vmem:[#allocation4 + $0x44] sm:$0xf] %vm1825_vm1, %v1774_v1  ;;  %v1386_v4 = vadd.f32 %v15840_v27, %v1385_v3  ;;  %v1569_v6 = vpop.f32.mrf.mxu1 }
 0x28b   :  { %v1565_v7 = vadd.f32 %v1564_v52, %v1386_v4  ;;  %1424 = vmatmul.bf16.gmra.mxu0 %v11026_v2  ;;  %v13364_v52 = vld [vmem:[%s18659_s0 + $0x144] sm:$0xf0] }
 0x28c   :  { %11225 = vmatmul.msk.bf16.gmra.mxu1 %vm1228_vm0, %v11038_v5  ;;  %v11050_v57 = vor.u32 %v13364_v52, %v11049_v51  ;;  %v11057_v5 = vld [vmem:[%s18659_s0 + $0x150] sm:$0xf] }
 0x28d   :  { %v1707_v8 = vmax.f32 %v1565_v7, 0.0 }
 0x28f   :  { %v1775_v9 = vpack.c.bf16 %v1707_v8, %v1707_v8  ;;  %v13367_v8 = vld [vmem:[%s18659_s0 + $0x164] sm:$0xf] }
 0x290   :  { %v1387_v10 = vpop.f32.mrf.mxu0 }
 0x291   :  { %1844 = vst.msk [vmem:[#allocation4 + $0x48] sm:$0xf] %vm1825_vm1, %v1775_v9  ;;  %v1388_v11 = vadd.f32 %v15840_v27, %v1387_v10  ;;  %v1571_v12 = vpop.f32.mrf.mxu1  ;;  %v11067_v9 = vld [vmem:[%s18659_s0 + $0x168] sm:$0xf0] }
 0x292   :  { %v11070_v14 = vor.u32 %v13367_v8, %v11067_v9 }
 0x293   :  { %v1567_v13 = vadd.f32 %v1566_v58, %v1388_v11 }
 0x295   :  { %v1708_v16 = vmax.f32 %v1567_v13, 0.0 }
 0x297   :  { %v1776_v19 = vpack.c.bf16 %v1708_v16, %v1708_v16 }
 0x298   :  { %v1390_v21 = vpop.f32.mrf.mxu0 }
 0x299   :  { %1845 = vst.msk [vmem:[#allocation4 + $0x4c] sm:$0xf] %vm1825_vm1, %v1776_v19  ;;  %v1391_v22 = vadd.f32 %v15840_v27, %v1390_v21  ;;  %v1574_v24 = vpop.f32.mrf.mxu1 }
 0x29b   :  { %v1570_v25 = vadd.f32 %v1569_v6, %v1391_v22  ;;  %1429 = vmatmul.bf16.gmra.mxu0 %v11034_v20  ;;  %v13366_v6 = vld [vmem:[%s18659_s0 + $0x154] sm:$0xf0] }
 0x29c   :  { %11226 = vmatmul.msk.bf16.gmra.mxu1 %vm1228_vm0, %v11046_v23  ;;  %v11058_v11 = vor.u32 %v13366_v6, %v11057_v5  ;;  %v11065_v23 = vld [vmem:[%s18659_s0 + $0x160] sm:$0xf] }
 0x29d   :  { %v1709_v26 = vmax.f32 %v1570_v25, 0.0 }
 0x29f   :  { %v1777_v28 = vpack.c.bf16 %v1709_v26, %v1709_v26  ;;  %v13369_v26 = vld [vmem:[%s18659_s0 + $0x174] sm:$0xf] }
 0x2a0   :  { %v1392_v29 = vpop.f32.mrf.mxu0 }
 0x2a1   :  { %1846 = vst.msk [vmem:[#allocation4 + $0x50] sm:$0xf] %vm1825_vm1, %v1777_v28  ;;  %v1393_v30 = vadd.f32 %v15840_v27, %v1392_v29  ;;  %v1576_v31 = vpop.f32.mrf.mxu1  ;;  %v11075_v28 = vld [vmem:[%s18659_s0 + $0x178] sm:$0xf0] }
 0x2a2   :  { %v11078_v33 = vor.u32 %v13369_v26, %v11075_v28 }
 0x2a3   :  { %v1572_v32 = vadd.f32 %v1571_v12, %v1393_v30 }
 0x2a5   :  { %v1710_v35 = vmax.f32 %v1572_v32, 0.0 }
 0x2a7   :  { %v1778_v38 = vpack.c.bf16 %v1710_v35, %v1710_v35 }
 0x2a8   :  { %v1395_v40 = vpop.f32.mrf.mxu0 }
 0x2a9   :  { %1847 = vst.msk [vmem:[#allocation4 + $0x54] sm:$0xf] %vm1825_vm1, %v1778_v38  ;;  %v1396_v41 = vadd.f32 %v15840_v27, %v1395_v40  ;;  %v1579_v43 = vpop.f32.mrf.mxu1 }
 0x2ab   :  { %v1575_v44 = vadd.f32 %v1574_v24, %v1396_v41  ;;  %1434 = vmatmul.bf16.gmra.mxu0 %v11042_v39  ;;  %v13368_v24 = vld [vmem:[%s18659_s0 + $0x164] sm:$0xf0] }
 0x2ac   :  { %11227 = vmatmul.msk.bf16.gmra.mxu1 %vm1228_vm0, %v11054_v42  ;;  %v11066_v30 = vor.u32 %v13368_v24, %v11065_v23  ;;  %v11073_v42 = vld [vmem:[%s18659_s0 + $0x170] sm:$0xf] }
 0x2ad   :  { %v1711_v45 = vmax.f32 %v1575_v44, 0.0 }
 0x2af   :  { %v1779_v46 = vpack.c.bf16 %v1711_v45, %v1711_v45  ;;  %v13371_v45 = vld [vmem:[%s18659_s0 + $0x184] sm:$0xf] }
 0x2b0   :  { %v1397_v47 = vpop.f32.mrf.mxu0 }
 0x2b1   :  { %1848 = vst.msk [vmem:[#allocation4 + $0x58] sm:$0xf] %vm1825_vm1, %v1779_v46  ;;  %v1398_v48 = vadd.f32 %v15840_v27, %v1397_v47  ;;  %v1581_v49 = vpop.f32.mrf.mxu1  ;;  %v11083_v46 = vld [vmem:[%s18659_s0 + $0x188] sm:$0xf0] }
 0x2b2   :  { %v11086_v51 = vor.u32 %v13371_v45, %v11083_v46 }
 0x2b3   :  { %v1577_v50 = vadd.f32 %v1576_v31, %v1398_v48 }
 0x2b5   :  { %v1712_v53 = vmax.f32 %v1577_v50, 0.0 }
 0x2b7   :  { %v1780_v56 = vpack.c.bf16 %v1712_v53, %v1712_v53 }
 0x2b8   :  { %v1400_v58 = vpop.f32.mrf.mxu0 }
 0x2b9   :  { %1849 = vst.msk [vmem:[#allocation4 + $0x5c] sm:$0xf] %vm1825_vm1, %v1780_v56  ;;  %v1401_v59 = vadd.f32 %v15840_v27, %v1400_v58  ;;  %v1584_v61 = vpop.f32.mrf.mxu1 }
 0x2bb   :  { %v1580_v62 = vadd.f32 %v1579_v43, %v1401_v59  ;;  %1439 = vmatmul.bf16.gmra.mxu0 %v11050_v57  ;;  %v13370_v43 = vld [vmem:[%s18659_s0 + $0x174] sm:$0xf0] }
 0x2bc   :  { %11228 = vmatmul.msk.bf16.gmra.mxu1 %vm1228_vm0, %v11062_v60  ;;  %v11074_v48 = vor.u32 %v13370_v43, %v11073_v42  ;;  %v11081_v60 = vld [vmem:[%s18659_s0 + $0x180] sm:$0xf] }
 0x2bd   :  { %v1713_v63 = vmax.f32 %v1580_v62, 0.0 }
 0x2bf   :  { %v1781_v0 = vpack.c.bf16 %v1713_v63, %v1713_v63  ;;  %v13373_v63 = vld [vmem:[%s18659_s0 + $0x194] sm:$0xf] }
 0x2c0   :  { %v1402_v1 = vpop.f32.mrf.mxu0 }
 0x2c1   :  { %1850 = vst.msk [vmem:[#allocation4 + $0x60] sm:$0xf] %vm1825_vm1, %v1781_v0  ;;  %v1403_v2 = vadd.f32 %v15840_v27, %v1402_v1  ;;  %v1586_v3 = vpop.f32.mrf.mxu1  ;;  %v11091_v0 = vld [vmem:[%s18659_s0 + $0x198] sm:$0xf0] }
 0x2c2   :  { %v11094_v5 = vor.u32 %v13373_v63, %v11091_v0 }
 0x2c3   :  { %v1582_v4 = vadd.f32 %v1581_v49, %v1403_v2 }
 0x2c5   :  { %v1714_v7 = vmax.f32 %v1582_v4, 0.0 }
 0x2c7   :  { %v1782_v10 = vpack.c.bf16 %v1714_v7, %v1714_v7 }
 0x2c8   :  { %v1405_v12 = vpop.f32.mrf.mxu0 }
 0x2c9   :  { %1851 = vst.msk [vmem:[#allocation4 + $0x64] sm:$0xf] %vm1825_vm1, %v1782_v10  ;;  %v1406_v13 = vadd.f32 %v15840_v27, %v1405_v12  ;;  %v1589_v15 = vpop.f32.mrf.mxu1 }
 0x2cb   :  { %v1585_v16 = vadd.f32 %v1584_v61, %v1406_v13  ;;  %1444 = vmatmul.bf16.gmra.mxu0 %v11058_v11  ;;  %v13372_v61 = vld [vmem:[%s18659_s0 + $0x184] sm:$0xf0] }
 0x2cc   :  { %11229 = vmatmul.msk.bf16.gmra.mxu1 %vm1228_vm0, %v11070_v14  ;;  %v11082_v2 = vor.u32 %v13372_v61, %v11081_v60  ;;  %v11089_v14 = vld [vmem:[%s18659_s0 + $0x190] sm:$0xf] }
 0x2cd   :  { %v1715_v17 = vmax.f32 %v1585_v16, 0.0 }
 0x2cf   :  { %v1783_v18 = vpack.c.bf16 %v1715_v17, %v1715_v17  ;;  %v13375_v17 = vld [vmem:[%s18659_s0 + $0x1a4] sm:$0xf] }
 0x2d0   :  { %v1407_v19 = vpop.f32.mrf.mxu0 }
 0x2d1   :  { %1852 = vst.msk [vmem:[#allocation4 + $0x68] sm:$0xf] %vm1825_vm1, %v1783_v18  ;;  %v1408_v20 = vadd.f32 %v15840_v27, %v1407_v19  ;;  %v1591_v21 = vpop.f32.mrf.mxu1  ;;  %v11099_v18 = vld [vmem:[%s18659_s0 + $0x1a8] sm:$0xf0] }
 0x2d2   :  { %v11102_v23 = vor.u32 %v13375_v17, %v11099_v18 }
 0x2d3   :  { %v1587_v22 = vadd.f32 %v1586_v3, %v1408_v20 }
 0x2d5   :  { %v1716_v25 = vmax.f32 %v1587_v22, 0.0 }
 0x2d7   :  { %v1784_v29 = vpack.c.bf16 %v1716_v25, %v1716_v25 }
 0x2d8   :  { %v1410_v31 = vpop.f32.mrf.mxu0 }
 0x2d9   :  { %1853 = vst.msk [vmem:[#allocation4 + $0x6c] sm:$0xf] %vm1825_vm1, %v1784_v29  ;;  %v1411_v32 = vadd.f32 %v15840_v27, %v1410_v31  ;;  %v1594_v34 = vpop.f32.mrf.mxu1 }
 0x2db   :  { %v1590_v35 = vadd.f32 %v1589_v15, %v1411_v32  ;;  %1449 = vmatmul.bf16.gmra.mxu0 %v11066_v30  ;;  %v13374_v15 = vld [vmem:[%s18659_s0 + $0x194] sm:$0xf0] }
 0x2dc   :  { %11230 = vmatmul.msk.bf16.gmra.mxu1 %vm1228_vm0, %v11078_v33  ;;  %v11090_v20 = vor.u32 %v13374_v15, %v11089_v14  ;;  %v11097_v33 = vld [vmem:[%s18659_s0 + $0x1a0] sm:$0xf] }
 0x2dd   :  { %v1717_v36 = vmax.f32 %v1590_v35, 0.0 }
 0x2df   :  { %v1785_v37 = vpack.c.bf16 %v1717_v36, %v1717_v36  ;;  %v13377_v36 = vld [vmem:[%s18659_s0 + $0x1b4] sm:$0xf] }
 0x2e0   :  { %v1412_v38 = vpop.f32.mrf.mxu0 }
 0x2e1   :  { %1854 = vst.msk [vmem:[#allocation4 + $0x70] sm:$0xf] %vm1825_vm1, %v1785_v37  ;;  %v1413_v39 = vadd.f32 %v15840_v27, %v1412_v38  ;;  %v1596_v40 = vpop.f32.mrf.mxu1  ;;  %v11107_v37 = vld [vmem:[%s18659_s0 + $0x1b8] sm:$0xf0] }
 0x2e2   :  { %v11110_v42 = vor.u32 %v13377_v36, %v11107_v37 }
 0x2e3   :  { %v1592_v41 = vadd.f32 %v1591_v21, %v1413_v39 }
 0x2e5   :  { %v1718_v44 = vmax.f32 %v1592_v41, 0.0 }
 0x2e7   :  { %v1786_v47 = vpack.c.bf16 %v1718_v44, %v1718_v44 }
 0x2e8   :  { %v1415_v49 = vpop.f32.mrf.mxu0 }
 0x2e9   :  { %1855 = vst.msk [vmem:[#allocation4 + $0x74] sm:$0xf] %vm1825_vm1, %v1786_v47  ;;  %v1416_v50 = vadd.f32 %v15840_v27, %v1415_v49  ;;  %v1599_v52 = vpop.f32.mrf.mxu1 }
 0x2eb   :  { %v1595_v53 = vadd.f32 %v1594_v34, %v1416_v50  ;;  %1454 = vmatmul.bf16.gmra.mxu0 %v11074_v48  ;;  %v13376_v34 = vld [vmem:[%s18659_s0 + $0x1a4] sm:$0xf0] }
 0x2ec   :  { %11231 = vmatmul.msk.bf16.gmra.mxu1 %vm1228_vm0, %v11086_v51  ;;  %v11098_v39 = vor.u32 %v13376_v34, %v11097_v33  ;;  %v11105_v51 = vld [vmem:[%s18659_s0 + $0x1b0] sm:$0xf] }
 0x2ed   :  { %v1719_v54 = vmax.f32 %v1595_v53, 0.0 }
 0x2ef   :  { %v1787_v55 = vpack.c.bf16 %v1719_v54, %v1719_v54  ;;  %v13379_v54 = vld [vmem:[%s18659_s0 + $0x1c4] sm:$0xf] }
 0x2f0   :  { %v1417_v56 = vpop.f32.mrf.mxu0 }
 0x2f1   :  { %1856 = vst.msk [vmem:[#allocation4 + $0x78] sm:$0xf] %vm1825_vm1, %v1787_v55  ;;  %v1418_v57 = vadd.f32 %v15840_v27, %v1417_v56  ;;  %v1601_v58 = vpop.f32.mrf.mxu1  ;;  %v11115_v55 = vld [vmem:[%s18659_s0 + $0x1c8] sm:$0xf0] }
 0x2f2   :  { %v11118_v60 = vor.u32 %v13379_v54, %v11115_v55  ;;  %v13389_v54 = vld [vmem:[%s18659_s0 + $0x214] sm:$0xf]  ;;  %v11155_v55 = vld [vmem:[%s18659_s0 + $0x218] sm:$0xf0] }
 0x2f3   :  { %v1597_v59 = vadd.f32 %v1596_v40, %v1418_v57 }
 0x2f5   :  { %v1720_v62 = vmax.f32 %v1597_v59, 0.0 }
 0x2f7   :  { %v1788_v1 = vpack.c.bf16 %v1720_v62, %v1720_v62 }
 0x2f8   :  { %v1420_v3 = vpop.f32.mrf.mxu0 }
 0x2f9   :  { %1857 = vst.msk [vmem:[#allocation4 + $0x7c] sm:$0xf] %vm1825_vm1, %v1788_v1  ;;  %v1421_v4 = vadd.f32 %v15840_v27, %v1420_v3  ;;  %v1604_v6 = vpop.f32.mrf.mxu1 }
 0x2fb   :  { %v1600_v7 = vadd.f32 %v1599_v52, %v1421_v4  ;;  %1459 = vmatmul.bf16.gmra.mxu0 %v11082_v2  ;;  %v13378_v52 = vld [vmem:[%s18659_s0 + $0x1b4] sm:$0xf0] }
 0x2fc   :  { %11232 = vmatmul.msk.bf16.gmra.mxu1 %vm1228_vm0, %v11094_v5  ;;  %v11106_v57 = vor.u32 %v13378_v52, %v11105_v51  ;;  %v11113_v5 = vld [vmem:[%s18659_s0 + $0x1c0] sm:$0xf] }
 0x2fd   :  { %v1721_v8 = vmax.f32 %v1600_v7, 0.0 }
 0x2ff   :  { %v1789_v9 = vpack.c.bf16 %v1721_v8, %v1721_v8  ;;  %v13381_v8 = vld [vmem:[%s18659_s0 + $0x1d4] sm:$0xf] }
 0x300   :  { %v1422_v10 = vpop.f32.mrf.mxu0 }
 0x301   :  { %1858 = vst.msk [vmem:[#allocation4 + $0x80] sm:$0xf] %vm1825_vm1, %v1789_v9  ;;  %v1423_v11 = vadd.f32 %v15840_v27, %v1422_v10  ;;  %v1606_v12 = vpop.f32.mrf.mxu1  ;;  %v11123_v9 = vld [vmem:[%s18659_s0 + $0x1d8] sm:$0xf0] }
 0x302   :  { %v11126_v14 = vor.u32 %v13381_v8, %v11123_v9 }
 0x303   :  { %v1602_v13 = vadd.f32 %v1601_v58, %v1423_v11 }
 0x305   :  { %v1722_v16 = vmax.f32 %v1602_v13, 0.0 }
 0x307   :  { %v1790_v19 = vpack.c.bf16 %v1722_v16, %v1722_v16 }
 0x308   :  { %v1425_v21 = vpop.f32.mrf.mxu0 }
 0x309   :  { %1859 = vst.msk [vmem:[#allocation4 + $0x84] sm:$0xf] %vm1825_vm1, %v1790_v19  ;;  %v1426_v22 = vadd.f32 %v15840_v27, %v1425_v21  ;;  %v1609_v24 = vpop.f32.mrf.mxu1 }
 0x30b   :  { %v1605_v25 = vadd.f32 %v1604_v6, %v1426_v22  ;;  %1464 = vmatmul.bf16.gmra.mxu0 %v11090_v20  ;;  %v13380_v6 = vld [vmem:[%s18659_s0 + $0x1c4] sm:$0xf0] }
 0x30c   :  { %11233 = vmatmul.msk.bf16.gmra.mxu1 %vm1228_vm0, %v11102_v23  ;;  %v11114_v11 = vor.u32 %v13380_v6, %v11113_v5  ;;  %v11121_v23 = vld [vmem:[%s18659_s0 + $0x1d0] sm:$0xf]  ;;  %v16249_v6 = vld [vmem:[%s18661_s2] ss:$0 sm:$0xff] }
 0x30d   :  { %v1723_v26 = vmax.f32 %v1605_v25, 0.0 }
 0x30f   :  { %v1791_v28 = vpack.c.bf16 %v1723_v26, %v1723_v26  ;;  %v13383_v26 = vld [vmem:[%s18659_s0 + $0x1e4] sm:$0xf] }
 0x310   :  { %v1427_v29 = vpop.f32.mrf.mxu0 }
 0x311   :  { %1860 = vst.msk [vmem:[#allocation4 + $0x88] sm:$0xf] %vm1825_vm1, %v1791_v28  ;;  %v1428_v30 = vadd.f32 %v15840_v27, %v1427_v29  ;;  %v1611_v31 = vpop.f32.mrf.mxu1  ;;  %v11131_v28 = vld [vmem:[%s18659_s0 + $0x1e8] sm:$0xf0] }
 0x312   :  { %v11134_v33 = vor.u32 %v13383_v26, %v11131_v28 }
 0x313   :  { %v1607_v32 = vadd.f32 %v1606_v12, %v1428_v30 }
 0x315   :  { %v1724_v35 = vmax.f32 %v1607_v32, 0.0 }
 0x317   :  { %v1792_v38 = vpack.c.bf16 %v1724_v35, %v1724_v35 }
 0x318   :  { %v1430_v40 = vpop.f32.mrf.mxu0 }
 0x319   :  { %1861 = vst.msk [vmem:[#allocation4 + $0x8c] sm:$0xf] %vm1825_vm1, %v1792_v38  ;;  %v1431_v41 = vadd.f32 %v15840_v27, %v1430_v40  ;;  %v1614_v43 = vpop.f32.mrf.mxu1 }
 0x31b   :  { %v1610_v44 = vadd.f32 %v1609_v24, %v1431_v41  ;;  %1469 = vmatmul.bf16.gmra.mxu0 %v11098_v39  ;;  %v13382_v24 = vld [vmem:[%s18659_s0 + $0x1d4] sm:$0xf0] }
 0x31c   :  { %11234 = vmatmul.msk.bf16.gmra.mxu1 %vm1228_vm0, %v11110_v42  ;;  %v11122_v30 = vor.u32 %v13382_v24, %v11121_v23  ;;  %v11129_v42 = vld [vmem:[%s18659_s0 + $0x1e0] sm:$0xf] }
 0x31d   :  { %v1725_v45 = vmax.f32 %v1610_v44, 0.0 }
 0x31f   :  { %v1793_v46 = vpack.c.bf16 %v1725_v45, %v1725_v45  ;;  %v13385_v45 = vld [vmem:[%s18659_s0 + $0x1f4] sm:$0xf] }
 0x320   :  { %v1432_v47 = vpop.f32.mrf.mxu0 }
 0x321   :  { %1862 = vst.msk [vmem:[#allocation4 + $0x90] sm:$0xf] %vm1825_vm1, %v1793_v46  ;;  %v1433_v48 = vadd.f32 %v15840_v27, %v1432_v47  ;;  %v1616_v49 = vpop.f32.mrf.mxu1  ;;  %v11139_v46 = vld [vmem:[%s18659_s0 + $0x1f8] sm:$0xf0] }
 0x322   :  { %v11142_v51 = vor.u32 %v13385_v45, %v11139_v46 }
 0x323   :  { %v1612_v50 = vadd.f32 %v1611_v31, %v1433_v48 }
 0x325   :  { %v1726_v53 = vmax.f32 %v1612_v50, 0.0 }
 0x327   :  { %v1794_v56 = vpack.c.bf16 %v1726_v53, %v1726_v53 }
 0x328   :  { %v1435_v58 = vpop.f32.mrf.mxu0 }
 0x329   :  { %1863 = vst.msk [vmem:[#allocation4 + $0x94] sm:$0xf] %vm1825_vm1, %v1794_v56  ;;  %v1436_v59 = vadd.f32 %v15840_v27, %v1435_v58  ;;  %v1619_v61 = vpop.f32.mrf.mxu1 }
 0x32b   :  { %v1615_v62 = vadd.f32 %v1614_v43, %v1436_v59  ;;  %1474 = vmatmul.bf16.gmra.mxu0 %v11106_v57  ;;  %v13384_v43 = vld [vmem:[%s18659_s0 + $0x1e4] sm:$0xf0]  ;;  %v11158_v57 = vor.u32 %v13389_v54, %v11155_v55 }
 0x32c   :  { %11235 = vmatmul.msk.bf16.gmra.mxu1 %vm1228_vm0, %v11118_v60  ;;  %v11130_v48 = vor.u32 %v13384_v43, %v11129_v42 }
 0x32d   :  { %v1727_v63 = vmax.f32 %v1615_v62, 0.0  ;;  %11240 = vmatmul.msk.bf16.vlgmr.msra.gmra.mxu3 %vm1228_vm0, %v11158_v57 }
 0x32f   :  { %v1795_v0 = vpack.c.bf16 %v1727_v63, %v1727_v63  ;;  %v11137_v63 = vld [vmem:[%s18659_s0 + $0x1f0] sm:$0xf] }
 0x330   :  { %v1437_v1 = vpop.f32.mrf.mxu0 }
 0x331   :  { %1864 = vst.msk [vmem:[#allocation4 + $0x98] sm:$0xf] %vm1825_vm1, %v1795_v0  ;;  %v1438_v2 = vadd.f32 %v15840_v27, %v1437_v1  ;;  %v1621_v3 = vpop.f32.mrf.mxu1  ;;  %v13386_v0 = vld [vmem:[%s18659_s0 + $0x1f4] sm:$0xf0] }
 0x333   :  { %v1617_v4 = vadd.f32 %v1616_v49, %v1438_v2  ;;  %v13387_v2 = vld [vmem:[%s18659_s0 + $0x204] sm:$0xf] }
 0x335   :  { %v1728_v7 = vmax.f32 %v1617_v4, 0.0  ;;  %v11138_v4 = vor.u32 %v13386_v0, %v11137_v63 }
 0x337   :  { %v1796_v10 = vpack.c.bf16 %v1728_v7, %v1728_v7 }
 0x338   :  { %v1440_v12 = vpop.f32.mrf.mxu0 }
 0x339   :  { %1865 = vst.msk [vmem:[#allocation4 + $0x9c] sm:$0xf] %vm1825_vm1, %v1796_v10  ;;  %v1441_v13 = vadd.f32 %v15840_v27, %v1440_v12  ;;  %v1624_v15 = vpop.f32.mrf.mxu1 }
 0x33b   :  { %v1620_v16 = vadd.f32 %v1619_v61, %v1441_v13  ;;  %1479 = vmatmul.bf16.gmra.mxu0 %v11114_v11 }
 0x33c   :  { %11236 = vmatmul.msk.bf16.gmra.mxu1 %vm1228_vm0, %v11126_v14 }
 0x33d   :  { %v1729_v17 = vmax.f32 %v1620_v16, 0.0 }
 0x33f   :  { %v1797_v18 = vpack.c.bf16 %v1729_v17, %v1729_v17  ;;  %v11145_v17 = vld [vmem:[%s18659_s0 + $0x200] sm:$0xf] }
 0x340   :  { %v1442_v19 = vpop.f32.mrf.mxu0 }
 0x341   :  { %1866 = vst.msk [vmem:[#allocation4 + $0xa0] sm:$0xf] %vm1825_vm1, %v1797_v18  ;;  %v1443_v20 = vadd.f32 %v15840_v27, %v1442_v19  ;;  %v1626_v21 = vpop.f32.mrf.mxu1  ;;  %v13388_v18 = vld [vmem:[%s18659_s0 + $0x204] sm:$0xf0] }
 0x343   :  { %v1622_v22 = vadd.f32 %v1621_v3, %v1443_v20  ;;  %v11147_v3 = vld [vmem:[%s18659_s0 + $0x208] sm:$0xf0] }
 0x344   :  { %v11150_v8 = vor.u32 %v13387_v2, %v11147_v3 }
 0x345   :  { %v1730_v25 = vmax.f32 %v1622_v22, 0.0 }
 0x347   :  { %v1798_v29 = vpack.c.bf16 %v1730_v25, %v1730_v25 }
 0x348   :  { %v1445_v31 = vpop.f32.mrf.mxu0 }
 0x349   :  { %1867 = vst.msk [vmem:[#allocation4 + $0xa4] sm:$0xf] %vm1825_vm1, %v1798_v29  ;;  %v1446_v32 = vadd.f32 %v15840_v27, %v1445_v31  ;;  %v1629_v34 = vpop.f32.mrf.mxu1 }
 0x34b   :  { %v1625_v35 = vadd.f32 %v1624_v15, %v1446_v32  ;;  %1484 = vmatmul.bf16.gmra.mxu0 %v11122_v30 }
 0x34c   :  { %11237 = vmatmul.msk.bf16.gmra.mxu1 %vm1228_vm0, %v11134_v33  ;;  %v11153_v33 = vld [vmem:[%s18659_s0 + $0x210] sm:$0xf] }
 0x34d   :  { %v1731_v36 = vmax.f32 %v1625_v35, 0.0 }
 0x34f   :  { %v1799_v37 = vpack.c.bf16 %v1731_v36, %v1731_v36 }
 0x350   :  { %v1447_v38 = vpop.f32.mrf.mxu0 }
 0x351   :  { %1868 = vst.msk [vmem:[#allocation4 + $0xa8] sm:$0xf] %vm1825_vm1, %v1799_v37  ;;  %v1448_v39 = vadd.f32 %v15840_v27, %v1447_v38  ;;  %v1631_v40 = vpop.f32.mrf.mxu1 }
 0x353   :  { %v1627_v41 = vadd.f32 %v1626_v21, %v1448_v39  ;;  %v11146_v21 = vor.u32 %v13388_v18, %v11145_v17 }
 0x355   :  { %v1732_v44 = vmax.f32 %v1627_v41, 0.0 }
 0x357   :  { %v1800_v47 = vpack.c.bf16 %v1732_v44, %v1732_v44 }
 0x358   :  { %v1450_v49 = vpop.f32.mrf.mxu0 }
 0x359   :  { %1869 = vst.msk [vmem:[#allocation4 + $0xac] sm:$0xf] %vm1825_vm1, %v1800_v47  ;;  %v1451_v50 = vadd.f32 %v15840_v27, %v1450_v49  ;;  %v1634_v52 = vpop.f32.mrf.mxu1 }
 0x35b   :  { %v1630_v53 = vadd.f32 %v1629_v34, %v1451_v50  ;;  %1489 = vmatmul.bf16.gmra.mxu0 %v11130_v48  ;;  %v13390_v34 = vld [vmem:[%s18659_s0 + $0x214] sm:$0xf0] }
 0x35c   :  { %11238 = vmatmul.msk.bf16.gmra.mxu1 %vm1228_vm0, %v11142_v51  ;;  %v11154_v37 = vor.u32 %v13390_v34, %v11153_v33 }
 0x35d   :  { %v1733_v56 = vmax.f32 %v1630_v53, 0.0 }
 0x35f   :  { %v1801_v58 = vpack.c.bf16 %v1733_v56, %v1733_v56 }
 0x360   :  { %v1452_v59 = vpop.f32.mrf.mxu0 }
 0x361   :  { %1870 = vst.msk [vmem:[#allocation4 + $0xb0] sm:$0xf] %vm1825_vm1, %v1801_v58  ;;  %v1453_v60 = vadd.f32 %v15840_v27, %v1452_v59  ;;  %v1636_v61 = vpop.f32.mrf.mxu1 }
 0x363   :  { %v1632_v62 = vadd.f32 %v1631_v40, %v1453_v60 }
 0x365   :  { %v1734_v1 = vmax.f32 %v1632_v62, 0.0 }
 0x367   :  { %v1802_v27 = vpack.c.bf16 %v1734_v1, %v1734_v1 }
 0x368   :  { %v1455_v5 = vpop.f32.mrf.mxu0 }
 0x369   :  { %1871 = vst.msk [vmem:[#allocation4 + $0xb4] sm:$0xf] %vm1825_vm1, %v1802_v27  ;;  %v1456_v7 = vadd.f32 %v16249_v6, %v1455_v5  ;;  %v1639_v9 = vpop.f32.mrf.mxu1 }
 0x36b   :  { %v1635_v10 = vadd.f32 %v1634_v52, %v1456_v7  ;;  %1494 = vmatmul.bf16.gmra.mxu0 %v11138_v4 }
 0x36c   :  { %11239 = vmatmul.msk.bf16.gmra.mxu1 %vm1228_vm0, %v11150_v8 }
 0x36d   :  { %v1735_v11 = vmax.f32 %v1635_v10, 0.0 }
 0x36f   :  { %v1803_v12 = vpack.c.bf16 %v1735_v11, %v1735_v11 }
 0x370   :  { %v1457_v13 = vpop.f32.mrf.mxu0 }
 0x371   :  { %1872 = vst.msk [vmem:[#allocation4 + $0xb8] sm:$0xf] %vm1825_vm1, %v1803_v12  ;;  %v1458_v14 = vadd.f32 %v16249_v6, %v1457_v13  ;;  %v1641_v15 = vpop.f32.mrf.mxu1 }
 0x373   :  { %v1637_v16 = vadd.f32 %v1636_v61, %v1458_v14 }
 0x375   :  { %v1736_v19 = vmax.f32 %v1637_v16, 0.0 }
 0x377   :  { %v1804_v20 = vpack.c.bf16 %v1736_v19, %v1736_v19 }
 0x378   :  { %v1460_v22 = vpop.f32.mrf.mxu0 }
 0x379   :  { %1873 = vst.msk [vmem:[#allocation4 + $0xbc] sm:$0xf] %vm1825_vm1, %v1804_v20  ;;  %v1461_v23 = vadd.f32 %v16249_v6, %v1460_v22  ;;  %v1644_v24 = vpop.f32.mrf.mxu1 }
 0x37b   :  { %v1640_v25 = vadd.f32 %v1639_v9, %v1461_v23  ;;  %1499 = vmatmul.bf16.gmra.mxu0 %v11146_v21 }
 0x37d   :  { %v1737_v26 = vmax.f32 %v1640_v25, 0.0 }
 0x37f   :  { %v1805_v28 = vpack.c.bf16 %v1737_v26, %v1737_v26 }
 0x380   :  { %v1462_v29 = vpop.f32.mrf.mxu0 }
 0x381   :  { %1874 = vst.msk [vmem:[#allocation4 + $0xc0] sm:$0xf] %vm1825_vm1, %v1805_v28  ;;  %v1463_v30 = vadd.f32 %v16249_v6, %v1462_v29  ;;  %v1646_v31 = vpop.f32.mrf.mxu1 }
 0x383   :  { %v1642_v32 = vadd.f32 %v1641_v15, %v1463_v30 }
 0x385   :  { %v1738_v35 = vmax.f32 %v1642_v32, 0.0 }
 0x387   :  { %v1806_v36 = vpack.c.bf16 %v1738_v35, %v1738_v35 }
 0x388   :  { %v1465_v38 = vpop.f32.mrf.mxu0 }
 0x389   :  { %1875 = vst.msk [vmem:[#allocation4 + $0xc4] sm:$0xf] %vm1825_vm1, %v1806_v36  ;;  %v1466_v39 = vadd.f32 %v16249_v6, %v1465_v38  ;;  %v1649_v40 = vpop.f32.mrf.mxu1 }
 0x38b   :  { %v1645_v41 = vadd.f32 %v1644_v24, %v1466_v39  ;;  %1504 = vmatmul.bf16.gmra.mxu0 %v11154_v37 }
 0x38d   :  { %v1739_v42 = vmax.f32 %v1645_v41, 0.0 }
 0x38f   :  { %v1807_v43 = vpack.c.bf16 %v1739_v42, %v1739_v42 }
 0x390   :  { %v1467_v44 = vpop.f32.mrf.mxu0 }
 0x391   :  { %1876 = vst.msk [vmem:[#allocation4 + $0xc8] sm:$0xf] %vm1825_vm1, %v1807_v43  ;;  %v1468_v45 = vadd.f32 %v16249_v6, %v1467_v44  ;;  %v1651_v46 = vpop.f32.mrf.mxu1 }
 0x393   :  { %v1647_v47 = vadd.f32 %v1646_v31, %v1468_v45 }
 0x395   :  { %v1740_v48 = vmax.f32 %v1647_v47, 0.0 }
 0x397   :  { %v1808_v49 = vpack.c.bf16 %v1740_v48, %v1740_v48 }
 0x398   :  { %v1470_v50 = vpop.f32.mrf.mxu0 }
 0x399   :  { %1877 = vst.msk [vmem:[#allocation4 + $0xcc] sm:$0xf] %vm1825_vm1, %v1808_v49  ;;  %v1471_v51 = vadd.f32 %v16249_v6, %v1470_v50  ;;  %v1654_v52 = vpop.f32.mrf.mxu1 }
 0x39b   :  { %v1650_v53 = vadd.f32 %v1649_v40, %v1471_v51 }
 0x39d   :  { %v1741_v54 = vmax.f32 %v1650_v53, 0.0 }
 0x39f   :  { %v1809_v55 = vpack.c.bf16 %v1741_v54, %v1741_v54 }
 0x3a0   :  { %v1472_v56 = vpop.f32.mrf.mxu0 }
 0x3a1   :  { %1878 = vst.msk [vmem:[#allocation4 + $0xd0] sm:$0xf] %vm1825_vm1, %v1809_v55  ;;  %v1473_v57 = vadd.f32 %v16249_v6, %v1472_v56  ;;  %v1656_v58 = vpop.f32.mrf.mxu1 }
 0x3a3   :  { %v1652_v59 = vadd.f32 %v1651_v46, %v1473_v57 }
 0x3a5   :  { %v1742_v60 = vmax.f32 %v1652_v59, 0.0 }
 0x3a7   :  { %v1810_v61 = vpack.c.bf16 %v1742_v60, %v1742_v60 }
 0x3a8   :  { %v1475_v62 = vpop.f32.mrf.mxu0 }
 0x3a9   :  { %1879 = vst.msk [vmem:[#allocation4 + $0xd4] sm:$0xf] %vm1825_vm1, %v1810_v61  ;;  %v1476_v63 = vadd.f32 %v16249_v6, %v1475_v62  ;;  %v1659_v0 = vpop.f32.mrf.mxu1 }
 0x3ab   :  { %v1655_v1 = vadd.f32 %v1654_v52, %v1476_v63 }
 0x3ad   :  { %v1743_v2 = vmax.f32 %v1655_v1, 0.0 }
 0x3af   :  { %v1811_v3 = vpack.c.bf16 %v1743_v2, %v1743_v2 }
 0x3b0   :  { %v1477_v27 = vpop.f32.mrf.mxu0 }
 0x3b1   :  { %1880 = vst.msk [vmem:[#allocation4 + $0xd8] sm:$0xf] %vm1825_vm1, %v1811_v3  ;;  %v1478_v4 = vadd.f32 %v16249_v6, %v1477_v27  ;;  %v1661_v5 = vpop.f32.mrf.mxu1 }
 0x3b3   :  { %v1657_v7 = vadd.f32 %v1656_v58, %v1478_v4  ;;  %v1684_v4 = vpop.f32.mrf.mxu3 }
 0x3b5   :  { %v1744_v8 = vmax.f32 %v1657_v7, 0.0 }
 0x3b7   :  { %v1812_v9 = vpack.c.bf16 %v1744_v8, %v1744_v8 }
 0x3b8   :  { %v1480_v10 = vpop.f32.mrf.mxu0 }
 0x3b9   :  { %1881 = vst.msk [vmem:[#allocation4 + $0xdc] sm:$0xf] %vm1825_vm1, %v1812_v9  ;;  %v1481_v11 = vadd.f32 %v16249_v6, %v1480_v10  ;;  %v1664_v12 = vpop.f32.mrf.mxu1 }
 0x3bb   :  { %v1660_v13 = vadd.f32 %v1659_v0, %v1481_v11 }
 0x3bd   :  { %v1745_v14 = vmax.f32 %v1660_v13, 0.0 }
 0x3bf   :  { %v1813_v15 = vpack.c.bf16 %v1745_v14, %v1745_v14 }
 0x3c0   :  { %v1482_v16 = vpop.f32.mrf.mxu0 }
 0x3c1   :  { %1882 = vst.msk [vmem:[#allocation4 + $0xe0] sm:$0xf] %vm1825_vm1, %v1813_v15  ;;  %v1483_v17 = vadd.f32 %v16249_v6, %v1482_v16  ;;  %v1666_v19 = vpop.f32.mrf.mxu1 }
 0x3c3   :  { %v1662_v18 = vadd.f32 %v1661_v5, %v1483_v17 }
 0x3c5   :  { %v1746_v20 = vmax.f32 %v1662_v18, 0.0 }
 0x3c7   :  { %v1814_v21 = vpack.c.bf16 %v1746_v20, %v1746_v20 }
 0x3c8   :  { %v1485_v22 = vpop.f32.mrf.mxu0 }
 0x3c9   :  { %1883 = vst.msk [vmem:[#allocation4 + $0xe4] sm:$0xf] %vm1825_vm1, %v1814_v21  ;;  %v1486_v23 = vadd.f32 %v16249_v6, %v1485_v22  ;;  %v1669_v26 = vpop.f32.mrf.mxu1 }
 0x3cb   :  { %v1665_v24 = vadd.f32 %v1664_v12, %v1486_v23  ;;  %v1686_v12 = vpop.f32.mrf.mxu3 }
 0x3cd   :  { %v1747_v25 = vmax.f32 %v1665_v24, 0.0 }
 0x3cf   :  { %v1815_v28 = vpack.c.bf16 %v1747_v25, %v1747_v25 }
 0x3d0   :  { %v1487_v29 = vpop.f32.mrf.mxu0 }
 0x3d1   :  { %1884 = vst.msk [vmem:[#allocation4 + $0xe8] sm:$0xf] %vm1825_vm1, %v1815_v28  ;;  %v1488_v30 = vadd.f32 %v16249_v6, %v1487_v29  ;;  %v1671_v35 = vpop.f32.mrf.mxu1 }
 0x3d3   :  { %v1667_v31 = vadd.f32 %v1666_v19, %v1488_v30 }
 0x3d5   :  { %v1748_v32 = vmax.f32 %v1667_v31, 0.0 }
 0x3d7   :  { %v1816_v33 = vpack.c.bf16 %v1748_v32, %v1748_v32 }
 0x3d8   :  { %v1490_v34 = vpop.f32.mrf.mxu0 }
 0x3d9   :  { %1885 = vst.msk [vmem:[#allocation4 + $0xec] sm:$0xf] %vm1825_vm1, %v1816_v33  ;;  %v1491_v36 = vadd.f32 %v16249_v6, %v1490_v34  ;;  %v1674_v42 = vpop.f32.mrf.mxu1 }
 0x3db   :  { %v1670_v37 = vadd.f32 %v1669_v26, %v1491_v36 }
 0x3dd   :  { %v1749_v38 = vmax.f32 %v1670_v37, 0.0 }
 0x3df   :  { %v1817_v39 = vpack.c.bf16 %v1749_v38, %v1749_v38 }
 0x3e0   :  { %v1492_v40 = vpop.f32.mrf.mxu0 }
 0x3e1   :  { %1886 = vst.msk [vmem:[#allocation4 + $0xf0] sm:$0xf] %vm1825_vm1, %v1817_v39  ;;  %v1493_v41 = vadd.f32 %v16249_v6, %v1492_v40  ;;  %v1676_v49 = vpop.f32.mrf.mxu1 }
 0x3e3   :  { %v1672_v43 = vadd.f32 %v1671_v35, %v1493_v41 }
 0x3e5   :  { %v1750_v44 = vmax.f32 %v1672_v43, 0.0 }
 0x3e7   :  { %v1818_v45 = vpack.c.bf16 %v1750_v44, %v1750_v44 }
 0x3e8   :  { %v1495_v46 = vpop.f32.mrf.mxu0 }
 0x3e9   :  { %1887 = vst.msk [vmem:[#allocation4 + $0xf4] sm:$0xf] %vm1825_vm1, %v1818_v45  ;;  %v1496_v47 = vadd.f32 %v16249_v6, %v1495_v46  ;;  %v1679_v56 = vpop.f32.mrf.mxu1 }
 0x3eb   :  { %v1675_v48 = vadd.f32 %v1674_v42, %v1496_v47 }
 0x3ed   :  { %v1751_v50 = vmax.f32 %v1675_v48, 0.0 }
 0x3ef   :  { %v1819_v51 = vpack.c.bf16 %v1751_v50, %v1751_v50 }
 0x3f0   :  { %v1497_v52 = vpop.f32.mrf.mxu0 }
 0x3f1   :  { %1888 = vst.msk [vmem:[#allocation4 + $0xf8] sm:$0xf] %vm1825_vm1, %v1819_v51  ;;  %v1498_v53 = vadd.f32 %v16249_v6, %v1497_v52  ;;  %v1681_v0 = vpop.f32.mrf.mxu1 }
 0x3f3   :  { %v1677_v54 = vadd.f32 %v1676_v49, %v1498_v53 }
 0x3f5   :  { %v1752_v55 = vmax.f32 %v1677_v54, 0.0 }
 0x3f7   :  { %v1820_v57 = vpack.c.bf16 %v1752_v55, %v1752_v55 }
 0x3f8   :  { %v1500_v58 = vpop.f32.mrf.mxu0 }
 0x3f9   :  { %1889 = vst.msk [vmem:[#allocation4 + $0xfc] sm:$0xf] %vm1825_vm1, %v1820_v57  ;;  %v1501_v59 = vadd.f32 %v16249_v6, %v1500_v58 }
 0x3fb   :  { %v1680_v60 = vadd.f32 %v1679_v56, %v1501_v59 }
 0x3fd   :  { %v1753_v61 = vmax.f32 %v1680_v60, 0.0 }
 0x3ff   :  { %v1821_v62 = vpack.c.bf16 %v1753_v61, %v1753_v61 }
 0x400   :  { %v1502_v63 = vpop.f32.mrf.mxu0 }
 0x401   :  { %1890 = vst.msk [vmem:[#allocation4 + $0x100] sm:$0xf] %vm1825_vm1, %v1821_v62  ;;  %v1503_v1 = vadd.f32 %v16249_v6, %v1502_v63 }
 0x403   :  { %v1682_v2 = vadd.f32 %v1681_v0, %v1503_v1 }
 0x405   :  { %v1754_v3 = vmax.f32 %v1682_v2, 0.0 }
 0x407   :  { %v1822_v27 = vpack.c.bf16 %v1754_v3, %v1754_v3 }
 0x408   :  { %v1505_v5 = vpop.f32.mrf.mxu0 }
 0x409   :  { %1891 = vst.msk [vmem:[#allocation4 + $0x104] sm:$0xf] %vm1825_vm1, %v1822_v27  ;;  %v1506_v7 = vadd.f32 %v16249_v6, %v1505_v5 }
 0x40b   :  { %v1685_v8 = vadd.f32 %v1684_v4, %v1506_v7 }
 0x40d   :  { %v1755_v9 = vmax.f32 %v1685_v8, 0.0 }
 0x40f   :  { %v1823_v10 = vpack.c.bf16 %v1755_v9, %v1755_v9 }
 0x410   :  { %v1507_v11 = vpop.f32.mrf.mxu0 }
 0x411   :  { %1892 = vst.msk [vmem:[#allocation4 + $0x108] sm:$0xf] %vm1825_vm1, %v1823_v10 }
 0x412   :  { %14590 = dma.done.wait [#allocation5], 18432 }
 0x413   :  { %14591 = vsyncadd [#allocation5], 4294948864  ;;  %v13426_v13 = vld [vmem:[#allocation2 + $0x100] sm:$0xff]  ;;  %v13414_v14 = vld [vmem:[#allocation2 + $0x448] sm:$0xff]  ;;  %vm2288_vm2 = vsmask.f32 7424 }
 0x414   :  { %2038 = vmatpush.bf16.msra.mxu2 %v13426_v13  ;;  %2175 = vmatpush.bf16.msrb.mxu3 %v13414_v14  ;;  %v13425_v15 = vld [vmem:[#allocation2 + $0x370] sm:$0xff]  ;;  %v13424_v17 = vld [vmem:[#allocation2 + $0x438] sm:$0xff]  ;;  %v13423_v6 = vld [vmem:[#allocation2 + $0x320] sm:$0xff]  ;;  %vm2731_vm3 = vcmask 1046528  }
 0x415   :  { %v13413_v16 = vld [vmem:[#allocation2 + $0x10] sm:$0xff]  ;;  %v13415_v20 = vld [vmem:[#allocation4 + $0x40] sm:$0xff]  ;;  %v13416_v22 = vld [vmem:[#allocation4 + $0x48] sm:$0xff] }
 0x416   :  { %v13412_v18 = vld [vmem:[#allocation2 + $0x3b0] sm:$0xff]  ;;  %v13403_v21 = vld [vmem:[#allocation4] sm:$0xff]  ;;  %v13404_v23 = vld [vmem:[#allocation4 + $0x8] sm:$0xff] }
 0x417   :  { %v13411_v19 = vld [vmem:[#allocation2 + $0x2b0] sm:$0xff]  ;;  %v13418_v26 = vld [vmem:[#allocation4 + $0x58] sm:$0xff]  ;;  %v13419_v29 = vld [vmem:[#allocation4 + $0x60] sm:$0xff] }
 0x418   :  { %2039 = vmatpush.bf16.msra.mxu2 %v13425_v15  ;;  %2176 = vmatpush.bf16.msrb.mxu3 %v13413_v16  ;;  %v13417_v24 = vld [vmem:[#allocation4 + $0x50] sm:$0xff]  ;;  %v13406_v28 = vld [vmem:[#allocation4 + $0x18] sm:$0xff]  ;;  %v13407_v30 = vld [vmem:[#allocation4 + $0x20] sm:$0xff] }
 0x419   :  { %v13405_v25 = vld [vmem:[#allocation4 + $0x10] sm:$0xff]  ;;  %v13430_v31 = vld [vmem:[#allocation2 + $0x380] sm:$0xff]  ;;  %v13434_v32 = vld [vmem:[#allocation2 + $0x148] sm:$0xff] }
 0x41a   :  { %v13420_v33 = vld [vmem:[#allocation4 + $0x68] sm:$0xff]  ;;  %v13429_v35 = vld [vmem:[#allocation2 + $0x290] sm:$0xff]  ;;  %v13432_v38 = vld [vmem:[#allocation2 + $0xc0] sm:$0xff] }
 0x41b   :  { %v13408_v34 = vld [vmem:[#allocation4 + $0x28] sm:$0xff]  ;;  %v13433_v36 = vld [vmem:[#allocation2 + $0x30] sm:$0xff]  ;;  %v13427_v39 = vld [vmem:[#allocation2 + $0x300] sm:$0xff] }
 0x41c   :  { %2040 = vmatpush.bf16.msra.mxu2 %v13424_v17  ;;  %2177 = vmatpush.bf16.msrb.mxu3 %v13412_v18  ;;  %v13428_v37 = vld [vmem:[#allocation2 + $0x2f0] sm:$0xff]  ;;  %v13431_v40 = vld [vmem:[#allocation2 + $0x48] sm:$0xff]  ;;  %v13422_v43 = vld [vmem:[#allocation4 + $0x78] sm:$0xff] }
 0x41d   :  { %v13421_v41 = vld [vmem:[#allocation4 + $0x70] sm:$0xff]  ;;  %v13410_v44 = vld [vmem:[#allocation4 + $0x38] sm:$0xff]  ;;  %v16320_v45 = vld [vmem:[#allocation4] sm:$0xff]  }
 0x41e   :  { %v13409_v42 = vld [vmem:[#allocation4 + $0x30] sm:$0xff]  ;;  %v16322_v46 = vld [vmem:[#allocation4 + $0x40] sm:$0xff]   ;;  %v16326_v47 = vld [vmem:[#allocation4 + $0x8] sm:$0xff]   ;;  %v2292_v48 = vshll.u32 %v16320_v45, 16  ;;  %v2290_v51 = vshrl.u32 %v16320_v45, 16 }
 0x41f   :  { %v2541_v49 = vshll.u32 %v16322_v46, 16  ;;  %v16330_v50 = vld [vmem:[#allocation4 + $0x48] sm:$0xff]   ;;  %v2297_v52 = vshll.u32 %v16326_v47, 16  ;;  %v2539_v54 = vshrl.u32 %v16322_v46, 16  ;;  %v16340_v63 = vld [vmem:[#allocation4 + $0x10] sm:$0xff]   ;;  %v2301_v27 = vshrl.u32 %v16326_v47, 16 }
 0x420   :  { %2041 = vmatpush.bf16.msra.mxu2 %v13423_v6  ;;  %2178 = vmatpush.bf16.msrb.mxu3 %v13411_v19  ;;  %v2294_v53 = vrot.slane %v2292_v48, 1  ;;  %v2546_v56 = vshll.u32 %v16330_v50, 16  ;;  %v16342_v0 = vld [vmem:[#allocation4 + $0x50] sm:$0xff]   ;;  %v2305_v4 = vshll.u32 %v16340_v63, 16  ;;  %v2550_v5 = vshrl.u32 %v16330_v50, 16  ;;  %v16356_v17 = vld [vmem:[#allocation4 + $0x18] sm:$0xff]  }
 0x421   :  { %v2543_v55 = vrot.slane %v2541_v49, 1  ;;  %v2299_v58 = vrot.slane %v2297_v52, 1  ;;  %v2554_v7 = vshll.u32 %v16342_v0, 16  ;;  %v16358_v18 = vld [vmem:[#allocation4 + $0x58] sm:$0xff]  }
 0x422   :  { %v2295_v57 = vor.u32 %v2294_v53, %v2290_v51  ;;  %v2548_v60 = vrot.slane %v2546_v56, 1  ;;  %v2307_v9 = vrot.slane %v2305_v4, 1 }
 0x423   :  { %11289 = vmatmul.msk.bf16.vlgmr.msra.gmra.mxu2 %vm1228_vm0, %v13415_v20  ;;  %11345 = vmatmul.msk.bf16.vlgmr.msrb.gmra.mxu3 %vm1228_vm0, %v13403_v21  ;;  %v2544_v59 = vor.u32 %v2543_v55, %v2539_v54  ;;  %v2303_v8 = vor.u32 %v2301_v27, %v2299_v58  ;;  %v2556_v11 = vrot.slane %v2554_v7, 1  ;;  %v2309_v21 = vshrl.u32 %v16340_v63, 16 }
 0x424   :  { %2409 = vmatpush.bf16.msrb.mxu2 %v13430_v31  ;;  %2658 = vmatpush.bf16.msra.mxu3 %v13434_v32  ;;  %v2300_v61 = vsel %vm2288_vm2, %v2295_v57, %v2299_v58  ;;  %v2552_v10 = vor.u32 %v2550_v5, %v2548_v60  ;;  %v16388_v57 = vld [vmem:[#allocation4 + $0x28] sm:$0xff]  }
 0x425   :  { %v2549_v62 = vsel %vm2288_vm2, %v2544_v59, %v2548_v60  ;;  %v2308_v15 = vsel %vm2288_vm2, %v2303_v8, %v2307_v9  ;;  %v16390_v58 = vld [vmem:[#allocation4 + $0x68] sm:$0xff]  }
 0x426   :  { %v2557_v16 = vsel %vm2288_vm2, %v2552_v10, %v2556_v11  ;;  %v2578_v27 = vshll.u32 %v16390_v58, 16 }
 0x428   :  { %2410 = vmatpush.bf16.msrb.mxu2 %v13429_v35  ;;  %2659 = vmatpush.bf16.msra.mxu3 %v13433_v36  ;;  %v16372_v35 = vld [vmem:[#allocation4 + $0x20] sm:$0xff]   ;;  %v2580_v8 = vrot.slane %v2578_v27, 1 }
 0x429   :  { %v16374_v36 = vld [vmem:[#allocation4 + $0x60] sm:$0xff]  }
 0x42c   :  { %2411 = vmatpush.bf16.msrb.mxu2 %v13428_v37  ;;  %2660 = vmatpush.bf16.msra.mxu3 %v13432_v38 }
 0x430   :  { %2412 = vmatpush.bf16.msrb.mxu2 %v13427_v39  ;;  %2661 = vmatpush.bf16.msra.mxu3 %v13431_v40  ;;  %v2317_v40 = vshrl.u32 %v16356_v17, 16 }
 0x433   :  { %11290 = vmatmul.msk.bf16.gmra.mxu2 %vm1228_vm0, %v13416_v22  ;;  %11346 = vmatmul.msk.bf16.gmra.mxu3 %vm1228_vm0, %v13404_v23  ;;  %v2313_v22 = vshll.u32 %v16356_v17, 16  ;;  %v2558_v23 = vshrl.u32 %v16342_v0, 16 }
 0x443   :  { %11291 = vmatmul.msk.bf16.gmra.mxu2 %vm1228_vm0, %v13417_v24  ;;  %11347 = vmatmul.msk.bf16.gmra.mxu3 %vm1228_vm0, %v13405_v25  ;;  %v2562_v24 = vshll.u32 %v16358_v18, 16  ;;  %v2311_v25 = vor.u32 %v2309_v21, %v2307_v9 }
 0x453   :  { %11292 = vmatmul.msk.bf16.gmra.mxu2 %vm1228_vm0, %v13418_v26  ;;  %11348 = vmatmul.msk.bf16.gmra.mxu3 %vm1228_vm0, %v13406_v28  ;;  %v2315_v26 = vrot.slane %v2313_v22, 1  ;;  %v2560_v28 = vor.u32 %v2558_v23, %v2556_v11  ;;  %v13442_v23 = vld [vmem:[#allocation2 + $0x450] sm:$0xff] }
 0x454   :  { %2943 = vmatpush.bf16.msrb.mxu3 %v13442_v23 }
 0x463   :  { %11293 = vmatmul.msk.bf16.gmra.mxu2 %vm1228_vm0, %v13419_v29  ;;  %11349 = vmatmul.msk.bf16.gmra.mxu3 %vm1228_vm0, %v13407_v30  ;;  %v2564_v29 = vrot.slane %v2562_v24, 1  ;;  %v2333_v24 = vshrl.u32 %v16388_v57, 16 }
 0x473   :  { %11294 = vmatmul.msk.bf16.gmra.mxu2 %vm1228_vm0, %v13420_v33  ;;  %11350 = vmatmul.msk.bf16.gmra.mxu3 %vm1228_vm0, %v13408_v34  ;;  %v2316_v33 = vsel %vm2288_vm2, %v2311_v25, %v2315_v26  ;;  %v2565_v34 = vsel %vm2288_vm2, %v2560_v28, %v2564_v29 }
 0x483   :  { %11295 = vmatmul.msk.bf16.gmra.mxu2 %vm1228_vm0, %v13421_v41  ;;  %11351 = vmatmul.msk.bf16.gmra.mxu3 %vm1228_vm0, %v13409_v42  ;;  %v2321_v41 = vshll.u32 %v16372_v35, 16  ;;  %v2566_v42 = vshrl.u32 %v16358_v18, 16 }
 0x485   :  { %v2323_v48 = vrot.slane %v2321_v41, 1  ;;  %v2568_v49 = vor.u32 %v2566_v42, %v2564_v29  ;;  %v16420_v42 = vld [vmem:[#allocation4 + $0x38] sm:$0xff]  }
 0x493   :  { %11296 = vmatmul.msk.bf16.gmra.mxu2 %vm1228_vm0, %v13422_v43  ;;  %11352 = vmatmul.msk.bf16.gmra.mxu3 %vm1228_vm0, %v13410_v44  ;;  %v2570_v43 = vshll.u32 %v16374_v36, 16  ;;  %v2319_v44 = vor.u32 %v2317_v40, %v2315_v26  ;;  %v2582_v26 = vshrl.u32 %v16390_v58, 16 }
 0x495   :  { %v2572_v51 = vrot.slane %v2570_v43, 1  ;;  %v2324_v55 = vsel %vm2288_vm2, %v2319_v44, %v2323_v48  ;;  %v16422_v43 = vld [vmem:[#allocation4 + $0x78] sm:$0xff]  }
 0x497   :  { %v2573_v56 = vsel %vm2288_vm2, %v2568_v49, %v2572_v51  ;;  %v13437_v49 = vld [vmem:[#allocation2 + $0x348] sm:$0xff] }
 0x4a3   :  { %11369 = vmatmul.msk.bf16.vlgmr.msrb.gmra.mxu2 %vm1228_vm0, %v2300_v61  ;;  %11393 = vmatmul.msk.bf16.vlgmr.msra.gmra.mxu3 %vm1228_vm0, %v2549_v62  ;;  %v2325_v62 = vshrl.u32 %v16372_v35, 16 }
 0x4a5   :  { %v2327_v4 = vor.u32 %v2325_v62, %v2323_v48  ;;  %v13440_v62 = vld [vmem:[#allocation2 + $0x3e0] sm:$0xff] }
 0x4a6   :  { %v2043_v1 = vpop.f32.mrf.mxu2  ;;  %v2180_v2 = vpop.f32.mrf.mxu3 }
 0x4a7   :  { %v16344_v3 = vadd.f32 %v2180_v2, %v2043_v1  ;;  %v2329_v1 = vshll.u32 %v16388_v57, 16  ;;  %v2574_v2 = vshrl.u32 %v16374_v36, 16 }
 0x4a9   :  { %v2331_v5 = vrot.slane %v2329_v1, 1  ;;  %v2576_v7 = vor.u32 %v2574_v2, %v2572_v51  ;;  %v13441_v51 = vld [vmem:[#allocation2 + $0x1a8] sm:$0xff] }
 0x4aa   :  { %2944 = vmatpush.bf16.msrb.mxu3 %v13441_v51 }
 0x4ab   :  { %v2335_v29 = vor.u32 %v2333_v24, %v2331_v5 }
 0x4ae   :  { %v2045_v12 = vpop.f32.mrf.mxu2  ;;  %v2182_v13 = vpop.f32.mrf.mxu3  ;;  %2945 = vmatpush.bf16.msrb.mxu3 %v13440_v62 }
 0x4af   :  { %v16350_v14 = vadd.f32 %v2182_v13, %v2045_v12  ;;  %v2332_v12 = vsel %vm2288_vm2, %v2327_v4, %v2331_v5  ;;  %v2581_v13 = vsel %vm2288_vm2, %v2576_v7, %v2580_v8  ;;  %v2236_v5 = vld [vmem:[#allocation4 + $0x40] sm:$0x1] }
 0x4b0   :  { %v2486_v7 = vld [vmem:[#allocation4 + $0x80] sm:$0x1] }
 0x4b1   :  { %v2528_v23 = vunpack.c.l.b16 %v2486_v7 }
 0x4b3   :  { %11370 = vmatmul.msk.bf16.gmra.mxu2 %vm1228_vm0, %v2308_v15  ;;  %11394 = vmatmul.msk.bf16.gmra.mxu3 %vm1228_vm0, %v2557_v16  ;;  %v13438_v15 = vld [vmem:[#allocation2 + $0xe0] sm:$0xff]  ;;  %v16404_v16 = vld [vmem:[#allocation4 + $0x30] sm:$0xff]  }
 0x4b4   :  { %2801 = vmatpush.bf16.msra.mxu2 %v13438_v15  ;;  %v2337_v25 = vshll.u32 %v16404_v16, 16 }
 0x4b6   :  { %v2048_v6 = vpop.f32.mrf.mxu2  ;;  %v2185_v19 = vpop.f32.mrf.mxu3 }
 0x4b7   :  { %v16360_v20 = vadd.f32 %v2185_v19, %v2048_v6  ;;  %v16406_v6 = vld [vmem:[#allocation4 + $0x70] sm:$0xff]  }
 0x4b8   :  { %v2586_v28 = vshll.u32 %v16406_v6, 16  ;;  %2802 = vmatpush.bf16.msra.mxu2 %v13437_v49 }
 0x4be   :  { %v2050_v30 = vpop.f32.mrf.mxu2  ;;  %v2187_v31 = vpop.f32.mrf.mxu3 }
 0x4bf   :  { %v16366_v32 = vadd.f32 %v2187_v31, %v2050_v30  ;;  %v2339_v30 = vrot.slane %v2337_v25, 1  ;;  %v2584_v31 = vor.u32 %v2582_v26, %v2580_v8  ;;  %v16438_v25 = vpack.c.b16 %v2528_v23, %v2528_v23 }
 0x4c1   :  { %v2340_v40 = vsel %vm2288_vm2, %v2335_v29, %v2339_v30 }
 0x4c3   :  { %11371 = vmatmul.msk.bf16.gmra.mxu2 %vm1228_vm0, %v2316_v33  ;;  %11395 = vmatmul.msk.bf16.gmra.mxu3 %vm1228_vm0, %v2565_v34  ;;  %v2588_v33 = vrot.slane %v2586_v28, 1 }
 0x4c5   :  { %v2589_v41 = vsel %vm2288_vm2, %v2584_v31, %v2588_v33 }
 0x4c6   :  { %v2053_v37 = vpop.f32.mrf.mxu2  ;;  %v2190_v38 = vpop.f32.mrf.mxu3 }
 0x4c7   :  { %v16376_v39 = vadd.f32 %v2190_v38, %v2053_v37 }
 0x4ce   :  { %v2055_v52 = vpop.f32.mrf.mxu2  ;;  %v2192_v53 = vpop.f32.mrf.mxu3 }
 0x4cf   :  { %v16382_v54 = vadd.f32 %v2192_v53, %v2055_v52  ;;  %v2341_v53 = vshrl.u32 %v16404_v16, 16 }
 0x4d1   :  { %v2343_v1 = vor.u32 %v2341_v53, %v2339_v30  ;;  %v2349_v30 = vshrl.u32 %v16420_v42, 16 }
 0x4d3   :  { %11372 = vmatmul.msk.bf16.gmra.mxu2 %vm1228_vm0, %v2324_v55  ;;  %11396 = vmatmul.msk.bf16.gmra.mxu3 %vm1228_vm0, %v2573_v56  ;;  %v2345_v55 = vshll.u32 %v16420_v42, 16  ;;  %v2590_v56 = vshrl.u32 %v16406_v6, 16 }
 0x4d5   :  { %v2347_v2 = vrot.slane %v2345_v55, 1  ;;  %v2592_v27 = vor.u32 %v2590_v56, %v2588_v33  ;;  %v2598_v33 = vshrl.u32 %v16422_v43, 16  ;;  %v2719_v56 = vld [vmem:[#allocation4] sm:$0xe] }
 0x4d6   :  { %v2058_v59 = vpop.f32.mrf.mxu2  ;;  %v2195_v60 = vpop.f32.mrf.mxu3  ;;  %v2729_v62 = vunpack.c.l.b16 %v2719_v56 }
 0x4d7   :  { %v16392_v61 = vadd.f32 %v2195_v60, %v2058_v59  ;;  %v2594_v59 = vshll.u32 %v16422_v43, 16  ;;  %v13436_v60 = vld [vmem:[#allocation2 + $0x88] sm:$0xff]  ;;  %v2348_v15 = vsel %vm2288_vm2, %v2343_v1, %v2347_v2  ;;  %v13886_v1 = vunpack.c.h.b16 %v16322_v46 }
 0x4d8   :  { %2803 = vmatpush.bf16.msra.mxu2 %v13436_v60  ;;  %v13854_v60 = vunpack.c.h.b16 %v16320_v45 }
 0x4d9   :  { %v2596_v4 = vrot.slane %v2594_v59, 1  ;;  %v2862_v59 = vld [vmem:[#allocation4 + $0x40] sm:$0xe] }
 0x4da   :  { %v2730_v7 = vpack.c.b16 %v13854_v60, %v2729_v62 }
 0x4de   :  { %v2060_v9 = vpop.f32.mrf.mxu2  ;;  %v2197_v10 = vpop.f32.mrf.mxu3 }
 0x4df   :  { %v16398_v11 = vadd.f32 %v2197_v10, %v2060_v9  ;;  %v13435_v10 = vld [vmem:[#allocation2 + $0x208] sm:$0xff] }
 0x4e0   :  { %2804 = vmatpush.bf16.msra.mxu2 %v13435_v10  ;;  %v2733_v10 = vrot.slane %v16326_v47, 1 }
 0x4e3   :  { %11373 = vmatmul.msk.bf16.gmra.mxu2 %vm1228_vm0, %v2332_v12  ;;  %11397 = vmatmul.msk.bf16.gmra.mxu3 %vm1228_vm0, %v2581_v13  ;;  %v13439_v12 = vld [vmem:[#allocation2 + $0x368] sm:$0xff] }
 0x4e4   :  { %2946 = vmatpush.bf16.msrb.mxu3 %v13439_v12 }
 0x4e6   :  { %v2063_v19 = vpop.f32.mrf.mxu2  ;;  %v2200_v21 = vpop.f32.mrf.mxu3 }
 0x4e7   :  { %v16408_v22 = vadd.f32 %v2200_v21, %v2063_v19  ;;  %v2597_v19 = vsel %vm2288_vm2, %v2592_v27, %v2596_v4  ;;  %v2278_v21 = vunpack.c.l.b16 %v2236_v5 }
 0x4e9   :  { %v16436_v24 = vpack.c.b16 %v2278_v21, %v2278_v21 }
 0x4eb   :  { %v2353_v31 = vshll.u32 %v16436_v24, 16 }
 0x4ee   :  { %v2065_v34 = vpop.f32.mrf.mxu2  ;;  %v2202_v37 = vpop.f32.mrf.mxu3 }
 0x4ef   :  { %v16414_v38 = vadd.f32 %v2202_v37, %v2065_v34  ;;  %v2602_v34 = vshll.u32 %v16438_v25, 16  ;;  %v2351_v37 = vor.u32 %v2349_v30, %v2347_v2  ;;  %v2872_v2 = vunpack.c.l.b16 %v2862_v59 }
 0x4f3   :  { %11374 = vmatmul.msk.bf16.gmra.mxu2 %vm1228_vm0, %v2340_v40  ;;  %11398 = vmatmul.msk.bf16.gmra.mxu3 %vm1228_vm0, %v2589_v41  ;;  %v2355_v40 = vrot.slane %v2353_v31, 1  ;;  %v2600_v41 = vor.u32 %v2598_v33, %v2596_v4 }
 0x4f5   :  { %v2356_v53 = vsel %vm2288_vm2, %v2351_v37, %v2355_v40 }
 0x4f6   :  { %v2068_v44 = vpop.f32.mrf.mxu2  ;;  %v2205_v48 = vpop.f32.mrf.mxu3 }
 0x4f7   :  { %v16424_v52 = vadd.f32 %v2205_v48, %v2068_v44  ;;  %v2604_v44 = vrot.slane %v2602_v34, 1  ;;  %v2877_v34 = vrot.slane %v16342_v0, 1  ;;  %v2737_v0 = vrot.slane %v16356_v17, 1 }
 0x4f9   :  { %v2605_v55 = vsel %vm2288_vm2, %v2600_v41, %v2604_v44 }
 0x4fe   :  { %v2070_v8 = vpop.f32.mrf.mxu2  ;;  %v2207_v9 = vpop.f32.mrf.mxu3 }
 0x4ff   :  { %v16430_v13 = vadd.f32 %v2207_v9, %v2070_v8  ;;  %v2873_v8 = vpack.c.b16 %v13886_v1, %v2872_v2  ;;  %v2732_v9 = vrot.slane %v2730_v7, 1 }
 0x501   :  { %v2874_v12 = vrot.slane %v2873_v8, 1 }
 0x503   :  { %11375 = vmatmul.msk.bf16.gmra.mxu2 %vm1228_vm0, %v2348_v15  ;;  %11399 = vmatmul.msk.bf16.gmra.mxu3 %vm1228_vm0, %v2597_v19  ;;  %v2875_v15 = vrot.slane %v16330_v50, 1  ;;  %v2735_v50 = vrot.slane %v16340_v63, 1 }
 0x505   :  { %v2736_v44 = vsel %vm2731_vm3, %v2733_v10, %v2735_v50  ;;  %v2738_v2 = vsel %vm2731_vm3, %v2735_v50, %v2737_v0 }
 0x506   :  { %v2073_v26 = vpop.f32.mrf.mxu2  ;;  %v2210_v28 = vpop.f32.mrf.mxu3 }
 0x507   :  { %v16440_v29 = vadd.f32 %v2210_v28, %v2073_v26  ;;  %v2734_v26 = vsel %vm2731_vm3, %v2732_v9, %v2733_v10  ;;  %v2876_v28 = vsel %vm2731_vm3, %v2874_v12, %v2875_v15 }
 0x50e   :  { %v2075_v48 = vpop.f32.mrf.mxu2  ;;  %v2212_v49 = vpop.f32.mrf.mxu3 }
 0x50f   :  { %v16446_v51 = vadd.f32 %v2212_v49, %v2075_v48  ;;  %v2878_v48 = vsel %vm2731_vm3, %v2875_v15, %v2877_v34 }
 0x513   :  { %11376 = vmatmul.msk.bf16.gmra.mxu2 %vm1228_vm0, %v2356_v53  ;;  %11400 = vmatmul.msk.bf16.gmra.mxu3 %vm1228_vm0, %v2605_v55 }
 0x516   :  { %v2078_v27 = vpop.f32.mrf.mxu2  ;;  %v2215_v4 = vpop.f32.mrf.mxu3 }
 0x517   :  { %v16454_v5 = vadd.f32 %v2215_v4, %v2078_v27 }
 0x51e   :  { %v2080_v19 = vpop.f32.mrf.mxu2  ;;  %v2217_v21 = vpop.f32.mrf.mxu3 }
 0x51f   :  { %v16462_v23 = vadd.f32 %v2217_v21, %v2080_v19 }
 0x523   :  { %11417 = vmatmul.msk.bf16.vlgmr.msra.gmra.mxu2 %vm1228_vm0, %v2734_v26  ;;  %11441 = vmatmul.msk.bf16.vlgmr.msrb.gmra.mxu3 %vm1228_vm0, %v2876_v28 }
 0x526   :  { %v2414_v30 = vpop.f32.mrf.mxu2  ;;  %v2663_v31 = vpop.f32.mrf.mxu3 }
 0x527   :  { %v2454_v47 = vadd.f32 %v2414_v30, %v16344_v3 }
 0x529   :  { %v16469_v33 = vadd.f32 %v2663_v31, %v2454_v47 }
 0x52e   :  { %v2416_v37 = vpop.f32.mrf.mxu2  ;;  %v2665_v40 = vpop.f32.mrf.mxu3 }
 0x52f   :  { %v2455_v41 = vadd.f32 %v2416_v37, %v16350_v14  ;;  %v2879_v14 = vrot.slane %v16358_v18, 1  ;;  %v2739_v18 = vrot.slane %v16372_v35, 1 }
 0x531   :  { %v16476_v49 = vadd.f32 %v2665_v40, %v2455_v41  ;;  %v2880_v27 = vsel %vm2731_vm3, %v2877_v34, %v2879_v14  ;;  %v2740_v15 = vsel %vm2731_vm3, %v2737_v0, %v2739_v18 }
 0x533   :  { %11418 = vmatmul.msk.bf16.gmra.mxu2 %vm1228_vm0, %v2736_v44  ;;  %11442 = vmatmul.msk.bf16.gmra.mxu3 %vm1228_vm0, %v2878_v48  ;;  %v13466_v44 = vld [vmem:[#allocation2 + $0x68] sm:$0xff]  ;;  %v2885_v48 = vrot.slane %v16406_v6, 1 }
 0x534   :  { %3297 = vmatpush.bf16.msra.mxu3 %v13466_v44 }
 0x536   :  { %v2419_v3 = vpop.f32.mrf.mxu2  ;;  %v2668_v53 = vpop.f32.mrf.mxu3 }
 0x537   :  { %v2456_v63 = vadd.f32 %v2419_v3, %v16360_v20 }
 0x539   :  { %v16481_v55 = vadd.f32 %v2668_v53, %v2456_v63 }
 0x53e   :  { %v2421_v56 = vpop.f32.mrf.mxu2  ;;  %v2670_v59 = vpop.f32.mrf.mxu3 }
 0x53f   :  { %v2457_v62 = vadd.f32 %v2421_v56, %v16366_v32  ;;  %v2881_v32 = vrot.slane %v16374_v36, 1  ;;  %v2741_v36 = vrot.slane %v16388_v57, 1 }
 0x541   :  { %v16488_v4 = vadd.f32 %v2670_v59, %v2457_v62  ;;  %v2882_v19 = vsel %vm2731_vm3, %v2879_v14, %v2881_v32  ;;  %v2742_v50 = vsel %vm2731_vm3, %v2739_v18, %v2741_v36  ;;  %v13453_v62 = vld [vmem:[#allocation2 + $0x350] sm:$0xff] }
 0x543   :  { %11419 = vmatmul.msk.bf16.gmra.mxu2 %vm1228_vm0, %v2738_v2  ;;  %11443 = vmatmul.msk.bf16.gmra.mxu3 %vm1228_vm0, %v2880_v27  ;;  %v13464_v27 = vld [vmem:[#allocation2 + $0x390] sm:$0xff] }
 0x546   :  { %v2424_v20 = vpop.f32.mrf.mxu2  ;;  %v2673_v7 = vpop.f32.mrf.mxu3 }
 0x547   :  { %v2458_v17 = vadd.f32 %v2424_v20, %v16376_v39  ;;  %v2745_v20 = vrot.slane %v16420_v42, 1 }
 0x549   :  { %v16493_v8 = vadd.f32 %v2673_v7, %v2458_v17  ;;  %v2887_v7 = vrot.slane %v16422_v43, 1 }
 0x54e   :  { %v2426_v9 = vpop.f32.mrf.mxu2  ;;  %v2675_v10 = vpop.f32.mrf.mxu3 }
 0x54f   :  { %v2459_v12 = vadd.f32 %v2426_v9, %v16382_v54  ;;  %v2883_v54 = vrot.slane %v16390_v58, 1  ;;  %v13463_v9 = vld [vmem:[#allocation2 + $0x240] sm:$0xff] }
 0x551   :  { %v16500_v21 = vadd.f32 %v2675_v10, %v2459_v12  ;;  %v2884_v34 = vsel %vm2731_vm3, %v2881_v32, %v2883_v54  ;;  %v2886_v14 = vsel %vm2731_vm3, %v2883_v54, %v2885_v48  ;;  %v13451_v32 = vld [vmem:[#allocation2 + $0x420] sm:$0xff]  ;;  %v2888_v12 = vsel %vm2731_vm3, %v2885_v48, %v2887_v7 }
 0x553   :  { %11420 = vmatmul.msk.bf16.gmra.mxu2 %vm1228_vm0, %v2740_v15  ;;  %11444 = vmatmul.msk.bf16.gmra.mxu3 %vm1228_vm0, %v2882_v19 }
 0x556   :  { %v2429_v39 = vpop.f32.mrf.mxu2  ;;  %v2678_v26 = vpop.f32.mrf.mxu3 }
 0x557   :  { %v2460_v35 = vadd.f32 %v2429_v39, %v16392_v61  ;;  %v13454_v61 = vld [vmem:[#allocation2 + $0xc8] sm:$0xff] }
 0x558   :  { %3120 = vmatpush.bf16.msrb.mxu2 %v13454_v61 }
 0x559   :  { %v16505_v28 = vadd.f32 %v2678_v26, %v2460_v35  ;;  %v2889_v26 = vrot.slane %v16438_v25, 1 }
 0x55c   :  { %3121 = vmatpush.bf16.msrb.mxu2 %v13453_v62 }
 0x55e   :  { %v2431_v30 = vpop.f32.mrf.mxu2  ;;  %v2680_v31 = vpop.f32.mrf.mxu3 }
 0x55f   :  { %v2461_v47 = vadd.f32 %v2431_v30, %v16398_v11  ;;  %v2743_v11 = vrot.slane %v16404_v16, 1  ;;  %v13465_v16 = vld [vmem:[#allocation2 + $0x458] sm:$0xff] }
 0x560   :  { %3298 = vmatpush.bf16.msra.mxu3 %v13465_v16 }
 0x561   :  { %v16512_v37 = vadd.f32 %v2680_v31, %v2461_v47  ;;  %v2744_v0 = vsel %vm2731_vm3, %v2741_v36, %v2743_v11  ;;  %v2890_v31 = vsel %vm2731_vm3, %v2887_v7, %v2889_v26 }
 0x563   :  { %11421 = vmatmul.msk.bf16.gmra.mxu2 %vm1228_vm0, %v2742_v50  ;;  %11445 = vmatmul.msk.bf16.gmra.mxu3 %vm1228_vm0, %v2884_v34 }
 0x564   :  { %3299 = vmatpush.bf16.msra.mxu3 %v13464_v27  ;;  %v13445_v27 = vld [vmem:[#allocation4 + $0x90] sm:$0xff] }
 0x566   :  { %v2434_v40 = vpop.f32.mrf.mxu2  ;;  %v2683_v57 = vpop.f32.mrf.mxu3 }
 0x567   :  { %v2462_v58 = vadd.f32 %v2434_v40, %v16408_v22  ;;  %v13443_v40 = vld [vmem:[#allocation4 + $0x80] sm:$0xff] }
 0x568   :  { %3300 = vmatpush.bf16.msra.mxu3 %v13463_v9 }
 0x569   :  { %v16517_v41 = vadd.f32 %v2683_v57, %v2462_v58  ;;  %v13455_v57 = vld [vmem:[#allocation4 + $0xc0] sm:$0xff] }
 0x56e   :  { %v2436_v3 = vpop.f32.mrf.mxu2  ;;  %v2685_v53 = vpop.f32.mrf.mxu3 }
 0x56f   :  { %v2463_v63 = vadd.f32 %v2436_v3, %v16414_v38  ;;  %v13452_v38 = vld [vmem:[#allocation2 + $0x398] sm:$0xff] }
 0x570   :  { %3122 = vmatpush.bf16.msrb.mxu2 %v13452_v38 }
 0x571   :  { %v16524_v56 = vadd.f32 %v2685_v53, %v2463_v63 }
 0x573   :  { %11422 = vmatmul.msk.bf16.gmra.mxu2 %vm1228_vm0, %v2744_v0  ;;  %11446 = vmatmul.msk.bf16.gmra.mxu3 %vm1228_vm0, %v2886_v14  ;;  %v13444_v0 = vld [vmem:[#allocation4 + $0x88] sm:$0xff] }
 0x574   :  { %3123 = vmatpush.bf16.msrb.mxu2 %v13451_v32 }
 0x576   :  { %v2439_v22 = vpop.f32.mrf.mxu2  ;;  %v2688_v59 = vpop.f32.mrf.mxu3 }
 0x577   :  { %v2464_v6 = vadd.f32 %v2439_v22, %v16424_v52  ;;  %v2746_v52 = vsel %vm2731_vm3, %v2743_v11, %v2745_v20 }
 0x579   :  { %v16529_v2 = vadd.f32 %v2688_v59, %v2464_v6 }
 0x57e   :  { %v2441_v17 = vpop.f32.mrf.mxu2  ;;  %v2690_v18 = vpop.f32.mrf.mxu3 }
 0x57f   :  { %v2465_v10 = vadd.f32 %v2441_v17, %v16430_v13  ;;  %v2747_v13 = vrot.slane %v16436_v24, 1 }
 0x581   :  { %v16536_v15 = vadd.f32 %v2690_v18, %v2465_v10  ;;  %v2748_v30 = vsel %vm2731_vm3, %v2745_v20, %v2747_v13 }
 0x583   :  { %11423 = vmatmul.msk.bf16.gmra.mxu2 %vm1228_vm0, %v2746_v52  ;;  %11447 = vmatmul.msk.bf16.gmra.mxu3 %vm1228_vm0, %v2888_v12  ;;  %v13446_v52 = vld [vmem:[#allocation4 + $0x98] sm:$0xff] }
 0x586   :  { %v2444_v42 = vpop.f32.mrf.mxu2  ;;  %v2693_v43 = vpop.f32.mrf.mxu3 }
 0x587   :  { %v2466_v19 = vadd.f32 %v2444_v42, %v16440_v29 }
 0x589   :  { %v16541_v39 = vadd.f32 %v2693_v43, %v2466_v19 }
 0x58e   :  { %v2446_v35 = vpop.f32.mrf.mxu2  ;;  %v2695_v36 = vpop.f32.mrf.mxu3 }
 0x58f   :  { %v2467_v54 = vadd.f32 %v2446_v35, %v16446_v51 }
 0x591   :  { %v16548_v47 = vadd.f32 %v2695_v36, %v2467_v54  ;;  %v13447_v36 = vld [vmem:[#allocation4 + $0xa0] sm:$0xff] }
 0x593   :  { %11424 = vmatmul.msk.bf16.gmra.mxu2 %vm1228_vm0, %v2748_v30  ;;  %11448 = vmatmul.msk.bf16.gmra.mxu3 %vm1228_vm0, %v2890_v31  ;;  %v13470_v30 = vld [vmem:[#allocation2 + $0x170] sm:$0xff] }
 0x594   :  { %3546 = vmatpush.bf16.msra.mxu2 %v13470_v30 }
 0x596   :  { %v2449_v29 = vpop.f32.mrf.mxu2  ;;  %v2698_v50 = vpop.f32.mrf.mxu3 }
 0x597   :  { %v2468_v24 = vadd.f32 %v2449_v29, %v16454_v5 }
 0x599   :  { %v16553_v34 = vadd.f32 %v2698_v50, %v2468_v24  ;;  %v13474_v24 = vld [vmem:[#allocation2 + $0x1e8] sm:$0xff] }
 0x59a   :  { %3795 = vmatpush.bf16.msrb.mxu3 %v13474_v24 }
 0x59e   :  { %v2451_v25 = vpop.f32.mrf.mxu2  ;;  %v2700_v61 = vpop.f32.mrf.mxu3 }
 0x59f   :  { %v2469_v51 = vadd.f32 %v2451_v25, %v16462_v23  ;;  %v13456_v23 = vld [vmem:[#allocation4 + $0xc8] sm:$0xff] }
 0x5a1   :  { %v16556_v58 = vadd.f32 %v2700_v61, %v2469_v51  ;;  %v13448_v51 = vld [vmem:[#allocation4 + $0xa8] sm:$0xff] }
 0x5a3   :  { %11497 = vmatmul.msk.bf16.vlgmr.msrb.gmra.mxu2 %vm1228_vm0, %v13443_v40  ;;  %11553 = vmatmul.msk.bf16.vlgmr.msra.gmra.mxu3 %vm1228_vm0, %v13455_v57  ;;  %v13460_v40 = vld [vmem:[#allocation4 + $0xe8] sm:$0xff] }
 0x5a6   :  { %v2806_v44 = vpop.f32.mrf.mxu2  ;;  %v2948_v11 = vpop.f32.mrf.mxu3 }
 0x5a7   :  { %v2846_v48 = vadd.f32 %v2806_v44, %v16469_v33  ;;  %v13478_v44 = vld [vmem:[#allocation2 + $0x18] sm:$0xff] }
 0x5a8   :  { %3937 = vmatpush.bf16.msrb.mxu1 %v13478_v44 }
 0x5a9   :  { %v16561_v3 = vadd.f32 %v2948_v11, %v2846_v48 }
 0x5ae   :  { %v2808_v5 = vpop.f32.mrf.mxu2  ;;  %v2950_v53 = vpop.f32.mrf.mxu3 }
 0x5af   :  { %v2847_v63 = vadd.f32 %v2808_v5, %v16476_v49  ;;  %v13457_v49 = vld [vmem:[#allocation4 + $0xd0] sm:$0xff]  ;;  %v13473_v5 = vld [vmem:[#allocation2 + $0x20] sm:$0xff] }
 0x5b0   :  { %3796 = vmatpush.bf16.msrb.mxu3 %v13473_v5 }
 0x5b1   :  { %v16564_v14 = vadd.f32 %v2950_v53, %v2847_v63  ;;  %v13482_v53 = vld [vmem:[#allocation2 + $0xd0] sm:$0xff] }
 0x5b2   :  { %4079 = vmatpush.bf16.msrb.mxu0 %v13482_v53 }
 0x5b3   :  { %11498 = vmatmul.msk.bf16.gmra.mxu2 %vm1228_vm0, %v13444_v0  ;;  %11554 = vmatmul.msk.bf16.gmra.mxu3 %vm1228_vm0, %v13456_v23  ;;  %v13468_v23 = vld [vmem:[#allocation2 + $0x298] sm:$0xff] }
 0x5b6   :  { %v2811_v22 = vpop.f32.mrf.mxu2  ;;  %v2953_v59 = vpop.f32.mrf.mxu3 }
 0x5b7   :  { %v2848_v62 = vadd.f32 %v2811_v22, %v16481_v55  ;;  %v13472_v22 = vld [vmem:[#allocation2 + $0xb0] sm:$0xff] }
 0x5b8   :  { %3797 = vmatpush.bf16.msrb.mxu3 %v13472_v22 }
 0x5b9   :  { %v16569_v16 = vadd.f32 %v2953_v59, %v2848_v62  ;;  %v13481_v59 = vld [vmem:[#allocation2 + $0x258] sm:$0xff]  ;;  %v13476_v62 = vld [vmem:[#allocation2 + $0x60] sm:$0xff] }
 0x5ba   :  { %4080 = vmatpush.bf16.msrb.mxu0 %v13481_v59 }
 0x5be   :  { %v2813_v33 = vpop.f32.mrf.mxu2  ;;  %v2955_v6 = vpop.f32.mrf.mxu3 }
 0x5bf   :  { %v2849_v38 = vadd.f32 %v2813_v33, %v16488_v4  ;;  %v13458_v4 = vld [vmem:[#allocation4 + $0xd8] sm:$0xff]  ;;  %v13449_v33 = vld [vmem:[#allocation4 + $0xb0] sm:$0xff] }
 0x5c1   :  { %v16572_v20 = vadd.f32 %v2955_v6, %v2849_v38  ;;  %v16603_v6 = vld [vmem:[#allocation4 + $0x80] sm:$0xff]  }
 0x5c2   :  { %v3856_v38 = vld [vmem:[#allocation4 + $0x80] sm:$0xe] }
 0x5c3   :  { %11499 = vmatmul.msk.bf16.gmra.mxu2 %vm1228_vm0, %v13445_v27  ;;  %11555 = vmatmul.msk.bf16.gmra.mxu3 %vm1228_vm0, %v13457_v49  ;;  %v13467_v49 = vld [vmem:[#allocation2 + $0x470] sm:$0xff] }
 0x5c6   :  { %v2816_v7 = vpop.f32.mrf.mxu2  ;;  %v2958_v17 = vpop.f32.mrf.mxu3 }
 0x5c7   :  { %v2850_v18 = vadd.f32 %v2816_v7, %v16493_v8  ;;  %v13471_v7 = vld [vmem:[#allocation2 + $0x198] sm:$0xff] }
 0x5c8   :  { %3798 = vmatpush.bf16.msrb.mxu3 %v13471_v7 }
 0x5c9   :  { %v16577_v32 = vadd.f32 %v2958_v17, %v2850_v18  ;;  %v13480_v17 = vld [vmem:[#allocation2 + $0x1d0] sm:$0xff]  ;;  %v13918_v18 = vunpack.c.h.b16 %v16603_v6 }
 0x5ca   :  { %4081 = vmatpush.bf16.msrb.mxu0 %v13480_v17 }
 0x5ce   :  { %v2818_v55 = vpop.f32.mrf.mxu2  ;;  %v2960_v9 = vpop.f32.mrf.mxu3 }
 0x5cf   :  { %v2851_v10 = vadd.f32 %v2818_v55, %v16500_v21  ;;  %v13459_v21 = vld [vmem:[#allocation4 + $0xe0] sm:$0xff] }
 0x5d1   :  { %v16580_v12 = vadd.f32 %v2960_v9, %v2851_v10  ;;  %v13461_v9 = vld [vmem:[#allocation4 + $0xf0] sm:$0xff]  ;;  %v16607_v10 = vld [vmem:[#allocation4 + $0xc0] sm:$0xff]  }
 0x5d3   :  { %11500 = vmatmul.msk.bf16.gmra.mxu2 %vm1228_vm0, %v13446_v52  ;;  %11556 = vmatmul.msk.bf16.gmra.mxu3 %vm1228_vm0, %v13458_v4  ;;  %v3998_v52 = vld [vmem:[#allocation4 + $0xc0] sm:$0xe]  ;;  %v13475_v4 = vld [vmem:[#allocation2 + $0x1f8] sm:$0xff] }
 0x5d6   :  { %v2821_v42 = vpop.f32.mrf.mxu2  ;;  %v2963_v43 = vpop.f32.mrf.mxu3 }
 0x5d7   :  { %v2852_v19 = vadd.f32 %v2821_v42, %v16505_v28  ;;  %v3866_v42 = vunpack.c.l.b16 %v3856_v38  ;;  %v3678_v38 = vshll.u32 %v16607_v10, 16 }
 0x5d9   :  { %v16585_v13 = vadd.f32 %v2963_v43, %v2852_v19  ;;  %v13950_v43 = vunpack.c.h.b16 %v16607_v10 }
 0x5de   :  { %v2823_v8 = vpop.f32.mrf.mxu2  ;;  %v2965_v26 = vpop.f32.mrf.mxu3 }
 0x5df   :  { %v2853_v35 = vadd.f32 %v2823_v8, %v16512_v37  ;;  %v16612_v8 = vld [vmem:[#allocation4 + $0x88] sm:$0xff]  }
 0x5e0   :  { %v13921_v30 = vunpack.c.l.b16 %v16612_v8 }
 0x5e1   :  { %v16588_v54 = vadd.f32 %v2965_v26, %v2853_v35  ;;  %v4008_v26 = vunpack.c.l.b16 %v3998_v52  ;;  %v13479_v35 = vld [vmem:[#allocation2 + $0xa0] sm:$0xff]  ;;  %v3676_v52 = vshrl.u32 %v16607_v10, 16 }
 0x5e2   :  { %4082 = vmatpush.bf16.msrb.mxu0 %v13479_v35  ;;  %v16621_v24 = vpack.c.b16 %v13921_v30, %v13918_v18 }
 0x5e3   :  { %11501 = vmatmul.msk.bf16.gmra.mxu2 %vm1228_vm0, %v13447_v36  ;;  %11557 = vmatmul.msk.bf16.gmra.mxu3 %vm1228_vm0, %v13459_v21  ;;  %v3867_v36 = vpack.c.b16 %v13918_v18, %v3866_v42  ;;  %v16617_v21 = vld [vmem:[#allocation4 + $0xc8] sm:$0xff]   ;;  %v3427_v18 = vshrl.u32 %v16603_v6, 16 }
 0x5e4   :  { %v3683_v42 = vshll.u32 %v16617_v21, 16 }
 0x5e6   :  { %v2826_v31 = vpop.f32.mrf.mxu2  ;;  %v2968_v29 = vpop.f32.mrf.mxu3 }
 0x5e7   :  { %v2854_v28 = vadd.f32 %v2826_v31, %v16517_v41  ;;  %v13469_v41 = vld [vmem:[#allocation2 + $0x278] sm:$0xff]  ;;  %v4009_v31 = vpack.c.b16 %v13950_v43, %v4008_v26 }
 0x5e8   :  { %3547 = vmatpush.bf16.msra.mxu2 %v13469_v41 }
 0x5e9   :  { %v16593_v50 = vadd.f32 %v2968_v29, %v2854_v28  ;;  %v3868_v29 = vrot.slane %v3867_v36, 1  ;;  %v4011_v28 = vrot.slane %v16617_v21, 1 }
 0x5ec   :  { %3548 = vmatpush.bf16.msra.mxu2 %v13468_v23  ;;  %v13462_v23 = vld [vmem:[#allocation4 + $0xf8] sm:$0xff] }
 0x5ee   :  { %v2828_v25 = vpop.f32.mrf.mxu2  ;;  %v2970_v37 = vpop.f32.mrf.mxu3 }
 0x5ef   :  { %v2855_v61 = vadd.f32 %v2828_v25, %v16524_v56  ;;  %v13477_v56 = vld [vmem:[#allocation2 + $0x3c8] sm:$0xff]  ;;  %v4010_v25 = vrot.slane %v4009_v31, 1 }
 0x5f0   :  { %3938 = vmatpush.bf16.msrb.mxu1 %v13477_v56  ;;  %3549 = vmatpush.bf16.msra.mxu2 %v13467_v49  ;;  %v13450_v56 = vld [vmem:[#allocation4 + $0xb8] sm:$0xff] }
 0x5f1   :  { %v16596_v57 = vadd.f32 %v2970_v37, %v2855_v61  ;;  %v4012_v44 = vsel %vm2731_vm3, %v4010_v25, %v4011_v28 }
 0x5f2   :  { %11649 = vmatmul.msk.bf16.vlgmr.msrb.gmra.mxu0 %vm1228_vm0, %v4012_v44 }
 0x5f3   :  { %11502 = vmatmul.msk.bf16.gmra.mxu2 %vm1228_vm0, %v13448_v51  ;;  %11558 = vmatmul.msk.bf16.gmra.mxu3 %vm1228_vm0, %v13460_v40 }
 0x5f4   :  { %3939 = vmatpush.bf16.msrb.mxu1 %v13476_v62  ;;  %v3429_v62 = vshll.u32 %v16603_v6, 16 }
 0x5f6   :  { %v2831_v11 = vpop.f32.mrf.mxu2  ;;  %v2973_v48 = vpop.f32.mrf.mxu3 }
 0x5f7   :  { %v2856_v63 = vadd.f32 %v2831_v11, %v16529_v2 }
 0x5f8   :  { %3940 = vmatpush.bf16.msrb.mxu1 %v13475_v4  ;;  %v3680_v4 = vrot.slane %v3678_v38, 1 }
 0x5f9   :  { %v16601_v0 = vadd.f32 %v2973_v48, %v2856_v63  ;;  %v13953_v48 = vunpack.c.l.b16 %v16617_v21 }
 0x5fa   :  { %v3681_v36 = vor.u32 %v3680_v4, %v3676_v52 }
 0x5fb   :  { %v16631_v41 = vpack.c.b16 %v13953_v48, %v13950_v43 }
 0x5fe   :  { %v2833_v27 = vpop.f32.mrf.mxu2  ;;  %v2975_v2 = vpop.f32.mrf.mxu3 }
 0x5ff   :  { %v2857_v55 = vadd.f32 %v2833_v27, %v16536_v15  ;;  %v3869_v15 = vrot.slane %v16612_v8, 1 }
 0x601   :  { %v16610_v19 = vadd.f32 %v2975_v2, %v2857_v55  ;;  %v3870_v51 = vsel %vm2731_vm3, %v3868_v29, %v3869_v15  ;;  %v3431_v55 = vrot.slane %v3429_v62, 1 }
 0x602   :  { %11625 = vmatmul.msk.bf16.vlgmr.msrb.gmra.mxu1 %vm1228_vm0, %v3870_v51 }
 0x603   :  { %11503 = vmatmul.msk.bf16.gmra.mxu2 %vm1228_vm0, %v13449_v33  ;;  %11559 = vmatmul.msk.bf16.gmra.mxu3 %vm1228_vm0, %v13461_v9  ;;  %v16642_v33 = vld [vmem:[#allocation4 + $0xd0] sm:$0xff]   ;;  %v3434_v9 = vshll.u32 %v16612_v8, 16  ;;  %v3432_v26 = vor.u32 %v3431_v55, %v3427_v18  ;;  %v16691_v18 = vld [vmem:[#allocation4 + $0xe0] sm:$0xff]  }
 0x604   :  { %v4013_v27 = vrot.slane %v16642_v33, 1 }
 0x605   :  { %v3436_v35 = vrot.slane %v3434_v9, 1 }
 0x606   :  { %v2836_v37 = vpop.f32.mrf.mxu2  ;;  %v2978_v61 = vpop.f32.mrf.mxu3  ;;  %v4014_v7 = vsel %vm2731_vm3, %v4011_v28, %v4013_v27  ;;  %v16662_v28 = vld [vmem:[#allocation4 + $0x98] sm:$0xff]  }
 0x607   :  { %v2858_v40 = vadd.f32 %v2836_v37, %v16541_v39  ;;  %v16636_v39 = vld [vmem:[#allocation4 + $0x90] sm:$0xff]   ;;  %11650 = vmatmul.msk.bf16.gmra.mxu0 %vm1228_vm0, %v4014_v7  ;;  %v3437_v31 = vsel %vm2288_vm2, %v3432_v26, %v3436_v35  ;;  %v3873_v25 = vrot.slane %v16662_v28, 1  ;;  %v16667_v37 = vld [vmem:[#allocation4 + $0xd8] sm:$0xff]  }
 0x608   :  { %v3871_v59 = vrot.slane %v16636_v39, 1  ;;  %v3446_v26 = vshrl.u32 %v16636_v39, 16 }
 0x609   :  { %v16628_v11 = vadd.f32 %v2978_v61, %v2858_v40 }
 0x60a   :  { %v3874_v61 = vsel %vm2731_vm3, %v3871_v59, %v3873_v25 }
 0x60e   :  { %v2838_v5 = vpop.f32.mrf.mxu2  ;;  %v2980_v53 = vpop.f32.mrf.mxu3 }
 0x60f   :  { %v2859_v63 = vadd.f32 %v2838_v5, %v16548_v47  ;;  %v3872_v47 = vsel %vm2731_vm3, %v3869_v15, %v3871_v59  ;;  %v3438_v5 = vshrl.u32 %v16612_v8, 16 }
 0x611   :  { %v16634_v22 = vadd.f32 %v2980_v53, %v2859_v63  ;;  %v3442_v53 = vshll.u32 %v16636_v39, 16  ;;  %v3687_v63 = vshrl.u32 %v16617_v21, 16  ;;  %v3440_v59 = vor.u32 %v3438_v5, %v3436_v35  ;;  %v16686_v21 = vld [vmem:[#allocation4 + $0xa0] sm:$0xff]  }
 0x612   :  { %11626 = vmatmul.msk.bf16.gmra.mxu1 %vm1228_vm0, %v3872_v47  ;;  %v3450_v35 = vshll.u32 %v16662_v28, 16 }
 0x613   :  { %11504 = vmatmul.msk.bf16.gmra.mxu2 %vm1228_vm0, %v13450_v56  ;;  %11560 = vmatmul.msk.bf16.gmra.mxu3 %vm1228_vm0, %v13462_v23  ;;  %v3691_v56 = vshll.u32 %v16642_v33, 16  ;;  %v3444_v62 = vrot.slane %v3442_v53, 1 }
 0x615   :  { %v3693_v47 = vrot.slane %v3691_v56, 1  ;;  %v3445_v8 = vsel %vm2288_vm2, %v3440_v59, %v3444_v62  ;;  %v3454_v59 = vshrl.u32 %v16662_v28, 16 }
 0x616   :  { %v2841_v2 = vpop.f32.mrf.mxu2  ;;  %v2983_v49 = vpop.f32.mrf.mxu3 }
 0x617   :  { %v2860_v17 = vadd.f32 %v2841_v2, %v16553_v34  ;;  %v3685_v34 = vrot.slane %v3683_v42, 1 }
 0x619   :  { %v16655_v43 = vadd.f32 %v2983_v49, %v2860_v17  ;;  %v3686_v29 = vsel %vm2288_vm2, %v3681_v36, %v3685_v34  ;;  %v3689_v38 = vor.u32 %v3687_v63, %v3685_v34  ;;  %v3875_v17 = vrot.slane %v16686_v21, 1 }
 0x61a   :  { %v3695_v36 = vshrl.u32 %v16642_v33, 16  ;;  %v3699_v34 = vshll.u32 %v16667_v37, 16  ;;  %v16710_v33 = vld [vmem:[#allocation4 + $0xa8] sm:$0xff]  }
 0x61b   :  { %v3694_v49 = vsel %vm2288_vm2, %v3689_v38, %v3693_v47  ;;  %v3876_v55 = vsel %vm2731_vm3, %v3873_v25, %v3875_v17  ;;  %v3703_v38 = vshrl.u32 %v16667_v37, 16 }
 0x61e   :  { %v2843_v15 = vpop.f32.mrf.mxu2  ;;  %v2985_v6 = vpop.f32.mrf.mxu3 }
 0x61f   :  { %v2861_v30 = vadd.f32 %v2843_v15, %v16556_v58  ;;  %v4015_v58 = vrot.slane %v16667_v37, 1  ;;  %v16734_v37 = vld [vmem:[#allocation4 + $0xb0] sm:$0xff]  }
 0x621   :  { %v16660_v10 = vadd.f32 %v2985_v6, %v2861_v30  ;;  %v4016_v44 = vsel %vm2731_vm3, %v4013_v27, %v4015_v58  ;;  %v3448_v6 = vor.u32 %v3446_v26, %v3444_v62  ;;  %v3452_v30 = vrot.slane %v3450_v35, 1 }
 0x622   :  { %11627 = vmatmul.msk.bf16.gmra.mxu1 %vm1228_vm0, %v3874_v61  ;;  %11651 = vmatmul.msk.bf16.gmra.mxu0 %vm1228_vm0, %v4016_v44  ;;  %v16715_v44 = vld [vmem:[#allocation4 + $0xe8] sm:$0xff]   ;;  %v3458_v62 = vshll.u32 %v16686_v21, 16 }
 0x623   :  { %11577 = vmatmul.msk.bf16.vlgmr.msra.gmra.mxu2 %vm1228_vm0, %v3437_v31  ;;  %11601 = vmatmul.msk.bf16.vlgmr.msrb.gmra.mxu3 %vm1228_vm0, %v3686_v29  ;;  %v3697_v31 = vor.u32 %v3695_v36, %v3693_v47  ;;  %v3701_v29 = vrot.slane %v3699_v34, 1  ;;  %v3453_v39 = vsel %vm2288_vm2, %v3448_v6, %v3452_v30  ;;  %v3707_v47 = vshll.u32 %v16691_v18, 16 }
 0x624   :  { %v3462_v6 = vshrl.u32 %v16686_v21, 16 }
 0x626   :  { %v3125_v51 = vpop.f32.mrf.mxu2  ;;  %v3302_v40 = vpop.f32.mrf.mxu3 }
 0x627   :  { %v3165_v48 = vadd.f32 %v3125_v51, %v16561_v3 }
 0x629   :  { %v16679_v23 = vadd.f32 %v3302_v40, %v3165_v48  ;;  %v3877_v40 = vrot.slane %v16710_v33, 1 }
 0x62b   :  { %v3878_v48 = vsel %vm2731_vm3, %v3875_v17, %v3877_v40 }
 0x62e   :  { %v3127_v27 = vpop.f32.mrf.mxu2  ;;  %v3304_v3 = vpop.f32.mrf.mxu3 }
 0x62f   :  { %v3166_v2 = vadd.f32 %v3127_v27, %v16564_v14  ;;  %v4017_v14 = vrot.slane %v16691_v18, 1 }
 0x631   :  { %v16684_v7 = vadd.f32 %v3304_v3, %v3166_v2  ;;  %v4018_v4 = vsel %vm2731_vm3, %v4015_v58, %v4017_v14  ;;  %v3702_v58 = vsel %vm2288_vm2, %v3697_v31, %v3701_v29  ;;  %v3456_v3 = vor.u32 %v3454_v59, %v3452_v30 }
 0x632   :  { %11628 = vmatmul.msk.bf16.gmra.mxu1 %vm1228_vm0, %v3876_v55  ;;  %11652 = vmatmul.msk.bf16.gmra.mxu0 %vm1228_vm0, %v4018_v4  ;;  %v3460_v2 = vrot.slane %v3458_v62, 1  ;;  %v16739_v4 = vld [vmem:[#allocation4 + $0xf0] sm:$0xff]   ;;  %v3466_v30 = vshll.u32 %v16710_v33, 16  ;;  %v3711_v31 = vshrl.u32 %v16691_v18, 16  ;;  %v16758_v18 = vld [vmem:[#allocation4 + $0xb8] sm:$0xff]  }
 0x633   :  { %11578 = vmatmul.msk.bf16.gmra.mxu2 %vm1228_vm0, %v3445_v8  ;;  %11602 = vmatmul.msk.bf16.gmra.mxu3 %vm1228_vm0, %v3694_v49  ;;  %v3705_v8 = vor.u32 %v3703_v38, %v3701_v29  ;;  %v3709_v49 = vrot.slane %v3707_v47, 1  ;;  %v3715_v29 = vshll.u32 %v16715_v44, 16 }
 0x634   :  { %v3461_v28 = vsel %vm2288_vm2, %v3456_v3, %v3460_v2 }
 0x636   :  { %v3130_v9 = vpop.f32.mrf.mxu2  ;;  %v3307_v52 = vpop.f32.mrf.mxu3 }
 0x637   :  { %v3167_v42 = vadd.f32 %v3130_v9, %v16569_v16 }
 0x639   :  { %v16703_v15 = vadd.f32 %v3307_v52, %v3167_v42  ;;  %v3879_v52 = vrot.slane %v16734_v37, 1 }
 0x63b   :  { %v3880_v42 = vsel %vm2731_vm3, %v3877_v40, %v3879_v52 }
 0x63e   :  { %v3132_v25 = vpop.f32.mrf.mxu2  ;;  %v3309_v16 = vpop.f32.mrf.mxu3 }
 0x63f   :  { %v3168_v61 = vadd.f32 %v3132_v25, %v16572_v20  ;;  %v4019_v20 = vrot.slane %v16715_v44, 1 }
 0x641   :  { %v16708_v51 = vadd.f32 %v3309_v16, %v3168_v61  ;;  %v4020_v63 = vsel %vm2731_vm3, %v4017_v14, %v4019_v20  ;;  %v3710_v14 = vsel %vm2288_vm2, %v3705_v8, %v3709_v49  ;;  %v3464_v16 = vor.u32 %v3462_v6, %v3460_v2 }
 0x642   :  { %11629 = vmatmul.msk.bf16.gmra.mxu1 %vm1228_vm0, %v3878_v48  ;;  %11653 = vmatmul.msk.bf16.gmra.mxu0 %vm1228_vm0, %v4020_v63  ;;  %v3468_v61 = vrot.slane %v3466_v30, 1  ;;  %v16763_v63 = vld [vmem:[#allocation4 + $0xf8] sm:$0xff]   ;;  %v3470_v2 = vshrl.u32 %v16710_v33, 16  ;;  %v3474_v8 = vshll.u32 %v16734_v37, 16 }
 0x643   :  { %11579 = vmatmul.msk.bf16.gmra.mxu2 %vm1228_vm0, %v3453_v39  ;;  %11603 = vmatmul.msk.bf16.gmra.mxu3 %vm1228_vm0, %v3702_v58  ;;  %v3713_v39 = vor.u32 %v3711_v31, %v3709_v49  ;;  %v3717_v58 = vrot.slane %v3715_v29, 1  ;;  %v3719_v49 = vshrl.u32 %v16715_v44, 16  ;;  %v13494_v29 = vld [vmem:[#allocation2 + $0x288] sm:$0xff] }
 0x644   :  { %v3469_v21 = vsel %vm2288_vm2, %v3464_v16, %v3468_v61  ;;  %v13498_v16 = vld [vmem:[#allocation2 + $0x3c0] sm:$0xff]  ;;  %4592 = vmatpush.bf16.msra.mxu1 %v13494_v29 }
 0x645   :  { %4841 = vmatpush.bf16.msra.mxu0 %v13498_v16  ;;  %v13496_v29 = vld [vmem:[#allocation2 + $0x120] sm:$0xff] }
 0x646   :  { %v3135_v5 = vpop.f32.mrf.mxu2  ;;  %v3312_v53 = vpop.f32.mrf.mxu3 }
 0x647   :  { %v3169_v56 = vadd.f32 %v3135_v5, %v16577_v32 }
 0x649   :  { %v16727_v27 = vadd.f32 %v3312_v53, %v3169_v56  ;;  %v3881_v53 = vrot.slane %v16758_v18, 1  ;;  %v13486_v56 = vld [vmem:[#allocation2 + $0x3f0] sm:$0xff] }
 0x64a   :  { %4211 = vmatpush.bf16.msrb.mxu2 %v13486_v56 }
 0x64b   :  { %v3882_v59 = vsel %vm2731_vm3, %v3879_v52, %v3881_v53  ;;  %v3623_v52 = vld [vmem:[#allocation4 + $0x100] sm:$0x1] }
 0x64e   :  { %v3137_v17 = vpop.f32.mrf.mxu2  ;;  %v3314_v32 = vpop.f32.mrf.mxu3 }
 0x64f   :  { %v3170_v55 = vadd.f32 %v3137_v17, %v16580_v12  ;;  %v4021_v12 = vrot.slane %v16739_v4, 1  ;;  %v3723_v17 = vshll.u32 %v16739_v4, 16 }
 0x651   :  { %v16732_v9 = vadd.f32 %v3314_v32, %v3170_v55  ;;  %v4022_v36 = vsel %vm2731_vm3, %v4019_v20, %v4021_v12  ;;  %v3718_v20 = vsel %vm2288_vm2, %v3713_v39, %v3717_v58  ;;  %v13490_v55 = vld [vmem:[#allocation2 + $0x220] sm:$0xff]  ;;  %v3725_v33 = vrot.slane %v3723_v17, 1 }
 0x652   :  { %11630 = vmatmul.msk.bf16.gmra.mxu1 %vm1228_vm0, %v3880_v42  ;;  %11654 = vmatmul.msk.bf16.gmra.mxu0 %vm1228_vm0, %v4022_v36  ;;  %v3721_v42 = vor.u32 %v3719_v49, %v3717_v58  ;;  %v3665_v36 = vunpack.c.l.b16 %v3623_v52 }
 0x653   :  { %11580 = vmatmul.msk.bf16.gmra.mxu2 %vm1228_vm0, %v3461_v28  ;;  %11604 = vmatmul.msk.bf16.gmra.mxu3 %vm1228_vm0, %v3710_v14  ;;  %v3374_v28 = vld [vmem:[#allocation4 + $0xc0] sm:$0x1]  ;;  %v3472_v14 = vor.u32 %v3470_v2, %v3468_v61  ;;  %v13488_v2 = vld [vmem:[#allocation2 + $0x248] sm:$0xff] }
 0x654   :  { %4343 = vmatpush.bf16.msra.mxu3 %v13490_v55  ;;  %v3726_v6 = vsel %vm2288_vm2, %v3721_v42, %v3725_v33  ;;  %v16784_v61 = vpack.c.b16 %v3665_v36, %v3665_v36 }
 0x656   :  { %v3140_v26 = vpop.f32.mrf.mxu2  ;;  %v3317_v35 = vpop.f32.mrf.mxu3  ;;  %v4025_v58 = vrot.slane %v16784_v61, 1 }
 0x657   :  { %v3171_v34 = vadd.f32 %v3140_v26, %v16585_v13 }
 0x659   :  { %v16751_v25 = vadd.f32 %v3317_v35, %v3171_v34 }
 0x65e   :  { %v3142_v40 = vpop.f32.mrf.mxu2  ;;  %v3319_v13 = vpop.f32.mrf.mxu3 }
 0x65f   :  { %v3172_v48 = vadd.f32 %v3142_v40, %v16588_v54  ;;  %v4023_v54 = vrot.slane %v16763_v63, 1 }
 0x661   :  { %v16756_v5 = vadd.f32 %v3319_v13, %v3172_v48  ;;  %v4024_v47 = vsel %vm2731_vm3, %v4021_v12, %v4023_v54  ;;  %v3416_v12 = vunpack.c.l.b16 %v3374_v28  ;;  %v4026_v48 = vsel %vm2731_vm3, %v4023_v54, %v4025_v58  ;;  %v13484_v54 = vld [vmem:[#allocation2 + $0x2c0] sm:$0xff] }
 0x662   :  { %11631 = vmatmul.msk.bf16.gmra.mxu1 %vm1228_vm0, %v3882_v59  ;;  %11655 = vmatmul.msk.bf16.gmra.mxu0 %vm1228_vm0, %v4024_v47  ;;  %v3478_v59 = vshrl.u32 %v16734_v37, 16  ;;  %v13493_v47 = vld [vmem:[#allocation2 + $0x280] sm:$0xff] }
 0x663   :  { %11581 = vmatmul.msk.bf16.gmra.mxu2 %vm1228_vm0, %v3469_v21  ;;  %11605 = vmatmul.msk.bf16.gmra.mxu3 %vm1228_vm0, %v3718_v20  ;;  %v16780_v30 = vpack.c.b16 %v3416_v12, %v3416_v12  ;;  %v13485_v21 = vld [vmem:[#allocation2 + $0x3f8] sm:$0xff]  ;;  %v13489_v20 = vld [vmem:[#allocation2 + $0x330] sm:$0xff]  ;;  %v4404_v37 = vld [vmem:[#allocation4 + $0x4] sm:$0xf] }
 0x664   :  { %4212 = vmatpush.bf16.msrb.mxu2 %v13485_v21  ;;  %4344 = vmatpush.bf16.msra.mxu3 %v13489_v20  ;;  %v4446_v55 = vunpack.c.l.b16 %v4404_v37  ;;  %v16804_v28 = vld [vmem:[#allocation4 + $0x40] sm:$0xff]   ;;  %v13492_v12 = vld [vmem:[#allocation2 + $0x310] sm:$0xff] }
 0x665   :  { %v3883_v39 = vrot.slane %v16780_v30, 1  ;;  %4593 = vmatpush.bf16.msra.mxu1 %v13493_v47  ;;  %18677 = vst [vmem:[#allocation13_spill] sm:$0xff] %v16804_v28  ;;  %v16819_v21 = vld [vmem:[#allocation4 + $0x4c] sm:$0xff]  }
 0x666   :  { %v3145_v62 = vpop.f32.mrf.mxu2  ;;  %v3322_v38 = vpop.f32.mrf.mxu3  ;;  %v4729_v47 = vshll.u32 %v16819_v21, 16 }
 0x667   :  { %v3173_v3 = vadd.f32 %v3145_v62, %v16593_v50  ;;  %v3476_v50 = vrot.slane %v3474_v8, 1  ;;  %v3482_v62 = vshll.u32 %v16758_v18, 16  ;;  %v16801_v8 = vld [vmem:[#allocation4 + $0x8] sm:$0xff]  }
 0x668   :  { %4213 = vmatpush.bf16.msrb.mxu2 %v13484_v54  ;;  %4345 = vmatpush.bf16.msra.mxu3 %v13488_v2 }
 0x669   :  { %v16775_v32 = vadd.f32 %v3322_v38, %v3173_v3  ;;  %v3477_v34 = vsel %vm2288_vm2, %v3472_v14, %v3476_v50  ;;  %v3727_v38 = vshrl.u32 %v16739_v4, 16  ;;  %v3480_v49 = vor.u32 %v3478_v59, %v3476_v50  ;;  %v16806_v14 = vld [vmem:[#allocation4 + $0x48] sm:$0xff]   ;;  %4594 = vmatpush.bf16.msra.mxu1 %v13492_v12 }
 0x66a   :  { %v3484_v17 = vrot.slane %v3482_v62, 1  ;;  %v18672_v4 = vunpack.c.l.b16 %v16801_v8 }
 0x66b   :  { %v3729_v52 = vor.u32 %v3727_v38, %v3725_v33 }
 0x66c   :  { %v4463_v50 = vpack.c.b16 %v18672_v4, %v4446_v55  ;;  %v3485_v58 = vsel %vm2288_vm2, %v3480_v49, %v3484_v17  ;;  %v4731_v49 = vrot.slane %v4729_v47, 1 }
 0x66e   :  { %v3147_v26 = vpop.f32.mrf.mxu2  ;;  %v3324_v35 = vpop.f32.mrf.mxu3 }
 0x66f   :  { %v3174_v44 = vadd.f32 %v3147_v26, %v16596_v57  ;;  %v3884_v57 = vsel %vm2731_vm3, %v3881_v53, %v3883_v39  ;;  %v3731_v53 = vshll.u32 %v16763_v63, 16  ;;  %v18670_v26 = vunpack.c.l.b16 %v16806_v14  ;;  %v16815_v39 = vld [vmem:[#allocation4 + $0xc] sm:$0xff]   ;;  %v16829_v55 = vpop.f32.mrf.mxu0 }
 0x670   :  { %v4480_v62 = vshll.u32 %v16815_v39, 16 }
 0x671   :  { %v16782_v31 = vadd.f32 %v3324_v35, %v3174_v44  ;;  %v3733_v42 = vrot.slane %v3731_v53, 1  ;;  %v4695_v35 = vunpack.c.h.b16 %v16804_v28 }
 0x672   :  { %11632 = vmatmul.msk.bf16.gmra.mxu1 %vm1228_vm0, %v3884_v57  ;;  %11656 = vmatmul.msk.bf16.gmra.mxu0 %vm1228_vm0, %v4026_v48  ;;  %v4475_v57 = vshll.u32 %v4463_v50, 16  ;;  %v4473_v48 = vshrl.u32 %v4463_v50, 16 }
 0x673   :  { %11582 = vmatmul.msk.bf16.gmra.mxu2 %vm1228_vm0, %v3477_v34  ;;  %11606 = vmatmul.msk.bf16.gmra.mxu3 %vm1228_vm0, %v3726_v6  ;;  %v13483_v34 = vld [vmem:[#allocation2 + $0x408] sm:$0xff]  ;;  %v13487_v6 = vld [vmem:[#allocation2 + $0x338] sm:$0xff]  ;;  %v4712_v33 = vpack.c.b16 %v18670_v26, %v4695_v35 }
 0x674   :  { %4214 = vmatpush.bf16.msrb.mxu2 %v13483_v34  ;;  %4346 = vmatpush.bf16.msra.mxu3 %v13487_v6  ;;  %v4477_v59 = vrot.slane %v4475_v57, 1  ;;  %v3490_v34 = vshll.u32 %v16780_v30, 16  ;;  %v3735_v6 = vshrl.u32 %v16763_v63, 16 }
 0x675   :  { %v4724_v20 = vshll.u32 %v4712_v33, 16  ;;  %v4722_v38 = vshrl.u32 %v4712_v33, 16 }
 0x676   :  { %v3150_v40 = vpop.f32.mrf.mxu2  ;;  %v3327_v13 = vpop.f32.mrf.mxu3  ;;  %v4478_v54 = vor.u32 %v4477_v59, %v4473_v48  ;;  %v3492_v57 = vrot.slane %v3490_v34, 1  ;;  %v4484_v59 = vshrl.u32 %v16815_v39, 16  ;;  %v14554_v34 = vld [vmem:[#allocation4 + $0x8] sm:$0xff]  }
 0x677   :  { %v3175_v56 = vadd.f32 %v3150_v40, %v16601_v0  ;;  %v13497_v0 = vld [vmem:[#allocation2 + $0x2c8] sm:$0xff]  ;;  %v3734_v40 = vsel %vm2288_vm2, %v3729_v52, %v3733_v42  ;;  %v4726_v53 = vrot.slane %v4724_v20, 1  ;;  %v16846_v20 = vld [vmem:[#allocation4 + $0x14] sm:$0xff]  }
 0x678   :  { %4842 = vmatpush.bf16.msra.mxu0 %v13497_v0  ;;  %v4482_v0 = vrot.slane %v4480_v62, 1 }
 0x679   :  { %v16799_v3 = vadd.f32 %v3327_v13, %v3175_v56  ;;  %v13491_v13 = vld [vmem:[#allocation2 + $0x1b8] sm:$0xff]  ;;  %v4727_v37 = vor.u32 %v4726_v53, %v4722_v38  ;;  %v4733_v53 = vshrl.u32 %v16819_v21, 16 }
 0x67a   :  { %4595 = vmatpush.bf16.msra.mxu1 %v13491_v13  ;;  %v4483_v35 = vsel %vm2288_vm2, %v4478_v54, %v4482_v0  ;;  %v4486_v62 = vor.u32 %v4484_v59, %v4482_v0  ;;  %v16885_v59 = vld [vmem:[#allocation4 + $0x5c] sm:$0xff]  }
 0x67b   :  { %v4732_v50 = vsel %vm2288_vm2, %v4727_v37, %v4731_v49  ;;  %v4735_v37 = vor.u32 %v4733_v53, %v4731_v49 }
 0x67c   :  { %4843 = vmatpush.bf16.msra.mxu0 %v13496_v29  ;;  %v3739_v29 = vshll.u32 %v16784_v61, 16 }
 0x67e   :  { %v3152_v36 = vpop.f32.mrf.mxu2  ;;  %v3329_v44 = vpop.f32.mrf.mxu3 }
 0x67f   :  { %v3176_v16 = vadd.f32 %v3152_v36, %v16610_v19  ;;  %v13495_v19 = vld [vmem:[#allocation2 + $0x2e8] sm:$0xff]  ;;  %v16827_v2 = vpop.f32.mrf.mxu1 }
 0x680   :  { %4844 = vmatpush.bf16.msra.mxu0 %v13495_v19 }
 0x681   :  { %v16821_v56 = vadd.f32 %v3329_v44, %v3176_v16  ;;  %v3486_v44 = vshrl.u32 %v16758_v18, 16 }
 0x682   :  { %11721 = vmatmul.msk.bf16.vlgmr.msra.gmra.mxu1 %vm1228_vm0, %v4483_v35 }
 0x683   :  { %11583 = vmatmul.msk.bf16.gmra.mxu2 %vm1228_vm0, %v3485_v58  ;;  %11607 = vmatmul.msk.bf16.gmra.mxu3 %vm1228_vm0, %v3734_v40  ;;  %v3488_v16 = vor.u32 %v3486_v44, %v3484_v17  ;;  %v3737_v58 = vor.u32 %v3735_v6, %v3733_v42  ;;  %v3741_v40 = vrot.slane %v3739_v29, 1  ;;  %v4488_v17 = vshll.u32 %v16846_v20, 16  ;;  %v16853_v42 = vld [vmem:[#allocation4 + $0x54] sm:$0xff]   ;;  %v14555_v29 = vld [vmem:[#allocation4 + $0x48] sm:$0xff]  }
 0x684   :  { %11745 = vmatmul.msk.bf16.vlgmr.msra.gmra.mxu0 %vm1228_vm0, %v4732_v50  ;;  %v4737_v47 = vshll.u32 %v16853_v42, 16  ;;  %v13857_v6 = vunpack.c.l.b16 %v14554_v34 }
 0x685   :  { %v3493_v30 = vsel %vm2288_vm2, %v3488_v16, %v3492_v57  ;;  %v3742_v61 = vsel %vm2288_vm2, %v3737_v58, %v3741_v40  ;;  %v4490_v38 = vrot.slane %v4488_v17, 1  ;;  %v13889_v16 = vunpack.c.l.b16 %v14555_v29 }
 0x686   :  { %v3155_v52 = vpop.f32.mrf.mxu2  ;;  %v3332_v12 = vpop.f32.mrf.mxu3 }
 0x687   :  { %v3177_v36 = vadd.f32 %v3155_v52, %v16628_v11  ;;  %v16842_v13 = vpop.f32.mrf.mxu1  ;;  %v16844_v11 = vpop.f32.mrf.mxu0  ;;  %v4491_v54 = vsel %vm2288_vm2, %v4486_v62, %v4490_v38  ;;  %v4739_v52 = vrot.slane %v4737_v47, 1  ;;  %v4741_v47 = vshrl.u32 %v16853_v42, 16 }
 0x689   :  { %v16840_v33 = vadd.f32 %v3332_v12, %v3177_v36  ;;  %v4740_v0 = vsel %vm2288_vm2, %v4735_v37, %v4739_v52 }
 0x68e   :  { %v3157_v48 = vpop.f32.mrf.mxu2  ;;  %v3334_v18 = vpop.f32.mrf.mxu3 }
 0x68f   :  { %v3178_v63 = vadd.f32 %v3157_v48, %v16634_v22  ;;  %v16861_v22 = vpop.f32.mrf.mxu1  ;;  %v16864_v12 = vpop.f32.mrf.mxu0  ;;  %v16876_v48 = vld [vmem:[#allocation4 + $0x1c] sm:$0xff]  }
 0x691   :  { %v16855_v19 = vadd.f32 %v3334_v18, %v3178_v63  ;;  %v4151_v18 = vpack.c.b16 %v13857_v6, %v13854_v60  ;;  %v4283_v63 = vpack.c.b16 %v13889_v16, %v13886_v1  ;;  %v4743_v60 = vor.u32 %v4741_v47, %v4739_v52 }
 0x692   :  { %11722 = vmatmul.msk.bf16.gmra.mxu1 %vm1228_vm0, %v4491_v54 }
 0x693   :  { %11584 = vmatmul.msk.bf16.gmra.mxu2 %vm1228_vm0, %v3493_v30  ;;  %11608 = vmatmul.msk.bf16.gmra.mxu3 %vm1228_vm0, %v3742_v61  ;;  %v4492_v30 = vshrl.u32 %v16846_v20, 16  ;;  %v4496_v61 = vshll.u32 %v16876_v48, 16 }
 0x694   :  { %11746 = vmatmul.msk.bf16.gmra.mxu0 %vm1228_vm0, %v4740_v0 }
 0x695   :  { %v4494_v62 = vor.u32 %v4492_v30, %v4490_v38  ;;  %v4498_v53 = vrot.slane %v4496_v61, 1 }
 0x696   :  { %v3160_v35 = vpop.f32.mrf.mxu2  ;;  %v3337_v50 = vpop.f32.mrf.mxu3 }
 0x697   :  { %v3179_v36 = vadd.f32 %v3160_v35, %v16655_v43  ;;  %v16872_v49 = vpop.f32.mrf.mxu1  ;;  %v16874_v57 = vpop.f32.mrf.mxu0  ;;  %v4499_v46 = vsel %vm2288_vm2, %v4494_v62, %v4498_v53 }
 0x699   :  { %v16870_v44 = vadd.f32 %v3337_v50, %v3179_v36 }
 0x69e   :  { %v3162_v58 = vpop.f32.mrf.mxu2  ;;  %v3339_v40 = vpop.f32.mrf.mxu3 }
 0x69f   :  { %v3180_v43 = vadd.f32 %v3162_v58, %v16660_v10  ;;  %v4745_v10 = vshll.u32 %v16885_v59, 16  ;;  %v16893_v45 = vpop.f32.mrf.mxu1  ;;  %v16896_v54 = vpop.f32.mrf.mxu0  ;;  %v16910_v58 = vld [vmem:[#allocation4 + $0x24] sm:$0xff]  }
 0x6a1   :  { %v16887_v17 = vadd.f32 %v3339_v40, %v3180_v43  ;;  %v4747_v1 = vrot.slane %v4745_v10, 1  ;;  %v14324_v40 = vld [vmem:[#allocation4 + $0xc] sm:$0xff]  }
 0x6a2   :  { %11723 = vmatmul.msk.bf16.gmra.mxu1 %vm1228_vm0, %v4499_v46  ;;  %v14337_v43 = vld [vmem:[#allocation4 + $0x4c] sm:$0xff]  }
 0x6a3   :  { %11673 = vmatmul.msk.bf16.vlgmr.msrb.gmra.mxu2 %vm1228_vm0, %v4151_v18  ;;  %11697 = vmatmul.msk.bf16.vlgmr.msra.gmra.mxu3 %vm1228_vm0, %v4283_v63  ;;  %v4748_v38 = vsel %vm2288_vm2, %v4743_v60, %v4747_v1  ;;  %v4500_v18 = vshrl.u32 %v16876_v48, 16  ;;  %v4504_v63 = vshll.u32 %v16910_v58, 16 }
 0x6a4   :  { %11747 = vmatmul.msk.bf16.gmra.mxu0 %vm1228_vm0, %v4748_v38 }
 0x6a5   :  { %v4502_v61 = vor.u32 %v4500_v18, %v4498_v53  ;;  %v4506_v62 = vrot.slane %v4504_v63, 1  ;;  %v14326_v18 = vld [vmem:[#allocation4 + $0x14] sm:$0xff]  }
 0x6a6   :  { %v3551_v37 = vpop.f32.mrf.mxu2  ;;  %v3800_v35 = vpop.f32.mrf.mxu3  ;;  %v14339_v63 = vld [vmem:[#allocation4 + $0x54] sm:$0xff]  }
 0x6a7   :  { %v3591_v50 = vadd.f32 %v3551_v37, %v16679_v23  ;;  %v16903_v34 = vpop.f32.mrf.mxu1  ;;  %v16905_v6 = vpop.f32.mrf.mxu0  ;;  %v4507_v46 = vsel %vm2288_vm2, %v4502_v61, %v4506_v62 }
 0x6a9   :  { %v3840_v0 = vadd.f32 %v3800_v35, %v3591_v50 }
 0x6ab   :  { %v3982_v36 = vadd.f32 %v16827_v2, %v3840_v0  ;;  %v16915_v2 = vld [vmem:[#allocation4 + $0x64] sm:$0xff]  }
 0x6ac   :  { %v4753_v47 = vshll.u32 %v16915_v2, 16 }
 0x6ad   :  { %v16908_v52 = vadd.f32 %v16829_v55, %v3982_v36  ;;  %v4749_v55 = vshrl.u32 %v16885_v59, 16 }
 0x6ae   :  { %v3553_v29 = vpop.f32.mrf.mxu2  ;;  %v3802_v16 = vpop.f32.mrf.mxu3  ;;  %v4755_v37 = vrot.slane %v4753_v47, 1 }
 0x6af   :  { %v3592_v23 = vadd.f32 %v3553_v29, %v16684_v7  ;;  %v16922_v7 = vpop.f32.mrf.mxu1  ;;  %v4751_v60 = vor.u32 %v4749_v55, %v4747_v1  ;;  %v16925_v35 = vpop.f32.mrf.mxu0 }
 0x6b1   :  { %v3841_v30 = vadd.f32 %v3802_v16, %v3592_v23  ;;  %v4756_v0 = vsel %vm2288_vm2, %v4751_v60, %v4755_v37 }
 0x6b2   :  { %11724 = vmatmul.msk.bf16.gmra.mxu1 %vm1228_vm0, %v4507_v46 }
 0x6b3   :  { %v3983_v10 = vadd.f32 %v16842_v13, %v3841_v30  ;;  %11674 = vmatmul.msk.bf16.gmra.mxu2 %vm1228_vm0, %v14324_v40  ;;  %11698 = vmatmul.msk.bf16.gmra.mxu3 %vm1228_vm0, %v14337_v43  ;;  %v16942_v43 = vld [vmem:[#allocation4 + $0x2c] sm:$0xff]   ;;  %v4508_v30 = vshrl.u32 %v16910_v58, 16 }
 0x6b4   :  { %11748 = vmatmul.msk.bf16.gmra.mxu0 %vm1228_vm0, %v4756_v0  ;;  %v4512_v61 = vshll.u32 %v16942_v43, 16 }
 0x6b5   :  { %v16928_v53 = vadd.f32 %v16844_v11, %v3983_v10  ;;  %v4510_v47 = vor.u32 %v4508_v30, %v4506_v62 }
 0x6b6   :  { %v3556_v38 = vpop.f32.mrf.mxu2  ;;  %v3805_v50 = vpop.f32.mrf.mxu3  ;;  %v4514_v10 = vrot.slane %v4512_v61, 1  ;;  %v16974_v61 = vld [vmem:[#allocation4 + $0x34] sm:$0xff]  }
 0x6b7   :  { %v3593_v13 = vadd.f32 %v3556_v38, %v16703_v15  ;;  %v16935_v1 = vpop.f32.mrf.mxu1  ;;  %v16937_v16 = vpop.f32.mrf.mxu0 }
 0x6b8   :  { %v4515_v38 = vsel %vm2288_vm2, %v4510_v47, %v4514_v10  ;;  %v14341_v47 = vld [vmem:[#allocation4 + $0x5c] sm:$0xff]  }
 0x6b9   :  { %v3842_v36 = vadd.f32 %v3805_v50, %v3593_v13 }
 0x6bb   :  { %v3984_v29 = vadd.f32 %v16861_v22, %v3842_v36  ;;  %v16947_v22 = vld [vmem:[#allocation4 + $0x6c] sm:$0xff]  }
 0x6bc   :  { %v4761_v46 = vshll.u32 %v16947_v22, 16 }
 0x6bd   :  { %v16940_v11 = vadd.f32 %v16864_v12, %v3984_v29  ;;  %v4757_v12 = vshrl.u32 %v16915_v2, 16 }
 0x6be   :  { %v3558_v23 = vpop.f32.mrf.mxu2  ;;  %v3807_v40 = vpop.f32.mrf.mxu3  ;;  %v4763_v0 = vrot.slane %v4761_v46, 1  ;;  %v4520_v46 = vshll.u32 %v16974_v61, 16 }
 0x6bf   :  { %v3594_v15 = vadd.f32 %v3558_v23, %v16708_v51  ;;  %v16954_v51 = vpop.f32.mrf.mxu1  ;;  %v4759_v50 = vor.u32 %v4757_v12, %v4755_v37  ;;  %v16957_v13 = vpop.f32.mrf.mxu0  ;;  %v4516_v12 = vshrl.u32 %v16942_v43, 16 }
 0x6c1   :  { %v3843_v55 = vadd.f32 %v3807_v40, %v3594_v15  ;;  %v4764_v23 = vsel %vm2288_vm2, %v4759_v50, %v4763_v0  ;;  %v4522_v50 = vrot.slane %v4520_v46, 1 }
 0x6c2   :  { %11725 = vmatmul.msk.bf16.gmra.mxu1 %vm1228_vm0, %v4515_v38  ;;  %v4518_v38 = vor.u32 %v4516_v12, %v4514_v10 }
 0x6c3   :  { %v3985_v60 = vadd.f32 %v16872_v49, %v3843_v55  ;;  %11675 = vmatmul.msk.bf16.gmra.mxu2 %vm1228_vm0, %v14326_v18  ;;  %11699 = vmatmul.msk.bf16.gmra.mxu3 %vm1228_vm0, %v14339_v63  ;;  %v14328_v55 = vld [vmem:[#allocation4 + $0x1c] sm:$0xff]  }
 0x6c4   :  { %11749 = vmatmul.msk.bf16.gmra.mxu0 %vm1228_vm0, %v4764_v23  ;;  %v4523_v23 = vsel %vm2288_vm2, %v4518_v38, %v4522_v50  ;;  %v14221_v38 = vld [vmem:[#allocation4 + $0x78] sm:$0xff]  }
 0x6c5   :  { %v16960_v62 = vadd.f32 %v16874_v57, %v3985_v60 }
 0x6c6   :  { %v3561_v36 = vpop.f32.mrf.mxu2  ;;  %v3810_v29 = vpop.f32.mrf.mxu3 }
 0x6c7   :  { %v3595_v49 = vadd.f32 %v3561_v36, %v16727_v27  ;;  %v16967_v37 = vpop.f32.mrf.mxu1  ;;  %v16969_v18 = vpop.f32.mrf.mxu0 }
 0x6c9   :  { %v3844_v40 = vadd.f32 %v3810_v29, %v3595_v49 }
 0x6cb   :  { %v3986_v15 = vadd.f32 %v16893_v45, %v3844_v40  ;;  %v16979_v45 = vld [vmem:[#allocation4 + $0x74] sm:$0xff]  }
 0x6cc   :  { %v4769_v36 = vshll.u32 %v16979_v45, 16 }
 0x6cd   :  { %v16972_v57 = vadd.f32 %v16896_v54, %v3986_v15  ;;  %v4765_v54 = vshrl.u32 %v16947_v22, 16 }
 0x6ce   :  { %v3563_v63 = vpop.f32.mrf.mxu2  ;;  %v3812_v30 = vpop.f32.mrf.mxu3  ;;  %v4771_v40 = vrot.slane %v4769_v36, 1 }
 0x6cf   :  { %v3596_v27 = vadd.f32 %v3563_v63, %v16732_v9  ;;  %v16986_v9 = vpop.f32.mrf.mxu1  ;;  %v4767_v49 = vor.u32 %v4765_v54, %v4763_v0  ;;  %v16989_v15 = vpop.f32.mrf.mxu0  ;;  %v14214_v0 = vld [vmem:[#allocation4 + $0x38] sm:$0xff]   ;;  %v17004_v54 = vld [vmem:[#allocation4 + $0x80] sm:$0xf] }
 0x6d0   :  { %v14006_v46 = vunpack.c.h.b16 %v14214_v0  ;;  %18678 = vst [vmem:[#allocation14_spill] sm:$0xff] %v17004_v54 }
 0x6d1   :  { %v3845_v60 = vadd.f32 %v3812_v30, %v3596_v27  ;;  %v4772_v27 = vsel %vm2288_vm2, %v4767_v49, %v4771_v40  ;;  %v18673_v49 = vunpack.c.l.b16 %v17004_v54 }
 0x6d2   :  { %11726 = vmatmul.msk.bf16.gmra.mxu1 %vm1228_vm0, %v4523_v23 }
 0x6d3   :  { %v3987_v29 = vadd.f32 %v16903_v34, %v3845_v60  ;;  %11676 = vmatmul.msk.bf16.gmra.mxu2 %vm1228_vm0, %v14328_v55  ;;  %11700 = vmatmul.msk.bf16.gmra.mxu3 %vm1228_vm0, %v14341_v47 }
 0x6d4   :  { %11750 = vmatmul.msk.bf16.gmra.mxu0 %vm1228_vm0, %v4772_v27  ;;  %v14343_v27 = vld [vmem:[#allocation4 + $0x64] sm:$0xff]  }
 0x6d5   :  { %v16992_v10 = vadd.f32 %v16905_v6, %v3987_v29  ;;  %v18671_v6 = vunpack.c.l.b16 %v16804_v28 }
 0x6d6   :  { %v3566_v63 = vpop.f32.mrf.mxu2  ;;  %v3815_v30 = vpop.f32.mrf.mxu3 }
 0x6d7   :  { %v3597_v34 = vadd.f32 %v3566_v63, %v16751_v25  ;;  %v16999_v12 = vpop.f32.mrf.mxu1  ;;  %v17002_v60 = vpop.f32.mrf.mxu0  ;;  %v17011_v23 = vpack.c.b16 %v18671_v6, %v14006_v46  ;;  %v4773_v46 = vshrl.u32 %v16979_v45, 16 }
 0x6d9   :  { %v3846_v55 = vadd.f32 %v3815_v30, %v3597_v34  ;;  %v14330_v30 = vld [vmem:[#allocation4 + $0x24] sm:$0xff]   ;;  %v4524_v34 = vshrl.u32 %v16974_v61, 16 }
 0x6db   :  { %v3988_v47 = vadd.f32 %v16922_v7, %v3846_v55  ;;  %v14034_v7 = vunpack.c.h.b16 %v14221_v38  ;;  %v4528_v55 = vshll.u32 %v17011_v23, 16  ;;  %v4526_v0 = vor.u32 %v4524_v34, %v4522_v50 }
 0x6dd   :  { %v17007_v25 = vadd.f32 %v16925_v35, %v3988_v47  ;;  %v17019_v35 = vpack.c.b16 %v18673_v49, %v14034_v7  ;;  %v4530_v26 = vrot.slane %v4528_v55, 1  ;;  %v4775_v7 = vor.u32 %v4773_v46, %v4771_v40  ;;  %v13506_v55 = vld [vmem:[#allocation2 + $0xf8] sm:$0xff] }
 0x6de   :  { %v3568_v36 = vpop.f32.mrf.mxu2  ;;  %v3817_v29 = vpop.f32.mrf.mxu3  ;;  %5125 = vmatpush.bf16.msrb.mxu3 %v13506_v55 }
 0x6df   :  { %v3598_v63 = vadd.f32 %v3568_v36, %v16756_v5  ;;  %v4777_v38 = vshll.u32 %v17019_v35, 16  ;;  %v13502_v5 = vld [vmem:[#allocation2 + $0x200] sm:$0xff]  ;;  %v17026_v36 = vpop.f32.mrf.mxu1  ;;  %v4531_v4 = vsel %vm2288_vm2, %v4526_v0, %v4530_v26 }
 0x6e0   :  { %4983 = vmatpush.bf16.msra.mxu2 %v13502_v5 }
 0x6e1   :  { %v3847_v47 = vadd.f32 %v3817_v29, %v3598_v63  ;;  %v4779_v49 = vrot.slane %v4777_v38, 1  ;;  %v17029_v29 = vpop.f32.mrf.mxu0 }
 0x6e2   :  { %11727 = vmatmul.msk.bf16.gmra.mxu1 %vm1228_vm0, %v4531_v4 }
 0x6e3   :  { %v3989_v6 = vadd.f32 %v16935_v1, %v3847_v47  ;;  %11677 = vmatmul.msk.bf16.gmra.mxu2 %vm1228_vm0, %v14330_v30  ;;  %11701 = vmatmul.msk.bf16.gmra.mxu3 %vm1228_vm0, %v14343_v27  ;;  %v4780_v1 = vsel %vm2288_vm2, %v4775_v7, %v4779_v49  ;;  %v4420_v47 = vld [vmem:[#allocation4 + $0x44] sm:$0x1] }
 0x6e4   :  { %11751 = vmatmul.msk.bf16.gmra.mxu0 %vm1228_vm0, %v4780_v1  ;;  %v4462_v46 = vunpack.c.l.b16 %v4420_v47  ;;  %v4532_v1 = vshrl.u32 %v17011_v23, 16 }
 0x6e5   :  { %v17032_v50 = vadd.f32 %v16937_v16, %v3989_v6  ;;  %v4669_v6 = vld [vmem:[#allocation4 + $0x84] sm:$0x1] }
 0x6e6   :  { %v3571_v63 = vpop.f32.mrf.mxu2  ;;  %v3820_v34 = vpop.f32.mrf.mxu3  ;;  %v17046_v4 = vpack.c.b16 %v4462_v46, %v4462_v46  ;;  %v4711_v7 = vunpack.c.l.b16 %v4669_v6  ;;  %v4534_v47 = vor.u32 %v4532_v1, %v4530_v26  ;;  %v13514_v6 = vld [vmem:[#allocation2 + $0x410] sm:$0xff] }
 0x6e7   :  { %v3599_v30 = vadd.f32 %v3571_v63, %v16775_v32  ;;  %v17039_v0 = vpop.f32.mrf.mxu1  ;;  %5389 = vmatpush.bf16.msrb.mxu0 %v13514_v6 }
 0x6e9   :  { %v3848_v27 = vadd.f32 %v3820_v34, %v3599_v30  ;;  %v17041_v16 = vpop.f32.mrf.mxu0  ;;  %v14345_v34 = vld [vmem:[#allocation4 + $0x6c] sm:$0xff]   ;;  %v4536_v30 = vshll.u32 %v17046_v4, 16 }
 0x6eb   :  { %v3990_v40 = vadd.f32 %v16954_v51, %v3848_v27  ;;  %v14332_v51 = vld [vmem:[#allocation4 + $0x2c] sm:$0xff]   ;;  %v17051_v27 = vpack.c.b16 %v4711_v7, %v4711_v7  ;;  %v4538_v54 = vrot.slane %v4536_v30, 1  ;;  %v13505_v30 = vld [vmem:[#allocation2 + $0x3a0] sm:$0xff] }
 0x6ec   :  { %5126 = vmatpush.bf16.msrb.mxu3 %v13505_v30  ;;  %v13507_v30 = vld [vmem:[#allocation2 + $0x128] sm:$0xff] }
 0x6ed   :  { %v17044_v38 = vadd.f32 %v16957_v13, %v3990_v40  ;;  %v4781_v13 = vshrl.u32 %v17019_v35, 16  ;;  %v4785_v40 = vshll.u32 %v17051_v27, 16  ;;  %v4539_v7 = vsel %vm2288_vm2, %v4534_v47, %v4538_v54  ;;  %v13509_v54 = vld [vmem:[#allocation2 + $0x2a8] sm:$0xff]  ;;  %v13500_v47 = vld [vmem:[#allocation2 + $0x70] sm:$0xff] }
 0x6ee   :  { %v3573_v32 = vpop.f32.mrf.mxu2  ;;  %v3822_v5 = vpop.f32.mrf.mxu3 }
 0x6ef   :  { %v3600_v63 = vadd.f32 %v3573_v32, %v16782_v31  ;;  %v13510_v31 = vld [vmem:[#allocation2 + $0x130] sm:$0xff]  ;;  %v17058_v32 = vpop.f32.mrf.mxu1  ;;  %v4783_v28 = vor.u32 %v4781_v13, %v4779_v49  ;;  %v13513_v13 = vld [vmem:[#allocation2 + $0x228] sm:$0xff] }
 0x6f0   :  { %5257 = vmatpush.bf16.msrb.mxu1 %v13510_v31  ;;  %5390 = vmatpush.bf16.msrb.mxu0 %v13513_v13 }
 0x6f1   :  { %v3849_v55 = vadd.f32 %v3822_v5, %v3600_v63  ;;  %v4787_v5 = vrot.slane %v4785_v40, 1  ;;  %v17061_v26 = vpop.f32.mrf.mxu0 }
 0x6f2   :  { %11728 = vmatmul.msk.bf16.gmra.mxu1 %vm1228_vm0, %v4539_v7 }
 0x6f3   :  { %v3991_v46 = vadd.f32 %v16967_v37, %v3849_v55  ;;  %11678 = vmatmul.msk.bf16.gmra.mxu2 %vm1228_vm0, %v14332_v51  ;;  %11702 = vmatmul.msk.bf16.gmra.mxu3 %vm1228_vm0, %v14345_v34  ;;  %v4788_v51 = vsel %vm2288_vm2, %v4783_v28, %v4787_v5  ;;  %v13501_v34 = vld [vmem:[#allocation2 + $0x270] sm:$0xff]  ;;  %v13508_v28 = vld [vmem:[#allocation2 + $0x160] sm:$0xff]  ;;  %v13499_v5 = vld [vmem:[#allocation2 + $0x418] sm:$0xff] }
 0x6f4   :  { %11752 = vmatmul.msk.bf16.gmra.mxu0 %vm1228_vm0, %v4788_v51  ;;  %4984 = vmatpush.bf16.msra.mxu2 %v13501_v34  ;;  %v14347_v34 = vld [vmem:[#allocation4 + $0x74] sm:$0xff]  }
 0x6f5   :  { %v17064_v63 = vadd.f32 %v16969_v18, %v3991_v46  ;;  %5258 = vmatpush.bf16.msrb.mxu1 %v13509_v54  ;;  %v13504_v18 = vld [vmem:[#allocation2 + $0x140] sm:$0xff]  ;;  %v13511_v54 = vld [vmem:[#allocation2 + $0x318] sm:$0xff] }
 0x6f6   :  { %v3576_v37 = vpop.f32.mrf.mxu2  ;;  %v3825_v1 = vpop.f32.mrf.mxu3  ;;  %5127 = vmatpush.bf16.msrb.mxu3 %v13504_v18 }
 0x6f7   :  { %v3601_v55 = vadd.f32 %v3576_v37, %v16799_v3  ;;  %v17071_v46 = vpop.f32.mrf.mxu1  ;;  %v13503_v37 = vld [vmem:[#allocation2 + $0x1a0] sm:$0xff] }
 0x6f8   :  { %4985 = vmatpush.bf16.msra.mxu2 %v13500_v47 }
 0x6f9   :  { %v3850_v49 = vadd.f32 %v3825_v1, %v3601_v55  ;;  %v17073_v3 = vpop.f32.mrf.mxu0  ;;  %5259 = vmatpush.bf16.msrb.mxu1 %v13508_v28  ;;  %v13512_v1 = vld [vmem:[#allocation2 + $0x268] sm:$0xff] }
 0x6fa   :  { %5391 = vmatpush.bf16.msrb.mxu0 %v13512_v1  ;;  %5128 = vmatpush.bf16.msrb.mxu3 %v13503_v37  ;;  %v14374_v1 = vld [vmem:[#allocation4 + $0x3c] sm:$0xff] }
 0x6fb   :  { %v3992_v40 = vadd.f32 %v16986_v9, %v3850_v49  ;;  %v14334_v9 = vld [vmem:[#allocation4 + $0x34] sm:$0xff]  }
 0x6fc   :  { %4986 = vmatpush.bf16.msra.mxu2 %v13499_v5 }
 0x6fd   :  { %v17076_v31 = vadd.f32 %v16989_v15, %v3992_v40  ;;  %5260 = vmatpush.bf16.msrb.mxu1 %v13507_v30 }
 0x6fe   :  { %v3578_v6 = vpop.f32.mrf.mxu2  ;;  %v3827_v7 = vpop.f32.mrf.mxu3  ;;  %5392 = vmatpush.bf16.msrb.mxu0 %v13511_v54 }
 0x6ff   :  { %v3602_v51 = vadd.f32 %v3578_v6, %v16821_v56  ;;  %v17082_v49 = vpop.f32.mrf.mxu1 }
 0x701   :  { %v3851_v55 = vadd.f32 %v3827_v7, %v3602_v51  ;;  %v17084_v47 = vpop.f32.mrf.mxu0  ;;  %v14375_v51 = vld [vmem:[#allocation4 + $0x7c] sm:$0xff] }
 0x702   :  { %11817 = vmatmul.msk.bf16.vlgmr.msrb.gmra.mxu1 %vm1228_vm0, %v16621_v24 }
 0x703   :  { %v3993_v15 = vadd.f32 %v16999_v12, %v3851_v55  ;;  %11679 = vmatmul.msk.bf16.gmra.mxu2 %vm1228_vm0, %v14334_v9  ;;  %11703 = vmatmul.msk.bf16.gmra.mxu3 %vm1228_vm0, %v14347_v34  ;;  %v4902_v9 = vld [vmem:[#allocation4 + $0x4] sm:$0xe] }
 0x704   :  { %11841 = vmatmul.msk.bf16.vlgmr.msrb.gmra.mxu0 %vm1228_vm0, %v16631_v41  ;;  %v5044_v34 = vld [vmem:[#allocation4 + $0x44] sm:$0xe]  ;;  %v4912_v30 = vunpack.c.l.b16 %v4902_v9 }
 0x705   :  { %v17087_v56 = vadd.f32 %v17002_v60, %v3993_v15  ;;  %v5054_v55 = vunpack.c.l.b16 %v5044_v34  ;;  %v14363_v15 = vld [vmem:[#allocation4 + $0xcc] sm:$0xff]  }
 0x706   :  { %v3581_v18 = vpop.f32.mrf.mxu2  ;;  %v3830_v13 = vpop.f32.mrf.mxu3 }
 0x707   :  { %v3603_v40 = vadd.f32 %v3581_v18, %v16840_v33  ;;  %v17095_v6 = vpop.f32.mrf.mxu1 }
 0x709   :  { %v3852_v12 = vadd.f32 %v3830_v13, %v3603_v40  ;;  %v17097_v7 = vpop.f32.mrf.mxu0 }
 0x70b   :  { %v3994_v28 = vadd.f32 %v17026_v36, %v3852_v12  ;;  %v14350_v36 = vld [vmem:[#allocation4 + $0x8c] sm:$0xff]  }
 0x70d   :  { %v17100_v60 = vadd.f32 %v17029_v29, %v3994_v28  ;;  %v18680_v28 = vunpack.c.l.b16 %v16806_v14 }
 0x70e   :  { %v3583_v5 = vpop.f32.mrf.mxu2  ;;  %v3832_v37 = vpop.f32.mrf.mxu3 }
 0x70f   :  { %v3604_v33 = vadd.f32 %v3583_v5, %v16855_v19  ;;  %v17106_v29 = vpop.f32.mrf.mxu1  ;;  %v5055_v5 = vpack.c.b16 %v18680_v28, %v5054_v55  ;;  %v5059_v28 = vrot.slane %v16853_v42, 1 }
 0x711   :  { %v3853_v24 = vadd.f32 %v3832_v37, %v3604_v33  ;;  %v17108_v54 = vpop.f32.mrf.mxu0 }
 0x712   :  { %11818 = vmatmul.msk.bf16.gmra.mxu1 %vm1228_vm0, %v14350_v36 }
 0x713   :  { %v3995_v41 = vadd.f32 %v17039_v0, %v3853_v24  ;;  %11680 = vmatmul.msk.bf16.gmra.mxu2 %vm1228_vm0, %v14374_v1  ;;  %11704 = vmatmul.msk.bf16.gmra.mxu3 %vm1228_vm0, %v14375_v51  ;;  %v18679_v0 = vunpack.c.l.b16 %v16801_v8  ;;  %v5056_v51 = vrot.slane %v5055_v5, 1  ;;  %v5057_v24 = vrot.slane %v16819_v21, 1  ;;  %v14352_v21 = vld [vmem:[#allocation4 + $0x94] sm:$0xff]  }
 0x714   :  { %11842 = vmatmul.msk.bf16.gmra.mxu0 %vm1228_vm0, %v14363_v15 }
 0x715   :  { %v17111_v19 = vadd.f32 %v17041_v16, %v3995_v41  ;;  %v4913_v12 = vpack.c.b16 %v18679_v0, %v4912_v30  ;;  %v4915_v16 = vrot.slane %v16815_v39, 1 }
 0x716   :  { %v3586_v18 = vpop.f32.mrf.mxu2  ;;  %v3835_v13 = vpop.f32.mrf.mxu3 }
 0x717   :  { %v3605_v40 = vadd.f32 %v3586_v18, %v16870_v44  ;;  %v4914_v1 = vrot.slane %v4913_v12, 1  ;;  %v4604_v44 = vpop.f32.mrf.mxu1  ;;  %v4917_v12 = vrot.slane %v16846_v20, 1  ;;  %v14354_v20 = vld [vmem:[#allocation4 + $0x9c] sm:$0xff]  }
 0x719   :  { %v3854_v37 = vadd.f32 %v3835_v13, %v3605_v40  ;;  %v17123_v9 = vpop.f32.mrf.mxu0  ;;  %v4916_v36 = vsel %vm2731_vm3, %v4914_v1, %v4915_v16 }
 0x71b   :  { %v3996_v33 = vadd.f32 %v17058_v32, %v3854_v37  ;;  %v5058_v32 = vsel %vm2731_vm3, %v5056_v51, %v5057_v24  ;;  %v4918_v51 = vsel %vm2731_vm3, %v4915_v16, %v4917_v12 }
 0x71d   :  { %v17126_v8 = vadd.f32 %v17061_v26, %v3996_v33  ;;  %v14365_v26 = vld [vmem:[#allocation4 + $0xd4] sm:$0xff]  }
 0x71e   :  { %v3588_v34 = vpop.f32.mrf.mxu2  ;;  %v3837_v14 = vpop.f32.mrf.mxu3 }
 0x71f   :  { %v3606_v41 = vadd.f32 %v3588_v34, %v16887_v17  ;;  %v4607_v55 = vpop.f32.mrf.mxu1  ;;  %v5060_v34 = vsel %vm2731_vm3, %v5057_v24, %v5059_v28 }
 0x721   :  { %v3855_v30 = vadd.f32 %v3837_v14, %v3606_v41  ;;  %v17134_v15 = vpop.f32.mrf.mxu0 }
 0x722   :  { %11819 = vmatmul.msk.bf16.gmra.mxu1 %vm1228_vm0, %v14352_v21 }
 0x723   :  { %v3997_v39 = vadd.f32 %v17071_v46, %v3855_v30  ;;  %11769 = vmatmul.msk.bf16.vlgmr.msra.gmra.mxu2 %vm1228_vm0, %v4916_v36  ;;  %11793 = vmatmul.msk.bf16.vlgmr.msrb.gmra.mxu3 %vm1228_vm0, %v5058_v32  ;;  %v4919_v30 = vrot.slane %v16876_v48, 1  ;;  %v14356_v48 = vld [vmem:[#allocation4 + $0xa4] sm:$0xff]  }
 0x724   :  { %11843 = vmatmul.msk.bf16.gmra.mxu0 %vm1228_vm0, %v14365_v26 }
 0x725   :  { %v17137_v18 = vadd.f32 %v17073_v3, %v3997_v39  ;;  %v5061_v39 = vrot.slane %v16885_v59, 1 }
 0x726   :  { %v4216_v17 = vpop.f32.mrf.mxu2  ;;  %v4348_v13 = vpop.f32.mrf.mxu3 }
 0x727   :  { %v4256_v40 = vadd.f32 %v4216_v17, %v16908_v52  ;;  %v4609_v5 = vpop.f32.mrf.mxu1 }
 0x729   :  { %v4388_v46 = vadd.f32 %v4348_v13, %v4256_v40  ;;  %v17145_v37 = vpop.f32.mrf.mxu0  ;;  %v4920_v40 = vsel %vm2731_vm3, %v4917_v12, %v4919_v30 }
 0x72b   :  { %v4637_v0 = vadd.f32 %v17082_v49, %v4388_v46  ;;  %v5062_v46 = vsel %vm2731_vm3, %v5059_v28, %v5061_v39 }
 0x72d   :  { %v17148_v3 = vadd.f32 %v17084_v47, %v4637_v0  ;;  %v14367_v47 = vld [vmem:[#allocation4 + $0xdc] sm:$0xff]  }
 0x72e   :  { %v4218_v33 = vpop.f32.mrf.mxu2  ;;  %v4350_v1 = vpop.f32.mrf.mxu3 }
 0x72f   :  { %v4257_v52 = vadd.f32 %v4218_v33, %v16928_v53  ;;  %v4612_v42 = vpop.f32.mrf.mxu1 }
 0x731   :  { %v4389_v14 = vadd.f32 %v4350_v1, %v4257_v52  ;;  %v17156_v41 = vpop.f32.mrf.mxu0 }
 0x732   :  { %11820 = vmatmul.msk.bf16.gmra.mxu1 %vm1228_vm0, %v14354_v20 }
 0x733   :  { %v4638_v49 = vadd.f32 %v17095_v6, %v4389_v14  ;;  %11770 = vmatmul.msk.bf16.gmra.mxu2 %vm1228_vm0, %v4918_v51  ;;  %11794 = vmatmul.msk.bf16.gmra.mxu3 %vm1228_vm0, %v5060_v34  ;;  %v4921_v51 = vrot.slane %v16910_v58, 1  ;;  %v5063_v34 = vrot.slane %v16915_v2, 1  ;;  %v14358_v58 = vld [vmem:[#allocation4 + $0xac] sm:$0xff]  }
 0x734   :  { %11844 = vmatmul.msk.bf16.gmra.mxu0 %vm1228_vm0, %v14367_v47 }
 0x735   :  { %v17159_v36 = vadd.f32 %v17097_v7, %v4638_v49 }
 0x736   :  { %v4221_v53 = vpop.f32.mrf.mxu2  ;;  %v4353_v32 = vpop.f32.mrf.mxu3 }
 0x737   :  { %v4258_v16 = vadd.f32 %v4221_v53, %v16940_v11  ;;  %v4614_v21 = vpop.f32.mrf.mxu1  ;;  %v4922_v53 = vsel %vm2731_vm3, %v4919_v30, %v4921_v51 }
 0x739   :  { %v4390_v6 = vadd.f32 %v4353_v32, %v4258_v16  ;;  %v17167_v26 = vpop.f32.mrf.mxu0  ;;  %v5064_v32 = vsel %vm2731_vm3, %v5061_v39, %v5063_v34 }
 0x73b   :  { %v4639_v24 = vadd.f32 %v17106_v29, %v4390_v6 }
 0x73d   :  { %v17170_v7 = vadd.f32 %v17108_v54, %v4639_v24  ;;  %v14369_v54 = vld [vmem:[#allocation4 + $0xe4] sm:$0xff]  }
 0x73e   :  { %v4223_v17 = vpop.f32.mrf.mxu2  ;;  %v4355_v13 = vpop.f32.mrf.mxu3 }
 0x73f   :  { %v4259_v11 = vadd.f32 %v4223_v17, %v16960_v62  ;;  %v17177_v59 = vpop.f32.mrf.mxu1 }
 0x741   :  { %v4391_v0 = vadd.f32 %v4355_v13, %v4259_v11  ;;  %v17179_v33 = vpop.f32.mrf.mxu0  ;;  %v4923_v13 = vrot.slane %v16942_v43, 1  ;;  %v5065_v11 = vrot.slane %v16947_v22, 1  ;;  %v13518_v43 = vld [vmem:[#allocation2 + $0x8] sm:$0xff]  ;;  %v14360_v22 = vld [vmem:[#allocation4 + $0xb4] sm:$0xff]  }
 0x742   :  { %11821 = vmatmul.msk.bf16.gmra.mxu1 %vm1228_vm0, %v14356_v48  ;;  %5638 = vmatpush.bf16.msrb.mxu2 %v13518_v43  ;;  %v4927_v43 = vrot.slane %v17011_v23, 1 }
 0x743   :  { %v4640_v29 = vadd.f32 %v4604_v44, %v4391_v0  ;;  %11771 = vmatmul.msk.bf16.gmra.mxu2 %vm1228_vm0, %v4920_v40  ;;  %11795 = vmatmul.msk.bf16.gmra.mxu3 %vm1228_vm0, %v5062_v46  ;;  %v4924_v48 = vsel %vm2731_vm3, %v4921_v51, %v4923_v13 }
 0x744   :  { %11845 = vmatmul.msk.bf16.gmra.mxu0 %vm1228_vm0, %v14369_v54  ;;  %v5066_v54 = vsel %vm2731_vm3, %v5063_v34, %v5065_v11 }
 0x745   :  { %v17182_v1 = vadd.f32 %v17123_v9, %v4640_v29 }
 0x746   :  { %v4226_v62 = vpop.f32.mrf.mxu2  ;;  %v4358_v52 = vpop.f32.mrf.mxu3 }
 0x747   :  { %v4260_v12 = vadd.f32 %v4226_v62, %v16972_v57  ;;  %v17189_v14 = vpop.f32.mrf.mxu1 }
 0x749   :  { %v4392_v44 = vadd.f32 %v4358_v52, %v4260_v12  ;;  %v17191_v49 = vpop.f32.mrf.mxu0  ;;  %v14373_v12 = vld [vmem:[#allocation4 + $0xf4] sm:$0xff]  }
 0x74b   :  { %v4641_v28 = vadd.f32 %v4607_v55, %v4392_v44 }
 0x74d   :  { %v17194_v9 = vadd.f32 %v17134_v15, %v4641_v28  ;;  %v14371_v15 = vld [vmem:[#allocation4 + $0xec] sm:$0xff]  }
 0x74e   :  { %v4228_v20 = vpop.f32.mrf.mxu2  ;;  %v4360_v47 = vpop.f32.mrf.mxu3 }
 0x74f   :  { %v4261_v57 = vadd.f32 %v4228_v20, %v16992_v10  ;;  %v17201_v2 = vpop.f32.mrf.mxu1  ;;  %v13522_v20 = vld [vmem:[#allocation2 + $0x230] sm:$0xff] }
 0x750   :  { %5887 = vmatpush.bf16.msra.mxu3 %v13522_v20 }
 0x751   :  { %v4393_v55 = vadd.f32 %v4360_v47, %v4261_v57  ;;  %v17203_v6 = vpop.f32.mrf.mxu0  ;;  %v4925_v47 = vrot.slane %v16974_v61, 1  ;;  %v5067_v57 = vrot.slane %v16979_v45, 1 }
 0x752   :  { %11822 = vmatmul.msk.bf16.gmra.mxu1 %vm1228_vm0, %v14358_v58 }
 0x753   :  { %v4642_v16 = vadd.f32 %v4609_v5, %v4393_v55  ;;  %11772 = vmatmul.msk.bf16.gmra.mxu2 %vm1228_vm0, %v4922_v53  ;;  %11796 = vmatmul.msk.bf16.gmra.mxu3 %vm1228_vm0, %v5064_v32  ;;  %v4926_v58 = vsel %vm2731_vm3, %v4923_v13, %v4925_v47  ;;  %v5068_v61 = vsel %vm2731_vm3, %v5065_v11, %v5067_v57 }
 0x754   :  { %11846 = vmatmul.msk.bf16.gmra.mxu0 %vm1228_vm0, %v14371_v15 }
 0x755   :  { %v17206_v24 = vadd.f32 %v17145_v37, %v4642_v16 }
 0x756   :  { %v4231_v10 = vpop.f32.mrf.mxu2  ;;  %v4363_v17 = vpop.f32.mrf.mxu3 }
 0x757   :  { %v4262_v30 = vadd.f32 %v4231_v10, %v17007_v25  ;;  %v17213_v40 = vpop.f32.mrf.mxu1  ;;  %v13526_v10 = vld [vmem:[#allocation2 + $0x78] sm:$0xff] }
 0x758   :  { %6029 = vmatpush.bf16.msra.mxu1 %v13526_v10  ;;  %v6090_v10 = vld [vmem:[#allocation4 + $0xc4] sm:$0xe] }
 0x759   :  { %v4394_v5 = vadd.f32 %v4363_v17, %v4262_v30  ;;  %v17215_v46 = vpop.f32.mrf.mxu0  ;;  %v14436_v17 = vld [vmem:[#allocation4 + $0xbc] sm:$0xff] }
 0x75b   :  { %v4643_v39 = vadd.f32 %v4612_v42, %v4394_v5  ;;  %v14437_v5 = vld [vmem:[#allocation4 + $0xfc] sm:$0xff] }
 0x75d   :  { %v17218_v37 = vadd.f32 %v17156_v41, %v4643_v39 }
 0x75e   :  { %v4233_v0 = vpop.f32.mrf.mxu2  ;;  %v4365_v29 = vpop.f32.mrf.mxu3 }
 0x75f   :  { %v4263_v25 = vadd.f32 %v4233_v0, %v17032_v50  ;;  %v17225_v52 = vpop.f32.mrf.mxu1  ;;  %v13521_v0 = vld [vmem:[#allocation2 + $0x328] sm:$0xff] }
 0x760   :  { %5888 = vmatpush.bf16.msra.mxu3 %v13521_v0 }
 0x761   :  { %v4395_v42 = vadd.f32 %v4365_v29, %v4263_v25  ;;  %v17227_v41 = vpop.f32.mrf.mxu0  ;;  %v13525_v25 = vld [vmem:[#allocation2 + $0x2d0] sm:$0xff] }
 0x762   :  { %11823 = vmatmul.msk.bf16.gmra.mxu1 %vm1228_vm0, %v14360_v22  ;;  %v17265_v22 = vld [vmem:[#allocation4 + $0x88] sm:$0xff]  }
 0x763   :  { %v4644_v62 = vadd.f32 %v4614_v21, %v4395_v42  ;;  %11773 = vmatmul.msk.bf16.gmra.mxu2 %vm1228_vm0, %v4924_v48  ;;  %11797 = vmatmul.msk.bf16.gmra.mxu3 %vm1228_vm0, %v5066_v54  ;;  %v13516_v54 = vld [vmem:[#allocation2 + $0x1c0] sm:$0xff]  ;;  %v13520_v42 = vld [vmem:[#allocation2 + $0x1b0] sm:$0xff] }
 0x764   :  { %11847 = vmatmul.msk.bf16.gmra.mxu0 %vm1228_vm0, %v14373_v12  ;;  %6030 = vmatpush.bf16.msra.mxu1 %v13525_v25 }
 0x765   :  { %v17230_v50 = vadd.f32 %v17167_v26, %v4644_v62  ;;  %v13529_v62 = vld [vmem:[#allocation2 + $0x1f0] sm:$0xff]  ;;  %5889 = vmatpush.bf16.msra.mxu3 %v13520_v42 }
 0x766   :  { %v4236_v44 = vpop.f32.mrf.mxu2  ;;  %v4368_v28 = vpop.f32.mrf.mxu3 }
 0x767   :  { %v4264_v51 = vadd.f32 %v4236_v44, %v17044_v38  ;;  %v17238_v53 = vpop.f32.mrf.mxu1  ;;  %v13524_v44 = vld [vmem:[#allocation2 + $0x468] sm:$0xff] }
 0x768   :  { %6031 = vmatpush.bf16.msra.mxu1 %v13524_v44 }
 0x769   :  { %v4396_v21 = vadd.f32 %v4368_v28, %v4264_v51  ;;  %v17240_v26 = vpop.f32.mrf.mxu0  ;;  %v17272_v51 = vld [vmem:[#allocation4 + $0xc8] sm:$0xff]  }
 0x76b   :  { %v4645_v34 = vadd.f32 %v17177_v59, %v4396_v21  ;;  %v5948_v21 = vld [vmem:[#allocation4 + $0x84] sm:$0xe] }
 0x76d   :  { %v17243_v32 = vadd.f32 %v17179_v33, %v4645_v34  ;;  %v13530_v33 = vld [vmem:[#allocation2 + $0x178] sm:$0xff] }
 0x76e   :  { %v4238_v38 = vpop.f32.mrf.mxu2  ;;  %v4370_v55 = vpop.f32.mrf.mxu3  ;;  %6171 = vmatpush.bf16.msra.mxu0 %v13530_v33  ;;  %v13523_v33 = vld [vmem:[#allocation2 + $0xb8] sm:$0xff] }
 0x76f   :  { %v4265_v16 = vadd.f32 %v4238_v38, %v17064_v63  ;;  %v17253_v30 = vpop.f32.mrf.mxu1  ;;  %v13515_v38 = vld [vmem:[#allocation2 + $0x210] sm:$0xff]  ;;  %6032 = vmatpush.bf16.msra.mxu1 %v13523_v33 }
 0x771   :  { %v4397_v59 = vadd.f32 %v4370_v55, %v4265_v16  ;;  %v17255_v63 = vpop.f32.mrf.mxu0  ;;  %v13519_v55 = vld [vmem:[#allocation2 + $0x400] sm:$0xff]  ;;  %v13528_v16 = vld [vmem:[#allocation2 + $0x218] sm:$0xff] }
 0x772   :  { %11824 = vmatmul.msk.bf16.gmra.mxu1 %vm1228_vm0, %v14436_v17  ;;  %6172 = vmatpush.bf16.msra.mxu0 %v13529_v62  ;;  %v17287_v17 = vld [vmem:[#allocation4 + $0x8c] sm:$0xff]  }
 0x773   :  { %v4646_v15 = vadd.f32 %v17189_v14, %v4397_v59  ;;  %11774 = vmatmul.msk.bf16.gmra.mxu2 %vm1228_vm0, %v4926_v58  ;;  %11798 = vmatmul.msk.bf16.gmra.mxu3 %vm1228_vm0, %v5068_v61  ;;  %v13517_v14 = vld [vmem:[#allocation2 + $0x358] sm:$0xff]  ;;  %v14037_v58 = vunpack.c.l.b16 %v17265_v22  ;;  %v5958_v61 = vunpack.c.l.b16 %v5948_v21  ;;  %v5961_v45 = vrot.slane %v17287_v17, 1  ;;  %v5450_v21 = vld [vmem:[#allocation4 + $0x84] sm:$0xf] }
 0x774   :  { %11848 = vmatmul.msk.bf16.gmra.mxu0 %vm1228_vm0, %v14437_v5  ;;  %5639 = vmatpush.bf16.msrb.mxu2 %v13517_v14  ;;  %v14065_v5 = vunpack.c.l.b16 %v17272_v51  ;;  %v13527_v14 = vld [vmem:[#allocation2 + $0x2f8] sm:$0xff] }
 0x775   :  { %v17258_v39 = vadd.f32 %v17191_v49, %v4646_v15  ;;  %v4928_v15 = vsel %vm2731_vm3, %v4925_v47, %v4927_v43  ;;  %5890 = vmatpush.bf16.msra.mxu3 %v13519_v55  ;;  %v17290_v47 = vld [vmem:[#allocation4 + $0xcc] sm:$0xff]   ;;  %v5492_v55 = vunpack.c.l.b16 %v5450_v21 }
 0x776   :  { %v4241_v13 = vpop.f32.mrf.mxu2  ;;  %v4373_v11 = vpop.f32.mrf.mxu3  ;;  %6173 = vmatpush.bf16.msra.mxu0 %v13528_v16  ;;  %v6103_v42 = vrot.slane %v17290_v47, 1  ;;  %v5071_v16 = vrot.slane %v17051_v27, 1 }
 0x777   :  { %v4266_v29 = vadd.f32 %v4241_v13, %v17076_v31  ;;  %v5069_v31 = vrot.slane %v17019_v35, 1  ;;  %v17268_v12 = vpop.f32.mrf.mxu1  ;;  %v5959_v13 = vpack.c.b16 %v14037_v58, %v5958_v61 }
 0x778   :  { %5640 = vmatpush.bf16.msrb.mxu2 %v13516_v54 }
 0x779   :  { %v4398_v48 = vadd.f32 %v4373_v11, %v4266_v29  ;;  %v17270_v28 = vpop.f32.mrf.mxu0  ;;  %v5960_v0 = vrot.slane %v5959_v13, 1  ;;  %v5509_v13 = vpack.c.b16 %v14037_v58, %v5492_v55  ;;  %v5072_v27 = vsel %vm2731_vm3, %v5069_v31, %v5071_v16 }
 0x77a   :  { %6174 = vmatpush.bf16.msra.mxu0 %v13527_v14  ;;  %v17331_v14 = vld [vmem:[#allocation4 + $0xd4] sm:$0xff]  }
 0x77b   :  { %v4647_v49 = vadd.f32 %v17201_v2, %v4398_v48  ;;  %v5962_v48 = vsel %vm2731_vm3, %v5960_v0, %v5961_v45  ;;  %v5521_v23 = vshll.u32 %v5509_v13, 16 }
 0x77c   :  { %5641 = vmatpush.bf16.msrb.mxu2 %v13515_v38 }
 0x77d   :  { %v17275_v34 = vadd.f32 %v17203_v6, %v4647_v49  ;;  %v5070_v6 = vsel %vm2731_vm3, %v5067_v57, %v5069_v31  ;;  %v6105_v31 = vrot.slane %v17331_v14, 1 }
 0x77e   :  { %v4243_v2 = vpop.f32.mrf.mxu2  ;;  %v4375_v20 = vpop.f32.mrf.mxu3 }
 0x77f   :  { %v4267_v59 = vadd.f32 %v4243_v2, %v17087_v56  ;;  %v6100_v56 = vunpack.c.l.b16 %v6090_v10  ;;  %v17296_v25 = vpop.f32.mrf.mxu1 }
 0x781   :  { %v4399_v11 = vadd.f32 %v4375_v20, %v4267_v59  ;;  %v6101_v29 = vpack.c.b16 %v14065_v5, %v6100_v56  ;;  %v17300_v62 = vpop.f32.mrf.mxu0  ;;  %v17309_v20 = vld [vmem:[#allocation4 + $0xc0] sm:$0xff]   ;;  %v17329_v56 = vld [vmem:[#allocation4 + $0x94] sm:$0xff]  }
 0x782   :  { %11913 = vmatmul.msk.bf16.vlgmr.msra.gmra.mxu1 %vm1228_vm0, %v5962_v48  ;;  %v5741_v61 = vunpack.c.h.b16 %v17309_v20 }
 0x783   :  { %v4648_v57 = vadd.f32 %v17213_v40, %v4399_v11  ;;  %11775 = vmatmul.msk.bf16.gmra.mxu2 %vm1228_vm0, %v4928_v15  ;;  %11799 = vmatmul.msk.bf16.gmra.mxu3 %vm1228_vm0, %v5070_v6  ;;  %v6102_v54 = vrot.slane %v6101_v29, 1 }
 0x785   :  { %v17303_v49 = vadd.f32 %v17215_v46, %v4648_v57  ;;  %v6104_v40 = vsel %vm2731_vm3, %v6102_v54, %v6103_v42  ;;  %v4929_v46 = vrot.slane %v17046_v4, 1  ;;  %v5519_v54 = vshrl.u32 %v5509_v13, 16 }
 0x786   :  { %v4246_v22 = vpop.f32.mrf.mxu2  ;;  %v4378_v44 = vpop.f32.mrf.mxu3  ;;  %11937 = vmatmul.msk.bf16.vlgmr.msra.gmra.mxu0 %vm1228_vm0, %v6104_v40 }
 0x787   :  { %v4268_v51 = vadd.f32 %v4246_v22, %v17100_v60  ;;  %v17315_v59 = vpop.f32.mrf.mxu1  ;;  %v4930_v4 = vsel %vm2731_vm3, %v4927_v43, %v4929_v46  ;;  %v5523_v22 = vrot.slane %v5521_v23, 1 }
 0x789   :  { %v4400_v2 = vadd.f32 %v4378_v44, %v4268_v51  ;;  %v17317_v60 = vpop.f32.mrf.mxu0  ;;  %v5526_v44 = vshll.u32 %v17287_v17, 16  ;;  %v5775_v51 = vshll.u32 %v17290_v47, 16 }
 0x78b   :  { %v4649_v38 = vadd.f32 %v17225_v52, %v4400_v2  ;;  %v5758_v52 = vpack.c.b16 %v14065_v5, %v5741_v61  ;;  %v5524_v2 = vor.u32 %v5523_v22, %v5519_v54  ;;  %v5777_v55 = vrot.slane %v5775_v51, 1 }
 0x78c   :  { %v5783_v54 = vshll.u32 %v17331_v14, 16 }
 0x78d   :  { %v17320_v15 = vadd.f32 %v17227_v41, %v4649_v38  ;;  %v5963_v41 = vrot.slane %v17329_v56, 1  ;;  %v5528_v38 = vrot.slane %v5526_v44, 1 }
 0x78e   :  { %v4248_v10 = vpop.f32.mrf.mxu2  ;;  %v4380_v6 = vpop.f32.mrf.mxu3 }
 0x78f   :  { %v4269_v33 = vadd.f32 %v4248_v10, %v17111_v19  ;;  %v5770_v19 = vshll.u32 %v5758_v52, 16  ;;  %v17337_v43 = vpop.f32.mrf.mxu1  ;;  %v5964_v35 = vsel %vm2731_vm3, %v5961_v45, %v5963_v41  ;;  %v5768_v45 = vshrl.u32 %v5758_v52, 16 }
 0x791   :  { %v4401_v11 = vadd.f32 %v4380_v6, %v4269_v33  ;;  %v17341_v58 = vpop.f32.mrf.mxu0  ;;  %v5772_v40 = vrot.slane %v5770_v19, 1  ;;  %v5529_v33 = vsel %vm2288_vm2, %v5524_v2, %v5528_v38 }
 0x792   :  { %11914 = vmatmul.msk.bf16.gmra.mxu1 %vm1228_vm0, %v5964_v35 }
 0x793   :  { %v4650_v0 = vadd.f32 %v17238_v53, %v4401_v11  ;;  %11776 = vmatmul.msk.bf16.gmra.mxu2 %vm1228_vm0, %v4930_v4  ;;  %11800 = vmatmul.msk.bf16.gmra.mxu3 %vm1228_vm0, %v5072_v27  ;;  %v6106_v53 = vsel %vm2731_vm3, %v6103_v42, %v6105_v31  ;;  %v5773_v42 = vor.u32 %v5772_v40, %v5768_v45  ;;  %v17365_v27 = vld [vmem:[#allocation4 + $0xdc] sm:$0xff]   ;;  %v5785_v40 = vrot.slane %v5783_v54, 1 }
 0x795   :  { %v17344_v5 = vadd.f32 %v17240_v26, %v4650_v0  ;;  %v5778_v13 = vsel %vm2288_vm2, %v5773_v42, %v5777_v55  ;;  %v6107_v0 = vrot.slane %v17365_v27, 1 }
 0x796   :  { %v4251_v29 = vpop.f32.mrf.mxu2  ;;  %v4383_v57 = vpop.f32.mrf.mxu3  ;;  %11938 = vmatmul.msk.bf16.gmra.mxu0 %vm1228_vm0, %v6106_v53  ;;  %v5530_v53 = vshrl.u32 %v17287_v17, 16 }
 0x797   :  { %v4270_v48 = vadd.f32 %v4251_v29, %v17126_v8  ;;  %v17353_v8 = vpop.f32.mrf.mxu1 }
 0x798   :  { %v5532_v44 = vor.u32 %v5530_v53, %v5528_v38 }
 0x799   :  { %v4402_v26 = vadd.f32 %v4383_v57, %v4270_v48  ;;  %v17355_v46 = vpop.f32.mrf.mxu0  ;;  %v6108_v57 = vsel %vm2731_vm3, %v6105_v31, %v6107_v0  ;;  %v5534_v48 = vshll.u32 %v17329_v56, 16 }
 0x79b   :  { %v4651_v21 = vadd.f32 %v17253_v30, %v4402_v26  ;;  %v17363_v30 = vld [vmem:[#allocation4 + $0x9c] sm:$0xff]   ;;  %v5536_v45 = vrot.slane %v5534_v48, 1 }
 0x79c   :  { %v5965_v52 = vrot.slane %v17363_v30, 1 }
 0x79d   :  { %v17358_v16 = vadd.f32 %v17255_v63, %v4651_v21  ;;  %v5537_v2 = vsel %vm2288_vm2, %v5532_v44, %v5536_v45 }
 0x79e   :  { %v4253_v61 = vpop.f32.mrf.mxu2  ;;  %v4385_v10 = vpop.f32.mrf.mxu3 }
 0x79f   :  { %v4271_v6 = vadd.f32 %v4253_v61, %v17137_v18  ;;  %v17371_v63 = vpop.f32.mrf.mxu1  ;;  %v5966_v18 = vsel %vm2731_vm3, %v5963_v41, %v5965_v52  ;;  %v5779_v41 = vshrl.u32 %v17290_v47, 16 }
 0x7a1   :  { %v4403_v4 = vadd.f32 %v4385_v10, %v4271_v6  ;;  %v17375_v23 = vpop.f32.mrf.mxu0  ;;  %v5781_v31 = vor.u32 %v5779_v41, %v5777_v55  ;;  %v17401_v55 = vld [vmem:[#allocation4 + $0xe4] sm:$0xff]  }
 0x7a2   :  { %11915 = vmatmul.msk.bf16.gmra.mxu1 %vm1228_vm0, %v5966_v18  ;;  %v6109_v6 = vrot.slane %v17401_v55, 1 }
 0x7a3   :  { %v4652_v11 = vadd.f32 %v17268_v12, %v4403_v4  ;;  %11865 = vmatmul.msk.bf16.vlgmr.msrb.gmra.mxu2 %vm1228_vm0, %v5529_v33  ;;  %11889 = vmatmul.msk.bf16.vlgmr.msra.gmra.mxu3 %vm1228_vm0, %v5778_v13  ;;  %v5786_v42 = vsel %vm2288_vm2, %v5781_v31, %v5785_v40 }
 0x7a4   :  { %v6110_v18 = vsel %vm2731_vm3, %v6107_v0, %v6109_v6 }
 0x7a5   :  { %v17378_v19 = vadd.f32 %v17270_v28, %v4652_v11 }
 0x7a6   :  { %v4988_v35 = vpop.f32.mrf.mxu2  ;;  %v5130_v29 = vpop.f32.mrf.mxu3  ;;  %11939 = vmatmul.msk.bf16.gmra.mxu0 %vm1228_vm0, %v6108_v57  ;;  %v5791_v57 = vshll.u32 %v17365_v27, 16 }
 0x7a7   :  { %v5028_v12 = vadd.f32 %v4988_v35, %v17148_v3  ;;  %v17389_v3 = vpop.f32.mrf.mxu1  ;;  %v5538_v35 = vshrl.u32 %v17329_v56, 16 }
 0x7a8   :  { %v5793_v41 = vrot.slane %v5791_v57, 1 }
 0x7a9   :  { %v5170_v28 = vadd.f32 %v5130_v29, %v5028_v12  ;;  %v17391_v51 = vpop.f32.mrf.mxu0  ;;  %v5542_v29 = vshll.u32 %v17363_v30, 16  ;;  %v5540_v53 = vor.u32 %v5538_v35, %v5536_v45 }
 0x7ab   :  { %v5302_v22 = vadd.f32 %v17296_v25, %v5170_v28  ;;  %v17399_v25 = vld [vmem:[#allocation4 + $0xa4] sm:$0xff]   ;;  %v5544_v48 = vrot.slane %v5542_v29, 1 }
 0x7ac   :  { %v5967_v61 = vrot.slane %v17399_v25, 1 }
 0x7ad   :  { %v17394_v17 = vadd.f32 %v17300_v62, %v5302_v22  ;;  %v5545_v44 = vsel %vm2288_vm2, %v5540_v53, %v5544_v48 }
 0x7ae   :  { %v4990_v26 = vpop.f32.mrf.mxu2  ;;  %v5132_v47 = vpop.f32.mrf.mxu3 }
 0x7af   :  { %v5029_v21 = vadd.f32 %v4990_v26, %v17159_v36  ;;  %v17407_v62 = vpop.f32.mrf.mxu1  ;;  %v5968_v36 = vsel %vm2731_vm3, %v5965_v52, %v5967_v61  ;;  %v5787_v52 = vshrl.u32 %v17331_v14, 16 }
 0x7b1   :  { %v5171_v38 = vadd.f32 %v5132_v47, %v5029_v21  ;;  %v17411_v33 = vpop.f32.mrf.mxu0  ;;  %v5789_v0 = vor.u32 %v5787_v52, %v5785_v40  ;;  %v17437_v40 = vld [vmem:[#allocation4 + $0xec] sm:$0xff]  }
 0x7b2   :  { %11916 = vmatmul.msk.bf16.gmra.mxu1 %vm1228_vm0, %v5968_v36  ;;  %v6111_v21 = vrot.slane %v17437_v40, 1 }
 0x7b3   :  { %v5303_v10 = vadd.f32 %v17315_v59, %v5171_v38  ;;  %11866 = vmatmul.msk.bf16.gmra.mxu2 %vm1228_vm0, %v5537_v2  ;;  %11890 = vmatmul.msk.bf16.gmra.mxu3 %vm1228_vm0, %v5786_v42  ;;  %v5794_v31 = vsel %vm2288_vm2, %v5789_v0, %v5793_v41 }
 0x7b4   :  { %v6112_v36 = vsel %vm2731_vm3, %v6109_v6, %v6111_v21 }
 0x7b5   :  { %v17414_v13 = vadd.f32 %v17317_v60, %v5303_v10 }
 0x7b6   :  { %v4993_v4 = vpop.f32.mrf.mxu2  ;;  %v5135_v11 = vpop.f32.mrf.mxu3  ;;  %11940 = vmatmul.msk.bf16.gmra.mxu0 %vm1228_vm0, %v6110_v18  ;;  %v5799_v18 = vshll.u32 %v17401_v55, 16 }
 0x7b7   :  { %v5030_v59 = vadd.f32 %v4993_v4, %v17170_v7  ;;  %v17425_v7 = vpop.f32.mrf.mxu1  ;;  %v5546_v4 = vshrl.u32 %v17363_v30, 16 }
 0x7b8   :  { %v5801_v52 = vrot.slane %v5799_v18, 1 }
 0x7b9   :  { %v5172_v60 = vadd.f32 %v5135_v11, %v5030_v59  ;;  %v17427_v54 = vpop.f32.mrf.mxu0  ;;  %v5550_v11 = vshll.u32 %v17399_v25, 16  ;;  %v5548_v35 = vor.u32 %v5546_v4, %v5544_v48 }
 0x7bb   :  { %v5304_v12 = vadd.f32 %v17337_v43, %v5172_v60  ;;  %v17435_v43 = vld [vmem:[#allocation4 + $0xac] sm:$0xff]   ;;  %v5552_v29 = vrot.slane %v5550_v11, 1 }
 0x7bc   :  { %v5969_v26 = vrot.slane %v17435_v43, 1 }
 0x7bd   :  { %v17430_v56 = vadd.f32 %v17341_v58, %v5304_v12  ;;  %v5553_v53 = vsel %vm2288_vm2, %v5548_v35, %v5552_v29 }
 0x7be   :  { %v4995_v28 = vpop.f32.mrf.mxu2  ;;  %v5137_v14 = vpop.f32.mrf.mxu3 }
 0x7bf   :  { %v5031_v22 = vadd.f32 %v4995_v28, %v17182_v1  ;;  %v17443_v58 = vpop.f32.mrf.mxu1  ;;  %v5970_v1 = vsel %vm2731_vm3, %v5967_v61, %v5969_v26  ;;  %v5795_v61 = vshrl.u32 %v17365_v27, 16 }
 0x7c1   :  { %v5173_v45 = vadd.f32 %v5137_v14, %v5031_v22  ;;  %v17447_v2 = vpop.f32.mrf.mxu0  ;;  %v5797_v6 = vor.u32 %v5795_v61, %v5793_v41  ;;  %v17473_v41 = vld [vmem:[#allocation4 + $0xf4] sm:$0xff]  }
 0x7c2   :  { %11917 = vmatmul.msk.bf16.gmra.mxu1 %vm1228_vm0, %v5970_v1  ;;  %v6113_v22 = vrot.slane %v17473_v41, 1  ;;  %v14305_v61 = vld [vmem:[#allocation4 + $0xf8] sm:$0xff]  }
 0x7c3   :  { %v5305_v47 = vadd.f32 %v17353_v8, %v5173_v45  ;;  %11867 = vmatmul.msk.bf16.gmra.mxu2 %vm1228_vm0, %v5545_v44  ;;  %11891 = vmatmul.msk.bf16.gmra.mxu3 %vm1228_vm0, %v5794_v31  ;;  %v5802_v0 = vsel %vm2288_vm2, %v5797_v6, %v5801_v52 }
 0x7c4   :  { %v6114_v1 = vsel %vm2731_vm3, %v6111_v21, %v6113_v22 }
 0x7c5   :  { %v17450_v42 = vadd.f32 %v17355_v46, %v5305_v47 }
 0x7c6   :  { %v4998_v38 = vpop.f32.mrf.mxu2  ;;  %v5140_v10 = vpop.f32.mrf.mxu3  ;;  %11941 = vmatmul.msk.bf16.gmra.mxu0 %vm1228_vm0, %v6112_v36  ;;  %v5807_v36 = vshll.u32 %v17437_v40, 16 }
 0x7c7   :  { %v5032_v8 = vadd.f32 %v4998_v38, %v17194_v9  ;;  %v17461_v9 = vpop.f32.mrf.mxu1  ;;  %v5554_v38 = vshrl.u32 %v17399_v25, 16 }
 0x7c8   :  { %v5809_v18 = vrot.slane %v5807_v36, 1 }
 0x7c9   :  { %v5174_v46 = vadd.f32 %v5140_v10, %v5032_v8  ;;  %v17463_v57 = vpop.f32.mrf.mxu0  ;;  %v5558_v10 = vshll.u32 %v17435_v43, 16  ;;  %v14298_v8 = vld [vmem:[#allocation4 + $0xb8] sm:$0xff]   ;;  %v5556_v11 = vor.u32 %v5554_v38, %v5552_v29 }
 0x7cb   :  { %v5306_v59 = vadd.f32 %v17371_v63, %v5174_v46  ;;  %v17471_v63 = vld [vmem:[#allocation4 + $0xb4] sm:$0xff]   ;;  %v5560_v21 = vrot.slane %v5558_v10, 1 }
 0x7cc   :  { %v5971_v28 = vrot.slane %v17471_v63, 1 }
 0x7cd   :  { %v17466_v30 = vadd.f32 %v17375_v23, %v5306_v59  ;;  %v14062_v59 = vunpack.c.h.b16 %v14298_v8  ;;  %v5811_v8 = vshrl.u32 %v17437_v40, 16 }
 0x7ce   :  { %v5000_v60 = vpop.f32.mrf.mxu2  ;;  %v5142_v27 = vpop.f32.mrf.mxu3 }
 0x7cf   :  { %v5033_v12 = vadd.f32 %v5000_v60, %v17206_v24  ;;  %v17479_v23 = vpop.f32.mrf.mxu1  ;;  %v5972_v24 = vsel %vm2731_vm3, %v5969_v26, %v5971_v28  ;;  %v5803_v26 = vshrl.u32 %v17401_v55, 16  ;;  %v5507_v55 = vunpack.c.l.b16 %v17309_v20 }
 0x7d1   :  { %v5175_v48 = vadd.f32 %v5142_v27, %v5033_v12  ;;  %v17483_v44 = vpop.f32.mrf.mxu0  ;;  %v5805_v25 = vor.u32 %v5803_v26, %v5801_v52  ;;  %v5561_v52 = vsel %vm2288_vm2, %v5556_v11, %v5560_v21  ;;  %v5466_v11 = vld [vmem:[#allocation4 + $0xc4] sm:$0x1] }
 0x7d2   :  { %11918 = vmatmul.msk.bf16.gmra.mxu1 %vm1228_vm0, %v5972_v24 }
 0x7d3   :  { %v5307_v14 = vadd.f32 %v17389_v3, %v5175_v48  ;;  %11868 = vmatmul.msk.bf16.gmra.mxu2 %vm1228_vm0, %v5553_v53  ;;  %11892 = vmatmul.msk.bf16.gmra.mxu3 %vm1228_vm0, %v5802_v0  ;;  %v5810_v53 = vsel %vm2288_vm2, %v5805_v25, %v5809_v18  ;;  %v17513_v0 = vpack.c.b16 %v5507_v55, %v14062_v59  ;;  %v5715_v59 = vld [vmem:[#allocation4 + $0x104] sm:$0x1] }
 0x7d5   :  { %v17486_v31 = vadd.f32 %v17391_v51, %v5307_v14  ;;  %v5973_v14 = vrot.slane %v17513_v0, 1 }
 0x7d6   :  { %v5003_v45 = vpop.f32.mrf.mxu2  ;;  %v5145_v47 = vpop.f32.mrf.mxu3  ;;  %11942 = vmatmul.msk.bf16.gmra.mxu0 %vm1228_vm0, %v6114_v1 }
 0x7d7   :  { %v5034_v3 = vadd.f32 %v5003_v45, %v17218_v37  ;;  %v17497_v37 = vld [vmem:[#allocation4 + $0x100] sm:$0xf]  ;;  %v17499_v46 = vpop.f32.mrf.mxu1 }
 0x7d8   :  { %v18676_v29 = vunpack.c.l.b16 %v17497_v37 }
 0x7d9   :  { %v5176_v51 = vadd.f32 %v5145_v47, %v5034_v3  ;;  %v17502_v35 = vpop.f32.mrf.mxu0  ;;  %v5974_v47 = vsel %vm2731_vm3, %v5971_v28, %v5973_v14  ;;  %v5566_v28 = vshll.u32 %v17471_v63, 16 }
 0x7db   :  { %v5308_v4 = vadd.f32 %v17407_v62, %v5176_v51  ;;  %v14090_v62 = vunpack.c.h.b16 %v14305_v61  ;;  %v5562_v51 = vshrl.u32 %v17435_v43, 16 }
 0x7dd   :  { %v17505_v6 = vadd.f32 %v17411_v33, %v5308_v4  ;;  %v17517_v33 = vpack.c.b16 %v18676_v29, %v14090_v62  ;;  %v5815_v4 = vshll.u32 %v17473_v41, 16  ;;  %v5564_v25 = vor.u32 %v5562_v51, %v5560_v21 }
 0x7de   :  { %v5005_v60 = vpop.f32.mrf.mxu2  ;;  %v5147_v27 = vpop.f32.mrf.mxu3  ;;  %v5508_v62 = vunpack.c.l.b16 %v5466_v11  ;;  %v13533_v11 = vld [vmem:[#allocation2 + $0x2a0] sm:$0xff] }
 0x7df   :  { %v5035_v12 = vadd.f32 %v5005_v60, %v17230_v50  ;;  %v13534_v50 = vld [vmem:[#allocation2 + $0x3d8] sm:$0xff]  ;;  %v17523_v45 = vpop.f32.mrf.mxu1  ;;  %v6115_v1 = vrot.slane %v17517_v33, 1  ;;  %v5813_v60 = vor.u32 %v5811_v8, %v5809_v18  ;;  %v5817_v43 = vrot.slane %v5815_v4, 1 }
 0x7e0   :  { %6303 = vmatpush.bf16.msra.mxu2 %v13534_v50  ;;  %v17551_v18 = vpack.c.b16 %v5508_v62, %v5508_v62 }
 0x7e1   :  { %v5177_v48 = vadd.f32 %v5147_v27, %v5035_v12  ;;  %v17527_v3 = vpop.f32.mrf.mxu0 }
 0x7e2   :  { %11919 = vmatmul.msk.bf16.gmra.mxu1 %vm1228_vm0, %v5974_v47 }
 0x7e3   :  { %v5309_v24 = vadd.f32 %v17425_v7, %v5177_v48  ;;  %11869 = vmatmul.msk.bf16.gmra.mxu2 %vm1228_vm0, %v5561_v52  ;;  %11893 = vmatmul.msk.bf16.gmra.mxu3 %vm1228_vm0, %v5810_v53  ;;  %v6116_v7 = vsel %vm2731_vm3, %v6113_v22, %v6115_v1  ;;  %v13538_v22 = vld [vmem:[#allocation2] sm:$0xff]  ;;  %v5757_v48 = vunpack.c.l.b16 %v5715_v59  ;;  %v5819_v59 = vshrl.u32 %v17473_v41, 16  ;;  %v13547_v41 = vld [vmem:[#allocation2 + $0x138] sm:$0xff] }
 0x7e4   :  { %6435 = vmatpush.bf16.msrb.mxu3 %v13538_v22  ;;  %v5570_v22 = vshrl.u32 %v17471_v63, 16  ;;  %6304 = vmatpush.bf16.msra.mxu2 %v13533_v11 }
 0x7e5   :  { %v17530_v38 = vadd.f32 %v17427_v54, %v5309_v24  ;;  %v5818_v24 = vsel %vm2288_vm2, %v5813_v60, %v5817_v43  ;;  %v17553_v47 = vpack.c.b16 %v5757_v48, %v5757_v48  ;;  %v5823_v60 = vshll.u32 %v17517_v33, 16 }
 0x7e6   :  { %v5008_v10 = vpop.f32.mrf.mxu2  ;;  %v5150_v26 = vpop.f32.mrf.mxu3  ;;  %11943 = vmatmul.msk.bf16.gmra.mxu0 %vm1228_vm0, %v6116_v7  ;;  %v13560_v7 = vld [vmem:[#allocation2 + $0x28] sm:$0xff] }
 0x7e7   :  { %v5036_v36 = vadd.f32 %v5008_v10, %v17243_v32  ;;  %v5568_v32 = vrot.slane %v5566_v28, 1  ;;  %v17541_v27 = vpop.f32.mrf.mxu1  ;;  %v5975_v10 = vrot.slane %v17551_v18, 1  ;;  %v6117_v51 = vrot.slane %v17553_v47, 1  ;;  %6933 = vmatpush.bf16.msrb.mxu0 %v13560_v7 }
 0x7e9   :  { %v5178_v54 = vadd.f32 %v5150_v26, %v5036_v36  ;;  %v17543_v12 = vpop.f32.mrf.mxu0  ;;  %v5569_v21 = vsel %vm2288_vm2, %v5564_v25, %v5568_v32  ;;  %v5976_v36 = vsel %vm2731_vm3, %v5973_v14, %v5975_v10  ;;  %v5574_v14 = vshll.u32 %v17513_v0, 16  ;;  %v14306_v10 = vld [vmem:[#allocation4 + $0x8] sm:$0xff]  }
 0x7eb   :  { %v5310_v61 = vadd.f32 %v17443_v58, %v5178_v54  ;;  %v6118_v54 = vsel %vm2731_vm3, %v6115_v1, %v6117_v51  ;;  %v13532_v1 = vld [vmem:[#allocation2 + $0x460] sm:$0xff]  ;;  %v5576_v48 = vrot.slane %v5574_v14, 1 }
 0x7ec   :  { %6305 = vmatpush.bf16.msra.mxu2 %v13532_v1 }
 0x7ed   :  { %v17546_v40 = vadd.f32 %v17447_v2, %v5310_v61  ;;  %v13549_v2 = vld [vmem:[#allocation2 + $0x2d8] sm:$0xff] }
 0x7ee   :  { %v5010_v52 = vpop.f32.mrf.mxu2  ;;  %v5152_v53 = vpop.f32.mrf.mxu3  ;;  %6684 = vmatpush.bf16.msrb.mxu1 %v13549_v2  ;;  %v13537_v61 = vld [vmem:[#allocation2 + $0x118] sm:$0xff] }
 0x7ef   :  { %v5037_v58 = vadd.f32 %v5010_v52, %v17258_v39  ;;  %v17559_v39 = vpop.f32.mrf.mxu1  ;;  %6436 = vmatpush.bf16.msrb.mxu3 %v13537_v61  ;;  %v13536_v52 = vld [vmem:[#allocation2 + $0x1d8] sm:$0xff]  ;;  %v6565_v61 = vshrl.u32 %v14306_v10, 16 }
 0x7f1   :  { %v5179_v50 = vadd.f32 %v5152_v53, %v5037_v58  ;;  %v17563_v28 = vpop.f32.mrf.mxu0  ;;  %v5572_v53 = vor.u32 %v5570_v22, %v5568_v32  ;;  %v5821_v58 = vor.u32 %v5819_v59, %v5817_v43  ;;  %v13535_v32 = vld [vmem:[#allocation2 + $0xa8] sm:$0xff]  ;;  %v6567_v43 = vshll.u32 %v14306_v10, 16  ;;  %v17589_v22 = vld [vmem:[#allocation4 + $0x50] sm:$0xff] }
 0x7f2   :  { %11920 = vmatmul.msk.bf16.gmra.mxu1 %vm1228_vm0, %v5976_v36  ;;  %v13558_v36 = vld [vmem:[#allocation2 + $0x3b8] sm:$0xff] }
 0x7f3   :  { %v5311_v26 = vadd.f32 %v17461_v9, %v5179_v50  ;;  %11870 = vmatmul.msk.bf16.gmra.mxu2 %vm1228_vm0, %v5569_v21  ;;  %11894 = vmatmul.msk.bf16.gmra.mxu3 %vm1228_vm0, %v5818_v24  ;;  %v5825_v21 = vrot.slane %v5823_v60, 1 }
 0x7f4   :  { %6437 = vmatpush.bf16.msrb.mxu3 %v13536_v52  ;;  %v6821_v52 = vshll.u32 %v17589_v22, 16 }
 0x7f5   :  { %v17566_v8 = vadd.f32 %v17463_v57, %v5311_v26  ;;  %v13548_v57 = vld [vmem:[#allocation2 + $0xd8] sm:$0xff]  ;;  %v5826_v11 = vsel %vm2288_vm2, %v5821_v58, %v5825_v21 }
 0x7f6   :  { %v5013_v9 = vpop.f32.mrf.mxu2  ;;  %v5155_v4 = vpop.f32.mrf.mxu3  ;;  %11944 = vmatmul.msk.bf16.gmra.mxu0 %vm1228_vm0, %v6118_v54  ;;  %6685 = vmatpush.bf16.msrb.mxu1 %v13548_v57  ;;  %v14307_v54 = vld [vmem:[#allocation4 + $0x48] sm:$0xff]  }
 0x7f7   :  { %v5038_v25 = vadd.f32 %v5013_v9, %v17275_v34  ;;  %v13559_v34 = vld [vmem:[#allocation2 + $0x180] sm:$0xff]  ;;  %v17577_v24 = vpop.f32.mrf.mxu1  ;;  %v5577_v9 = vsel %vm2288_vm2, %v5572_v53, %v5576_v48  ;;  %v6816_v14 = vshll.u32 %v14307_v54, 16 }
 0x7f8   :  { %6934 = vmatpush.bf16.msrb.mxu0 %v13559_v34  ;;  %6438 = vmatpush.bf16.msrb.mxu3 %v13535_v32 }
 0x7f9   :  { %v5180_v62 = vadd.f32 %v5155_v4, %v5038_v25  ;;  %v17579_v50 = vpop.f32.mrf.mxu0  ;;  %v17586_v4 = vld [vmem:[#allocation4 + $0x10] sm:$0xff]  ;;  %v6569_v25 = vrot.slane %v6567_v43, 1  ;;  %v6818_v1 = vrot.slane %v6816_v14, 1  ;;  %v5578_v43 = vshrl.u32 %v17513_v0, 16 }
 0x7fa   :  { %6686 = vmatpush.bf16.msrb.mxu1 %v13547_v41  ;;  %v6572_v60 = vshll.u32 %v17586_v4, 16  ;;  %v6823_v41 = vrot.slane %v6821_v52, 1  ;;  %v6825_v52 = vshrl.u32 %v17589_v22, 16 }
 0x7fb   :  { %v5312_v63 = vadd.f32 %v17479_v23, %v5180_v62  ;;  %v13531_v23 = vld [vmem:[#allocation2 + $0x110] sm:$0xff]  ;;  %v6570_v57 = vor.u32 %v6569_v25, %v6565_v61  ;;  %v6814_v62 = vshrl.u32 %v14307_v54, 16  ;;  %v5831_v54 = vshll.u32 %v17553_v47, 16 }
 0x7fc   :  { %6306 = vmatpush.bf16.msra.mxu2 %v13531_v23  ;;  %6935 = vmatpush.bf16.msrb.mxu0 %v13558_v36 }
 0x7fd   :  { %v17582_v26 = vadd.f32 %v17483_v44, %v5312_v63  ;;  %v13546_v44 = vld [vmem:[#allocation2 + $0x478] sm:$0xff]  ;;  %v6574_v63 = vrot.slane %v6572_v60, 1  ;;  %v6819_v58 = vor.u32 %v6818_v1, %v6814_v62  ;;  %v5833_v14 = vrot.slane %v5831_v54, 1 }
 0x7fe   :  { %v5015_v2 = vpop.f32.mrf.mxu2  ;;  %v5157_v7 = vpop.f32.mrf.mxu3  ;;  %6687 = vmatpush.bf16.msrb.mxu1 %v13546_v44  ;;  %v5580_v44 = vor.u32 %v5578_v43, %v5576_v48  ;;  %v17620_v60 = vld [vmem:[#allocation4 + $0x18] sm:$0xff]  ;;  %v6576_v48 = vshrl.u32 %v17586_v4, 16 }
 0x7ff   :  { %v5039_v51 = vadd.f32 %v5015_v2, %v17303_v49  ;;  %v13557_v49 = vld [vmem:[#allocation2 + $0x260] sm:$0xff]  ;;  %v17596_v53 = vpop.f32.mrf.mxu1  ;;  %v6575_v2 = vsel %vm2288_vm2, %v6570_v57, %v6574_v63  ;;  %v17627_v57 = vld [vmem:[#allocation4 + $0x58] sm:$0xff] }
 0x800   :  { %6936 = vmatpush.bf16.msrb.mxu0 %v13557_v49  ;;  %v6578_v1 = vor.u32 %v6576_v48, %v6574_v63  ;;  %v14556_v48 = vld [vmem:[#allocation4 + $0x8] sm:$0xff]  }
 0x801   :  { %v5181_v59 = vadd.f32 %v5157_v7, %v5039_v51  ;;  %v5582_v51 = vshll.u32 %v17551_v18, 16 }
 0x802   :  { %12037 = vmatmul.msk.bf16.vlgmr.msrb.gmra.mxu1 %vm1228_vm0, %v6575_v2 }
 0x803   :  { %v5313_v34 = vadd.f32 %v17499_v46, %v5181_v59  ;;  %11871 = vmatmul.msk.bf16.gmra.mxu2 %vm1228_vm0, %v5577_v9  ;;  %11895 = vmatmul.msk.bf16.gmra.mxu3 %vm1228_vm0, %v5826_v11  ;;  %v17598_v10 = vpop.f32.mrf.mxu0  ;;  %v6824_v46 = vsel %vm2288_vm2, %v6819_v58, %v6823_v41  ;;  %v5827_v9 = vshrl.u32 %v17517_v33, 16  ;;  %v5584_v61 = vrot.slane %v5582_v51, 1 }
 0x805   :  { %v17602_v7 = vadd.f32 %v17502_v35, %v5313_v34  ;;  %v5829_v25 = vor.u32 %v5827_v9, %v5825_v21  ;;  %v5585_v49 = vsel %vm2288_vm2, %v5580_v44, %v5584_v61  ;;  %v6580_v21 = vshll.u32 %v17620_v60, 16  ;;  %v17654_v61 = vld [vmem:[#allocation4 + $0x20] sm:$0xff] }
 0x806   :  { %v5018_v23 = vpop.f32.mrf.mxu2  ;;  %v5160_v32 = vpop.f32.mrf.mxu3  ;;  %12089 = vmatmul.msk.bf16.vlgmr.msrb.gmra.mxu0 %vm1228_vm0, %v6824_v46  ;;  %v6829_v34 = vshll.u32 %v17627_v57, 16 }
 0x807   :  { %v5040_v36 = vadd.f32 %v5018_v23, %v17320_v15  ;;  %v17613_v15 = vpop.f32.mrf.mxu1  ;;  %v6827_v23 = vor.u32 %v6825_v52, %v6823_v41 }
 0x809   :  { %v5182_v35 = vadd.f32 %v5160_v32, %v5040_v36  ;;  %v6831_v32 = vrot.slane %v6829_v34, 1 }
 0x80b   :  { %v5314_v11 = vadd.f32 %v17523_v45, %v5182_v35  ;;  %v17615_v59 = vpop.f32.mrf.mxu0  ;;  %v5834_v45 = vsel %vm2288_vm2, %v5829_v25, %v5833_v14  ;;  %v6832_v51 = vsel %vm2288_vm2, %v6827_v23, %v6831_v32  ;;  %v6584_v25 = vshrl.u32 %v17620_v60, 16 }
 0x80c   :  { %v6588_v14 = vshll.u32 %v17654_v61, 16 }
 0x80d   :  { %v17618_v0 = vadd.f32 %v17527_v3, %v5314_v11  ;;  %v6582_v3 = vrot.slane %v6580_v21, 1  ;;  %v14557_v21 = vld [vmem:[#allocation4 + $0x48] sm:$0xff]  }
 0x80e   :  { %v5020_v18 = vpop.f32.mrf.mxu2  ;;  %v5162_v33 = vpop.f32.mrf.mxu3 }
 0x80f   :  { %v5041_v47 = vadd.f32 %v5020_v18, %v17344_v5  ;;  %v17634_v5 = vpop.f32.mrf.mxu1  ;;  %v6583_v2 = vsel %vm2288_vm2, %v6578_v1, %v6582_v3  ;;  %v17659_v18 = vld [vmem:[#allocation4 + $0x60] sm:$0xff] }
 0x811   :  { %v5183_v62 = vadd.f32 %v5162_v33, %v5041_v47  ;;  %v6586_v33 = vor.u32 %v6584_v25, %v6582_v3  ;;  %v6590_v47 = vrot.slane %v6588_v14, 1 }
 0x812   :  { %12038 = vmatmul.msk.bf16.gmra.mxu1 %vm1228_vm0, %v6583_v2 }
 0x813   :  { %v5315_v58 = vadd.f32 %v17541_v27, %v5183_v62  ;;  %11872 = vmatmul.msk.bf16.gmra.mxu2 %vm1228_vm0, %v5585_v49  ;;  %11896 = vmatmul.msk.bf16.gmra.mxu3 %vm1228_vm0, %v5834_v45  ;;  %v17637_v46 = vpop.f32.mrf.mxu0  ;;  %v6833_v49 = vshrl.u32 %v17627_v57, 16  ;;  %v6591_v62 = vsel %vm2288_vm2, %v6586_v33, %v6590_v47 }
 0x815   :  { %v17640_v63 = vadd.f32 %v17543_v12, %v5315_v58  ;;  %v6835_v1 = vor.u32 %v6833_v49, %v6831_v32 }
 0x816   :  { %v5023_v36 = vpop.f32.mrf.mxu2  ;;  %v5165_v43 = vpop.f32.mrf.mxu3  ;;  %12090 = vmatmul.msk.bf16.gmra.mxu0 %vm1228_vm0, %v6832_v51 }
 0x817   :  { %v5042_v27 = vadd.f32 %v5023_v36, %v17358_v16  ;;  %v17647_v41 = vpop.f32.mrf.mxu1 }
 0x819   :  { %v5184_v9 = vadd.f32 %v5165_v43, %v5042_v27 }
 0x81b   :  { %v5316_v54 = vadd.f32 %v17559_v39, %v5184_v9  ;;  %v17649_v35 = vpop.f32.mrf.mxu0 }
 0x81d   :  { %v17652_v12 = vadd.f32 %v17563_v28, %v5316_v54  ;;  %v6837_v28 = vshll.u32 %v17659_v18, 16  ;;  %v17686_v54 = vld [vmem:[#allocation4 + $0x28] sm:$0xff] }
 0x81e   :  { %v5025_v11 = vpop.f32.mrf.mxu2  ;;  %v5167_v44 = vpop.f32.mrf.mxu3  ;;  %v6596_v25 = vshll.u32 %v17686_v54, 16 }
 0x81f   :  { %v5043_v16 = vadd.f32 %v5025_v11, %v17378_v19  ;;  %v17666_v19 = vpop.f32.mrf.mxu1  ;;  %v6839_v52 = vrot.slane %v6837_v28, 1  ;;  %v14209_v11 = vld [vmem:[#allocation4 + $0x10] sm:$0xff]  }
 0x820   :  { %v6598_v33 = vrot.slane %v6596_v25, 1 }
 0x821   :  { %v5185_v39 = vadd.f32 %v5167_v44, %v5043_v16  ;;  %v14216_v44 = vld [vmem:[#allocation4 + $0x50] sm:$0xff]   ;;  %v6592_v16 = vshrl.u32 %v17654_v61, 16 }
 0x822   :  { %12039 = vmatmul.msk.bf16.gmra.mxu1 %vm1228_vm0, %v6591_v62 }
 0x823   :  { %v5317_v45 = vadd.f32 %v17577_v24, %v5185_v39  ;;  %11961 = vmatmul.msk.bf16.vlgmr.msra.gmra.mxu2 %vm1228_vm0, %v14556_v48  ;;  %11985 = vmatmul.msk.bf16.vlgmr.msrb.gmra.mxu3 %vm1228_vm0, %v14557_v21  ;;  %v17669_v3 = vpop.f32.mrf.mxu0  ;;  %v6840_v24 = vsel %vm2288_vm2, %v6835_v1, %v6839_v52  ;;  %v6594_v39 = vor.u32 %v6592_v16, %v6590_v47 }
 0x825   :  { %v17672_v34 = vadd.f32 %v17579_v50, %v5317_v45  ;;  %v6599_v45 = vsel %vm2288_vm2, %v6594_v39, %v6598_v33 }
 0x826   :  { %v5643_v58 = vpop.f32.mrf.mxu2  ;;  %v5892_v2 = vpop.f32.mrf.mxu3  ;;  %12091 = vmatmul.msk.bf16.gmra.mxu0 %vm1228_vm0, %v6840_v24 }
 0x827   :  { %v5683_v23 = vadd.f32 %v5643_v58, %v17394_v17  ;;  %v17679_v32 = vpop.f32.mrf.mxu1 }
 0x829   :  { %v5932_v36 = vadd.f32 %v5892_v2, %v5683_v23 }
 0x82b   :  { %v6074_v43 = vadd.f32 %v17596_v53, %v5932_v36  ;;  %v17681_v51 = vpop.f32.mrf.mxu0  ;;  %v17691_v53 = vld [vmem:[#allocation4 + $0x68] sm:$0xff] }
 0x82c   :  { %v6845_v49 = vshll.u32 %v17691_v53, 16 }
 0x82d   :  { %v17684_v50 = vadd.f32 %v17598_v10, %v6074_v43  ;;  %v6841_v10 = vshrl.u32 %v17659_v18, 16 }
 0x82e   :  { %v5645_v27 = vpop.f32.mrf.mxu2  ;;  %v5894_v9 = vpop.f32.mrf.mxu3  ;;  %v6847_v21 = vrot.slane %v6845_v49, 1 }
 0x82f   :  { %v5684_v17 = vadd.f32 %v5645_v27, %v17414_v13  ;;  %v17698_v13 = vpop.f32.mrf.mxu1  ;;  %v6843_v48 = vor.u32 %v6841_v10, %v6839_v52 }
 0x831   :  { %v5933_v14 = vadd.f32 %v5894_v9, %v5684_v17  ;;  %v6848_v2 = vsel %vm2288_vm2, %v6843_v48, %v6847_v21  ;;  %v17718_v9 = vld [vmem:[#allocation4 + $0x30] sm:$0xff]  ;;  %v14210_v17 = vld [vmem:[#allocation4 + $0x18] sm:$0xff]  }
 0x832   :  { %12040 = vmatmul.msk.bf16.gmra.mxu1 %vm1228_vm0, %v6599_v45  ;;  %v6604_v16 = vshll.u32 %v17718_v9, 16 }
 0x833   :  { %v6075_v28 = vadd.f32 %v17613_v15, %v5933_v14  ;;  %11962 = vmatmul.msk.bf16.gmra.mxu2 %vm1228_vm0, %v14209_v11  ;;  %11986 = vmatmul.msk.bf16.gmra.mxu3 %vm1228_vm0, %v14216_v44  ;;  %v17701_v62 = vpop.f32.mrf.mxu0  ;;  %v14217_v11 = vld [vmem:[#allocation4 + $0x58] sm:$0xff]   ;;  %v6600_v44 = vshrl.u32 %v17686_v54, 16 }
 0x834   :  { %v6606_v39 = vrot.slane %v6604_v16, 1  ;;  %v6608_v16 = vshrl.u32 %v17718_v9, 16 }
 0x835   :  { %v17704_v47 = vadd.f32 %v17615_v59, %v6075_v28  ;;  %v6602_v14 = vor.u32 %v6600_v44, %v6598_v33  ;;  %v14218_v44 = vld [vmem:[#allocation4 + $0x60] sm:$0xff]  }
 0x836   :  { %v5648_v1 = vpop.f32.mrf.mxu2  ;;  %v5897_v58 = vpop.f32.mrf.mxu3  ;;  %12092 = vmatmul.msk.bf16.gmra.mxu0 %vm1228_vm0, %v6848_v2 }
 0x837   :  { %v5685_v15 = vadd.f32 %v5648_v1, %v17430_v56  ;;  %v17711_v52 = vpop.f32.mrf.mxu1  ;;  %v6607_v28 = vsel %vm2288_vm2, %v6602_v14, %v6606_v39 }
 0x839   :  { %v5934_v24 = vadd.f32 %v5897_v58, %v5685_v15 }
 0x83b   :  { %v6076_v23 = vadd.f32 %v17634_v5, %v5934_v24  ;;  %v17713_v36 = vpop.f32.mrf.mxu0  ;;  %v17723_v5 = vld [vmem:[#allocation4 + $0x70] sm:$0xff] }
 0x83c   :  { %v6853_v10 = vshll.u32 %v17723_v5, 16 }
 0x83d   :  { %v17716_v59 = vadd.f32 %v17637_v46, %v6076_v23  ;;  %v6849_v46 = vshrl.u32 %v17691_v53, 16 }
 0x83e   :  { %v5650_v43 = vpop.f32.mrf.mxu2  ;;  %v5899_v27 = vpop.f32.mrf.mxu3  ;;  %v6855_v48 = vrot.slane %v6853_v10, 1 }
 0x83f   :  { %v5686_v56 = vadd.f32 %v5650_v43, %v17450_v42  ;;  %v17730_v42 = vpop.f32.mrf.mxu1  ;;  %v6851_v45 = vor.u32 %v6849_v46, %v6847_v21  ;;  %v6610_v46 = vor.u32 %v6608_v16, %v6606_v39  ;;  %v17782_v16 = vld [vmem:[#allocation4 + $0x40] sm:$0xff] }
 0x841   :  { %v5935_v25 = vadd.f32 %v5899_v27, %v5686_v56  ;;  %v6856_v15 = vsel %vm2288_vm2, %v6851_v45, %v6855_v48 }
 0x842   :  { %12041 = vmatmul.msk.bf16.gmra.mxu1 %vm1228_vm0, %v6607_v28 }
 0x843   :  { %v6077_v49 = vadd.f32 %v17647_v41, %v5935_v25  ;;  %11963 = vmatmul.msk.bf16.gmra.mxu2 %vm1228_vm0, %v14210_v17  ;;  %11987 = vmatmul.msk.bf16.gmra.mxu3 %vm1228_vm0, %v14217_v11  ;;  %v17733_v1 = vpop.f32.mrf.mxu0  ;;  %v17750_v17 = vld [vmem:[#allocation4 + $0x38] sm:$0xff]  ;;  %v14211_v11 = vld [vmem:[#allocation4 + $0x20] sm:$0xff]  }
 0x844   :  { %v6612_v25 = vshll.u32 %v17750_v17, 16 }
 0x845   :  { %v17736_v33 = vadd.f32 %v17649_v35, %v6077_v49 }
 0x846   :  { %v5653_v58 = vpop.f32.mrf.mxu2  ;;  %v5902_v2 = vpop.f32.mrf.mxu3  ;;  %12093 = vmatmul.msk.bf16.gmra.mxu0 %vm1228_vm0, %v6856_v15  ;;  %v6614_v10 = vrot.slane %v6612_v25, 1  ;;  %v14212_v25 = vld [vmem:[#allocation4 + $0x28] sm:$0xff]  }
 0x847   :  { %v5687_v41 = vadd.f32 %v5653_v58, %v17466_v30  ;;  %v17743_v21 = vpop.f32.mrf.mxu1 }
 0x848   :  { %v6615_v45 = vsel %vm2288_vm2, %v6610_v46, %v6614_v10  ;;  %v6616_v46 = vshrl.u32 %v17750_v17, 16 }
 0x849   :  { %v5936_v24 = vadd.f32 %v5902_v2, %v5687_v41 }
 0x84b   :  { %v6078_v23 = vadd.f32 %v17666_v19, %v5936_v24  ;;  %v17745_v43 = vpop.f32.mrf.mxu0  ;;  %v17755_v19 = vld [vmem:[#allocation4 + $0x78] sm:$0xff] }
 0x84c   :  { %v6861_v49 = vshll.u32 %v17755_v19, 16 }
 0x84d   :  { %v17748_v35 = vadd.f32 %v17669_v3, %v6078_v23  ;;  %v6857_v3 = vshrl.u32 %v17723_v5, 16 }
 0x84e   :  { %v5655_v27 = vpop.f32.mrf.mxu2  ;;  %v5904_v56 = vpop.f32.mrf.mxu3  ;;  %v6863_v2 = vrot.slane %v6861_v49, 1 }
 0x84f   :  { %v5688_v30 = vadd.f32 %v5655_v27, %v17486_v31  ;;  %v17762_v31 = vpop.f32.mrf.mxu1  ;;  %v6859_v58 = vor.u32 %v6857_v3, %v6855_v48  ;;  %v6620_v3 = vshll.u32 %v17782_v16, 16 }
 0x851   :  { %v5937_v14 = vadd.f32 %v5904_v56, %v5688_v30  ;;  %v6864_v23 = vsel %vm2288_vm2, %v6859_v58, %v6863_v2 }
 0x852   :  { %12042 = vmatmul.msk.bf16.gmra.mxu1 %vm1228_vm0, %v6615_v45  ;;  %v6622_v45 = vrot.slane %v6620_v3, 1 }
 0x853   :  { %v6079_v28 = vadd.f32 %v17679_v32, %v5937_v14  ;;  %11964 = vmatmul.msk.bf16.gmra.mxu2 %vm1228_vm0, %v14211_v11  ;;  %11988 = vmatmul.msk.bf16.gmra.mxu3 %vm1228_vm0, %v14218_v44  ;;  %v17765_v15 = vpop.f32.mrf.mxu0  ;;  %v14219_v14 = vld [vmem:[#allocation4 + $0x68] sm:$0xff]  }
 0x855   :  { %v17768_v39 = vadd.f32 %v17681_v51, %v6079_v28  ;;  %v6618_v28 = vor.u32 %v6616_v46, %v6614_v10  ;;  %v6512_v46 = vld [vmem:[#allocation4 + $0x48] sm:$0x1] }
 0x856   :  { %v5658_v41 = vpop.f32.mrf.mxu2  ;;  %v5907_v24 = vpop.f32.mrf.mxu3  ;;  %12094 = vmatmul.msk.bf16.gmra.mxu0 %vm1228_vm0, %v6864_v23 }
 0x857   :  { %v5689_v32 = vadd.f32 %v5658_v41, %v17505_v6  ;;  %v17775_v48 = vpop.f32.mrf.mxu1  ;;  %v6623_v23 = vsel %vm2288_vm2, %v6618_v28, %v6622_v45  ;;  %v6761_v28 = vld [vmem:[#allocation4 + $0x88] sm:$0x1] }
 0x859   :  { %v5938_v27 = vadd.f32 %v5907_v24, %v5689_v32 }
 0x85b   :  { %v6080_v56 = vadd.f32 %v17698_v13, %v5938_v27  ;;  %v17777_v30 = vpop.f32.mrf.mxu0  ;;  %v17787_v13 = vld [vmem:[#allocation4 + $0x80] sm:$0xff] }
 0x85c   :  { %v6869_v58 = vshll.u32 %v17787_v13, 16 }
 0x85d   :  { %v17780_v51 = vadd.f32 %v17701_v62, %v6080_v56  ;;  %v6865_v62 = vshrl.u32 %v17755_v19, 16 }
 0x85e   :  { %v5660_v11 = vpop.f32.mrf.mxu2  ;;  %v5909_v44 = vpop.f32.mrf.mxu3  ;;  %v6871_v27 = vrot.slane %v6869_v58, 1 }
 0x85f   :  { %v5690_v6 = vadd.f32 %v5660_v11, %v17530_v38  ;;  %v13564_v38 = vld [vmem:[#allocation2 + $0x158] sm:$0xff]  ;;  %v17794_v24 = vpop.f32.mrf.mxu1  ;;  %v6867_v32 = vor.u32 %v6865_v62, %v6863_v2 }
 0x860   :  { %7075 = vmatpush.bf16.msrb.mxu2 %v13564_v38  ;;  %v6803_v38 = vunpack.c.l.b16 %v6761_v28 }
 0x861   :  { %v5939_v49 = vadd.f32 %v5909_v44, %v5690_v6 }
 0x862   :  { %12043 = vmatmul.msk.bf16.gmra.mxu1 %vm1228_vm0, %v6623_v23 }
 0x863   :  { %v6081_v41 = vadd.f32 %v17711_v52, %v5939_v49  ;;  %11965 = vmatmul.msk.bf16.gmra.mxu2 %vm1228_vm0, %v14212_v25  ;;  %11989 = vmatmul.msk.bf16.gmra.mxu3 %vm1228_vm0, %v14219_v14  ;;  %v17797_v56 = vpop.f32.mrf.mxu0  ;;  %v6872_v52 = vsel %vm2288_vm2, %v6867_v32, %v6871_v27  ;;  %v13568_v14 = vld [vmem:[#allocation2 + $0x340] sm:$0xff]  ;;  %v6554_v49 = vunpack.c.l.b16 %v6512_v46  ;;  %v14220_v32 = vld [vmem:[#allocation4 + $0x70] sm:$0xff]  }
 0x864   :  { %7217 = vmatpush.bf16.msra.mxu3 %v13568_v14 }
 0x865   :  { %v17800_v10 = vadd.f32 %v17713_v36, %v6081_v41  ;;  %v17814_v41 = vpack.c.b16 %v6554_v49, %v6554_v49  ;;  %v13576_v49 = vld [vmem:[#allocation2 + $0xf0] sm:$0xff] }
 0x866   :  { %v5663_v11 = vpop.f32.mrf.mxu2  ;;  %v5912_v44 = vpop.f32.mrf.mxu3  ;;  %12095 = vmatmul.msk.bf16.gmra.mxu0 %vm1228_vm0, %v6872_v52  ;;  %v17819_v52 = vpack.c.b16 %v6803_v38, %v6803_v38 }
 0x867   :  { %v5691_v6 = vadd.f32 %v5663_v11, %v17546_v40  ;;  %v17807_v3 = vpop.f32.mrf.mxu1  ;;  %v6624_v11 = vshrl.u32 %v17782_v16, 16  ;;  %7481 = vmatpush.bf16.msra.mxu0 %v13576_v49 }
 0x869   :  { %v5940_v25 = vadd.f32 %v5912_v44, %v5691_v6  ;;  %v6628_v44 = vshll.u32 %v17814_v41, 16 }
 0x86b   :  { %v6082_v2 = vadd.f32 %v17730_v42, %v5940_v25  ;;  %v17809_v36 = vpop.f32.mrf.mxu0  ;;  %v14213_v42 = vld [vmem:[#allocation4 + $0x30] sm:$0xff]   ;;  %v6626_v25 = vor.u32 %v6624_v11, %v6622_v45  ;;  %v6630_v14 = vrot.slane %v6628_v44, 1  ;;  %v13567_v44 = vld [vmem:[#allocation2 + $0x308] sm:$0xff] }
 0x86c   :  { %7218 = vmatpush.bf16.msra.mxu3 %v13567_v44  ;;  %v13573_v44 = vld [vmem:[#allocation2 + $0x190] sm:$0xff] }
 0x86d   :  { %v17812_v62 = vadd.f32 %v17733_v1, %v6082_v2  ;;  %v6873_v1 = vshrl.u32 %v17787_v13, 16  ;;  %v6877_v2 = vshll.u32 %v17819_v52, 16 }
 0x86e   :  { %v5665_v40 = vpop.f32.mrf.mxu2  ;;  %v5914_v58 = vpop.f32.mrf.mxu3 }
 0x86f   :  { %v5692_v23 = vadd.f32 %v5665_v40, %v17566_v8  ;;  %v13572_v8 = vld [vmem:[#allocation2 + $0x1c8] sm:$0xff]  ;;  %v17826_v28 = vpop.f32.mrf.mxu1  ;;  %v6631_v40 = vsel %vm2288_vm2, %v6626_v25, %v6630_v14  ;;  %v6875_v38 = vor.u32 %v6873_v1, %v6871_v27  ;;  %v13571_v27 = vld [vmem:[#allocation2 + $0x250] sm:$0xff]  ;;  %v13562_v14 = vld [vmem:[#allocation2 + $0x378] sm:$0xff] }
 0x870   :  { %7349 = vmatpush.bf16.msra.mxu1 %v13572_v8  ;;  %v13575_v1 = vld [vmem:[#allocation2 + $0xe8] sm:$0xff] }
 0x871   :  { %v5941_v6 = vadd.f32 %v5914_v58, %v5692_v23  ;;  %v6879_v58 = vrot.slane %v6877_v2, 1  ;;  %7482 = vmatpush.bf16.msra.mxu0 %v13575_v1  ;;  %v13570_v8 = vld [vmem:[#allocation2 + $0x3e8] sm:$0xff] }
 0x872   :  { %12044 = vmatmul.msk.bf16.gmra.mxu1 %vm1228_vm0, %v6631_v40 }
 0x873   :  { %v6083_v46 = vadd.f32 %v17743_v21, %v5941_v6  ;;  %11966 = vmatmul.msk.bf16.gmra.mxu2 %vm1228_vm0, %v14213_v42  ;;  %11990 = vmatmul.msk.bf16.gmra.mxu3 %vm1228_vm0, %v14220_v32  ;;  %v17829_v45 = vpop.f32.mrf.mxu0  ;;  %v6880_v42 = vsel %vm2288_vm2, %v6875_v38, %v6879_v58  ;;  %v13563_v32 = vld [vmem:[#allocation2 + $0x440] sm:$0xff]  ;;  %v13561_v58 = vld [vmem:[#allocation2 + $0x108] sm:$0xff] }
 0x874   :  { %7076 = vmatpush.bf16.msrb.mxu2 %v13563_v32  ;;  %7350 = vmatpush.bf16.msra.mxu1 %v13571_v27  ;;  %v14558_v27 = vld [vmem:[#allocation4 + $0x38] sm:$0xff]  }
 0x875   :  { %v17832_v23 = vadd.f32 %v17745_v43, %v6083_v46  ;;  %v13566_v43 = vld [vmem:[#allocation2 + $0x50] sm:$0xff] }
 0x876   :  { %v5668_v21 = vpop.f32.mrf.mxu2  ;;  %v5917_v11 = vpop.f32.mrf.mxu3  ;;  %12096 = vmatmul.msk.bf16.gmra.mxu0 %vm1228_vm0, %v6880_v42  ;;  %7219 = vmatpush.bf16.msra.mxu3 %v13566_v43 }
 0x877   :  { %v5693_v6 = vadd.f32 %v5668_v21, %v17582_v26  ;;  %v17839_v46 = vpop.f32.mrf.mxu1  ;;  %v13565_v21 = vld [vmem:[#allocation2 + $0x360] sm:$0xff] }
 0x878   :  { %7077 = vmatpush.bf16.msrb.mxu2 %v13562_v14  ;;  %7351 = vmatpush.bf16.msra.mxu1 %v13570_v8  ;;  %v14560_v8 = vld [vmem:[#allocation4 + $0x88] sm:$0xff]  }
 0x879   :  { %v5942_v25 = vadd.f32 %v5917_v11, %v5693_v6  ;;  %v13574_v11 = vld [vmem:[#allocation2 + $0x3d0] sm:$0xff] }
 0x87a   :  { %7483 = vmatpush.bf16.msra.mxu0 %v13574_v11  ;;  %7220 = vmatpush.bf16.msra.mxu3 %v13565_v21 }
 0x87b   :  { %v6084_v2 = vadd.f32 %v17762_v31, %v5942_v25  ;;  %v17841_v26 = vpop.f32.mrf.mxu0  ;;  %v13569_v31 = vld [vmem:[#allocation2 + $0x2e0] sm:$0xff] }
 0x87c   :  { %7078 = vmatpush.bf16.msrb.mxu2 %v13561_v58  ;;  %7352 = vmatpush.bf16.msra.mxu1 %v13569_v31 }
 0x87d   :  { %v17844_v49 = vadd.f32 %v17765_v15, %v6084_v2  ;;  %v14559_v15 = vld [vmem:[#allocation4 + $0x78] sm:$0xff]  }
 0x87e   :  { %v5670_v40 = vpop.f32.mrf.mxu2  ;;  %v5919_v38 = vpop.f32.mrf.mxu3  ;;  %7484 = vmatpush.bf16.msra.mxu0 %v13573_v44 }
 0x87f   :  { %v5694_v42 = vadd.f32 %v5670_v40, %v17602_v7  ;;  %v17850_v25 = vpop.f32.mrf.mxu1  ;;  %v6364_v40 = vld [vmem:[#allocation4 + $0x84] sm:$0xf] }
 0x881   :  { %v5943_v32 = vadd.f32 %v5919_v38, %v5694_v42  ;;  %v14561_v38 = vld [vmem:[#allocation4 + $0xc8] sm:$0xff]   ;;  %v6374_v42 = vunpack.c.l.b16 %v6364_v40 }
 0x882   :  { %12161 = vmatmul.msk.bf16.vlgmr.msra.gmra.mxu1 %vm1228_vm0, %v14560_v8  ;;  %v18683_v8 = vld [vmem:[#allocation14_spill] sm:$0xff]  ;;  %v14308_v40 = vld [vmem:[#allocation4 + $0x8] sm:$0xf0] }
 0x883   :  { %v6085_v6 = vadd.f32 %v17775_v48, %v5943_v32  ;;  %11967 = vmatmul.msk.bf16.gmra.mxu2 %vm1228_vm0, %v14558_v27  ;;  %11991 = vmatmul.msk.bf16.gmra.mxu3 %vm1228_vm0, %v14559_v15  ;;  %v17852_v14 = vpop.f32.mrf.mxu0  ;;  %v6232_v48 = vld [vmem:[#allocation4 + $0x44] sm:$0xf]  ;;  %v18681_v27 = vld [vmem:[#allocation13_spill] sm:$0xff] }
 0x884   :  { %v6242_v11 = vunpack.c.l.b16 %v6232_v48  ;;  %v18682_v15 = vunpack.c.l.b16 %v18681_v27 }
 0x885   :  { %v17855_v7 = vadd.f32 %v17777_v30, %v6085_v6 }
 0x886   :  { %v5673_v43 = vpop.f32.mrf.mxu2  ;;  %v5922_v1 = vpop.f32.mrf.mxu3  ;;  %12185 = vmatmul.msk.bf16.vlgmr.msra.gmra.mxu0 %vm1228_vm0, %v14561_v38  ;;  %v14293_v38 = vld [vmem:[#allocation4 + $0x90] sm:$0xff]  }
 0x887   :  { %v5695_v2 = vadd.f32 %v5673_v43, %v17618_v0  ;;  %v17861_v31 = vpop.f32.mrf.mxu1  ;;  %v6250_v43 = vpack.c.b16 %v6242_v11, %v18682_v15 }
 0x889   :  { %v5944_v58 = vadd.f32 %v5922_v1, %v5695_v2  ;;  %v18684_v1 = vunpack.c.l.b16 %v18683_v8 }
 0x88b   :  { %v6086_v21 = vadd.f32 %v17794_v24, %v5944_v58  ;;  %v17863_v30 = vpop.f32.mrf.mxu0  ;;  %v6382_v2 = vpack.c.b16 %v6374_v42, %v18684_v1  ;;  %v14309_v58 = vld [vmem:[#allocation4 + $0x8] sm:$0xe] }
 0x88c   :  { %v14310_v27 = vor.u32 %v14309_v58, %v14308_v40 }
 0x88d   :  { %v17866_v32 = vadd.f32 %v17797_v56, %v6086_v21  ;;  %v14311_v21 = vld [vmem:[#allocation4 + $0x48] sm:$0xf0] }
 0x88e   :  { %v5675_v0 = vpop.f32.mrf.mxu2  ;;  %v5924_v44 = vpop.f32.mrf.mxu3  ;;  %v7006_v1 = vrot.slane %v14310_v27, 1 }
 0x88f   :  { %v5696_v6 = vadd.f32 %v5675_v0, %v17640_v63  ;;  %v17876_v56 = vpop.f32.mrf.mxu1  ;;  %v14312_v63 = vld [vmem:[#allocation4 + $0x48] sm:$0xe] }
 0x890   :  { %v14313_v15 = vor.u32 %v14312_v63, %v14311_v21 }
 0x891   :  { %v5945_v24 = vadd.f32 %v5924_v44, %v5696_v6  ;;  %v14300_v6 = vld [vmem:[#allocation4 + $0xd0] sm:$0xff]  }
 0x892   :  { %12162 = vmatmul.msk.bf16.gmra.mxu1 %vm1228_vm0, %v14293_v38 }
 0x893   :  { %v6087_v48 = vadd.f32 %v17807_v3, %v5945_v24  ;;  %11968 = vmatmul.msk.bf16.gmra.mxu2 %vm1228_vm0, %v6250_v43  ;;  %11992 = vmatmul.msk.bf16.gmra.mxu3 %vm1228_vm0, %v6382_v2  ;;  %v17878_v0 = vpop.f32.mrf.mxu0  ;;  %v7007_v2 = vrot.slane %v17586_v4, 1  ;;  %v7148_v24 = vrot.slane %v14313_v15, 1 }
 0x895   :  { %v17881_v11 = vadd.f32 %v17809_v36, %v6087_v48  ;;  %v7149_v36 = vrot.slane %v17589_v22, 1  ;;  %v7008_v21 = vsel %vm2731_vm3, %v7006_v1, %v7007_v2 }
 0x896   :  { %v5678_v42 = vpop.f32.mrf.mxu2  ;;  %v5927_v44 = vpop.f32.mrf.mxu3  ;;  %12186 = vmatmul.msk.bf16.gmra.mxu0 %vm1228_vm0, %v14300_v6 }
 0x897   :  { %v5697_v3 = vadd.f32 %v5678_v42, %v17652_v12  ;;  %v6696_v48 = vpop.f32.mrf.mxu1  ;;  %v14294_v42 = vld [vmem:[#allocation4 + $0x98] sm:$0xff]  }
 0x899   :  { %v5946_v43 = vadd.f32 %v5927_v44, %v5697_v3  ;;  %v14301_v3 = vld [vmem:[#allocation4 + $0xd8] sm:$0xff]  }
 0x89b   :  { %v6088_v8 = vadd.f32 %v17826_v28, %v5946_v43  ;;  %v17889_v29 = vpop.f32.mrf.mxu0  ;;  %v7150_v28 = vsel %vm2731_vm3, %v7148_v24, %v7149_v36  ;;  %v7009_v43 = vrot.slane %v17620_v60, 1 }
 0x89d   :  { %v17892_v12 = vadd.f32 %v17829_v45, %v6088_v8  ;;  %v7151_v8 = vrot.slane %v17627_v57, 1  ;;  %v14295_v57 = vld [vmem:[#allocation4 + $0xa0] sm:$0xff]  }
 0x89e   :  { %v5680_v38 = vpop.f32.mrf.mxu2  ;;  %v5929_v40 = vpop.f32.mrf.mxu3 }
 0x89f   :  { %v5698_v58 = vadd.f32 %v5680_v38, %v17672_v34  ;;  %v17900_v22 = vpop.f32.mrf.mxu1 }
 0x8a1   :  { %v5947_v63 = vadd.f32 %v5929_v40, %v5698_v58  ;;  %v7010_v58 = vsel %vm2731_vm3, %v7007_v2, %v7009_v43  ;;  %v14302_v2 = vld [vmem:[#allocation4 + $0xe0] sm:$0xff]  }
 0x8a2   :  { %12163 = vmatmul.msk.bf16.gmra.mxu1 %vm1228_vm0, %v14294_v42 }
 0x8a3   :  { %v6089_v4 = vadd.f32 %v17839_v46, %v5947_v63  ;;  %12113 = vmatmul.msk.bf16.vlgmr.msrb.gmra.mxu2 %vm1228_vm0, %v7008_v21  ;;  %12137 = vmatmul.msk.bf16.vlgmr.msra.gmra.mxu3 %vm1228_vm0, %v7150_v28  ;;  %v17902_v45 = vpop.f32.mrf.mxu0  ;;  %v7152_v21 = vsel %vm2731_vm3, %v7149_v36, %v7151_v8 }
 0x8a5   :  { %v17905_v44 = vadd.f32 %v17841_v26, %v6089_v4 }
 0x8a6   :  { %v6308_v34 = vpop.f32.mrf.mxu2  ;;  %v6440_v6 = vpop.f32.mrf.mxu3  ;;  %12187 = vmatmul.msk.bf16.gmra.mxu0 %vm1228_vm0, %v14301_v3 }
 0x8a7   :  { %v6348_v27 = vadd.f32 %v6308_v34, %v17684_v50  ;;  %v6701_v1 = vpop.f32.mrf.mxu1  ;;  %v7011_v34 = vrot.slane %v17654_v61, 1 }
 0x8a9   :  { %v6480_v46 = vadd.f32 %v6440_v6, %v6348_v27  ;;  %v7153_v6 = vrot.slane %v17659_v18, 1  ;;  %v14296_v18 = vld [vmem:[#allocation4 + $0xa8] sm:$0xff]  }
 0x8ab   :  { %v6729_v15 = vadd.f32 %v17850_v25, %v6480_v46  ;;  %v17913_v24 = vpop.f32.mrf.mxu0 }
 0x8ad   :  { %v17916_v26 = vadd.f32 %v17852_v14, %v6729_v15 }
 0x8ae   :  { %v6310_v38 = vpop.f32.mrf.mxu2  ;;  %v6442_v40 = vpop.f32.mrf.mxu3 }
 0x8af   :  { %v6349_v50 = vadd.f32 %v6310_v38, %v17704_v47  ;;  %v17924_v60 = vpop.f32.mrf.mxu1  ;;  %v7012_v38 = vsel %vm2731_vm3, %v7009_v43, %v7011_v34 }
 0x8b1   :  { %v6481_v28 = vadd.f32 %v6442_v40, %v6349_v50  ;;  %v7154_v40 = vsel %vm2731_vm3, %v7151_v8, %v7153_v6 }
 0x8b2   :  { %12164 = vmatmul.msk.bf16.gmra.mxu1 %vm1228_vm0, %v14295_v57  ;;  %v7155_v57 = vrot.slane %v17691_v53, 1  ;;  %v14297_v53 = vld [vmem:[#allocation4 + $0xb0] sm:$0xff]  }
 0x8b3   :  { %v6730_v25 = vadd.f32 %v17861_v31, %v6481_v28  ;;  %12114 = vmatmul.msk.bf16.gmra.mxu2 %vm1228_vm0, %v7010_v58  ;;  %12138 = vmatmul.msk.bf16.gmra.mxu3 %vm1228_vm0, %v7152_v21  ;;  %v17926_v14 = vpop.f32.mrf.mxu0  ;;  %v14303_v28 = vld [vmem:[#allocation4 + $0xe8] sm:$0xff]  }
 0x8b5   :  { %v17929_v63 = vadd.f32 %v17863_v30, %v6730_v25  ;;  %v7013_v25 = vrot.slane %v17686_v54, 1 }
 0x8b6   :  { %v6313_v47 = vpop.f32.mrf.mxu2  ;;  %v6445_v4 = vpop.f32.mrf.mxu3  ;;  %12188 = vmatmul.msk.bf16.gmra.mxu0 %vm1228_vm0, %v14302_v2 }
 0x8b7   :  { %v6350_v36 = vadd.f32 %v6313_v47, %v17716_v59  ;;  %v6706_v3 = vpop.f32.mrf.mxu1 }
 0x8b9   :  { %v6482_v31 = vadd.f32 %v6445_v4, %v6350_v36 }
 0x8bb   :  { %v6731_v42 = vadd.f32 %v17876_v56, %v6482_v31  ;;  %v17937_v27 = vpop.f32.mrf.mxu0  ;;  %v7014_v31 = vsel %vm2731_vm3, %v7011_v34, %v7013_v25 }
 0x8bd   :  { %v17940_v30 = vadd.f32 %v17878_v0, %v6731_v42  ;;  %v7156_v42 = vsel %vm2731_vm3, %v7153_v6, %v7155_v57 }
 0x8be   :  { %v6315_v46 = vpop.f32.mrf.mxu2  ;;  %v6447_v15 = vpop.f32.mrf.mxu3 }
 0x8bf   :  { %v6351_v59 = vadd.f32 %v6315_v46, %v17736_v33  ;;  %v17947_v61 = vpop.f32.mrf.mxu1 }
 0x8c1   :  { %v6483_v50 = vadd.f32 %v6447_v15, %v6351_v59 }
 0x8c2   :  { %12165 = vmatmul.msk.bf16.gmra.mxu1 %vm1228_vm0, %v14296_v18 }
 0x8c3   :  { %v6732_v56 = vadd.f32 %v6696_v48, %v6483_v50  ;;  %12115 = vmatmul.msk.bf16.gmra.mxu2 %vm1228_vm0, %v7012_v38  ;;  %12139 = vmatmul.msk.bf16.gmra.mxu3 %vm1228_vm0, %v7154_v40  ;;  %v17949_v58 = vpop.f32.mrf.mxu0  ;;  %v14304_v38 = vld [vmem:[#allocation4 + $0xf0] sm:$0xff]   ;;  %v7015_v40 = vrot.slane %v17718_v9, 1  ;;  %v7157_v50 = vrot.slane %v17723_v5, 1  ;;  %v13587_v9 = vld [vmem:[#allocation2 + $0x38] sm:$0xff] }
 0x8c4   :  { %7730 = vmatpush.bf16.msra.mxu2 %v13587_v9  ;;  %v13597_v9 = vld [vmem:[#allocation2 + $0x80] sm:$0xff] }
 0x8c5   :  { %v17952_v0 = vadd.f32 %v17889_v29, %v6732_v56 }
 0x8c6   :  { %v6318_v21 = vpop.f32.mrf.mxu2  ;;  %v6450_v33 = vpop.f32.mrf.mxu3  ;;  %12189 = vmatmul.msk.bf16.gmra.mxu0 %vm1228_vm0, %v14303_v28  ;;  %v7016_v28 = vsel %vm2731_vm3, %v7013_v25, %v7015_v40 }
 0x8c7   :  { %v6352_v43 = vadd.f32 %v6318_v21, %v17748_v35  ;;  %v17960_v47 = vpop.f32.mrf.mxu1 }
 0x8c9   :  { %v6484_v48 = vadd.f32 %v6450_v33, %v6352_v43  ;;  %v7158_v43 = vsel %vm2731_vm3, %v7155_v57, %v7157_v50  ;;  %v14562_v57 = vld [vmem:[#allocation4 + $0xb8] sm:$0xff]  }
 0x8cb   :  { %v6733_v8 = vadd.f32 %v17900_v22, %v6484_v48  ;;  %v17962_v29 = vpop.f32.mrf.mxu0 }
 0x8cd   :  { %v17965_v4 = vadd.f32 %v17902_v45, %v6733_v8 }
 0x8ce   :  { %v6320_v2 = vpop.f32.mrf.mxu2  ;;  %v6452_v35 = vpop.f32.mrf.mxu3 }
 0x8cf   :  { %v6353_v36 = vadd.f32 %v6320_v2, %v17768_v39  ;;  %v17972_v54 = vpop.f32.mrf.mxu1 }
 0x8d1   :  { %v6485_v22 = vadd.f32 %v6452_v35, %v6353_v36 }
 0x8d2   :  { %12166 = vmatmul.msk.bf16.gmra.mxu1 %vm1228_vm0, %v14297_v53 }
 0x8d3   :  { %v6734_v46 = vadd.f32 %v6701_v1, %v6485_v22  ;;  %12116 = vmatmul.msk.bf16.gmra.mxu2 %vm1228_vm0, %v7014_v31  ;;  %12140 = vmatmul.msk.bf16.gmra.mxu3 %vm1228_vm0, %v7156_v42  ;;  %v17974_v15 = vpop.f32.mrf.mxu0  ;;  %v13598_v31 = vld [vmem:[#allocation2 + $0x428] sm:$0xff]  ;;  %v7017_v42 = vrot.slane %v17750_v17, 1  ;;  %v7159_v22 = vrot.slane %v17755_v19, 1  ;;  %v7410_v19 = vld [vmem:[#allocation4 + $0x104] sm:$0xf] }
 0x8d4   :  { %7979 = vmatpush.bf16.msrb.mxu3 %v13598_v31 }
 0x8d5   :  { %v17977_v45 = vadd.f32 %v17913_v24, %v6734_v46 }
 0x8d6   :  { %v6323_v59 = vpop.f32.mrf.mxu2  ;;  %v6455_v39 = vpop.f32.mrf.mxu3  ;;  %12190 = vmatmul.msk.bf16.gmra.mxu0 %vm1228_vm0, %v14304_v38  ;;  %v7018_v38 = vsel %vm2731_vm3, %v7015_v40, %v7017_v42 }
 0x8d7   :  { %v6354_v34 = vadd.f32 %v6323_v59, %v17780_v51  ;;  %v17985_v56 = vpop.f32.mrf.mxu1 }
 0x8d8   :  { %7980 = vmatpush.bf16.msrb.mxu3 %v13597_v9 }
 0x8d9   :  { %v6486_v1 = vadd.f32 %v6455_v39, %v6354_v34  ;;  %v7278_v34 = vld [vmem:[#allocation4 + $0xc4] sm:$0xf] }
 0x8db   :  { %v6735_v6 = vadd.f32 %v17924_v60, %v6486_v1  ;;  %v17987_v24 = vpop.f32.mrf.mxu0  ;;  %v7288_v1 = vunpack.c.l.b16 %v7278_v34 }
 0x8dd   :  { %v17990_v18 = vadd.f32 %v17926_v14, %v6735_v6 }
 0x8de   :  { %v6325_v21 = vpop.f32.mrf.mxu2  ;;  %v6457_v51 = vpop.f32.mrf.mxu3 }
 0x8df   :  { %v6355_v33 = vadd.f32 %v6325_v21, %v17800_v10  ;;  %v17997_v5 = vpop.f32.mrf.mxu1  ;;  %v13606_v21 = vld [vmem:[#allocation2 + $0x188] sm:$0xff] }
 0x8e0   :  { %8263 = vmatpush.bf16.msrb.mxu0 %v13606_v21  ;;  %v14320_v21 = vld [vmem:[#allocation4 + $0xc8] sm:$0xe] }
 0x8e1   :  { %v6487_v60 = vadd.f32 %v6457_v51, %v6355_v33  ;;  %v7296_v51 = vpack.c.b16 %v7288_v1, %v5507_v55  ;;  %v13601_v55 = vld [vmem:[#allocation2 + $0x40] sm:$0xff]  ;;  %v18050_v1 = vld [vmem:[#allocation4 + $0x90] sm:$0xff] }
 0x8e2   :  { %12167 = vmatmul.msk.bf16.gmra.mxu1 %vm1228_vm0, %v14562_v57  ;;  %v7019_v57 = vrot.slane %v17782_v16, 1 }
 0x8e3   :  { %v6736_v48 = vadd.f32 %v6706_v3, %v6487_v60  ;;  %12117 = vmatmul.msk.bf16.gmra.mxu2 %vm1228_vm0, %v7016_v28  ;;  %12141 = vmatmul.msk.bf16.gmra.mxu3 %vm1228_vm0, %v7158_v43  ;;  %v17999_v8 = vpop.f32.mrf.mxu0  ;;  %v14563_v3 = vld [vmem:[#allocation4 + $0xf8] sm:$0xff]  }
 0x8e5   :  { %v18002_v14 = vadd.f32 %v17937_v27, %v6736_v48  ;;  %v13586_v48 = vld [vmem:[#allocation2 + $0x1e0] sm:$0xff] }
 0x8e6   :  { %v6328_v10 = vpop.f32.mrf.mxu2  ;;  %v6460_v2 = vpop.f32.mrf.mxu3  ;;  %12191 = vmatmul.msk.bf16.gmra.mxu0 %vm1228_vm0, %v14563_v3  ;;  %7731 = vmatpush.bf16.msra.mxu2 %v13586_v48  ;;  %v7161_v3 = vrot.slane %v17787_v13, 1  ;;  %v14316_v13 = vld [vmem:[#allocation4 + $0x88] sm:$0xf0] }
 0x8e7   :  { %v6356_v25 = vadd.f32 %v6328_v10, %v17812_v62  ;;  %v18010_v27 = vpop.f32.mrf.mxu1 }
 0x8e8   :  { %v7162_v34 = vsel %vm2731_vm3, %v7159_v22, %v7161_v3 }
 0x8e9   :  { %v6488_v35 = vadd.f32 %v6460_v2, %v6356_v25  ;;  %v13596_v2 = vld [vmem:[#allocation2 + $0x430] sm:$0xff]  ;;  %v13605_v25 = vld [vmem:[#allocation2 + $0x58] sm:$0xff] }
 0x8ea   :  { %8264 = vmatpush.bf16.msrb.mxu0 %v13605_v25  ;;  %7981 = vmatpush.bf16.msrb.mxu3 %v13596_v2 }
 0x8eb   :  { %v6737_v36 = vadd.f32 %v17947_v61, %v6488_v35  ;;  %v18012_v46 = vpop.f32.mrf.mxu0  ;;  %v7160_v61 = vsel %vm2731_vm3, %v7157_v50, %v7159_v22  ;;  %v18685_v50 = vunpack.c.l.b16 %v17497_v37  ;;  %v13585_v37 = vld [vmem:[#allocation2 + $0x90] sm:$0xff] }
 0x8ec   :  { %7732 = vmatpush.bf16.msra.mxu2 %v13585_v37 }
 0x8ed   :  { %v18015_v62 = vadd.f32 %v17949_v58, %v6737_v36  ;;  %v13602_v58 = vld [vmem:[#allocation2 + $0x150] sm:$0xff] }
 0x8ee   :  { %v6330_v53 = vpop.f32.mrf.mxu2  ;;  %v6462_v59 = vpop.f32.mrf.mxu3  ;;  %8121 = vmatpush.bf16.msrb.mxu1 %v13602_v58  ;;  %v14319_v58 = vld [vmem:[#allocation4 + $0xc8] sm:$0xf0] }
 0x8ef   :  { %v6357_v39 = vadd.f32 %v6330_v53, %v17832_v23  ;;  %v7420_v23 = vunpack.c.l.b16 %v7410_v19  ;;  %v18025_v33 = vpop.f32.mrf.mxu1 }
 0x8f1   :  { %v6489_v17 = vadd.f32 %v6462_v59, %v6357_v39  ;;  %v7428_v28 = vpack.c.b16 %v7420_v23, %v18685_v50  ;;  %v13584_v39 = vld [vmem:[#allocation2 + $0x168] sm:$0xff]  ;;  %v8053_v23 = vrot.slane %v18050_v1, 1 }
 0x8f2   :  { %12168 = vmatmul.msk.bf16.gmra.mxu1 %vm1228_vm0, %v7296_v51  ;;  %7733 = vmatpush.bf16.msra.mxu2 %v13584_v39  ;;  %v18052_v51 = vld [vmem:[#allocation4 + $0xd0] sm:$0xff] }
 0x8f3   :  { %v6738_v6 = vadd.f32 %v17960_v47, %v6489_v17  ;;  %12118 = vmatmul.msk.bf16.gmra.mxu2 %vm1228_vm0, %v7018_v38  ;;  %12142 = vmatmul.msk.bf16.gmra.mxu3 %vm1228_vm0, %v7160_v61  ;;  %v18027_v40 = vpop.f32.mrf.mxu0  ;;  %v13604_v38 = vld [vmem:[#allocation2 + $0x98] sm:$0xff]  ;;  %v7020_v61 = vsel %vm2731_vm3, %v7017_v42, %v7019_v57  ;;  %v14321_v42 = vor.u32 %v14320_v21, %v14319_v58 }
 0x8f4   :  { %8122 = vmatpush.bf16.msrb.mxu1 %v13601_v55  ;;  %8265 = vmatpush.bf16.msrb.mxu0 %v13604_v38  ;;  %v13599_v17 = vld [vmem:[#allocation2 + $0x238] sm:$0xff] }
 0x8f5   :  { %v18032_v47 = vadd.f32 %v17962_v29, %v6738_v6 }
 0x8f6   :  { %v6333_v43 = vpop.f32.mrf.mxu2  ;;  %v6465_v60 = vpop.f32.mrf.mxu3  ;;  %12192 = vmatmul.msk.bf16.gmra.mxu0 %vm1228_vm0, %v7428_v28 }
 0x8f7   :  { %v6358_v20 = vadd.f32 %v6333_v43, %v17844_v49  ;;  %v18040_v35 = vpop.f32.mrf.mxu1  ;;  %v13600_v49 = vld [vmem:[#allocation2 + $0x2b8] sm:$0xff]  ;;  %v8194_v43 = vrot.slane %v14321_v42, 1 }
 0x8f8   :  { %8123 = vmatpush.bf16.msrb.mxu1 %v13600_v49  ;;  %v7163_v49 = vrot.slane %v17819_v52, 1  ;;  %v14315_v52 = vld [vmem:[#allocation4 + $0xc8] sm:$0xff]  }
 0x8f9   :  { %v6490_v10 = vadd.f32 %v6465_v60, %v6358_v20  ;;  %v8195_v60 = vrot.slane %v18052_v51, 1 }
 0x8fb   :  { %v6739_v29 = vadd.f32 %v17972_v54, %v6490_v10  ;;  %v18042_v36 = vpop.f32.mrf.mxu0  ;;  %v13595_v54 = vld [vmem:[#allocation2 + $0x388] sm:$0xff]  ;;  %v8196_v10 = vsel %vm2731_vm3, %v8194_v43, %v8195_v60 }
 0x8fc   :  { %7982 = vmatpush.bf16.msrb.mxu3 %v13595_v54  ;;  %8124 = vmatpush.bf16.msrb.mxu1 %v13599_v17  ;;  %v7862_v17 = vshll.u32 %v14315_v52, 16 }
 0x8fd   :  { %v18045_v31 = vadd.f32 %v17974_v15, %v6739_v29  ;;  %v14317_v15 = vld [vmem:[#allocation4 + $0x88] sm:$0xe]  ;;  %v7021_v29 = vrot.slane %v17814_v41, 1 }
 0x8fe   :  { %v6335_v53 = vpop.f32.mrf.mxu2  ;;  %v6467_v59 = vpop.f32.mrf.mxu3  ;;  %v14318_v6 = vor.u32 %v14317_v15, %v14316_v13  ;;  %v18084_v13 = vld [vmem:[#allocation4 + $0x98] sm:$0xff]  ;;  %v7864_v43 = vrot.slane %v7862_v17, 1 }
 0x8ff   :  { %v6359_v16 = vadd.f32 %v6335_v53, %v17855_v7  ;;  %v13603_v7 = vld [vmem:[#allocation2 + $0x3a8] sm:$0xff]  ;;  %v18058_v28 = vpop.f32.mrf.mxu1  ;;  %v7022_v38 = vsel %vm2731_vm3, %v7019_v57, %v7021_v29 }
 0x900   :  { %v8052_v50 = vrot.slane %v14318_v6, 1  ;;  %8266 = vmatpush.bf16.msrb.mxu0 %v13603_v7 }
 0x901   :  { %v6491_v19 = vadd.f32 %v6467_v59, %v6359_v16  ;;  %v7164_v16 = vsel %vm2731_vm3, %v7161_v3, %v7163_v49 }
 0x902   :  { %v8054_v9 = vsel %vm2731_vm3, %v8052_v50, %v8053_v23  ;;  %v7618_v50 = vshll.u32 %v18050_v1, 16 }
 0x903   :  { %v6740_v22 = vadd.f32 %v17985_v56, %v6491_v19  ;;  %12119 = vmatmul.msk.bf16.gmra.mxu2 %vm1228_vm0, %v7020_v61  ;;  %12143 = vmatmul.msk.bf16.gmra.mxu3 %vm1228_vm0, %v7162_v34  ;;  %v18061_v48 = vpop.f32.mrf.mxu0  ;;  %v18086_v61 = vld [vmem:[#allocation4 + $0xd8] sm:$0xff]  ;;  %v8055_v34 = vrot.slane %v18084_v13, 1 }
 0x904   :  { %12313 = vmatmul.msk.bf16.vlgmr.msrb.gmra.mxu1 %vm1228_vm0, %v8054_v9  ;;  %v8197_v15 = vrot.slane %v18086_v61, 1  ;;  %v7867_v9 = vshll.u32 %v18052_v51, 16 }
 0x905   :  { %v18065_v20 = vadd.f32 %v17987_v24, %v6740_v22  ;;  %v8056_v3 = vsel %vm2731_vm3, %v8053_v23, %v8055_v34  ;;  %v7860_v23 = vshrl.u32 %v14315_v52, 16 }
 0x906   :  { %v6338_v55 = vpop.f32.mrf.mxu2  ;;  %v6470_v56 = vpop.f32.mrf.mxu3  ;;  %12337 = vmatmul.msk.bf16.vlgmr.msrb.gmra.mxu0 %vm1228_vm0, %v8196_v10  ;;  %v7620_v10 = vrot.slane %v7618_v50, 1 }
 0x907   :  { %v6360_v37 = vadd.f32 %v6338_v55, %v17866_v32  ;;  %v18074_v53 = vpop.f32.mrf.mxu1 }
 0x909   :  { %v6492_v2 = vadd.f32 %v6470_v56, %v6360_v37  ;;  %v7869_v37 = vrot.slane %v7867_v9, 1 }
 0x90b   :  { %v6741_v25 = vadd.f32 %v17997_v5, %v6492_v2  ;;  %v18076_v24 = vpop.f32.mrf.mxu0  ;;  %v14314_v5 = vld [vmem:[#allocation4 + $0x88] sm:$0xff]  }
 0x90c   :  { %v7611_v42 = vshrl.u32 %v14314_v5, 16 }
 0x90d   :  { %v18079_v59 = vadd.f32 %v17999_v8, %v6741_v25 }
 0x90e   :  { %v6340_v39 = vpop.f32.mrf.mxu2  ;;  %v6472_v32 = vpop.f32.mrf.mxu3 }
 0x90f   :  { %v6361_v54 = vadd.f32 %v6340_v39, %v17881_v11  ;;  %v7613_v11 = vshll.u32 %v14314_v5, 16  ;;  %v18092_v57 = vpop.f32.mrf.mxu1 }
 0x911   :  { %v6493_v41 = vadd.f32 %v6472_v32, %v6361_v54  ;;  %v7615_v22 = vrot.slane %v7613_v11, 1 }
 0x913   :  { %v6742_v8 = vadd.f32 %v18010_v27, %v6493_v41  ;;  %12120 = vmatmul.msk.bf16.gmra.mxu2 %vm1228_vm0, %v7022_v38  ;;  %12144 = vmatmul.msk.bf16.gmra.mxu3 %vm1228_vm0, %v7164_v16  ;;  %v18096_v19 = vpop.f32.mrf.mxu0  ;;  %v8198_v27 = vsel %vm2731_vm3, %v8195_v60, %v8197_v15  ;;  %v7616_v56 = vor.u32 %v7615_v22, %v7611_v42  ;;  %v18120_v16 = vld [vmem:[#allocation4 + $0xe0] sm:$0xff] }
 0x914   :  { %12314 = vmatmul.msk.bf16.gmra.mxu1 %vm1228_vm0, %v8056_v3  ;;  %v7865_v60 = vor.u32 %v7864_v43, %v7860_v23  ;;  %v8199_v52 = vrot.slane %v18120_v16, 1 }
 0x915   :  { %v18099_v6 = vadd.f32 %v18012_v46, %v6742_v8  ;;  %v7621_v32 = vsel %vm2288_vm2, %v7616_v56, %v7620_v10 }
 0x916   :  { %v6343_v58 = vpop.f32.mrf.mxu2  ;;  %v6475_v21 = vpop.f32.mrf.mxu3  ;;  %12338 = vmatmul.msk.bf16.gmra.mxu0 %vm1228_vm0, %v8198_v27  ;;  %v7870_v54 = vsel %vm2288_vm2, %v7865_v60, %v7869_v37  ;;  %v7626_v27 = vshll.u32 %v18084_v13, 16  ;;  %v18156_v60 = vld [vmem:[#allocation4 + $0xe8] sm:$0xff] }
 0x917   :  { %v6362_v7 = vadd.f32 %v6343_v58, %v17892_v12  ;;  %v18108_v12 = vpop.f32.mrf.mxu1  ;;  %v8200_v58 = vsel %vm2731_vm3, %v8197_v15, %v8199_v52 }
 0x918   :  { %v7628_v50 = vrot.slane %v7626_v27, 1 }
 0x919   :  { %v6494_v46 = vadd.f32 %v6475_v21, %v6362_v7  ;;  %v7622_v21 = vshrl.u32 %v18050_v1, 16  ;;  %v7875_v7 = vshll.u32 %v18086_v61, 16 }
 0x91b   :  { %v6743_v55 = vadd.f32 %v18025_v33, %v6494_v46  ;;  %v18110_v2 = vpop.f32.mrf.mxu0  ;;  %v18118_v33 = vld [vmem:[#allocation4 + $0xa0] sm:$0xff]  ;;  %v7624_v22 = vor.u32 %v7622_v21, %v7620_v10  ;;  %v7877_v23 = vrot.slane %v7875_v7, 1 }
 0x91c   :  { %v8057_v5 = vrot.slane %v18118_v33, 1 }
 0x91d   :  { %v18113_v25 = vadd.f32 %v18027_v40, %v6743_v55  ;;  %v7629_v55 = vsel %vm2288_vm2, %v7624_v22, %v7628_v50 }
 0x91e   :  { %v6345_v29 = vpop.f32.mrf.mxu2  ;;  %v6477_v49 = vpop.f32.mrf.mxu3 }
 0x91f   :  { %v6363_v39 = vadd.f32 %v6345_v29, %v17905_v44  ;;  %v18126_v40 = vpop.f32.mrf.mxu1  ;;  %v8058_v44 = vsel %vm2731_vm3, %v8055_v34, %v8057_v5  ;;  %v7871_v34 = vshrl.u32 %v18052_v51, 16 }
 0x921   :  { %v6495_v38 = vadd.f32 %v6477_v49, %v6363_v39  ;;  %v7873_v15 = vor.u32 %v7871_v34, %v7869_v37  ;;  %v8201_v49 = vrot.slane %v18156_v60, 1 }
 0x923   :  { %v6744_v41 = vadd.f32 %v18040_v35, %v6495_v38  ;;  %12237 = vmatmul.msk.bf16.vlgmr.msra.gmra.mxu2 %vm1228_vm0, %v7621_v32  ;;  %12289 = vmatmul.msk.bf16.vlgmr.msrb.gmra.mxu3 %vm1228_vm0, %v7870_v54  ;;  %v18130_v8 = vpop.f32.mrf.mxu0  ;;  %v7878_v56 = vsel %vm2288_vm2, %v7873_v15, %v7877_v23  ;;  %v18192_v15 = vld [vmem:[#allocation4 + $0xf0] sm:$0xff] }
 0x924   :  { %12315 = vmatmul.msk.bf16.gmra.mxu1 %vm1228_vm0, %v8058_v44  ;;  %v7630_v44 = vshrl.u32 %v18084_v13, 16 }
 0x925   :  { %v18133_v11 = vadd.f32 %v18042_v36, %v6744_v41  ;;  %v8202_v41 = vsel %vm2731_vm3, %v8199_v52, %v8201_v49 }
 0x926   :  { %v7080_v17 = vpop.f32.mrf.mxu2  ;;  %v7222_v3 = vpop.f32.mrf.mxu3  ;;  %12339 = vmatmul.msk.bf16.gmra.mxu0 %vm1228_vm0, %v8200_v58 }
 0x927   :  { %v7120_v35 = vadd.f32 %v7080_v17, %v17916_v26  ;;  %v18144_v26 = vpop.f32.mrf.mxu1  ;;  %v7634_v17 = vshll.u32 %v18118_v33, 16 }
 0x929   :  { %v7262_v36 = vadd.f32 %v7222_v3, %v7120_v35  ;;  %v7883_v3 = vshll.u32 %v18120_v16, 16  ;;  %v7632_v35 = vor.u32 %v7630_v44, %v7628_v50  ;;  %v7636_v21 = vrot.slane %v7634_v17, 1 }
 0x92b   :  { %v7394_v42 = vadd.f32 %v18058_v28, %v7262_v36  ;;  %v18146_v43 = vpop.f32.mrf.mxu0  ;;  %v18154_v28 = vld [vmem:[#allocation4 + $0xa8] sm:$0xff]  ;;  %v7885_v27 = vrot.slane %v7883_v3, 1 }
 0x92c   :  { %v8059_v37 = vrot.slane %v18154_v28, 1 }
 0x92d   :  { %v18149_v1 = vadd.f32 %v18061_v48, %v7394_v42  ;;  %v7637_v42 = vsel %vm2288_vm2, %v7632_v35, %v7636_v21 }
 0x92e   :  { %v7082_v9 = vpop.f32.mrf.mxu2  ;;  %v7224_v51 = vpop.f32.mrf.mxu3 }
 0x92f   :  { %v7121_v46 = vadd.f32 %v7082_v9, %v17929_v63  ;;  %v18162_v48 = vpop.f32.mrf.mxu1  ;;  %v8060_v63 = vsel %vm2731_vm3, %v8057_v5, %v8059_v37  ;;  %v7879_v5 = vshrl.u32 %v18086_v61, 16 }
 0x931   :  { %v7263_v10 = vadd.f32 %v7224_v51, %v7121_v46  ;;  %v7881_v52 = vor.u32 %v7879_v5, %v7877_v23  ;;  %v8203_v51 = vrot.slane %v18192_v15, 1 }
 0x933   :  { %v7395_v29 = vadd.f32 %v18074_v53, %v7263_v10  ;;  %12238 = vmatmul.msk.bf16.gmra.mxu2 %vm1228_vm0, %v7629_v55  ;;  %12290 = vmatmul.msk.bf16.gmra.mxu3 %vm1228_vm0, %v7878_v56  ;;  %v18166_v39 = vpop.f32.mrf.mxu0  ;;  %v7886_v22 = vsel %vm2288_vm2, %v7881_v52, %v7885_v27  ;;  %v18228_v52 = vld [vmem:[#allocation4 + $0xf8] sm:$0xff] }
 0x934   :  { %12316 = vmatmul.msk.bf16.gmra.mxu1 %vm1228_vm0, %v8060_v63  ;;  %v7638_v63 = vshrl.u32 %v18118_v33, 16 }
 0x935   :  { %v18169_v32 = vadd.f32 %v18076_v24, %v7395_v29  ;;  %v8204_v29 = vsel %vm2731_vm3, %v8201_v49, %v8203_v51 }
 0x936   :  { %v7085_v54 = vpop.f32.mrf.mxu2  ;;  %v7227_v38 = vpop.f32.mrf.mxu3  ;;  %12340 = vmatmul.msk.bf16.gmra.mxu0 %vm1228_vm0, %v8202_v41 }
 0x937   :  { %v7122_v53 = vadd.f32 %v7085_v54, %v17940_v30  ;;  %v18180_v30 = vpop.f32.mrf.mxu1  ;;  %v7642_v54 = vshll.u32 %v18154_v28, 16 }
 0x939   :  { %v7264_v24 = vadd.f32 %v7227_v38, %v7122_v53  ;;  %v7891_v38 = vshll.u32 %v18156_v60, 16  ;;  %v7640_v53 = vor.u32 %v7638_v63, %v7636_v21  ;;  %v7644_v44 = vrot.slane %v7642_v54, 1 }
 0x93b   :  { %v7396_v58 = vadd.f32 %v18092_v57, %v7264_v24  ;;  %v18182_v34 = vpop.f32.mrf.mxu0  ;;  %v18190_v57 = vld [vmem:[#allocation4 + $0xb0] sm:$0xff]  ;;  %v7893_v17 = vrot.slane %v7891_v38, 1 }
 0x93c   :  { %v8061_v23 = vrot.slane %v18190_v57, 1 }
 0x93d   :  { %v18185_v13 = vadd.f32 %v18096_v19, %v7396_v58  ;;  %v7645_v58 = vsel %vm2288_vm2, %v7640_v53, %v7644_v44 }
 0x93e   :  { %v7087_v7 = vpop.f32.mrf.mxu2  ;;  %v7229_v61 = vpop.f32.mrf.mxu3 }
 0x93f   :  { %v7123_v36 = vadd.f32 %v7087_v7, %v17952_v0  ;;  %v18198_v19 = vpop.f32.mrf.mxu1  ;;  %v8062_v0 = vsel %vm2731_vm3, %v8059_v37, %v8061_v23  ;;  %v7887_v37 = vshrl.u32 %v18120_v16, 16 }
 0x941   :  { %v7265_v50 = vadd.f32 %v7229_v61, %v7123_v36  ;;  %v7889_v49 = vor.u32 %v7887_v37, %v7885_v27  ;;  %v8205_v61 = vrot.slane %v18228_v52, 1 }
 0x943   :  { %v7397_v9 = vadd.f32 %v18108_v12, %v7265_v50  ;;  %12239 = vmatmul.msk.bf16.gmra.mxu2 %vm1228_vm0, %v7637_v42  ;;  %12291 = vmatmul.msk.bf16.gmra.mxu3 %vm1228_vm0, %v7886_v22  ;;  %v18202_v46 = vpop.f32.mrf.mxu0  ;;  %v7894_v35 = vsel %vm2288_vm2, %v7889_v49, %v7893_v17  ;;  %v18264_v49 = vld [vmem:[#allocation4 + $0x100] sm:$0xff] }
 0x944   :  { %12317 = vmatmul.msk.bf16.gmra.mxu1 %vm1228_vm0, %v8062_v0  ;;  %v7646_v0 = vshrl.u32 %v18154_v28, 16 }
 0x945   :  { %v18205_v55 = vadd.f32 %v18110_v2, %v7397_v9  ;;  %v8206_v9 = vsel %vm2731_vm3, %v8203_v51, %v8205_v61 }
 0x946   :  { %v7090_v56 = vpop.f32.mrf.mxu2  ;;  %v7232_v10 = vpop.f32.mrf.mxu3  ;;  %12341 = vmatmul.msk.bf16.gmra.mxu0 %vm1228_vm0, %v8204_v29 }
 0x947   :  { %v7124_v12 = vadd.f32 %v7090_v56, %v17965_v4  ;;  %v18216_v4 = vpop.f32.mrf.mxu1  ;;  %v7650_v56 = vshll.u32 %v18190_v57, 16 }
 0x949   :  { %v7266_v2 = vadd.f32 %v7232_v10, %v7124_v12  ;;  %v7899_v10 = vshll.u32 %v18192_v15, 16  ;;  %v7648_v12 = vor.u32 %v7646_v0, %v7644_v44  ;;  %v7652_v63 = vrot.slane %v7650_v56, 1 }
 0x94b   :  { %v7398_v41 = vadd.f32 %v18126_v40, %v7266_v2  ;;  %v18218_v5 = vpop.f32.mrf.mxu0  ;;  %v18226_v40 = vld [vmem:[#allocation4 + $0xb8] sm:$0xff]  ;;  %v7901_v54 = vrot.slane %v7899_v10, 1 }
 0x94c   :  { %v8063_v27 = vrot.slane %v18226_v40, 1 }
 0x94d   :  { %v18221_v33 = vadd.f32 %v18130_v8, %v7398_v41  ;;  %v7653_v41 = vsel %vm2288_vm2, %v7648_v12, %v7652_v63 }
 0x94e   :  { %v7092_v3 = vpop.f32.mrf.mxu2  ;;  %v7234_v16 = vpop.f32.mrf.mxu3 }
 0x94f   :  { %v7125_v24 = vadd.f32 %v7092_v3, %v17977_v45  ;;  %v18234_v8 = vpop.f32.mrf.mxu1  ;;  %v8064_v45 = vsel %vm2731_vm3, %v8061_v23, %v8063_v27  ;;  %v7895_v23 = vshrl.u32 %v18156_v60, 16 }
 0x951   :  { %v7267_v21 = vadd.f32 %v7234_v16, %v7125_v24  ;;  %v7897_v51 = vor.u32 %v7895_v23, %v7893_v17  ;;  %v8207_v16 = vrot.slane %v18264_v49, 1 }
 0x953   :  { %v7399_v7 = vadd.f32 %v18144_v26, %v7267_v21  ;;  %12240 = vmatmul.msk.bf16.gmra.mxu2 %vm1228_vm0, %v7645_v58  ;;  %12292 = vmatmul.msk.bf16.gmra.mxu3 %vm1228_vm0, %v7894_v35  ;;  %v18238_v36 = vpop.f32.mrf.mxu0  ;;  %v7902_v53 = vsel %vm2288_vm2, %v7897_v51, %v7901_v54 }
 0x954   :  { %12318 = vmatmul.msk.bf16.gmra.mxu1 %vm1228_vm0, %v8064_v45  ;;  %v7654_v45 = vshrl.u32 %v18190_v57, 16 }
 0x955   :  { %v18241_v42 = vadd.f32 %v18146_v43, %v7399_v7  ;;  %v8208_v7 = vsel %vm2731_vm3, %v8205_v61, %v8207_v16  ;;  %v7807_v61 = vld [vmem:[#allocation4 + $0x108] sm:$0x1] }
 0x956   :  { %v7095_v22 = vpop.f32.mrf.mxu2  ;;  %v7237_v50 = vpop.f32.mrf.mxu3  ;;  %12342 = vmatmul.msk.bf16.gmra.mxu0 %vm1228_vm0, %v8206_v9  ;;  %v7558_v9 = vld [vmem:[#allocation4 + $0xc8] sm:$0x1]  ;;  %v7656_v0 = vor.u32 %v7654_v45, %v7652_v63  ;;  %v7849_v12 = vunpack.c.l.b16 %v7807_v61  ;;  %v7911_v45 = vshrl.u32 %v18228_v52, 16 }
 0x957   :  { %v7126_v26 = vadd.f32 %v7095_v22, %v17990_v18  ;;  %v18252_v18 = vpop.f32.mrf.mxu1  ;;  %v7658_v22 = vshll.u32 %v18226_v40, 16  ;;  %v7600_v57 = vunpack.c.l.b16 %v7558_v9 }
 0x959   :  { %v7268_v43 = vadd.f32 %v7237_v50, %v7126_v26  ;;  %v7907_v50 = vshll.u32 %v18228_v52, 16  ;;  %v7660_v56 = vrot.slane %v7658_v22, 1 }
 0x95b   :  { %v7400_v29 = vadd.f32 %v18162_v48, %v7268_v43  ;;  %v18254_v37 = vpop.f32.mrf.mxu0  ;;  %v18262_v48 = vld [vmem:[#allocation4 + $0xc0] sm:$0xff]  ;;  %v7909_v23 = vrot.slane %v7907_v50, 1 }
 0x95c   :  { %v8065_v17 = vrot.slane %v18262_v48, 1 }
 0x95d   :  { %v18257_v28 = vadd.f32 %v18166_v39, %v7400_v29 }
 0x95e   :  { %v7097_v38 = vpop.f32.mrf.mxu2  ;;  %v7239_v60 = vpop.f32.mrf.mxu3 }
 0x95f   :  { %v7127_v2 = vadd.f32 %v7097_v38, %v18002_v14  ;;  %v18270_v39 = vpop.f32.mrf.mxu1  ;;  %v8066_v14 = vsel %vm2731_vm3, %v8063_v27, %v8065_v17  ;;  %v7903_v27 = vshrl.u32 %v18192_v15, 16 }
 0x961   :  { %v7269_v44 = vadd.f32 %v7239_v60, %v7127_v2  ;;  %v7609_v60 = vpack.c.b16 %v7600_v57, %v7600_v57  ;;  %v7858_v2 = vpack.c.b16 %v7849_v12, %v7849_v12 }
 0x963   :  { %v7401_v3 = vadd.f32 %v18180_v30, %v7269_v44  ;;  %12241 = vmatmul.msk.bf16.gmra.mxu2 %vm1228_vm0, %v7653_v41  ;;  %12293 = vmatmul.msk.bf16.gmra.mxu3 %vm1228_vm0, %v7902_v53  ;;  %v18274_v24 = vpop.f32.mrf.mxu0  ;;  %v8067_v41 = vrot.slane %v7609_v60, 1  ;;  %v8209_v44 = vrot.slane %v7858_v2, 1  ;;  %v7674_v12 = vshll.u32 %v7609_v60, 16 }
 0x964   :  { %12319 = vmatmul.msk.bf16.gmra.mxu1 %vm1228_vm0, %v8066_v14 }
 0x965   :  { %v18277_v58 = vadd.f32 %v18182_v34, %v7401_v3 }
 0x966   :  { %v7100_v35 = vpop.f32.mrf.mxu2  ;;  %v7242_v21 = vpop.f32.mrf.mxu3  ;;  %12343 = vmatmul.msk.bf16.gmra.mxu0 %vm1228_vm0, %v8208_v7 }
 0x967   :  { %v7128_v30 = vadd.f32 %v7100_v35, %v18015_v62  ;;  %v7905_v62 = vor.u32 %v7903_v27, %v7901_v54  ;;  %v18288_v10 = vpop.f32.mrf.mxu1  ;;  %v8210_v35 = vsel %vm2731_vm3, %v8207_v16, %v8209_v44 }
 0x969   :  { %v7270_v34 = vadd.f32 %v7242_v21, %v7128_v30  ;;  %v7910_v63 = vsel %vm2288_vm2, %v7905_v62, %v7909_v23  ;;  %v7666_v30 = vshll.u32 %v18262_v48, 16 }
 0x96b   :  { %v7402_v26 = vadd.f32 %v18198_v19, %v7270_v34  ;;  %v18294_v38 = vpop.f32.mrf.mxu0  ;;  %v7661_v19 = vsel %vm2288_vm2, %v7656_v0, %v7660_v56  ;;  %v7668_v50 = vrot.slane %v7666_v30, 1 }
 0x96d   :  { %v18291_v43 = vadd.f32 %v18202_v46, %v7402_v26  ;;  %v8068_v46 = vsel %vm2731_vm3, %v8065_v17, %v8067_v41  ;;  %v7915_v17 = vshll.u32 %v18264_v49, 16 }
 0x96e   :  { %v7102_v15 = vpop.f32.mrf.mxu2  ;;  %v7244_v29 = vpop.f32.mrf.mxu3 }
 0x96f   :  { %v7129_v51 = vadd.f32 %v7102_v15, %v18032_v47  ;;  %v7389_v7 = vpop.f32.mrf.mxu1  ;;  %v7917_v34 = vrot.slane %v7915_v17, 1 }
 0x971   :  { %v7271_v54 = vadd.f32 %v7244_v29, %v7129_v51  ;;  %v7670_v29 = vshrl.u32 %v18262_v48, 16  ;;  %v7919_v51 = vshrl.u32 %v18264_v49, 16 }
 0x973   :  { %v7403_v53 = vadd.f32 %v18216_v4, %v7271_v54  ;;  %12242 = vmatmul.msk.bf16.gmra.mxu2 %vm1228_vm0, %v7661_v19  ;;  %12294 = vmatmul.msk.bf16.gmra.mxu3 %vm1228_vm0, %v7910_v63  ;;  %v7662_v4 = vshrl.u32 %v18226_v40, 16  ;;  %v7521_v22 = vpop.f32.mrf.mxu0  ;;  %v7923_v19 = vshll.u32 %v7858_v2, 16  ;;  %v7672_v41 = vor.u32 %v7670_v29, %v7668_v50 }
 0x974   :  { %12320 = vmatmul.msk.bf16.gmra.mxu1 %vm1228_vm0, %v8068_v46  ;;  %v7921_v46 = vor.u32 %v7919_v51, %v7917_v34 }
 0x975   :  { %v18303_v47 = vadd.f32 %v18218_v5, %v7403_v53  ;;  %v7664_v16 = vor.u32 %v7662_v4, %v7660_v56  ;;  %v7676_v53 = vrot.slane %v7674_v12, 1  ;;  %v7925_v44 = vrot.slane %v7923_v19, 1 }
 0x976   :  { %v7105_v3 = vpop.f32.mrf.mxu2  ;;  %v7247_v14 = vpop.f32.mrf.mxu3  ;;  %12344 = vmatmul.msk.bf16.gmra.mxu0 %vm1228_vm0, %v8210_v35 }
 0x977   :  { %v7130_v21 = vadd.f32 %v7105_v3, %v18045_v31  ;;  %v7913_v31 = vor.u32 %v7911_v45, %v7909_v23  ;;  %v7669_v52 = vsel %vm2288_vm2, %v7664_v16, %v7668_v50  ;;  %v7391_v57 = vpop.f32.mrf.mxu1  ;;  %v7677_v60 = vsel %vm2288_vm2, %v7672_v41, %v7676_v53 }
 0x978   :  { %v7926_v49 = vsel %vm2288_vm2, %v7921_v46, %v7925_v44 }
 0x979   :  { %v7272_v5 = vadd.f32 %v7247_v14, %v7130_v21  ;;  %v7918_v61 = vsel %vm2288_vm2, %v7913_v31, %v7917_v34 }
 0x97b   :  { %v7404_v27 = vadd.f32 %v18234_v8, %v7272_v5  ;;  %v7523_v8 = vpop.f32.mrf.mxu0 }
 0x97d   :  { %v18315_v9 = vadd.f32 %v18238_v36, %v7404_v27 }
 0x97e   :  { %v7107_v40 = vpop.f32.mrf.mxu2  ;;  %v7249_v26 = vpop.f32.mrf.mxu3 }
 0x97f   :  { %v7131_v0 = vadd.f32 %v7107_v40, %v18065_v20 }
 0x981   :  { %v7273_v62 = vadd.f32 %v7249_v26, %v7131_v0  ;;  %v8126_v54 = vpop.f32.mrf.mxu1 }
 0x983   :  { %v7405_v15 = vadd.f32 %v18252_v18, %v7273_v62  ;;  %12243 = vmatmul.msk.bf16.gmra.mxu2 %vm1228_vm0, %v7669_v52  ;;  %12295 = vmatmul.msk.bf16.gmra.mxu3 %vm1228_vm0, %v7918_v61 }
 0x985   :  { %v18324_v36 = vadd.f32 %v18254_v37, %v7405_v15  ;;  %v8268_v37 = vpop.f32.mrf.mxu0 }
 0x986   :  { %v7110_v56 = vpop.f32.mrf.mxu2  ;;  %v7252_v23 = vpop.f32.mrf.mxu3 }
 0x987   :  { %v7132_v20 = vadd.f32 %v7110_v56, %v18079_v59 }
 0x989   :  { %v7274_v63 = vadd.f32 %v7252_v23, %v7132_v20  ;;  %v8128_v35 = vpop.f32.mrf.mxu1 }
 0x98b   :  { %v7406_v18 = vadd.f32 %v18270_v39, %v7274_v63 }
 0x98d   :  { %v18331_v3 = vadd.f32 %v18274_v24, %v7406_v18 }
 0x98e   :  { %v7112_v14 = vpop.f32.mrf.mxu2  ;;  %v7254_v59 = vpop.f32.mrf.mxu3 }
 0x98f   :  { %v7133_v48 = vadd.f32 %v7112_v14, %v18099_v6  ;;  %v8270_v6 = vpop.f32.mrf.mxu0 }
 0x991   :  { %v7275_v2 = vadd.f32 %v7254_v59, %v7133_v48  ;;  %v8131_v50 = vpop.f32.mrf.mxu1 }
 0x993   :  { %v7407_v39 = vadd.f32 %v18288_v10, %v7275_v2  ;;  %12244 = vmatmul.msk.bf16.gmra.mxu2 %vm1228_vm0, %v7677_v60  ;;  %12296 = vmatmul.msk.bf16.gmra.mxu3 %vm1228_vm0, %v7926_v49 }
 0x995   :  { %v18340_v21 = vadd.f32 %v18294_v38, %v7407_v39 }
 0x996   :  { %v7115_v24 = vpop.f32.mrf.mxu2  ;;  %v7257_v4 = vpop.f32.mrf.mxu3 }
 0x997   :  { %v7134_v30 = vadd.f32 %v7115_v24, %v18113_v25  ;;  %v8273_v34 = vpop.f32.mrf.mxu0 }
 0x999   :  { %v7276_v45 = vadd.f32 %v7257_v4, %v7134_v30  ;;  %v8133_v61 = vpop.f32.mrf.mxu1 }
 0x99b   :  { %v7408_v17 = vadd.f32 %v7389_v7, %v7276_v45 }
 0x99d   :  { %v18343_v5 = vadd.f32 %v7521_v22, %v7408_v17 }
 0x99e   :  { %v7117_v27 = vpop.f32.mrf.mxu2  ;;  %v7259_v16 = vpop.f32.mrf.mxu3 }
 0x99f   :  { %v7135_v10 = vadd.f32 %v7117_v27, %v18133_v11  ;;  %v8275_v7 = vpop.f32.mrf.mxu0 }
 0x9a1   :  { %v7277_v31 = vadd.f32 %v7259_v16, %v7135_v10  ;;  %v8136_v20 = vpop.f32.mrf.mxu1 }
 0x9a3   :  { %v7409_v40 = vadd.f32 %v7391_v57, %v7277_v31  ;;  %v18353_v57 = vld [vmem:[%s18663_s4] ss:$0 sm:$0xff] }
 0x9a5   :  { %v18346_v26 = vadd.f32 %v7523_v8, %v7409_v40 }
 0x9a6   :  { %v7735_v38 = vpop.f32.mrf.mxu2  ;;  %v7984_v0 = vpop.f32.mrf.mxu3 }
 0x9a7   :  { %v7775_v52 = vadd.f32 %v7735_v38, %v18149_v1  ;;  %v8278_v12 = vpop.f32.mrf.mxu0 }
 0x9a9   :  { %v8024_v25 = vadd.f32 %v7984_v0, %v7775_v52 }
 0x9ab   :  { %v8166_v62 = vadd.f32 %v8126_v54, %v8024_v25 }
 0x9ad   :  { %v8308_v22 = vadd.f32 %v8268_v37, %v8166_v62  ;;  %v8138_v37 = vpop.f32.mrf.mxu1 }
 0x9ae   :  { %v7737_v15 = vpop.f32.mrf.mxu2  ;;  %v7986_v56 = vpop.f32.mrf.mxu3 }
 0x9af   :  { %v7776_v23 = vadd.f32 %v7737_v15, %v18169_v32  ;;  %v8328_v1 = vadd.f32 %v18353_v57, %v8308_v22  ;;  %v8280_v60 = vpop.f32.mrf.mxu0 }
 0x9b1   :  { %v8025_v11 = vadd.f32 %v7986_v56, %v7776_v23  ;;  %v8344_v32 = vmax.f32 %v8328_v1, 0.0 }
 0x9b3   :  { %v8167_v8 = vadd.f32 %v8128_v35, %v8025_v11 }
 0x9b5   :  { %v8309_v29 = vadd.f32 %v8270_v6, %v8167_v8  ;;  %v8141_v30 = vpop.f32.mrf.mxu1 }
 0x9b6   :  { %v7740_v51 = vpop.f32.mrf.mxu2  ;;  %v7989_v19 = vpop.f32.mrf.mxu3 }
 0x9b7   :  { %v7777_v63 = vadd.f32 %v7740_v51, %v18185_v13  ;;  %v8329_v18 = vadd.f32 %v18353_v57, %v8309_v29  ;;  %v8283_v17 = vpop.f32.mrf.mxu0 }
 0x9b9   :  { %v8026_v54 = vadd.f32 %v7989_v19, %v7777_v63  ;;  %v8345_v41 = vmax.f32 %v8329_v18, 0.0 }
 0x9bb   :  { %v8168_v53 = vadd.f32 %v8131_v50, %v8026_v54  ;;  %v18358_v46 = vpack.c.bf16 %v8345_v41, %v8344_v32 }
 0x9bd   :  { %v8310_v44 = vadd.f32 %v8273_v34, %v8168_v53  ;;  %v8143_v0 = vpop.f32.mrf.mxu1 }
 0x9be   :  { %v7742_v14 = vpop.f32.mrf.mxu2  ;;  %v7991_v59 = vpop.f32.mrf.mxu3 }
 0x9bf   :  { %v7778_v48 = vadd.f32 %v7742_v14, %v18205_v55  ;;  %v8330_v13 = vadd.f32 %v18353_v57, %v8310_v44  ;;  %v8285_v25 = vpop.f32.mrf.mxu0 }
 0x9c1   :  { %v8027_v49 = vadd.f32 %v7991_v59, %v7778_v48  ;;  %v8346_v27 = vmax.f32 %v8330_v13, 0.0 }
 0x9c3   :  { %v8169_v2 = vadd.f32 %v8133_v61, %v8027_v49 }
 0x9c5   :  { %v8311_v39 = vadd.f32 %v8275_v7, %v8169_v2 }
 0x9c6   :  { %v7745_v35 = vpop.f32.mrf.mxu2  ;;  %v7994_v24 = vpop.f32.mrf.mxu3 }
 0x9c7   :  { %v7779_v4 = vadd.f32 %v7745_v35, %v18221_v33  ;;  %v8331_v6 = vadd.f32 %v18353_v57, %v8311_v39 }
 0x9c9   :  { %v8028_v45 = vadd.f32 %v7994_v24, %v7779_v4  ;;  %v8347_v16 = vmax.f32 %v8331_v6, 0.0 }
 0x9cb   :  { %v8170_v10 = vadd.f32 %v8136_v20, %v8028_v45  ;;  %v18364_v50 = vpack.c.bf16 %v8347_v16, %v8346_v27  ;;  %v8146_v20 = vpop.f32.mrf.mxu1 }
 0x9cd   :  { %v8312_v55 = vadd.f32 %v8278_v12, %v8170_v10  ;;  %v8288_v12 = vpop.f32.mrf.mxu0 }
 0x9ce   :  { %v7747_v31 = vpop.f32.mrf.mxu2  ;;  %v7996_v34 = vpop.f32.mrf.mxu3 }
 0x9cf   :  { %v7780_v40 = vadd.f32 %v7747_v31, %v18241_v42  ;;  %v8332_v61 = vadd.f32 %v18353_v57, %v8312_v55 }
 0x9d1   :  { %v8029_v38 = vadd.f32 %v7996_v34, %v7780_v40  ;;  %v8348_v23 = vmax.f32 %v8332_v61, 0.0 }
 0x9d3   :  { %v8171_v52 = vadd.f32 %v8138_v37, %v8029_v38  ;;  %v8148_v32 = vpop.f32.mrf.mxu1 }
 0x9d5   :  { %v8313_v33 = vadd.f32 %v8280_v60, %v8171_v52  ;;  %v8290_v37 = vpop.f32.mrf.mxu0 }
 0x9d6   :  { %v7750_v62 = vpop.f32.mrf.mxu2  ;;  %v7999_v7 = vpop.f32.mrf.mxu3 }
 0x9d7   :  { %v7781_v22 = vadd.f32 %v7750_v62, %v18257_v28  ;;  %v8333_v15 = vadd.f32 %v18353_v57, %v8313_v33 }
 0x9d9   :  { %v8030_v56 = vadd.f32 %v7999_v7, %v7781_v22  ;;  %v8349_v11 = vmax.f32 %v8333_v15, 0.0 }
 0x9db   :  { %v8172_v8 = vadd.f32 %v8141_v30, %v8030_v56  ;;  %v18370_v29 = vpack.c.bf16 %v8349_v11, %v8348_v23  ;;  %v8151_v24 = vpop.f32.mrf.mxu1 }
 0x9dd   :  { %v8314_v42 = vadd.f32 %v8283_v17, %v8172_v8  ;;  %v8293_v30 = vpop.f32.mrf.mxu0 }
 0x9de   :  { %v7752_v1 = vpop.f32.mrf.mxu2  ;;  %v8001_v51 = vpop.f32.mrf.mxu3 }
 0x9df   :  { %v7782_v19 = vadd.f32 %v7752_v1, %v18277_v58  ;;  %v8334_v28 = vadd.f32 %v18353_v57, %v8314_v42 }
 0x9e1   :  { %v8031_v63 = vadd.f32 %v8001_v51, %v7782_v19  ;;  %v8350_v48 = vmax.f32 %v8334_v28, 0.0 }
 0x9e3   :  { %v8173_v18 = vadd.f32 %v8143_v0, %v8031_v63  ;;  %v8153_v31 = vpop.f32.mrf.mxu1 }
 0x9e5   :  { %v8315_v54 = vadd.f32 %v8285_v25, %v8173_v18  ;;  %v8295_v38 = vpop.f32.mrf.mxu0 }
 0x9e6   :  { %v7755_v41 = vpop.f32.mrf.mxu2  ;;  %v8004_v53 = vpop.f32.mrf.mxu3 }
 0x9e7   :  { %v7783_v44 = vadd.f32 %v7755_v41, %v18291_v43  ;;  %v8335_v14 = vadd.f32 %v18353_v57, %v8315_v54 }
 0x9e9   :  { %v8032_v59 = vadd.f32 %v8004_v53, %v7783_v44  ;;  %v8351_v60 = vmax.f32 %v8335_v14, 0.0 }
 0x9eb   :  { %v8174_v49 = vadd.f32 %v8146_v20, %v8032_v59  ;;  %v18376_v2 = vpack.c.bf16 %v8351_v60, %v8350_v48  ;;  %v8156_v22 = vpop.f32.mrf.mxu1 }
 0x9ed   :  { %v8316_v58 = vadd.f32 %v8288_v12, %v8174_v49  ;;  %v8298_v56 = vpop.f32.mrf.mxu0 }
 0x9ee   :  { %v7757_v39 = vpop.f32.mrf.mxu2  ;;  %v8006_v13 = vpop.f32.mrf.mxu3 }
 0x9ef   :  { %v7784_v35 = vadd.f32 %v7757_v39, %v18303_v47  ;;  %v8336_v43 = vadd.f32 %v18353_v57, %v8316_v58 }
 0x9f1   :  { %v8033_v4 = vadd.f32 %v8006_v13, %v7784_v35  ;;  %v8352_v34 = vmax.f32 %v8336_v43, 0.0 }
 0x9f3   :  { %v8175_v6 = vadd.f32 %v8148_v32, %v8033_v4 }
 0x9f5   :  { %v8317_v45 = vadd.f32 %v8290_v37, %v8175_v6  ;;  %v8300_v32 = vpop.f32.mrf.mxu0 }
 0x9f6   :  { %v7760_v17 = vpop.f32.mrf.mxu2  ;;  %v8009_v27 = vpop.f32.mrf.mxu3 }
 0x9f7   :  { %v7785_v16 = vadd.f32 %v7760_v17, %v18315_v9  ;;  %v8337_v10 = vadd.f32 %v18353_v57, %v8317_v45 }
 0x9f9   :  { %v8034_v55 = vadd.f32 %v8009_v27, %v7785_v16  ;;  %v8353_v40 = vmax.f32 %v8337_v10, 0.0 }
 0x9fb   :  { %v8364_v0 = vpack.c.bf16 %v8353_v40, %v8352_v34  ;;  %v8176_v47 = vadd.f32 %v8151_v24, %v8034_v55  ;;  %v13613_v40 = vld [vmem:[%s18664_s5 + $0x30] sm:$0xff] }
 0x9fd   :  { %v8318_v61 = vadd.f32 %v8293_v30, %v8176_v47  ;;  %v8303_v13 = vpop.f32.mrf.mxu0 }
 0x9fe   :  { %v7762_v52 = vpop.f32.mrf.mxu2  ;;  %v8011_v25 = vpop.f32.mrf.mxu3 }
 0x9ff   :  { %v7786_v33 = vadd.f32 %v7762_v52, %v18324_v36  ;;  %v8338_v9 = vadd.f32 %v18353_v57, %v8318_v61  ;;  %v8158_v36 = vpop.f32.mrf.mxu1 }
 0xa01   :  { %v8035_v62 = vadd.f32 %v8011_v25, %v7786_v33  ;;  %v8354_v12 = vmax.f32 %v8338_v9, 0.0  ;;  %v13616_v25 = vld [vmem:[%s18664_s5 + $0x48] sm:$0xff]  ;;  %v8392_v9 = vld [vmem:[%s18664_s5 + $0x60] sm:$0xf] }
 0xa03   :  { %v8177_v7 = vadd.f32 %v8153_v31, %v8035_v62  ;;  %v13617_v62 = vld [vmem:[%s18664_s5 + $0x50] sm:$0xff] }
 0xa05   :  { %v8319_v15 = vadd.f32 %v8295_v38, %v8177_v7  ;;  %v8305_v27 = vpop.f32.mrf.mxu0  ;;  %v13614_v38 = vld [vmem:[%s18664_s5 + $0x38] sm:$0xff] }
 0xa06   :  { %v7765_v23 = vpop.f32.mrf.mxu2  ;;  %v8014_v11 = vpop.f32.mrf.mxu3 }
 0xa07   :  { %v7787_v8 = vadd.f32 %v7765_v23, %v18331_v3  ;;  %v8339_v20 = vadd.f32 %v18353_v57, %v8319_v15  ;;  %v8161_v60 = vpop.f32.mrf.mxu1  ;;  %v13618_v15 = vld [vmem:[%s18664_s5 + $0x58] sm:$0xff]  ;;  %v8442_v23 = vunpack.c.l.b16 %v8392_v9 }
 0xa09   :  { %v8036_v42 = vadd.f32 %v8014_v11, %v7787_v8  ;;  %v8355_v1 = vmax.f32 %v8339_v20, 0.0  ;;  %v8455_v8 = vpack.c.b16 %v8442_v23, %v8442_v23 }
 0xa0b   :  { %v8365_v51 = vpack.c.bf16 %v8355_v1, %v8354_v12  ;;  %v8178_v19 = vadd.f32 %v8156_v22, %v8036_v42 }
 0xa0d   :  { %v8320_v28 = vadd.f32 %v8298_v56, %v8178_v19 }
 0xa0e   :  { %v7767_v63 = vpop.f32.mrf.mxu2  ;;  %v8016_v18 = vpop.f32.mrf.mxu3 }
 0xa0f   :  { %v7788_v54 = vadd.f32 %v7767_v63, %v18340_v21  ;;  %v8340_v37 = vadd.f32 %v18353_v57, %v8320_v28  ;;  %v8163_v43 = vpop.f32.mrf.mxu1 }
 0xa11   :  { %v8037_v41 = vadd.f32 %v8016_v18, %v7788_v54  ;;  %v8356_v58 = vmax.f32 %v8340_v37, 0.0 }
 0xa13   :  { %v8179_v53 = vadd.f32 %v8158_v36, %v8037_v41 }
 0xa15   :  { %v8321_v44 = vadd.f32 %v8300_v32, %v8179_v53 }
 0xa16   :  { %v7770_v3 = vpop.f32.mrf.mxu2  ;;  %v8019_v14 = vpop.f32.mrf.mxu3 }
 0xa17   :  { %v7789_v59 = vadd.f32 %v7770_v3, %v18343_v5  ;;  %v8341_v48 = vadd.f32 %v18353_v57, %v8321_v44 }
 0xa19   :  { %v8038_v49 = vadd.f32 %v8019_v14, %v7789_v59  ;;  %v8357_v39 = vmax.f32 %v8341_v48, 0.0 }
 0xa1b   :  { %v8366_v35 = vpack.c.bf16 %v8357_v39, %v8356_v58  ;;  %v8180_v21 = vadd.f32 %v8161_v60, %v8038_v49 }
 0xa1d   :  { %v8322_v6 = vadd.f32 %v8303_v13, %v8180_v21 }
 0xa1e   :  { %v7772_v24 = vpop.f32.mrf.mxu2  ;;  %v8021_v30 = vpop.f32.mrf.mxu3 }
 0xa1f   :  { %v7790_v4 = vadd.f32 %v7772_v24, %v18346_v26  ;;  %v8342_v5 = vadd.f32 %v18353_v57, %v8322_v6  ;;  %v13607_v26 = vld [vmem:[%s18664_s5] sm:$0xff] }
 0xa21   :  { %v8039_v45 = vadd.f32 %v8021_v30, %v7790_v4  ;;  %v8358_v55 = vmax.f32 %v8342_v5, 0.0 }
 0xa23   :  { %v8181_v17 = vadd.f32 %v8163_v43, %v8039_v45 }
 0xa25   :  { %v8323_v16 = vadd.f32 %v8305_v27, %v8181_v17 }
 0xa27   :  { %v8343_v10 = vadd.f32 %v18353_v57, %v8323_v16  ;;  %v13608_v57 = vld [vmem:[%s18664_s5 + $0x8] sm:$0xff] }
 0xa29   :  { %v8359_v31 = vmax.f32 %v8343_v10, 0.0 }
 0xa2b   :  { %v8367_v34 = vpack.c.bf16 %v8359_v31, %v8358_v55 }
 0xa2d   :  { %8469 = vmatpush.bf16.msrb.mxu2 %v8367_v34 }
 0xa31   :  { %8470 = vmatpush.bf16.msrb.mxu2 %v8366_v35 }
 0xa35   :  { %8471 = vmatpush.bf16.msrb.mxu2 %v8365_v51 }
 0xa39   :  { %8472 = vmatpush.bf16.msrb.mxu2 %v8364_v0  ;;  %v13615_v0 = vld [vmem:[%s18664_s5 + $0x40] sm:$0xff] }
 0xa3d   :  { %8473 = vmatpush.bf16.msrb.mxu2 %v18376_v2  ;;  %v13609_v2 = vld [vmem:[%s18664_s5 + $0x10] sm:$0xff] }
 0xa41   :  { %8474 = vmatpush.bf16.msrb.mxu2 %v18370_v29  ;;  %v13612_v29 = vld [vmem:[%s18664_s5 + $0x28] sm:$0xff] }
 0xa45   :  { %8475 = vmatpush.bf16.msrb.mxu2 %v18364_v50  ;;  %v13610_v50 = vld [vmem:[%s18664_s5 + $0x18] sm:$0xff] }
 0xa49   :  { %8476 = vmatpush.bf16.msrb.mxu2 %v18358_v46  ;;  %v13611_v46 = vld [vmem:[%s18664_s5 + $0x20] sm:$0xff] }
 0xa4c   :  { %8477 = vmatmul.bf16.vlgmr.msrb.gmra.mxu2 %v13607_v26 }
 0xa5c   :  { %8482 = vmatmul.bf16.gmra.mxu2 %v13608_v57 }
 0xa6c   :  { %8487 = vmatmul.bf16.gmra.mxu2 %v13609_v2 }
 0xa7c   :  { %8492 = vmatmul.bf16.gmra.mxu2 %v13610_v50 }
 0xa8c   :  { %8497 = vmatmul.bf16.gmra.mxu2 %v13611_v46 }
 0xa9c   :  { %8502 = vmatmul.bf16.gmra.mxu2 %v13612_v29 }
 0xaac   :  { %8507 = vmatmul.bf16.gmra.mxu2 %v13613_v40 }
 0xabc   :  { %8512 = vmatmul.bf16.gmra.mxu2 %v13614_v38 }
 0xacc   :  { %8517 = vmatmul.bf16.gmra.mxu2 %v13615_v0 }
 0xacf   :  { %v18424_v47 = vpop.f32.mrf.mxu2 }
 0xad7   :  { %v18426_v52 = vpop.f32.mrf.mxu2 }
 0xadc   :  { %8522 = vmatmul.bf16.gmra.mxu2 %v13616_v25 }
 0xadf   :  { %v18431_v33 = vpop.f32.mrf.mxu2 }
 0xae7   :  { %v18433_v61 = vpop.f32.mrf.mxu2 }
 0xaec   :  { %8527 = vmatmul.bf16.gmra.mxu2 %v13617_v62 }
 0xaef   :  { %v18438_v7 = vpop.f32.mrf.mxu2 }
 0xaf7   :  { %v18440_v22 = vpop.f32.mrf.mxu2 }
 0xafc   :  { %8532 = vmatmul.bf16.gmra.mxu2 %v13618_v15 }
 0xaff   :  { %v18445_v56 = vpop.f32.mrf.mxu2 }
 0xb07   :  { %v18450_v11 = vpop.f32.mrf.mxu2 }
 0xb0c   :  { %8537 = vmatmul.bf16.gmra.mxu2 %v8455_v8 }
 0xb0f   :  { %v18452_v20 = vpop.f32.mrf.mxu2 }
 0xb17   :  { %v18454_v42 = vpop.f32.mrf.mxu2 }
 0xb1f   :  { %v18456_v12 = vpop.f32.mrf.mxu2 }
 0xb27   :  { %v18458_v1 = vpop.f32.mrf.mxu2 }
 0xb2f   :  { %v18460_v51 = vpop.f32.mrf.mxu2 }
 0xb37   :  { %v18462_v19 = vpop.f32.mrf.mxu2 }
 0xb3f   :  { %v18464_v36 = vpop.f32.mrf.mxu2 }
 0xb47   :  { %v18466_v63 = vpop.f32.mrf.mxu2 }
 0xb4f   :  { %v18468_v18 = vpop.f32.mrf.mxu2 }
 0xb57   :  { %v18470_v54 = vpop.f32.mrf.mxu2 }
 0xb5f   :  { %v18472_v32 = vpop.f32.mrf.mxu2 }
 0xb67   :  { %v18474_v28 = vpop.f32.mrf.mxu2 }
 0xb6f   :  { %v18476_v41 = vpop.f32.mrf.mxu2 }
 0xb77   :  { %v18478_v53 = vpop.f32.mrf.mxu2 }
 0xb7f   :  { %v18480_v44 = vpop.f32.mrf.mxu2 }
 0xb87   :  { %v18482_v37 = vpop.f32.mrf.mxu2 }
 0xb8f   :  { %v18484_v3 = vpop.f32.mrf.mxu2 }
 0xb97   :  { %v8540_v14 = vpop.f32.mrf.mxu2 }
 0xb98   :  { %14592 = dma.done.wait [#allocation5 + $0x1], 25600 }
 0xb99   :  { %14593 = vsyncadd [#allocation5 + $0x1], 4294941696  ;;  %v13634_v59 = vld [vmem:[#allocation3 + $0x420] sm:$0xff]  ;;  %v13633_v60 = vld [vmem:[#allocation3 + $0x348] sm:$0xff]  ;;  %v8563_v2 = vpack.c.bf16 %v18426_v52, %v18426_v52  ;;  %v8546_v50 = vpack.c.bf16 %v18424_v47, %v18424_v47  ;;  %v8781_v52 = vpack.c.bf16 %v18433_v61, %v18433_v61  ;;  %s14596_s12 = smov [#allocation6]   ;;  %s10857_s15 = sshll.u32 %s18669_s10, 4  ;;  %s10858_s15 = int_to_ptr.hbm [resolvable:$true] %s10857_s15 }
 0xb9a   :  { %v13626_v48 = vld [vmem:[#allocation3 + $0x4a0] sm:$0xff]  ;;  %8628 = vmatpush.bf16.msra.mxu3 %v13634_v59  ;;  %v13625_v49 = vld [vmem:[#allocation3 + $0x5d8] sm:$0xff]  ;;  %v13632_v39 = vld [vmem:[#allocation3 + $0x50] sm:$0xff]  ;;  %s10855_s13 = sshll.u32 %s14596_s12, 4  ;;  %vm10848_vm4 = vcmask 123904   ;;  %s10856_s13 = int_to_ptr.vmem [resolvable:$true] %s10855_s13 }
 0xb9b   :  { %8689 = vmatpush.bf16.msra.mxu1 %v13626_v48  ;;  %v13650_v58 = vld [vmem:[#allocation3 + $0x5c0] sm:$0xff]  ;;  %v13624_v13 = vld [vmem:[#allocation3 + $0x218] sm:$0xff]  ;;  %v13649_v35 = vld [vmem:[#allocation3 + $0x208] sm:$0xff] }
 0xb9c   :  { %8846 = vmatpush.bf16.msra.mxu0 %v13650_v58  ;;  %v13631_v21 = vld [vmem:[#allocation3 + $0x180] sm:$0xff]  ;;  %v13623_v24 = vld [vmem:[#allocation3 + $0x2f0] sm:$0xff]  ;;  %v13648_v4 = vld [vmem:[#allocation3 + $0xe8] sm:$0xff] }
 0xb9d   :  { %v13630_v30 = vld [vmem:[#allocation3 + $0xa8] sm:$0xff]  ;;  %v13622_v6 = vld [vmem:[#allocation3 + $0x298] sm:$0xff]  ;;  %v13647_v45 = vld [vmem:[#allocation3 + $0x540] sm:$0xff] }
 0xb9e   :  { %8629 = vmatpush.bf16.msra.mxu3 %v13633_v60  ;;  %v13629_v43 = vld [vmem:[#allocation3 + $0x480] sm:$0xff]  ;;  %v13621_v17 = vld [vmem:[#allocation3 + $0x88] sm:$0xff]  ;;  %v13645_v10 = vld [vmem:[#allocation3 + $0x110] sm:$0xff] }
 0xb9f   :  { %8690 = vmatpush.bf16.msra.mxu1 %v13625_v49  ;;  %v13646_v27 = vld [vmem:[#allocation3 + $0x3a8] sm:$0xff]  ;;  %v13627_v55 = vld [vmem:[#allocation3 + $0xd8] sm:$0xff]  ;;  %v13642_v34 = vld [vmem:[#allocation3 + $0x150] sm:$0xff] }
 0xba0   :  { %8847 = vmatpush.bf16.msra.mxu0 %v13649_v35  ;;  %v13628_v5 = vld [vmem:[#allocation3 + $0x1a8] sm:$0xff]  ;;  %v13619_v31 = vld [vmem:[#allocation3 + $0x58] sm:$0xff]  ;;  %v13644_v57 = vld [vmem:[#allocation3 + $0x240] sm:$0xff] }
 0xba1   :  { %v13620_v16 = vld [vmem:[#allocation3 + $0x488] sm:$0xff]  ;;  %v13657_v29 = vld [vmem:[#allocation3 + $0x118] sm:$0xff]  ;;  %v13674_v38 = vld [vmem:[#allocation3 + $0x160] sm:$0xff] }
 0xba2   :  { %8630 = vmatpush.bf16.msra.mxu3 %v13632_v39  ;;  %v13658_v26 = vld [vmem:[#allocation3 + $0x188] sm:$0xff]  ;;  %v13643_v40 = vld [vmem:[#allocation3 + $0x4b8] sm:$0xff]  ;;  %v13639_v62 = vld [vmem:[#allocation3 + $0x1b0] sm:$0xff] }
 0xba3   :  { %8691 = vmatpush.bf16.msra.mxu1 %v13624_v13  ;;  %v13641_v46 = vld [vmem:[#allocation3 + $0x5a8] sm:$0xff]  ;;  %v13655_v15 = vld [vmem:[#allocation3 + $0x158] sm:$0xff]  ;;  %v13672_v9 = vld [vmem:[#allocation3 + $0x30] sm:$0xff] }
 0xba4   :  { %8848 = vmatpush.bf16.msra.mxu0 %v13648_v4  ;;  %v13640_v0 = vld [vmem:[#allocation3 + $0x8] sm:$0xff]  ;;  %v13638_v23 = vld [vmem:[#allocation3 + $0x3d8] sm:$0xff]  ;;  %v13653_v48 = vld [vmem:[#allocation3 + $0x460] sm:$0xff]  ;;  %v8702_v4 = vpack.c.bf16 %v18431_v33, %v18431_v33  ;;  %v9018_v33 = vpack.c.bf16 %v18445_v56, %v18445_v56 }
 0xba5   :  { %v13656_v25 = vld [vmem:[#allocation3 + $0x3c8] sm:$0xff]  ;;  %v13654_v8 = vld [vmem:[#allocation3 + $0x38] sm:$0xff]  ;;  %v13670_v61 = vld [vmem:[#allocation3 + $0x290] sm:$0xff] }
 0xba6   :  { %8631 = vmatpush.bf16.msra.mxu3 %v13631_v21  ;;  %v13673_v47 = vld [vmem:[#allocation3 + $0x228] sm:$0xff]  ;;  %v13636_v60 = vld [vmem:[#allocation3 + $0x538] sm:$0xff]  ;;  %v13669_v58 = vld [vmem:[#allocation3 + $0x5f0] sm:$0xff] }
 0xba7   :  { %8692 = vmatpush.bf16.msra.mxu1 %v13623_v24  ;;  %v13671_v14 = vld [vmem:[#allocation3 + $0x168] sm:$0xff]  ;;  %v13635_v39 = vld [vmem:[#allocation3 + $0x40] sm:$0xff]  ;;  %v13651_v13 = vld [vmem:[#allocation3 + $0x610] sm:$0xff] }
 0xba8   :  { %8849 = vmatpush.bf16.msra.mxu0 %v13647_v45  ;;  %v13637_v59 = vld [vmem:[#allocation3 + $0x608] sm:$0xff]  ;;  %v13682_v21 = vld [vmem:[#allocation3 + $0x80] sm:$0xff]  ;;  %v13681_v45 = vld [vmem:[#allocation3 + $0x370] sm:$0xff] }
 0xba9   :  { %v13652_v49 = vld [vmem:[#allocation3 + $0x308] sm:$0xff]  ;;  %v13668_v24 = vld [vmem:[#allocation3 + $0x360] sm:$0xff]  ;;  %v13694_v56 = vld [vmem:[#allocation3 + $0x570] sm:$0xff] }
 0xbaa   :  { %8632 = vmatpush.bf16.msra.mxu3 %v13630_v30  ;;  %v13666_v35 = vld [vmem:[#allocation3 + $0x428] sm:$0xff]  ;;  %v8860_v30 = vpack.c.bf16 %v18438_v7, %v18438_v7  ;;  %v13697_v7 = vld [vmem:[#allocation3 + $0x318] sm:$0xff] }
 0xbab   :  { %8693 = vmatpush.bf16.msra.mxu1 %v13622_v6  ;;  %v13665_v6 = vld [vmem:[#allocation3 + $0x418] sm:$0xff] }
 0xbac   :  { %8850 = vmatpush.bf16.msra.mxu0 %v13646_v27  ;;  %v13664_v27 = vld [vmem:[#allocation3 + $0x368] sm:$0xff] }
 0xbae   :  { %8633 = vmatpush.bf16.msra.mxu3 %v13629_v43  ;;  %v13667_v43 = vld [vmem:[#allocation3 + $0x638] sm:$0xff] }
 0xbaf   :  { %8694 = vmatpush.bf16.msra.mxu1 %v13621_v17  ;;  %v13698_v17 = vld [vmem:[#allocation3 + $0x530] sm:$0xff] }
 0xbb0   :  { %8851 = vmatpush.bf16.msra.mxu0 %v13645_v10  ;;  %v13679_v10 = vld [vmem:[#allocation3 + $0x450] sm:$0xff] }
 0xbb2   :  { %8634 = vmatpush.bf16.msra.mxu3 %v13628_v5  ;;  %v13680_v5 = vld [vmem:[#allocation3 + $0x568] sm:$0xff] }
 0xbb3   :  { %8695 = vmatpush.bf16.msra.mxu1 %v13620_v16  ;;  %v13663_v16 = vld [vmem:[#allocation3 + $0x4f0] sm:$0xff] }
 0xbb4   :  { %8852 = vmatpush.bf16.msra.mxu0 %v13644_v57  ;;  %v13661_v57 = vld [vmem:[#allocation3 + $0x410] sm:$0xff] }
 0xbb6   :  { %8635 = vmatpush.bf16.msra.mxu3 %v13627_v55  ;;  %v13696_v55 = vld [vmem:[#allocation3 + $0x288] sm:$0xff] }
 0xbb7   :  { %8696 = vmatpush.bf16.msra.mxu1 %v13619_v31  ;;  %v13662_v31 = vld [vmem:[#allocation3 + $0x3e8] sm:$0xff] }
 0xbb8   :  { %8853 = vmatpush.bf16.msra.mxu0 %v13643_v40  ;;  %v13659_v40 = vld [vmem:[#allocation3 + $0x518] sm:$0xff] }
 0xbb9   :  { %8636 = vmatmul.bf16.vlgmr.msra.gmra.mxu3 %v8563_v2  ;;  %v13677_v2 = vld [vmem:[#allocation3 + $0x230] sm:$0xff] }
 0xbba   :  { %8767 = vmatpush.bf16.msrb.mxu3 %v13642_v34  ;;  %8697 = vmatmul.bf16.vlgmr.msra.gmra.mxu1 %v8546_v50  ;;  %v13678_v34 = vld [vmem:[#allocation3 + $0x490] sm:$0xff]  ;;  %v13660_v50 = vld [vmem:[#allocation3 + $0x1d8] sm:$0xff] }
 0xbbb   :  { %8925 = vmatpush.bf16.msrb.mxu1 %v13658_v26  ;;  %8854 = vmatmul.bf16.vlgmr.msra.gmra.mxu0 %v8781_v52  ;;  %v13695_v26 = vld [vmem:[#allocation3 + $0x1b8] sm:$0xff] }
 0xbbc   :  { %9083 = vmatpush.bf16.msrb.mxu0 %v13674_v38  ;;  %v13675_v38 = vld [vmem:[#allocation3 + $0x248] sm:$0xff]  ;;  %v13692_v52 = vld [vmem:[#allocation3 + $0x278] sm:$0xff] }
 0xbbe   :  { %8768 = vmatpush.bf16.msrb.mxu3 %v13641_v46  ;;  %v13676_v46 = vld [vmem:[#allocation3 + $0x1a0] sm:$0xff] }
 0xbbf   :  { %8926 = vmatpush.bf16.msrb.mxu1 %v13657_v29  ;;  %v13693_v29 = vld [vmem:[#allocation3 + $0x378] sm:$0xff] }
 0xbc0   :  { %9084 = vmatpush.bf16.msrb.mxu0 %v13673_v47  ;;  %v8939_v47 = vpack.c.bf16 %v18440_v22, %v18440_v22  ;;  %v9255_v22 = vpack.c.bf16 %v18454_v42, %v18454_v42  ;;  %v13718_v42 = vld [vmem:[#allocation3 + $0x190] sm:$0xff] }
 0xbc2   :  { %8769 = vmatpush.bf16.msrb.mxu3 %v13640_v0  ;;  %v13690_v0 = vld [vmem:[#allocation3 + $0x20] sm:$0xff] }
 0xbc3   :  { %8927 = vmatpush.bf16.msrb.mxu1 %v13656_v25  ;;  %v13706_v25 = vld [vmem:[#allocation3 + $0x3e0] sm:$0xff] }
 0xbc4   :  { %9085 = vmatpush.bf16.msrb.mxu0 %v13672_v9  ;;  %v13705_v9 = vld [vmem:[#allocation3 + $0x500] sm:$0xff] }
 0xbc6   :  { %8770 = vmatpush.bf16.msrb.mxu3 %v13639_v62  ;;  %v9097_v62 = vpack.c.bf16 %v18450_v11, %v18450_v11  ;;  %v13721_v11 = vld [vmem:[#allocation3 + $0x2a0] sm:$0xff] }
 0xbc7   :  { %8928 = vmatpush.bf16.msrb.mxu1 %v13655_v15  ;;  %v13689_v15 = vld [vmem:[#allocation3 + $0x5f8] sm:$0xff] }
 0xbc8   :  { %9086 = vmatpush.bf16.msrb.mxu0 %v13671_v14  ;;  %v13688_v14 = vld [vmem:[#allocation3 + $0x2f8] sm:$0xff] }
 0xbca   :  { %8771 = vmatpush.bf16.msrb.mxu3 %v13638_v23  ;;  %v13691_v23 = vld [vmem:[#allocation3 + $0x238] sm:$0xff] }
 0xbcb   :  { %8929 = vmatpush.bf16.msrb.mxu1 %v13654_v8  ;;  %v13722_v8 = vld [vmem:[#allocation3 + $0x5a0] sm:$0xff] }
 0xbcc   :  { %9087 = vmatpush.bf16.msrb.mxu0 %v13670_v61  ;;  %v13703_v61 = vld [vmem:[#allocation3 + $0x60] sm:$0xff] }
 0xbce   :  { %8772 = vmatpush.bf16.msrb.mxu3 %v13637_v59  ;;  %v13704_v59 = vld [vmem:[#allocation3 + $0x268] sm:$0xff] }
 0xbcf   :  { %8930 = vmatpush.bf16.msrb.mxu1 %v13653_v48  ;;  %v13687_v48 = vld [vmem:[#allocation3 + $0x5b0] sm:$0xff] }
 0xbd0   :  { %9088 = vmatpush.bf16.msrb.mxu0 %v13669_v58  ;;  %v13702_v58 = vld [vmem:[#allocation3 + $0x4e8] sm:$0xff] }
 0xbd2   :  { %8773 = vmatpush.bf16.msrb.mxu3 %v13636_v60  ;;  %v13720_v60 = vld [vmem:[#allocation3 + $0x100] sm:$0xff] }
 0xbd3   :  { %8931 = vmatpush.bf16.msrb.mxu1 %v13652_v49  ;;  %v13686_v49 = vld [vmem:[#allocation3 + $0x220] sm:$0xff] }
 0xbd4   :  { %9089 = vmatpush.bf16.msrb.mxu0 %v13668_v24  ;;  %v13700_v24 = vld [vmem:[#allocation3 + $0x398] sm:$0xff] }
 0xbd6   :  { %8774 = vmatpush.bf16.msrb.mxu3 %v13635_v39  ;;  %v13719_v39 = vld [vmem:[#allocation3 + $0x4d8] sm:$0xff] }
 0xbd7   :  { %8932 = vmatpush.bf16.msrb.mxu1 %v13651_v13  ;;  %v13685_v13 = vld [vmem:[#allocation3 + $0x138] sm:$0xff] }
 0xbd8   :  { %9090 = vmatpush.bf16.msrb.mxu0 %v13667_v43  ;;  %v13730_v43 = vld [vmem:[#allocation3 + $0x2c0] sm:$0xff] }
 0xbd9   :  { %8775 = vmatmul.bf16.vlgmr.msrb.gmra.mxu3 %v8702_v4  ;;  %v13717_v4 = vld [vmem:[#allocation3 + $0x358] sm:$0xff] }
 0xbda   :  { %9004 = vmatpush.bf16.msra.mxu3 %v13666_v35  ;;  %8933 = vmatmul.bf16.vlgmr.msrb.gmra.mxu1 %v8860_v30  ;;  %v13701_v35 = vld [vmem:[#allocation3 + $0x630] sm:$0xff]  ;;  %v13683_v30 = vld [vmem:[#allocation3 + $0x5c8] sm:$0xff] }
 0xbdb   :  { %9162 = vmatpush.bf16.msra.mxu1 %v13682_v21  ;;  %9091 = vmatmul.bf16.vlgmr.msrb.gmra.mxu0 %v9018_v33  ;;  %v13684_v21 = vld [vmem:[#allocation3 + $0x430] sm:$0xff]  ;;  %v13713_v33 = vld [vmem:[#allocation3 + $0x600] sm:$0xff] }
 0xbdc   :  { %9320 = vmatpush.bf16.msra.mxu0 %v13698_v17  ;;  %v13716_v17 = vld [vmem:[#allocation3 + $0x1d0] sm:$0xff] }
 0xbde   :  { %9005 = vmatpush.bf16.msra.mxu3 %v13665_v6  ;;  %v13699_v6 = vld [vmem:[#allocation3 + $0x448] sm:$0xff] }
 0xbdf   :  { %9163 = vmatpush.bf16.msra.mxu1 %v13681_v45  ;;  %v13714_v45 = vld [vmem:[#allocation3 + $0x2e0] sm:$0xff] }
 0xbe0   :  { %9321 = vmatpush.bf16.msra.mxu0 %v13697_v7  ;;  %v13729_v7 = vld [vmem:[#allocation3 + $0x590] sm:$0xff] }
 0xbe2   :  { %9006 = vmatpush.bf16.msra.mxu3 %v13664_v27  ;;  %v9176_v27 = vpack.c.bf16 %v18452_v20, %v18452_v20  ;;  %v9492_v20 = vpack.c.bf16 %v18460_v51, %v18460_v51  ;;  %v13742_v51 = vld [vmem:[#allocation3 + $0x440] sm:$0xff] }
 0xbe3   :  { %9164 = vmatpush.bf16.msra.mxu1 %v13680_v5  ;;  %v9334_v5 = vpack.c.bf16 %v18456_v12, %v18456_v12  ;;  %v13745_v12 = vld [vmem:[#allocation3 + $0x3c0] sm:$0xff] }
 0xbe4   :  { %9322 = vmatpush.bf16.msra.mxu0 %v13696_v55  ;;  %v13712_v55 = vld [vmem:[#allocation3 + $0x328] sm:$0xff] }
 0xbe6   :  { %9007 = vmatpush.bf16.msra.mxu3 %v13663_v16  ;;  %v13715_v16 = vld [vmem:[#allocation3 + $0x78] sm:$0xff] }
 0xbe7   :  { %9165 = vmatpush.bf16.msra.mxu1 %v13679_v10  ;;  %v13746_v10 = vld [vmem:[#allocation3 + $0x90] sm:$0xff] }
 0xbe8   :  { %9323 = vmatpush.bf16.msra.mxu0 %v13695_v26  ;;  %v13727_v26 = vld [vmem:[#allocation3 + $0x5e8] sm:$0xff] }
 0xbea   :  { %9008 = vmatpush.bf16.msra.mxu3 %v13662_v31  ;;  %v13728_v31 = vld [vmem:[#allocation3 + $0x200] sm:$0xff] }
 0xbeb   :  { %9166 = vmatpush.bf16.msra.mxu1 %v13678_v34  ;;  %v13711_v34 = vld [vmem:[#allocation3 + $0x468] sm:$0xff] }
 0xbec   :  { %9324 = vmatpush.bf16.msra.mxu0 %v13694_v56  ;;  %v13726_v56 = vld [vmem:[#allocation3 + $0x4e0] sm:$0xff] }
 0xbee   :  { %9009 = vmatpush.bf16.msra.mxu3 %v13661_v57  ;;  %v13744_v57 = vld [vmem:[#allocation3 + $0x98] sm:$0xff] }
 0xbef   :  { %9167 = vmatpush.bf16.msra.mxu1 %v13677_v2  ;;  %v13710_v2 = vld [vmem:[#allocation3 + $0x3d0] sm:$0xff] }
 0xbf0   :  { %9325 = vmatpush.bf16.msra.mxu0 %v13693_v29  ;;  %v13725_v29 = vld [vmem:[#allocation3 + $0xc8] sm:$0xff] }
 0xbf2   :  { %9010 = vmatpush.bf16.msra.mxu3 %v13660_v50  ;;  %v13743_v50 = vld [vmem:[#allocation3 + $0x1e0] sm:$0xff] }
 0xbf3   :  { %9168 = vmatpush.bf16.msra.mxu1 %v13676_v46  ;;  %v13709_v46 = vld [vmem:[#allocation3 + $0x280] sm:$0xff] }
 0xbf4   :  { %9326 = vmatpush.bf16.msra.mxu0 %v13692_v52  ;;  %v13707_v52 = vld [vmem:[#allocation3 + $0x558] sm:$0xff] }
 0xbf6   :  { %9011 = vmatpush.bf16.msra.mxu3 %v13659_v40  ;;  %v13708_v40 = vld [vmem:[#allocation3 + $0x260] sm:$0xff] }
 0xbf7   :  { %9169 = vmatpush.bf16.msra.mxu1 %v13675_v38  ;;  %v13724_v38 = vld [vmem:[#allocation3 + $0x3b8] sm:$0xff] }
 0xbf8   :  { %9327 = vmatpush.bf16.msra.mxu0 %v13691_v23  ;;  %v13740_v23 = vld [vmem:[#allocation3 + $0x580] sm:$0xff] }
 0xbf9   :  { %9012 = vmatmul.bf16.vlgmr.msra.gmra.mxu3 %v8939_v47  ;;  %v13723_v47 = vld [vmem:[#allocation3 + $0x350] sm:$0xff] }
 0xbfa   :  { %9241 = vmatpush.bf16.msrb.mxu3 %v13690_v0  ;;  %9170 = vmatmul.bf16.vlgmr.msra.gmra.mxu1 %v9097_v62  ;;  %v13778_v0 = vld [vmem:[#allocation3 + $0x2e8] sm:$0xff]  ;;  %v13777_v62 = vld [vmem:[#allocation3 + $0x4d0] sm:$0xff] }
 0xbfb   :  { %9399 = vmatpush.bf16.msrb.mxu1 %v13706_v25  ;;  %9328 = vmatmul.bf16.vlgmr.msra.gmra.mxu0 %v9255_v22  ;;  %v13741_v25 = vld [vmem:[#allocation3 + $0xb0] sm:$0xff]  ;;  %v13737_v22 = vld [vmem:[#allocation3 + $0x178] sm:$0xff] }
 0xbfc   :  { %9557 = vmatpush.bf16.msrb.mxu0 %v13722_v8  ;;  %10110 = vmatpush.bf16.msra.mxu2 %v13778_v0  ;;  %v9413_v8 = vpack.c.bf16 %v18458_v1, %v18458_v1  ;;  %v13752_v1 = vld [vmem:[#allocation3 + $0x28] sm:$0xff]  ;;  %v13785_v0 = vld [vmem:[#allocation3 + $0x2b0] sm:$0xff] }
 0xbfe   :  { %9242 = vmatpush.bf16.msrb.mxu3 %v13689_v15  ;;  %v13738_v15 = vld [vmem:[#allocation3 + $0x1e8] sm:$0xff] }
 0xbff   :  { %9400 = vmatpush.bf16.msrb.mxu1 %v13705_v9  ;;  %v13754_v9 = vld [vmem:[#allocation3 + $0x620] sm:$0xff] }
 0xc00   :  { %9558 = vmatpush.bf16.msrb.mxu0 %v13721_v11  ;;  %10111 = vmatpush.bf16.msra.mxu2 %v13777_v62  ;;  %v13753_v11 = vld [vmem:[#allocation3 + $0x340] sm:$0xff] }
 0xc01   :  { %v13784_v62 = vld [vmem:[#allocation3 + $0x400] sm:$0xff] }
 0xc02   :  { %9243 = vmatpush.bf16.msrb.mxu3 %v13688_v14  ;;  %v9571_v14 = vpack.c.bf16 %v18462_v19, %v18462_v19  ;;  %v9729_v19 = vpack.c.bf16 %v18466_v63, %v18466_v63  ;;  %v13767_v63 = vld [vmem:[#allocation3 + $0x108] sm:$0xff] }
 0xc03   :  { %9401 = vmatpush.bf16.msrb.mxu1 %v13704_v59  ;;  %v13776_v59 = vld [vmem:[#allocation3 + $0x250] sm:$0xff] }
 0xc04   :  { %9559 = vmatpush.bf16.msrb.mxu0 %v13720_v60  ;;  %10112 = vmatpush.bf16.msra.mxu2 %v13776_v59  ;;  %v13775_v60 = vld [vmem:[#allocation3 + $0x270] sm:$0xff] }
 0xc06   :  { %9244 = vmatpush.bf16.msrb.mxu3 %v13687_v48  ;;  %v13739_v48 = vld [vmem:[#allocation3 + $0x198] sm:$0xff] }
 0xc07   :  { %9402 = vmatpush.bf16.msrb.mxu1 %v13703_v61  ;;  %v13770_v61 = vld [vmem:[#allocation3 + $0x470] sm:$0xff] }
 0xc08   :  { %9560 = vmatpush.bf16.msrb.mxu0 %v13719_v39  ;;  %10113 = vmatpush.bf16.msra.mxu2 %v13775_v60  ;;  %v13774_v39 = vld [vmem:[#allocation3 + $0x5b8] sm:$0xff] }
 0xc09   :  { %v13757_v60 = vld [vmem:[#allocation3 + $0x498] sm:$0xff] }
 0xc0a   :  { %9245 = vmatpush.bf16.msrb.mxu3 %v13686_v49  ;;  %v13736_v49 = vld [vmem:[#allocation3 + $0xf0] sm:$0xff] }
 0xc0b   :  { %9403 = vmatpush.bf16.msrb.mxu1 %v13702_v58  ;;  %v13769_v58 = vld [vmem:[#allocation3 + $0x2b8] sm:$0xff] }
 0xc0c   :  { %9561 = vmatpush.bf16.msrb.mxu0 %v13718_v42  ;;  %10114 = vmatpush.bf16.msra.mxu2 %v13774_v39  ;;  %v13768_v42 = vld [vmem:[#allocation3 + $0x628] sm:$0xff] }
 0xc0e   :  { %9246 = vmatpush.bf16.msrb.mxu3 %v13685_v13  ;;  %v13735_v13 = vld [vmem:[#allocation3 + $0x528] sm:$0xff] }
 0xc0f   :  { %9404 = vmatpush.bf16.msrb.mxu1 %v13701_v35  ;;  %v13751_v35 = vld [vmem:[#allocation3 + $0x390] sm:$0xff] }
 0xc10   :  { %9562 = vmatpush.bf16.msrb.mxu0 %v13717_v4  ;;  %v13734_v4 = vld [vmem:[#allocation3 + $0x438] sm:$0xff] }
 0xc12   :  { %9247 = vmatpush.bf16.msrb.mxu3 %v13684_v21 }
 0xc13   :  { %9405 = vmatpush.bf16.msrb.mxu1 %v13700_v24  ;;  %v13773_v24 = vld [vmem:[#allocation3 + $0x10] sm:$0xff] }
 0xc14   :  { %9563 = vmatpush.bf16.msrb.mxu0 %v13716_v17  ;;  %10115 = vmatpush.bf16.msra.mxu2 %v13773_v24  ;;  %v13780_v24 = vld [vmem:[#allocation3 + $0x1f0] sm:$0xff] }
 0xc16   :  { %9248 = vmatpush.bf16.msrb.mxu3 %v13683_v30  ;;  %v13750_v30 = vld [vmem:[#allocation3 + $0x70] sm:$0xff] }
 0xc17   :  { %9406 = vmatpush.bf16.msrb.mxu1 %v13699_v6  ;;  %v13772_v6 = vld [vmem:[#allocation3 + $0x2c8] sm:$0xff] }
 0xc18   :  { %9564 = vmatpush.bf16.msrb.mxu0 %v13715_v16  ;;  %10116 = vmatpush.bf16.msra.mxu2 %v13772_v6  ;;  %v13771_v16 = vld [vmem:[#allocation3 + $0xd0] sm:$0xff]  ;;  %v13755_v6 = vld [vmem:[#allocation3 + $0x338] sm:$0xff] }
 0xc19   :  { %9249 = vmatmul.bf16.vlgmr.msrb.gmra.mxu3 %v9176_v27 }
 0xc1a   :  { %9478 = vmatpush.bf16.msra.mxu3 %v13714_v45  ;;  %9407 = vmatmul.bf16.vlgmr.msrb.gmra.mxu1 %v9334_v5  ;;  %v13733_v45 = vld [vmem:[#allocation3 + $0xc0] sm:$0xff]  ;;  %v13766_v5 = vld [vmem:[#allocation3 + $0x3f0] sm:$0xff] }
 0xc1b   :  { %9636 = vmatpush.bf16.msra.mxu1 %v13730_v43  ;;  %9565 = vmatmul.bf16.vlgmr.msrb.gmra.mxu0 %v9492_v20  ;;  %v13749_v43 = vld [vmem:[#allocation3 + $0x258] sm:$0xff]  ;;  %v13765_v20 = vld [vmem:[#allocation3 + $0x130] sm:$0xff] }
 0xc1c   :  { %9794 = vmatpush.bf16.msra.mxu0 %v13746_v10  ;;  %v13732_v10 = vld [vmem:[#allocation3 + $0x5e0] sm:$0xff]  ;;  %10117 = vmatpush.bf16.msra.mxu2 %v13771_v16  ;;  %v13793_v16 = vld [vmem:[#allocation3 + $0x598] sm:$0xff] }
 0xc1e   :  { %9479 = vmatpush.bf16.msra.mxu3 %v13713_v33 }
 0xc1f   :  { %9637 = vmatpush.bf16.msra.mxu1 %v13729_v7 }
 0xc20   :  { %9795 = vmatpush.bf16.msra.mxu0 %v13745_v12  ;;  %v13731_v12 = vld [vmem:[#allocation3 + $0x210] sm:$0xff] }
 0xc22   :  { %9480 = vmatpush.bf16.msra.mxu3 %v13712_v55  ;;  %v13748_v55 = vld [vmem:[#allocation3 + $0x510] sm:$0xff] }
 0xc23   :  { %9638 = vmatpush.bf16.msra.mxu1 %v13728_v31  ;;  %v13810_v31 = vld [vmem:[#allocation3 + $0x1c0] sm:$0xff] }
 0xc24   :  { %9796 = vmatpush.bf16.msra.mxu0 %v13744_v57  ;;  %10426 = vmatpush.bf16.msrb.mxu2 %v13810_v31  ;;  %v13762_v57 = vld [vmem:[#allocation3 + $0x3b0] sm:$0xff]  ;;  %v13792_v31 = vld [vmem:[#allocation3 + $0x548] sm:$0xff] }
 0xc26   :  { %9481 = vmatpush.bf16.msra.mxu3 %v13711_v34  ;;  %v13747_v34 = vld [vmem:[#allocation3 + $0x550] sm:$0xff] }
 0xc27   :  { %9639 = vmatpush.bf16.msra.mxu1 %v13727_v26  ;;  %v13809_v26 = vld [vmem:[#allocation3 + $0x5d0] sm:$0xff] }
 0xc28   :  { %9797 = vmatpush.bf16.msra.mxu0 %v13743_v50  ;;  %v13764_v50 = vld [vmem:[#allocation3 + $0x128] sm:$0xff]  ;;  %10427 = vmatpush.bf16.msrb.mxu2 %v13809_v26 }
 0xc29   :  { %v13790_v26 = vld [vmem:[#allocation3 + $0x48] sm:$0xff] }
 0xc2a   :  { %9482 = vmatpush.bf16.msra.mxu3 %v13710_v2  ;;  %v13786_v2 = vld [vmem:[#allocation3 + $0x560] sm:$0xff] }
 0xc2b   :  { %9640 = vmatpush.bf16.msra.mxu1 %v13726_v56 }
 0xc2c   :  { %9798 = vmatpush.bf16.msra.mxu0 %v13742_v51  ;;  %v9808_v51 = vpack.c.bf16 %v18468_v18, %v18468_v18  ;;  %v13760_v18 = vld [vmem:[#allocation3 + $0xb8] sm:$0xff] }
 0xc2e   :  { %9483 = vmatpush.bf16.msra.mxu3 %v13709_v46 }
 0xc2f   :  { %9641 = vmatpush.bf16.msra.mxu1 %v13725_v29  ;;  %v9650_v29 = vpack.c.bf16 %v18464_v36, %v18464_v36  ;;  %v13807_v36 = vld [vmem:[#allocation3 + $0x3a0] sm:$0xff] }
 0xc30   :  { %9799 = vmatpush.bf16.msra.mxu0 %v13741_v25  ;;  %v13763_v25 = vld [vmem:[#allocation3 + $0x4c8] sm:$0xff] }
 0xc32   :  { %9484 = vmatpush.bf16.msra.mxu3 %v13708_v40  ;;  %v13808_v40 = vld [vmem:[#allocation3 + $0x300] sm:$0xff] }
 0xc33   :  { %9642 = vmatpush.bf16.msra.mxu1 %v13724_v38  ;;  %v13761_v38 = vld [vmem:[#allocation3 + $0x388] sm:$0xff]  ;;  %10428 = vmatpush.bf16.msrb.mxu2 %v13808_v40 }
 0xc34   :  { %9800 = vmatpush.bf16.msra.mxu0 %v13740_v23  ;;  %v13806_v23 = vld [vmem:[#allocation3 + $0x4c0] sm:$0xff] }
 0xc36   :  { %9485 = vmatpush.bf16.msra.mxu3 %v13707_v52  ;;  %v10045_v52 = vpack.c.bf16 %v18474_v28, %v18474_v28  ;;  %v13783_v28 = vld [vmem:[#allocation3 + $0x18] sm:$0xff] }
 0xc37   :  { %9643 = vmatpush.bf16.msra.mxu1 %v13723_v47  ;;  %v8698_v21 = vpop.f32.mrf.mxu1  ;;  %v13802_v47 = vld [vmem:[#allocation3 + $0x380] sm:$0xff]  ;;  %10429 = vmatpush.bf16.msrb.mxu2 %v13807_v36 }
 0xc38   :  { %9801 = vmatpush.bf16.msra.mxu0 %v13739_v48  ;;  %v18518_v33 = vpop.f32.mrf.mxu0  ;;  %10118 = vmatmul.bf16.vlgmr.msra.gmra.mxu2 %v10045_v52  ;;  %v13782_v48 = vld [vmem:[#allocation3 + $0xa0] sm:$0xff]  ;;  %v13811_v52 = vld [vmem:[#allocation3 + $0x2d0] sm:$0xff] }
 0xc39   :  { %9486 = vmatmul.bf16.vlgmr.msra.gmra.mxu3 %v9413_v8  ;;  %v13759_v8 = vld [vmem:[#allocation3 + $0x4f8] sm:$0xff] }
 0xc3a   :  { %9715 = vmatpush.bf16.msrb.mxu3 %v13738_v15  ;;  %9644 = vmatmul.bf16.vlgmr.msra.gmra.mxu1 %v9571_v14  ;;  %v9966_v15 = vpack.c.bf16 %v18472_v32, %v18472_v32  ;;  %v13800_v14 = vld [vmem:[#allocation3 + $0x140] sm:$0xff]  ;;  %v13799_v32 = vld [vmem:[#allocation3 + $0x4b0] sm:$0xff] }
 0xc3b   :  { %9873 = vmatpush.bf16.msrb.mxu1 %v13754_v9  ;;  %9802 = vmatmul.bf16.vlgmr.msra.gmra.mxu0 %v9729_v19  ;;  %v13801_v9 = vld [vmem:[#allocation3 + $0x148] sm:$0xff] }
 0xc3c   :  { %10031 = vmatpush.bf16.msrb.mxu0 %v13770_v61  ;;  %v8637_v17 = vpop.f32.mrf.mxu3  ;;  %10430 = vmatpush.bf16.msrb.mxu2 %v13806_v23  ;;  %v13804_v61 = vld [vmem:[#allocation3 + $0x170] sm:$0xff] }
 0xc3d   :  { %v18516_v27 = vadd.f32 %v8698_v21, %v8637_v17  ;;  %v13756_v21 = vld [vmem:[#allocation3 + $0x330] sm:$0xff]  ;;  %v13818_v17 = vld [vmem:[#allocation3 + $0x578] sm:$0xff] }
 0xc3e   :  { %9716 = vmatpush.bf16.msrb.mxu3 %v13737_v22  ;;  %v13805_v22 = vld [vmem:[#allocation3 + $0x68] sm:$0xff] }
 0xc3f   :  { %9874 = vmatpush.bf16.msrb.mxu1 %v13753_v11  ;;  %v8700_v7 = vpop.f32.mrf.mxu1  ;;  %v13758_v11 = vld [vmem:[#allocation3 + $0x320] sm:$0xff] }
 0xc40   :  { %10032 = vmatpush.bf16.msrb.mxu0 %v13769_v58  ;;  %v8857_v46 = vpop.f32.mrf.mxu0  ;;  %10431 = vmatpush.bf16.msrb.mxu2 %v13805_v22  ;;  %v13798_v58 = vld [vmem:[#allocation3 + $0xf8] sm:$0xff]  ;;  %v9887_v7 = vpack.c.bf16 %v18470_v54, %v18470_v54  ;;  %v10282_v54 = vpack.c.bf16 %v18480_v44, %v18480_v44  ;;  %v13788_v44 = vld [vmem:[#allocation3 + $0x2a8] sm:$0xff] }
 0xc42   :  { %9717 = vmatpush.bf16.msrb.mxu3 %v13736_v49  ;;  %v13781_v49 = vld [vmem:[#allocation3 + $0x310] sm:$0xff] }
 0xc43   :  { %9875 = vmatpush.bf16.msrb.mxu1 %v13752_v1 }
 0xc44   :  { %10033 = vmatpush.bf16.msrb.mxu0 %v13768_v42  ;;  %v8639_v56 = vpop.f32.mrf.mxu3  ;;  %10432 = vmatpush.bf16.msrb.mxu2 %v13804_v61 }
 0xc45   :  { %v13813_v56 = vld [vmem:[#allocation3] sm:$0xff] }
 0xc46   :  { %9718 = vmatpush.bf16.msrb.mxu3 %v13735_v13 }
 0xc47   :  { %9876 = vmatpush.bf16.msrb.mxu1 %v13751_v35  ;;  %v13803_v35 = vld [vmem:[#allocation3 + $0x458] sm:$0xff] }
 0xc48   :  { %10034 = vmatpush.bf16.msrb.mxu0 %v13767_v63  ;;  %10433 = vmatpush.bf16.msrb.mxu2 %v13803_v35  ;;  %v13797_v63 = vld [vmem:[#allocation3 + $0x3f8] sm:$0xff] }
 0xc4a   :  { %9719 = vmatpush.bf16.msrb.mxu3 %v13734_v4  ;;  %v10361_v4 = vpack.c.bf16 %v18482_v37, %v18482_v37  ;;  %v10124_v37 = vpack.c.bf16 %v18476_v41, %v18476_v41  ;;  %v13791_v41 = vld [vmem:[#allocation3 + $0x1f8] sm:$0xff] }
 0xc4b   :  { %9877 = vmatpush.bf16.msrb.mxu1 %v13750_v30 }
 0xc4c   :  { %10035 = vmatpush.bf16.msrb.mxu0 %v13766_v5  ;;  %10434 = vmatmul.bf16.vlgmr.msrb.gmra.mxu2 %v10361_v4  ;;  %v13796_v5 = vld [vmem:[#allocation3 + $0x478] sm:$0xff] }
 0xc4d   :  { %v13826_v4 = vld [vmem:[%s18667_s8 + $0x38] sm:$0xff] }
 0xc4e   :  { %9720 = vmatpush.bf16.msrb.mxu3 %v13733_v45  ;;  %v13779_v45 = vld [vmem:[#allocation3 + $0x520] sm:$0xff] }
 0xc4f   :  { %9878 = vmatpush.bf16.msrb.mxu1 %v13749_v43  ;;  %v13794_v43 = vld [vmem:[#allocation3 + $0x1c8] sm:$0xff] }
 0xc50   :  { %10036 = vmatpush.bf16.msrb.mxu0 %v13765_v20  ;;  %v13816_v20 = vld [vmem:[#allocation3 + $0x120] sm:$0xff] }
 0xc52   :  { %9721 = vmatpush.bf16.msrb.mxu3 %v13732_v10  ;;  %v13817_v10 = vld [vmem:[#allocation3 + $0x618] sm:$0xff] }
 0xc53   :  { %9879 = vmatpush.bf16.msrb.mxu1 %v13748_v55  ;;  %v13795_v55 = vld [vmem:[#allocation3 + $0x588] sm:$0xff] }
 0xc54   :  { %10037 = vmatpush.bf16.msrb.mxu0 %v13764_v50 }
 0xc56   :  { %9722 = vmatpush.bf16.msrb.mxu3 %v13731_v12  ;;  %v13815_v12 = vld [vmem:[#allocation3 + $0x508] sm:$0xff] }
 0xc57   :  { %9880 = vmatpush.bf16.msrb.mxu1 %v13747_v34  ;;  %v8934_v59 = vpop.f32.mrf.mxu1 }
 0xc58   :  { %10038 = vmatpush.bf16.msrb.mxu0 %v13763_v25  ;;  %v9092_v39 = vpop.f32.mrf.mxu0  ;;  %v13787_v25 = vld [vmem:[#allocation3 + $0xe0] sm:$0xff] }
 0xc59   :  { %9723 = vmatmul.bf16.vlgmr.msrb.gmra.mxu3 %v9650_v29 }
 0xc5a   :  { %9952 = vmatpush.bf16.msra.mxu3 %v13762_v57  ;;  %9881 = vmatmul.bf16.vlgmr.msrb.gmra.mxu1 %v9808_v51  ;;  %v13814_v57 = vld [vmem:[#allocation3 + $0x4a8] sm:$0xff] }
 0xc5b   :  { %10189 = vmatpush.bf16.msra.mxu1 %v13786_v2  ;;  %10039 = vmatmul.bf16.vlgmr.msrb.gmra.mxu0 %v9966_v15  ;;  %v13789_v2 = vld [vmem:[#allocation3 + $0x2d8] sm:$0xff] }
 0xc5c   :  { %10347 = vmatpush.bf16.msra.mxu0 %v13802_v47  ;;  %v8776_v1 = vpop.f32.mrf.mxu3 }
 0xc5d   :  { %v8780_v19 = vadd.f32 %v8776_v1, %v18516_v27 }
 0xc5e   :  { %9953 = vmatpush.bf16.msra.mxu3 %v13761_v38  ;;  %v13812_v38 = vld [vmem:[#allocation3 + $0x408] sm:$0xff] }
 0xc5f   :  { %10190 = vmatpush.bf16.msra.mxu1 %v13785_v0  ;;  %v8936_v13 = vpop.f32.mrf.mxu1  ;;  %v8859_v42 = vadd.f32 %v18518_v33, %v8780_v19 }
 0xc60   :  { %10348 = vmatpush.bf16.msra.mxu0 %v13801_v9  ;;  %v9094_v33 = vpop.f32.mrf.mxu0 }
 0xc61   :  { %v8938_v30 = vadd.f32 %v8934_v59, %v8859_v42 }
 0xc62   :  { %9954 = vmatpush.bf16.msra.mxu3 %v13760_v18  ;;  %v10203_v18 = vpack.c.bf16 %v18478_v53, %v18478_v53 }
 0xc63   :  { %10191 = vmatpush.bf16.msra.mxu1 %v13784_v62  ;;  %v10440_v62 = vpack.c.bf16 %v18484_v3, %v18484_v3 }
 0xc64   :  { %10349 = vmatpush.bf16.msra.mxu0 %v13800_v14  ;;  %v8778_v27 = vpop.f32.mrf.mxu3 }
 0xc65   :  { %v13841_v27 = vld [vmem:[%s18667_s8 + $0xb0] sm:$0xff] }
 0xc66   :  { %9955 = vmatpush.bf16.msra.mxu3 %v13759_v8 }
 0xc67   :  { %10192 = vmatpush.bf16.msra.mxu1 %v13783_v28 }
 0xc68   :  { %10350 = vmatpush.bf16.msra.mxu0 %v13799_v32 }
 0xc6a   :  { %9956 = vmatpush.bf16.msra.mxu3 %v13758_v11 }
 0xc6b   :  { %10193 = vmatpush.bf16.msra.mxu1 %v13782_v48 }
 0xc6c   :  { %10351 = vmatpush.bf16.msra.mxu0 %v13798_v58 }
 0xc6e   :  { %9957 = vmatpush.bf16.msra.mxu3 %v13757_v60 }
 0xc6f   :  { %10194 = vmatpush.bf16.msra.mxu1 %v13781_v49 }
 0xc70   :  { %10352 = vmatpush.bf16.msra.mxu0 %v13797_v63  ;;  %v13842_v63 = vld [vmem:[%s18667_s8 + $0xb8] sm:$0xff] }
 0xc71   :  { %10749 = vmatpush.bf16.msra.mxu2 %v13842_v63 }
 0xc72   :  { %9958 = vmatpush.bf16.msra.mxu3 %v13756_v21 }
 0xc73   :  { %10195 = vmatpush.bf16.msra.mxu1 %v13780_v24 }
 0xc74   :  { %10353 = vmatpush.bf16.msra.mxu0 %v13796_v5  ;;  %v13849_v5 = vld [vmem:[%s18667_s8 + $0xf0] sm:$0xff] }
 0xc75   :  { %10750 = vmatpush.bf16.msra.mxu2 %v13841_v27 }
 0xc76   :  { %9959 = vmatpush.bf16.msra.mxu3 %v13755_v6  ;;  %v13850_v6 = vld [vmem:[%s18667_s8 + $0xf8] sm:$0xff] }
 0xc77   :  { %10196 = vmatpush.bf16.msra.mxu1 %v13779_v45  ;;  %v9171_v34 = vpop.f32.mrf.mxu1  ;;  %v13825_v45 = vld [vmem:[%s18667_s8 + $0x30] sm:$0xff] }
 0xc78   :  { %10354 = vmatpush.bf16.msra.mxu0 %v13795_v55  ;;  %v9329_v29 = vpop.f32.mrf.mxu0  ;;  %v13848_v55 = vld [vmem:[%s18667_s8 + $0xe8] sm:$0xff] }
 0xc79   :  { %9960 = vmatmul.bf16.vlgmr.msra.gmra.mxu3 %v9887_v7 }
 0xc7a   :  { %10268 = vmatpush.bf16.msrb.mxu3 %v13794_v43  ;;  %10197 = vmatmul.bf16.vlgmr.msra.gmra.mxu1 %v10124_v37  ;;  %v13833_v43 = vld [vmem:[%s18667_s8 + $0x70] sm:$0xff]  ;;  %v13824_v37 = vld [vmem:[%s18667_s8 + $0x28] sm:$0xff] }
 0xc7b   :  { %10505 = vmatpush.bf16.msrb.mxu1 %v13818_v17  ;;  %10355 = vmatmul.bf16.vlgmr.msra.gmra.mxu0 %v10282_v54  ;;  %v13839_v54 = vld [vmem:[%s18667_s8 + $0xa0] sm:$0xff] }
 0xc7c   :  { %v9013_v50 = vpop.f32.mrf.mxu3  ;;  %10670 = vmatpush.bf16.msrb.mxu0 %v13826_v4 }
 0xc7d   :  { %v9017_v46 = vadd.f32 %v9013_v50, %v8938_v30  ;;  %v13834_v30 = vld [vmem:[%s18667_s8 + $0x78] sm:$0xff]  ;;  %v13821_v50 = vld [vmem:[%s18667_s8 + $0x10] sm:$0xff] }
 0xc7e   :  { %10269 = vmatpush.bf16.msrb.mxu3 %v13793_v16  ;;  %v13832_v16 = vld [vmem:[%s18667_s8 + $0x68] sm:$0xff] }
 0xc7f   :  { %10506 = vmatpush.bf16.msrb.mxu1 %v13817_v10  ;;  %v9173_v51 = vpop.f32.mrf.mxu1  ;;  %v9096_v40 = vadd.f32 %v9092_v39, %v9017_v46  ;;  %v13840_v10 = vld [vmem:[%s18667_s8 + $0xa8] sm:$0xff] }
 0xc80   :  { %v9331_v36 = vpop.f32.mrf.mxu0  ;;  %10671 = vmatpush.bf16.msrb.mxu0 %v13825_v45  ;;  %10751 = vmatpush.bf16.msra.mxu2 %v13840_v10  ;;  %v13829_v51 = vld [vmem:[%s18667_s8 + $0x50] sm:$0xff] }
 0xc81   :  { %v9175_v0 = vadd.f32 %v9171_v34, %v9096_v40  ;;  %v13837_v40 = vld [vmem:[%s18667_s8 + $0x90] sm:$0xff]  ;;  %v13844_v36 = vld [vmem:[%s18667_s8 + $0xc8] sm:$0xff] }
 0xc82   :  { %10270 = vmatpush.bf16.msrb.mxu3 %v13792_v31  ;;  %v13823_v31 = vld [vmem:[%s18667_s8 + $0x20] sm:$0xff] }
 0xc83   :  { %10507 = vmatpush.bf16.msrb.mxu1 %v13816_v20  ;;  %v13831_v20 = vld [vmem:[%s18667_s8 + $0x60] sm:$0xff] }
 0xc84   :  { %v9015_v47 = vpop.f32.mrf.mxu3  ;;  %10672 = vmatpush.bf16.msrb.mxu0 %v13824_v37  ;;  %10752 = vmatpush.bf16.msra.mxu2 %v13839_v54 }
 0xc85   :  { %v13836_v47 = vld [vmem:[%s18667_s8 + $0x88] sm:$0xff] }
 0xc86   :  { %10271 = vmatpush.bf16.msrb.mxu3 %v13791_v41  ;;  %v13847_v41 = vld [vmem:[%s18667_s8 + $0xe0] sm:$0xff] }
 0xc87   :  { %10508 = vmatpush.bf16.msrb.mxu1 %v13815_v12 }
 0xc88   :  { %10673 = vmatpush.bf16.msrb.mxu0 %v13823_v31 }
 0xc8a   :  { %10272 = vmatpush.bf16.msrb.mxu3 %v13790_v26  ;;  %v13822_v26 = vld [vmem:[%s18667_s8 + $0x18] sm:$0xff] }
 0xc8b   :  { %10509 = vmatpush.bf16.msrb.mxu1 %v13814_v57  ;;  %v13830_v57 = vld [vmem:[%s18667_s8 + $0x58] sm:$0xff] }
 0xc8c   :  { %10674 = vmatpush.bf16.msrb.mxu0 %v13822_v26 }
 0xc8e   :  { %10273 = vmatpush.bf16.msrb.mxu3 %v13789_v2  ;;  %v13838_v2 = vld [vmem:[%s18667_s8 + $0x98] sm:$0xff] }
 0xc8f   :  { %10510 = vmatpush.bf16.msrb.mxu1 %v13813_v56  ;;  %v13846_v56 = vld [vmem:[%s18667_s8 + $0xd8] sm:$0xff]  ;;  %10753 = vmatpush.bf16.msra.mxu2 %v13838_v2 }
 0xc90   :  { %10675 = vmatpush.bf16.msrb.mxu0 %v13821_v50 }
 0xc92   :  { %10274 = vmatpush.bf16.msrb.mxu3 %v13788_v44  ;;  %v13845_v44 = vld [vmem:[%s18667_s8 + $0xd0] sm:$0xff] }
 0xc93   :  { %10511 = vmatpush.bf16.msrb.mxu1 %v13812_v38  ;;  %10754 = vmatpush.bf16.msra.mxu2 %v13837_v40 }
 0xc96   :  { %10275 = vmatpush.bf16.msrb.mxu3 %v13787_v25  ;;  %v13820_v25 = vld [vmem:[%s18667_s8 + $0x8] sm:$0xff] }
 0xc97   :  { %10512 = vmatpush.bf16.msrb.mxu1 %v13811_v52  ;;  %v9408_v15 = vpop.f32.mrf.mxu1  ;;  %10676 = vmatpush.bf16.msrb.mxu0 %v13820_v25  ;;  %v13828_v52 = vld [vmem:[%s18667_s8 + $0x48] sm:$0xff] }
 0xc98   :  { %v9566_v8 = vpop.f32.mrf.mxu0  ;;  %10755 = vmatpush.bf16.msra.mxu2 %v13836_v47 }
 0xc99   :  { %10276 = vmatmul.bf16.vlgmr.msrb.gmra.mxu3 %v10203_v18  ;;  %v13819_v18 = vld [vmem:[%s18667_s8] sm:$0xff] }
 0xc9a   :  { %10513 = vmatmul.bf16.vlgmr.msrb.gmra.mxu1 %v10440_v62  ;;  %10609 = vmatpush.bf16.msra.mxu3 %v13834_v30  ;;  %v13827_v62 = vld [vmem:[%s18667_s8 + $0x40] sm:$0xff] }
 0xc9b   :  { %10829 = vmatpush.bf16.msra.mxu1 %v13850_v6  ;;  %10677 = vmatpush.bf16.msrb.mxu0 %v13819_v18 }
 0xc9c   :  { %v9250_v9 = vpop.f32.mrf.mxu3 }
 0xc9d   :  { %v9254_v23 = vadd.f32 %v9250_v9, %v9175_v0 }
 0xc9e   :  { %10610 = vmatpush.bf16.msra.mxu3 %v13833_v43 }
 0xc9f   :  { %v9410_v28 = vpop.f32.mrf.mxu1  ;;  %v9333_v14 = vadd.f32 %v9329_v29, %v9254_v23  ;;  %10830 = vmatpush.bf16.msra.mxu1 %v13849_v5  ;;  %v13843_v23 = vld [vmem:[%s18667_s8 + $0xc0] sm:$0xff] }
 0xca0   :  { %v9568_v11 = vpop.f32.mrf.mxu0 }
 0xca1   :  { %v9412_v59 = vadd.f32 %v9408_v15, %v9333_v14  ;;  %v13835_v15 = vld [vmem:[%s18667_s8 + $0x80] sm:$0xff] }
 0xca2   :  { %10611 = vmatpush.bf16.msra.mxu3 %v13832_v16  ;;  %10756 = vmatpush.bf16.msra.mxu2 %v13835_v15 }
 0xca3   :  { %10831 = vmatpush.bf16.msra.mxu1 %v13848_v55 }
 0xca4   :  { %v9252_v22 = vpop.f32.mrf.mxu3 }
 0xca6   :  { %10612 = vmatpush.bf16.msra.mxu3 %v13831_v20 }
 0xca7   :  { %10832 = vmatpush.bf16.msra.mxu1 %v13847_v41 }
 0xcaa   :  { %10613 = vmatpush.bf16.msra.mxu3 %v13830_v57 }
 0xcab   :  { %10833 = vmatpush.bf16.msra.mxu1 %v13846_v56 }
 0xcae   :  { %10614 = vmatpush.bf16.msra.mxu3 %v13829_v51 }
 0xcaf   :  { %10834 = vmatpush.bf16.msra.mxu1 %v13845_v44 }
 0xcb2   :  { %10615 = vmatpush.bf16.msra.mxu3 %v13828_v52 }
 0xcb3   :  { %10835 = vmatpush.bf16.msra.mxu1 %v13844_v36 }
 0xcb6   :  { %10616 = vmatpush.bf16.msra.mxu3 %v13827_v62 }
 0xcb7   :  { %v9645_v48 = vpop.f32.mrf.mxu1  ;;  %10836 = vmatpush.bf16.msra.mxu1 %v13843_v23 }
 0xcb8   :  { %v9803_v53 = vpop.f32.mrf.mxu0 }
 0xcbb   :  { %v18546_v42 = vpop.f32.mrf.mxu2 }
 0xcbc   :  { %v9487_v32 = vpop.f32.mrf.mxu3 }
 0xcbd   :  { %v9491_v61 = vadd.f32 %v9487_v32, %v9412_v59 }
 0xcbf   :  { %v9647_v60 = vpop.f32.mrf.mxu1  ;;  %v9570_v49 = vadd.f32 %v9566_v8, %v9491_v61 }
 0xcc0   :  { %v9805_v19 = vpop.f32.mrf.mxu0 }
 0xcc1   :  { %v9649_v3 = vadd.f32 %v9645_v48, %v9570_v49 }
 0xcc3   :  { %v10121_v7 = vpop.f32.mrf.mxu2 }
 0xcc4   :  { %v9489_v1 = vpop.f32.mrf.mxu3 }
 0xccf   :  { %v10435_v34 = vpop.f32.mrf.mxu2 }
 0xcd7   :  { %v18542_v58 = vpop.f32.mrf.mxu1  ;;  %v10437_v0 = vpop.f32.mrf.mxu2 }
 0xcd8   :  { %v18544_v35 = vpop.f32.mrf.mxu0 }
 0xcdc   :  { %v9724_v39 = vpop.f32.mrf.mxu3 }
 0xcdd   :  { %v9728_v13 = vadd.f32 %v9724_v39, %v9649_v3  ;;  %v14564_v3 = vld [vmem:[%s18666_s7] ss:$0 sm:$0xff] }
 0xcdf   :  { %v9884_v21 = vpop.f32.mrf.mxu1  ;;  %v18548_v24 = vadd.f32 %v9803_v53, %v9728_v13 }
 0xce0   :  { %v10042_v33 = vpop.f32.mrf.mxu0 }
 0xce1   :  { %v9886_v28 = vadd.f32 %v18542_v58, %v18548_v24 }
 0xce4   :  { %v9726_v17 = vpop.f32.mrf.mxu3 }
 0xce5   :  { %v14565_v17 = vld [vmem:[%s18668_s9] ss:$0 sm:$0xff] }
 0xcf7   :  { %v10198_v12 = vpop.f32.mrf.mxu1 }
 0xcf8   :  { %v10356_v29 = vpop.f32.mrf.mxu0 }
 0xcfc   :  { %v9961_v46 = vpop.f32.mrf.mxu3 }
 0xcfd   :  { %v9965_v14 = vadd.f32 %v9961_v46, %v9886_v28 }
 0xcff   :  { %v10200_v38 = vpop.f32.mrf.mxu1  ;;  %v10044_v59 = vadd.f32 %v18544_v35, %v9965_v14 }
 0xd00   :  { %v10358_v8 = vpop.f32.mrf.mxu0 }
 0xd01   :  { %v10123_v11 = vadd.f32 %v18546_v42, %v10044_v59 }
 0xd03   :  { %v10202_v48 = vadd.f32 %v10198_v12, %v10123_v11 }
 0xd04   :  { %v9963_v9 = vpop.f32.mrf.mxu3 }
 0xd17   :  { %v10514_v22 = vpop.f32.mrf.mxu1 }
 0xd1c   :  { %v10277_v32 = vpop.f32.mrf.mxu3 }
 0xd1d   :  { %v10281_v61 = vadd.f32 %v10277_v32, %v10202_v48 }
 0xd1f   :  { %v10516_v53 = vpop.f32.mrf.mxu1  ;;  %v10360_v60 = vadd.f32 %v10356_v29, %v10281_v61 }
 0xd21   :  { %v10439_v49 = vadd.f32 %v10435_v34, %v10360_v60 }
 0xd23   :  { %v10518_v1 = vadd.f32 %v10514_v22, %v10439_v49 }
 0xd24   :  { %v10279_v19 = vpop.f32.mrf.mxu3 }
 0xd25   :  { %v10523_v39 = vadd.f32 %v14564_v3, %v10518_v1 }
 0xd27   :  { %v10524_v58 = vmax.f32 %v10523_v39, 0.0 }
 0xd29   :  { %v10525_v13 = vpack.c.bf16 %v10524_v58, %v10524_v58 }
 0xd2b   :  { %10678 = vmatmul.bf16.vlgmr.msrb.gmra.mxu0 %v10525_v13  ;;  %v10559_v35 = vrot.slane %v10525_v13, 1  ;;  %v10699_v21 = vrot.slane %v10525_v13, 2  ;;  %v10779_v24 = vrot.slane %v10525_v13, 3 }
 0xd2d   :  { %10617 = vmatmul.bf16.vlgmr.msra.gmra.mxu3 %v10559_v35  ;;  %10757 = vmatmul.bf16.vlgmr.msra.gmra.mxu2 %v10699_v21 }
 0xd2e   :  { %10837 = vmatmul.bf16.vlgmr.msra.gmra.mxu1 %v10779_v24 }
 0xda8   :  { %v10679_v42 = vpop.f32.mrf.mxu0 }
 0xdab   :  { %v10838_v4 = vpop.f32.mrf.mxu1 }
 0xdb0   :  { %v10618_v30 = vpop.f32.mrf.mxu3  ;;  %v10681_v63 = vpop.f32.mrf.mxu0 }
 0xdb1   :  { %v10680_v6 = vadd.f32 %v10679_v42, %v10618_v30  ;;  %v10758_v45 = vpop.f32.mrf.mxu2 }
 0xdb3   :  { %v10762_v43 = vadd.f32 %v10758_v45, %v10680_v6  ;;  %v10840_v27 = vpop.f32.mrf.mxu1 }
 0xdb5   :  { %v10842_v5 = vadd.f32 %v10838_v4, %v10762_v43 }
 0xdb7   :  { %v10847_v33 = vadd.f32 %v14565_v17, %v10842_v5 }
 0xdb8   :  { %v10620_v7 = vpop.f32.mrf.mxu3 }
 0xdb9   :  { %v10760_v37 = vpop.f32.mrf.mxu2  ;;  %10849 = vst.msk [vmem:[#allocation6] sm:$0x3] %vm10848_vm4, %v10847_v33 }
 0xdba   :  { %10860 = dma.vmem_to_hbm [thread:$0]  %s10856_s13, 32, %s10858_s15, [#allocation7]  }
 0xdbb   :  { %14594 = dma.done.wait [#allocation7], 32  }
 0xdbc   :  { %14595 = vsyncadd [#allocation7], 4294967264 }
 0xdbd   :  { %10865 = vsyncpa [#allocation7], 1 }
 0xdbe   :  { %10866 = vsyncmov [#allocation5] }
 0xdc1   :  { %s10867_s9 = vpop.sfrf %10866 }
 0xdc2   :  { %p13321_p0 = scmp.ne.s32.totalorder %s10867_s9, 0 }
 0xdc4   :  { %10871 = shalt.err (%p13321_p0)  }
 0xdc5   :  { %10873 = vsyncmov [#allocation5 + $0x1] }
 0xdc8   :  { %s10874_s16 = vpop.sfrf %10873 }
 0xdc9   :  { %p13322_p1 = scmp.ne.s32.totalorder %s10874_s16, 0 }
 0xdcb   :  { %10878 = shalt.err (%p13322_p1)  }

</bundles_post_ra>
